<compile_context>
chip_gen: v5e
topology: v5e:2x2
jax: 0.10.0
libtpu: 0.0.40
codegen_flags: <defaults>
</compile_context>

<pallas_src>
import functools

import jax
import jax.numpy as jnp
import numpy as np
from jax.experimental import pallas as pl
from jax.experimental.pallas import tpu as pltpu

PAD = 2                          # stored zero border = max dilation used
LANES = 128
VMEM_BUDGET = 40 * 1024 * 1024   # scratch + I/O budget used to pick strip size
VMEM_LIMIT = 48 * 1024 * 1024    # explicit scoped-VMEM limit (ok on v5e..v7x)


def _round_up(x, m):
    return (x + m - 1) // m * m


# ----------------------------------------------------------------------------
# Kernel
# ----------------------------------------------------------------------------
def _make_rsu_kernel(L, layer_cfg, WP, N_c, n_ext, s_off, act_dtype):
    """layer_cfg: list of (cin_total, cout, dilation) in execution order:
    [init, enc_0..enc_{L-1}, dilation, dec_0..dec_{L-1}]."""
    rslack = n_ext - s_off - N_c

    def kernel(x_ref, mask_ref, w_ref, b_ref, o_ref,
               init_buf, enc_buf, cur_buf):
        # Only the lane-slack columns [0, s_off) and [s_off+N_c, n_ext) are
        # never touched by the aligned full-width conv stores; zero just those
        # narrow slices so shifted tap loads read zeros there.
        def zero_slack(ref, lead=None):
            if lead is None:
                rows = ref.shape[0]
                ref[:, 0:s_off] = jnp.zeros((rows, s_off), act_dtype)
                ref[:, s_off + N_c:n_ext] = jnp.zeros((rows, rslack), act_dtype)
            else:
                rows = ref.shape[1]
                ref[lead, :, 0:s_off] = jnp.zeros((rows, s_off), act_dtype)
                ref[lead, :, s_off + N_c:n_ext] = jnp.zeros((rows, rslack),
                                                            act_dtype)

        zero_slack(init_buf)
        zero_slack(cur_buf)
        for l in range(L):
            zero_slack(enc_buf, l)

        mask = mask_ref[...]              # (1, N_c) f32, 1.0 on valid pixels

        def conv(srcs, lidx, dil, cin_tot, cout):
            """3x3 (dilated) conv + folded-BN bias + ReLU as 9 per-tap MXU
            contractions accumulated in f32 on lane-shifted activation views.
            srcs: [(ref, lead_idx_or_None, cin, concat_col_offset)]."""
            acc = None
            for ky in range(3):
                for kx in range(3):
                    off = s_off + (ky - 1) * dil * WP + (kx - 1) * dil
                    c0 = (ky * 3 + kx) * cin_tot
                    for ref, li, cin, coff in srcs:
                        w_tap = w_ref[lidx, 0:cout,
                                      c0 + coff:c0 + coff + cin]
                        if li is None:
                            a = ref[0:cin, off:off + N_c]
                        else:
                            a = ref[li, 0:cin, off:off + N_c]
                        d = jax.lax.dot_general(
                            w_tap, a, (((1,), (0,)), ((), ())),
                            preferred_element_type=jnp.float32)
                        acc = d if acc is None else acc + d
            bias = b_ref[lidx, 0:cout, :]             # (cout, 1) f32
            # f32 epilogue; the mask re-zeroes image-border / out-of-window
            # lanes so the stored activation remains a valid zero-padded input
            # for the next layer's shifted taps.
            return jnp.maximum(acc + bias, 0.0) * mask

        # ---- init layer ----
        cin, cout, dil = layer_cfg[0]
        out_c = cout
        y = conv([(x_ref, None, cin, 0)], 0, dil, cin, cout)
        init_buf[0:cout, s_off:s_off + N_c] = y.astype(act_dtype)

        # ---- encoders ----
        prev_ref, prev_idx = init_buf, None
        for i in range(L):
            cin, cout, dil = layer_cfg[1 + i]
            y = conv([(prev_ref, prev_idx, cin, 0)], 1 + i, dil, cin, cout)
            enc_buf[i, 0:cout, s_off:s_off + N_c] = y.astype(act_dtype)
            prev_ref, prev_idx = enc_buf, i

        # ---- dilation layer ----
        cin, cout, dil = layer_cfg[1 + L]
        y = conv([(prev_ref, prev_idx, cin, 0)], 1 + L, dil, cin, cout)
        cur_buf[0:cout, s_off:s_off + N_c] = y.astype(act_dtype)

        # ---- decoders (skip = encoder_features[i] == enc_buf[L-1-i]) ----
        for i in range(L):
            lidx = 2 + L + i
            cin, cout, dil = layer_cfg[lidx]
            enc_c = layer_cfg[1 + (L - 1 - i)][1]
            srcs = [(enc_buf, L - 1 - i, enc_c, 0),     # cat(enc_feat, out)
                    (cur_buf, None, cin - enc_c, enc_c)]
            y = conv(srcs, lidx, dil, cin, cout)
            if i == L - 1:
                res = init_buf[0:out_c, s_off:s_off + N_c].astype(jnp.float32)
                o_ref[...] = (y + res).astype(o_ref.dtype)   # residual init+out
            else:
                cur_buf[0:cout, s_off:s_off + N_c] = y.astype(act_dtype)

    return kernel


# ----------------------------------------------------------------------------
# Wrapper
# ----------------------------------------------------------------------------
def rsu_forward(x_nchw, params, L, *, compute_dtype=jnp.bfloat16,
                strip_rows=None):
    """RSU forward. x_nchw: (B, Cin, H, W) float32 -> (B, out_c, H, W) f32."""
    B, Cin, H, W = x_nchw.shape
    HP, WP = H + 2 * PAD, W + 2 * PAD

    layers = ([params["init"]] + list(params["enc"]) + [params["dil"]]
              + list(params["dec"]))
    dils = [1] + [1] * L + [2] + [1] * L
    layer_cfg = [(p["wmat"].shape[1] // 9, p["wmat"].shape[0], d)
                 for p, d in zip(layers, dils)]
    n_layers = len(layer_cfg)
    out_c = layer_cfg[0][1]
    assert layer_cfg[-1][1] == out_c
    enc_rows = max(layer_cfg[1 + i][1] for i in range(L))
    cur_rows = max([layer_cfg[1 + L][1]]
                   + [layer_cfg[2 + L + i][1] for i in range(L - 1)])
    cmax = max(c for _, c, _ in layer_cfg)
    kmax = max(9 * c for c, _, _ in layer_cfg)
    T = sum(dils)                         # halo rows needed per strip side
    act_bytes = jnp.dtype(compute_dtype).itemsize

    # 128-aligned lane offsets so every activation / output store is unmasked.
    max_shift = 2 * (WP + 1)              # largest tap shift (dilation-2 corner)
    s_off = _round_up(max_shift, LANES)
    rslack = _round_up(max_shift, LANES)

    def footprint(srows):
        n_c = _round_up((srows + 2 * T) * WP, LANES)
        n_e = s_off + n_c + rslack
        scratch = (out_c + L * enc_rows + cur_rows) * n_e * act_bytes
        io = 2 * (Cin * n_e * act_bytes + out_c * n_c * 4 + n_c * 4)
        return scratch + io + (1 << 20)   # +1 MiB weights / bias / slop

    if strip_rows is None:                # largest strip fitting the budget
        strip_rows = 8
        while (strip_rows + 8 <= _round_up(HP, 8)
               and footprint(strip_rows + 8) <= VMEM_BUDGET):
            strip_rows += 8
    S = strip_rows
    n_strips = -(-HP // S)
    HS = S + 2 * T                        # window rows per strip (core + halo)
    N_s = HS * WP
    N_c = _round_up(N_s, LANES)
    n_ext = s_off + N_c + rslack

    # ---- one-time layout plumbing (XLA side): pad, add halo rows, build the
    # overlapping per-strip windows, flatten rows*WP onto the lane axis. ----
    xp = jnp.pad(x_nchw, ((0, 0), (0, 0), (PAD, PAD), (PAD, PAD)))
    pad_bot = n_strips * S - HP + T
    xh = jnp.pad(xp, ((0, 0), (0, 0), (T, pad_bot), (0, 0)))
    wins = jnp.stack([xh[:, :, s * S:s * S + HS, :] for s in range(n_strips)],
                     axis=1)                            # (B, ns, Cin, HS, WP)
    x_ext = jnp.pad(wins.reshape(B, n_strips, Cin, N_s),
                    ((0, 0), (0, 0), (0, 0), (s_off, n_ext - N_s - s_off)))
    x_ext = x_ext.astype(compute_dtype)

    # Per-strip validity mask over the flattened window lanes.
    rows = np.arange(HS)
    col_ok = (np.arange(WP) >= PAD) & (np.arange(WP) < PAD + W)
    mask_np = np.zeros((n_strips, 1, N_c), np.float32)
    for s in range(n_strips):
        g = s * S - T + rows              # global padded-image row index
        row_ok = (g >= PAD) & (g < PAD + H)
        mask_np[s, 0, :N_s] = (row_ok[:, None] & col_ok[None, :]
                               ).reshape(N_s).astype(np.float32)
    mask_arr = jnp.asarray(mask_np)

    # Pack folded conv weights / biases into single padded slabs.
    w_all = jnp.zeros((n_layers, cmax, kmax), jnp.float32)
    b_all = jnp.zeros((n_layers, cmax, 1), jnp.float32)
    for l, p in enumerate(layers):
        co, k = p["wmat"].shape
        w_all = w_all.at[l, :co, :k].set(p["wmat"])
        b_all = b_all.at[l, :co, :].set(p["bias"])
    w_all = w_all.astype(compute_dtype)

    kernel = _make_rsu_kernel(L, layer_cfg, WP, N_c, n_ext, s_off,
                              compute_dtype)

    out = pl.pallas_call(
        kernel,
        out_shape=jax.ShapeDtypeStruct((B, n_strips, out_c, N_c), jnp.float32),
        grid=(B, n_strips),
        in_specs=[
            pl.BlockSpec((None, None, Cin, n_ext), lambda b, s: (b, s, 0, 0)),
            pl.BlockSpec((None, 1, N_c), lambda b, s: (s, 0, 0)),
            pl.BlockSpec((n_layers, cmax, kmax), lambda b, s: (0, 0, 0)),
            pl.BlockSpec((n_layers, cmax, 1), lambda b, s: (0, 0, 0)),
        ],
        out_specs=pl.BlockSpec((None, None, out_c, N_c),
                               lambda b, s: (b, s, 0, 0)),
        scratch_shapes=[
            pltpu.VMEM((out_c, n_ext), compute_dtype),        # init features
            pltpu.VMEM((L, enc_rows, n_ext), compute_dtype),  # encoder feats
            pltpu.VMEM((cur_rows, n_ext), compute_dtype),     # current feats
        ],
        compiler_params=pltpu.CompilerParams(
            dimension_semantics=("parallel", "parallel"),
            vmem_limit_bytes=VMEM_LIMIT),
    )(x_ext, mask_arr, w_all, b_all)

    # Assemble strips -> (B, out_c, HP, WP); drop halo rows and zero border.
    ow = out[..., :N_s].reshape(B, n_strips, out_c, HS, WP)
    core = ow[:, :, :, T:T + S, :]
    full = core.transpose(0, 2, 1, 3, 4).reshape(B, out_c, n_strips * S, WP)
    return full[:, :, PAD:PAD + H, PAD:PAD + W]


# ----------------------------------------------------------------------------
# Deterministic parameters: Conv2d + eval-mode BatchNorm folded to (wmat, bias)
# ----------------------------------------------------------------------------
def make_conv_params(key, cin, cout):
    kw, kb, kg, kbt, km, kv = jax.random.split(key, 6)
    w = jax.random.normal(kw, (3, 3, cin, cout), jnp.float32) / jnp.sqrt(9.0 * cin)
    conv_b = 0.1 * jax.random.normal(kb, (cout,), jnp.float32)
    gamma = 1.0 + 0.1 * jax.random.normal(kg, (cout,), jnp.float32)
    beta = 0.1 * jax.random.normal(kbt, (cout,), jnp.float32)
    mean = 0.1 * jax.random.normal(km, (cout,), jnp.float32)
    var = jax.random.uniform(kv, (cout,), jnp.float32, 0.5, 1.5)
    scale = gamma / jnp.sqrt(var + 1e-5)
    bias = (conv_b - mean) * scale + beta
    # Fold BN scale into the weights; column (ky*3+kx)*cin + ci matches the
    # in-kernel tap/column ordering.
    wmat = jnp.transpose(w * scale[None, None, None, :], (3, 0, 1, 2))
    return {"wmat": wmat.reshape(cout, 9 * cin), "bias": bias.reshape(cout, 1)}


# ----------------------------------------------------------------------------
# Pure-JAX fp32 reference (mirrors the PyTorch RSU.forward)
# ----------------------------------------------------------------------------
def _conv_ref(x, wmat, bias, dil):
    cout, k9 = wmat.shape
    cin = k9 // 9
    w = wmat.reshape(cout, 3, 3, cin).transpose(0, 3, 1, 2)    # OIHW
    y = jax.lax.conv_general_dilated(
        x, w, window_strides=(1, 1), padding=[(dil, dil), (dil, dil)],
        rhs_dilation=(dil, dil), dimension_numbers=("NCHW", "OIHW", "NCHW"),
        precision=jax.lax.Precision.HIGHEST)
    return jnp.maximum(y + bias.reshape(1, cout, 1, 1), 0.0)


def rsu_reference(x, params, L):
    init = _conv_ref(x, params["init"]["wmat"], params["init"]["bias"], 1)
    out = init                                # copy.deepcopy(init.data)
    feats = []
    for i in range(L):
        out = _conv_ref(out, params["enc"][i]["wmat"],
                        params["enc"][i]["bias"], 1)
        feats.insert(0, out)
    out = _conv_ref(out, params["dil"]["wmat"], params["dil"]["bias"], 2)
    for i in range(L):
        out = jnp.concatenate([feats[i], out], axis=1)
        out = _conv_ref(out, params["dec"][i]["wmat"],
                        params["dec"][i]["bias"], 1)
    return init + out


if __name__ == "__main__":
    L = 2
    in_c, mid_c, out_c = 4, 4, 8
    B, H, W = 2, 16, 16

    key = jax.random.PRNGKey(0)
    keys = jax.random.split(key, 2 + 2 * L + 1)

    params = {
        "init": make_conv_params(keys[0], in_c, out_c),
        "dil": make_conv_params(keys[1], mid_c, mid_c),
        "enc": [make_conv_params(keys[2 + i],
                                 out_c if i == 0 else mid_c, mid_c)
                for i in range(L)],
        "dec": [make_conv_params(keys[2 + L + i], 2 * mid_c,
                                 mid_c if i < L - 1 else out_c)
                for i in range(L)],
    }
    x = jax.random.normal(keys[-1], (B, in_c, H, W), jnp.float32)   # NCHW

    # strip_rows=8 -> 3 strips at this toy size, exercising the halo logic.
    rsu_bf16 = jax.jit(functools.partial(
        rsu_forward, L=L, compute_dtype=jnp.bfloat16, strip_rows=8))
    rsu_f32 = jax.jit(functools.partial(
        rsu_forward, L=L, compute_dtype=jnp.float32, strip_rows=8))

    y16 = jax.block_until_ready(rsu_bf16(x, params))
    y32 = jax.block_until_ready(rsu_f32(x, params))
    y_ref = jax.block_until_ready(
        jax.jit(functools.partial(rsu_reference, L=L))(x, params))

    assert y16.shape == (B, out_c, H, W) and y16.dtype == jnp.float32
    scale = float(jnp.max(jnp.abs(y_ref))) + 1.0
    err32 = float(jnp.max(jnp.abs(y32 - y_ref))) / scale
    err16 = float(jnp.max(jnp.abs(y16 - y_ref))) / scale
    assert err32 < 5e-2, f"f32 kernel vs reference mismatch: {err32}"
    assert err16 < 1.5e-1, f"bf16 kernel vs reference mismatch: {err16}"
    print("KERNEL_OK")
</pallas_src>

<mosaic_0001>
module attributes {stable_mosaic.version = 11 : i64} {
  func.func @kernel(%arg0: i32, %arg1: i32, %arg2: memref<1x1x4x768xbf16, #tpu.memory_space<vmem>>, %arg3: memref<1x1x512xf32, #tpu.memory_space<vmem>>, %arg4: memref<6x8x72xbf16, #tpu.memory_space<vmem>>, %arg5: memref<6x8x1xf32, #tpu.memory_space<vmem>>, %arg6: memref<1x1x8x512xf32, #tpu.memory_space<vmem>>, %arg7: memref<8x768xbf16, #tpu.memory_space<vmem>>, %arg8: memref<2x4x768xbf16, #tpu.memory_space<vmem>>, %arg9: memref<4x768xbf16, #tpu.memory_space<vmem>>) attributes {dimension_semantics = [#tpu.dimension_semantics<parallel>, #tpu.dimension_semantics<parallel>], iteration_bounds = array<i64: 2, 3>, scalar_prefetch = 0 : i64, scratch_operands = 3 : i64, tpu.core_type = #tpu.core_type<tc>, window_params = [{transform_indices = @transform_0, window_bounds = array<i64: 1, 1, 4, 768>}, {transform_indices = @transform_1, window_bounds = array<i64: 1, 1, 512>}, {pipeline_mode = #tpu.pipeline_mode<synchronous>, transform_indices = @transform_2, window_bounds = array<i64: 6, 8, 72>}, {pipeline_mode = #tpu.pipeline_mode<synchronous>, transform_indices = @transform_3, window_bounds = array<i64: 6, 8, 1>}, {transform_indices = @transform_4, window_bounds = array<i64: 1, 1, 8, 512>}]} {
    %cst = arith.constant 0.000000e+00 : bf16
    %0 = vector.broadcast %cst : bf16 to vector<8x128xbf16>
    %c0 = arith.constant 0 : index
    %c0_0 = arith.constant 0 : index
    %1 = vector.load %arg7[%c0, %c0_0] : memref<8x768xbf16, #tpu.memory_space<vmem>>, vector<8x128xbf16>
    tpu.vector_store %arg7[%c0, %c0_0], %0 {strides = array<i32>} : memref<8x768xbf16, #tpu.memory_space<vmem>>, vector<8x128xbf16>,
    %cst_1 = arith.constant 0.000000e+00 : bf16
    %2 = vector.broadcast %cst_1 : bf16 to vector<8x128xbf16>
    %c0_2 = arith.constant 0 : index
    %c640 = arith.constant 640 : index
    %3 = vector.load %arg7[%c0_2, %c640] : memref<8x768xbf16, #tpu.memory_space<vmem>>, vector<8x128xbf16>
    tpu.vector_store %arg7[%c0_2, %c640], %2 {strides = array<i32>} : memref<8x768xbf16, #tpu.memory_space<vmem>>, vector<8x128xbf16>,
    %cst_3 = arith.constant 0.000000e+00 : bf16
    %4 = vector.broadcast %cst_3 : bf16 to vector<4x128xbf16>
    %c0_4 = arith.constant 0 : index
    %c0_5 = arith.constant 0 : index
    %5 = vector.load %arg9[%c0_4, %c0_5] : memref<4x768xbf16, #tpu.memory_space<vmem>>, vector<4x128xbf16>
    tpu.vector_store %arg9[%c0_4, %c0_5], %4 {strides = array<i32>} : memref<4x768xbf16, #tpu.memory_space<vmem>>, vector<4x128xbf16>,
    %cst_6 = arith.constant 0.000000e+00 : bf16
    %6 = vector.broadcast %cst_6 : bf16 to vector<4x128xbf16>
    %c0_7 = arith.constant 0 : index
    %c640_8 = arith.constant 640 : index
    %7 = vector.load %arg9[%c0_7, %c640_8] : memref<4x768xbf16, #tpu.memory_space<vmem>>, vector<4x128xbf16>
    tpu.vector_store %arg9[%c0_7, %c640_8], %6 {strides = array<i32>} : memref<4x768xbf16, #tpu.memory_space<vmem>>, vector<4x128xbf16>,
    %cst_9 = arith.constant 0.000000e+00 : bf16
    %8 = vector.broadcast %cst_9 : bf16 to vector<4x128xbf16>
    %c0_10 = arith.constant 0 : index
    %c0_11 = arith.constant 0 : index
    %c0_12 = arith.constant 0 : index
    %9 = vector.load %arg8[%c0_10, %c0_11, %c0_12] : memref<2x4x768xbf16, #tpu.memory_space<vmem>>, vector<1x4x128xbf16>
    %10 = vector.shape_cast %9 : vector<1x4x128xbf16> to vector<4x128xbf16>
    %11 = vector.shape_cast %8 : vector<4x128xbf16> to vector<1x4x128xbf16>
    tpu.vector_store %arg8[%c0_10, %c0_11, %c0_12], %11 {strides = array<i32>} : memref<2x4x768xbf16, #tpu.memory_space<vmem>>, vector<1x4x128xbf16>,
    %cst_13 = arith.constant 0.000000e+00 : bf16
    %12 = vector.broadcast %cst_13 : bf16 to vector<4x128xbf16>
    %c0_14 = arith.constant 0 : index
    %c0_15 = arith.constant 0 : index
    %c640_16 = arith.constant 640 : index
    %13 = vector.load %arg8[%c0_14, %c0_15, %c640_16] : memref<2x4x768xbf16, #tpu.memory_space<vmem>>, vector<1x4x128xbf16>
    %14 = vector.shape_cast %13 : vector<1x4x128xbf16> to vector<4x128xbf16>
    %15 = vector.shape_cast %12 : vector<4x128xbf16> to vector<1x4x128xbf16>
    tpu.vector_store %arg8[%c0_14, %c0_15, %c640_16], %15 {strides = array<i32>} : memref<2x4x768xbf16, #tpu.memory_space<vmem>>, vector<1x4x128xbf16>,
    %cst_17 = arith.constant 0.000000e+00 : bf16
    %16 = vector.broadcast %cst_17 : bf16 to vector<4x128xbf16>
    %c1 = arith.constant 1 : index
    %c0_18 = arith.constant 0 : index
    %c0_19 = arith.constant 0 : index
    %17 = vector.load %arg8[%c1, %c0_18, %c0_19] : memref<2x4x768xbf16, #tpu.memory_space<vmem>>, vector<1x4x128xbf16>
    %18 = vector.shape_cast %17 : vector<1x4x128xbf16> to vector<4x128xbf16>
    %19 = vector.shape_cast %16 : vector<4x128xbf16> to vector<1x4x128xbf16>
    tpu.vector_store %arg8[%c1, %c0_18, %c0_19], %19 {strides = array<i32>} : memref<2x4x768xbf16, #tpu.memory_space<vmem>>, vector<1x4x128xbf16>,
    %cst_20 = arith.constant 0.000000e+00 : bf16
    %20 = vector.broadcast %cst_20 : bf16 to vector<4x128xbf16>
    %c1_21 = arith.constant 1 : index
    %c0_22 = arith.constant 0 : index
    %c640_23 = arith.constant 640 : index
    %21 = vector.load %arg8[%c1_21, %c0_22, %c640_23] : memref<2x4x768xbf16, #tpu.memory_space<vmem>>, vector<1x4x128xbf16>
    %22 = vector.shape_cast %21 : vector<1x4x128xbf16> to vector<4x128xbf16>
    %23 = vector.shape_cast %20 : vector<4x128xbf16> to vector<1x4x128xbf16>
    tpu.vector_store %arg8[%c1_21, %c0_22, %c640_23], %23 {strides = array<i32>} : memref<2x4x768xbf16, #tpu.memory_space<vmem>>, vector<1x4x128xbf16>,
    %c0_24 = arith.constant 0 : index
    %c0_25 = arith.constant 0 : index
    %c0_26 = arith.constant 0 : index
    %24 = vector.load %arg3[%c0_24, %c0_25, %c0_26] : memref<1x1x512xf32, #tpu.memory_space<vmem>>, vector<1x1x512xf32>
    %25 = vector.shape_cast %24 : vector<1x1x512xf32> to vector<1x512xf32>
    %c0_27 = arith.constant 0 : index
    %c0_28 = arith.constant 0 : index
    %c0_29 = arith.constant 0 : index
    %26 = vector.load %arg4[%c0_27, %c0_28, %c0_29] : memref<6x8x72xbf16, #tpu.memory_space<vmem>>, vector<1x8x4xbf16>
    %27 = vector.shape_cast %26 : vector<1x8x4xbf16> to vector<8x4xbf16>
    %c0_30 = arith.constant 0 : index
    %c0_31 = arith.constant 0 : index
    %c0_32 = arith.constant 0 : index
    %c107 = arith.constant 107 : index
    %28 = vector.load %arg2[%c0_30, %c0_31, %c0_32, %c107] : memref<1x1x4x768xbf16, #tpu.memory_space<vmem>>, vector<1x1x4x512xbf16>
    %29 = vector.shape_cast %28 : vector<1x1x4x512xbf16> to vector<4x512xbf16>
    %cst_33 = arith.constant dense<0.000000e+00> : vector<8x512xf32>
    %30 = tpu.matmul %27, %29, %cst_33 {dimension_numbers = #tpu.dot_dimension_numbers<[1], [0], [0], [1], [0, 0, 1, 1], [], []>} : vector<8x4xbf16>, vector<4x512xbf16>, vector<8x512xf32> -> vector<8x512xf32>
    %c0_34 = arith.constant 0 : index
    %c0_35 = arith.constant 0 : index
    %c4 = arith.constant 4 : index
    %31 = vector.load %arg4[%c0_34, %c0_35, %c4] : memref<6x8x72xbf16, #tpu.memory_space<vmem>>, vector<1x8x4xbf16>
    %32 = vector.shape_cast %31 : vector<1x8x4xbf16> to vector<8x4xbf16>
    %c0_36 = arith.constant 0 : index
    %c0_37 = arith.constant 0 : index
    %c0_38 = arith.constant 0 : index
    %c108 = arith.constant 108 : index
    %33 = vector.load %arg2[%c0_36, %c0_37, %c0_38, %c108] : memref<1x1x4x768xbf16, #tpu.memory_space<vmem>>, vector<1x1x4x512xbf16>
    %34 = vector.shape_cast %33 : vector<1x1x4x512xbf16> to vector<4x512xbf16>
    %cst_39 = arith.constant dense<0.000000e+00> : vector<8x512xf32>
    %35 = tpu.matmul %32, %34, %cst_39 {dimension_numbers = #tpu.dot_dimension_numbers<[1], [0], [0], [1], [0, 0, 1, 1], [], []>} : vector<8x4xbf16>, vector<4x512xbf16>, vector<8x512xf32> -> vector<8x512xf32>
    %36 = arith.addf %30, %35 : vector<8x512xf32>
    %c0_40 = arith.constant 0 : index
    %c0_41 = arith.constant 0 : index
    %c8 = arith.constant 8 : index
    %37 = vector.load %arg4[%c0_40, %c0_41, %c8] : memref<6x8x72xbf16, #tpu.memory_space<vmem>>, vector<1x8x4xbf16>
    %38 = vector.shape_cast %37 : vector<1x8x4xbf16> to vector<8x4xbf16>
    %c0_42 = arith.constant 0 : index
    %c0_43 = arith.constant 0 : index
    %c0_44 = arith.constant 0 : index
    %c109 = arith.constant 109 : index
    %39 = vector.load %arg2[%c0_42, %c0_43, %c0_44, %c109] : memref<1x1x4x768xbf16, #tpu.memory_space<vmem>>, vector<1x1x4x512xbf16>
    %40 = vector.shape_cast %39 : vector<1x1x4x512xbf16> to vector<4x512xbf16>
    %cst_45 = arith.constant dense<0.000000e+00> : vector<8x512xf32>
    %41 = tpu.matmul %38, %40, %cst_45 {dimension_numbers = #tpu.dot_dimension_numbers<[1], [0], [0], [1], [0, 0, 1, 1], [], []>} : vector<8x4xbf16>, vector<4x512xbf16>, vector<8x512xf32> -> vector<8x512xf32>
    %42 = arith.addf %36, %41 : vector<8x512xf32>
    %c0_46 = arith.constant 0 : index
    %c0_47 = arith.constant 0 : index
    %c12 = arith.constant 12 : index
    %43 = vector.load %arg4[%c0_46, %c0_47, %c12] : memref<6x8x72xbf16, #tpu.memory_space<vmem>>, vector<1x8x4xbf16>
    %44 = vector.shape_cast %43 : vector<1x8x4xbf16> to vector<8x4xbf16>
    %c0_48 = arith.constant 0 : index
    %c0_49 = arith.constant 0 : index
    %c0_50 = arith.constant 0 : index
    %c127 = arith.constant 127 : index
    %45 = vector.load %arg2[%c0_48, %c0_49, %c0_50, %c127] : memref<1x1x4x768xbf16, #tpu.memory_space<vmem>>, vector<1x1x4x512xbf16>
    %46 = vector.shape_cast %45 : vector<1x1x4x512xbf16> to vector<4x512xbf16>
    %cst_51 = arith.constant dense<0.000000e+00> : vector<8x512xf32>
    %47 = tpu.matmul %44, %46, %cst_51 {dimension_numbers = #tpu.dot_dimension_numbers<[1], [0], [0], [1], [0, 0, 1, 1], [], []>} : vector<8x4xbf16>, vector<4x512xbf16>, vector<8x512xf32> -> vector<8x512xf32>
    %48 = arith.addf %42, %47 : vector<8x512xf32>
    %c0_52 = arith.constant 0 : index
    %c0_53 = arith.constant 0 : index
    %c16 = arith.constant 16 : index
    %49 = vector.load %arg4[%c0_52, %c0_53, %c16] : memref<6x8x72xbf16, #tpu.memory_space<vmem>>, vector<1x8x4xbf16>
    %50 = vector.shape_cast %49 : vector<1x8x4xbf16> to vector<8x4xbf16>
    %c0_54 = arith.constant 0 : index
    %c0_55 = arith.constant 0 : index
    %c0_56 = arith.constant 0 : index
    %c128 = arith.constant 128 : index
    %51 = vector.load %arg2[%c0_54, %c0_55, %c0_56, %c128] : memref<1x1x4x768xbf16, #tpu.memory_space<vmem>>, vector<1x1x4x512xbf16>
    %52 = vector.shape_cast %51 : vector<1x1x4x512xbf16> to vector<4x512xbf16>
    %cst_57 = arith.constant dense<0.000000e+00> : vector<8x512xf32>
    %53 = tpu.matmul %50, %52, %cst_57 {dimension_numbers = #tpu.dot_dimension_numbers<[1], [0], [0], [1], [0, 0, 1, 1], [], []>} : vector<8x4xbf16>, vector<4x512xbf16>, vector<8x512xf32> -> vector<8x512xf32>
    %54 = arith.addf %48, %53 : vector<8x512xf32>
    %c0_58 = arith.constant 0 : index
    %c0_59 = arith.constant 0 : index
    %c20 = arith.constant 20 : index
    %55 = vector.load %arg4[%c0_58, %c0_59, %c20] : memref<6x8x72xbf16, #tpu.memory_space<vmem>>, vector<1x8x4xbf16>
    %56 = vector.shape_cast %55 : vector<1x8x4xbf16> to vector<8x4xbf16>
    %c0_60 = arith.constant 0 : index
    %c0_61 = arith.constant 0 : index
    %c0_62 = arith.constant 0 : index
    %c129 = arith.constant 129 : index
    %57 = vector.load %arg2[%c0_60, %c0_61, %c0_62, %c129] : memref<1x1x4x768xbf16, #tpu.memory_space<vmem>>, vector<1x1x4x512xbf16>
    %58 = vector.shape_cast %57 : vector<1x1x4x512xbf16> to vector<4x512xbf16>
    %cst_63 = arith.constant dense<0.000000e+00> : vector<8x512xf32>
    %59 = tpu.matmul %56, %58, %cst_63 {dimension_numbers = #tpu.dot_dimension_numbers<[1], [0], [0], [1], [0, 0, 1, 1], [], []>} : vector<8x4xbf16>, vector<4x512xbf16>, vector<8x512xf32> -> vector<8x512xf32>
    %60 = arith.addf %54, %59 : vector<8x512xf32>
    %c0_64 = arith.constant 0 : index
    %c0_65 = arith.constant 0 : index
    %c24 = arith.constant 24 : index
    %61 = vector.load %arg4[%c0_64, %c0_65, %c24] : memref<6x8x72xbf16, #tpu.memory_space<vmem>>, vector<1x8x4xbf16>
    %62 = vector.shape_cast %61 : vector<1x8x4xbf16> to vector<8x4xbf16>
    %c0_66 = arith.constant 0 : index
    %c0_67 = arith.constant 0 : index
    %c0_68 = arith.constant 0 : index
    %c147 = arith.constant 147 : index
    %63 = vector.load %arg2[%c0_66, %c0_67, %c0_68, %c147] : memref<1x1x4x768xbf16, #tpu.memory_space<vmem>>, vector<1x1x4x512xbf16>
    %64 = vector.shape_cast %63 : vector<1x1x4x512xbf16> to vector<4x512xbf16>
    %cst_69 = arith.constant dense<0.000000e+00> : vector<8x512xf32>
    %65 = tpu.matmul %62, %64, %cst_69 {dimension_numbers = #tpu.dot_dimension_numbers<[1], [0], [0], [1], [0, 0, 1, 1], [], []>} : vector<8x4xbf16>, vector<4x512xbf16>, vector<8x512xf32> -> vector<8x512xf32>
    %66 = arith.addf %60, %65 : vector<8x512xf32>
    %c0_70 = arith.constant 0 : index
    %c0_71 = arith.constant 0 : index
    %c28 = arith.constant 28 : index
    %67 = vector.load %arg4[%c0_70, %c0_71, %c28] : memref<6x8x72xbf16, #tpu.memory_space<vmem>>, vector<1x8x4xbf16>
    %68 = vector.shape_cast %67 : vector<1x8x4xbf16> to vector<8x4xbf16>
    %c0_72 = arith.constant 0 : index
    %c0_73 = arith.constant 0 : index
    %c0_74 = arith.constant 0 : index
    %c148 = arith.constant 148 : index
    %69 = vector.load %arg2[%c0_72, %c0_73, %c0_74, %c148] : memref<1x1x4x768xbf16, #tpu.memory_space<vmem>>, vector<1x1x4x512xbf16>
    %70 = vector.shape_cast %69 : vector<1x1x4x512xbf16> to vector<4x512xbf16>
    %cst_75 = arith.constant dense<0.000000e+00> : vector<8x512xf32>
    %71 = tpu.matmul %68, %70, %cst_75 {dimension_numbers = #tpu.dot_dimension_numbers<[1], [0], [0], [1], [0, 0, 1, 1], [], []>} : vector<8x4xbf16>, vector<4x512xbf16>, vector<8x512xf32> -> vector<8x512xf32>
    %72 = arith.addf %66, %71 : vector<8x512xf32>
    %c0_76 = arith.constant 0 : index
    %c0_77 = arith.constant 0 : index
    %c32 = arith.constant 32 : index
    %73 = vector.load %arg4[%c0_76, %c0_77, %c32] : memref<6x8x72xbf16, #tpu.memory_space<vmem>>, vector<1x8x4xbf16>
    %74 = vector.shape_cast %73 : vector<1x8x4xbf16> to vector<8x4xbf16>
    %c0_78 = arith.constant 0 : index
    %c0_79 = arith.constant 0 : index
    %c0_80 = arith.constant 0 : index
    %c149 = arith.constant 149 : index
    %75 = vector.load %arg2[%c0_78, %c0_79, %c0_80, %c149] : memref<1x1x4x768xbf16, #tpu.memory_space<vmem>>, vector<1x1x4x512xbf16>
    %76 = vector.shape_cast %75 : vector<1x1x4x512xbf16> to vector<4x512xbf16>
    %cst_81 = arith.constant dense<0.000000e+00> : vector<8x512xf32>
    %77 = tpu.matmul %74, %76, %cst_81 {dimension_numbers = #tpu.dot_dimension_numbers<[1], [0], [0], [1], [0, 0, 1, 1], [], []>} : vector<8x4xbf16>, vector<4x512xbf16>, vector<8x512xf32> -> vector<8x512xf32>
    %78 = arith.addf %72, %77 : vector<8x512xf32>
    %c0_82 = arith.constant 0 : index
    %c0_83 = arith.constant 0 : index
    %c0_84 = arith.constant 0 : index
    %79 = vector.load %arg5[%c0_82, %c0_83, %c0_84] : memref<6x8x1xf32, #tpu.memory_space<vmem>>, vector<1x8x1xf32>
    %80 = vector.shape_cast %79 : vector<1x8x1xf32> to vector<8x1xf32>
    %81 = vector.broadcast %80 : vector<8x1xf32> to vector<8x512xf32>
    %82 = arith.addf %78, %81 : vector<8x512xf32>
    %cst_85 = arith.constant 0.000000e+00 : f32
    %83 = vector.broadcast %cst_85 : f32 to vector<8x512xf32>
    %84 = arith.maximumf %82, %83 : vector<8x512xf32>
    %85 = vector.broadcast %25 : vector<1x512xf32> to vector<8x512xf32>
    %86 = arith.mulf %84, %85 : vector<8x512xf32>
    %87 = arith.truncf %86 : vector<8x512xf32> to vector<8x512xbf16>
    %c0_86 = arith.constant 0 : index
    %c128_87 = arith.constant 128 : index
    %88 = vector.load %arg7[%c0_86, %c128_87] : memref<8x768xbf16, #tpu.memory_space<vmem>>, vector<8x512xbf16>
    tpu.vector_store %arg7[%c0_86, %c128_87], %87 {strides = array<i32>} : memref<8x768xbf16, #tpu.memory_space<vmem>>, vector<8x512xbf16>,
    %c1_88 = arith.constant 1 : index
    %c0_89 = arith.constant 0 : index
    %c0_90 = arith.constant 0 : index
    %89 = vector.load %arg4[%c1_88, %c0_89, %c0_90] : memref<6x8x72xbf16, #tpu.memory_space<vmem>>, vector<1x4x8xbf16>
    %90 = vector.shape_cast %89 : vector<1x4x8xbf16> to vector<4x8xbf16>
    %c0_91 = arith.constant 0 : index
    %c107_92 = arith.constant 107 : index
    %91 = vector.load %arg7[%c0_91, %c107_92] : memref<8x768xbf16, #tpu.memory_space<vmem>>, vector<8x512xbf16>
    %cst_93 = arith.constant dense<0.000000e+00> : vector<4x512xf32>
    %92 = tpu.matmul %90, %91, %cst_93 {dimension_numbers = #tpu.dot_dimension_numbers<[1], [0], [0], [1], [0, 0, 1, 1], [], []>} : vector<4x8xbf16>, vector<8x512xbf16>, vector<4x512xf32> -> vector<4x512xf32>
    %c1_94 = arith.constant 1 : index
    %c0_95 = arith.constant 0 : index
    %c8_96 = arith.constant 8 : index
    %93 = vector.load %arg4[%c1_94, %c0_95, %c8_96] : memref<6x8x72xbf16, #tpu.memory_space<vmem>>, vector<1x4x8xbf16>
    %94 = vector.shape_cast %93 : vector<1x4x8xbf16> to vector<4x8xbf16>
    %c0_97 = arith.constant 0 : index
    %c108_98 = arith.constant 108 : index
    %95 = vector.load %arg7[%c0_97, %c108_98] : memref<8x768xbf16, #tpu.memory_space<vmem>>, vector<8x512xbf16>
    %cst_99 = arith.constant dense<0.000000e+00> : vector<4x512xf32>
    %96 = tpu.matmul %94, %95, %cst_99 {dimension_numbers = #tpu.dot_dimension_numbers<[1], [0], [0], [1], [0, 0, 1, 1], [], []>} : vector<4x8xbf16>, vector<8x512xbf16>, vector<4x512xf32> -> vector<4x512xf32>
    %97 = arith.addf %92, %96 : vector<4x512xf32>
    %c1_100 = arith.constant 1 : index
    %c0_101 = arith.constant 0 : index
    %c16_102 = arith.constant 16 : index
    %98 = vector.load %arg4[%c1_100, %c0_101, %c16_102] : memref<6x8x72xbf16, #tpu.memory_space<vmem>>, vector<1x4x8xbf16>
    %99 = vector.shape_cast %98 : vector<1x4x8xbf16> to vector<4x8xbf16>
    %c0_103 = arith.constant 0 : index
    %c109_104 = arith.constant 109 : index
    %100 = vector.load %arg7[%c0_103, %c109_104] : memref<8x768xbf16, #tpu.memory_space<vmem>>, vector<8x512xbf16>
    %cst_105 = arith.constant dense<0.000000e+00> : vector<4x512xf32>
    %101 = tpu.matmul %99, %100, %cst_105 {dimension_numbers = #tpu.dot_dimension_numbers<[1], [0], [0], [1], [0, 0, 1, 1], [], []>} : vector<4x8xbf16>, vector<8x512xbf16>, vector<4x512xf32> -> vector<4x512xf32>
    %102 = arith.addf %97, %101 : vector<4x512xf32>
    %c1_106 = arith.constant 1 : index
    %c0_107 = arith.constant 0 : index
    %c24_108 = arith.constant 24 : index
    %103 = vector.load %arg4[%c1_106, %c0_107, %c24_108] : memref<6x8x72xbf16, #tpu.memory_space<vmem>>, vector<1x4x8xbf16>
    %104 = vector.shape_cast %103 : vector<1x4x8xbf16> to vector<4x8xbf16>
    %c0_109 = arith.constant 0 : index
    %c127_110 = arith.constant 127 : index
    %105 = vector.load %arg7[%c0_109, %c127_110] : memref<8x768xbf16, #tpu.memory_space<vmem>>, vector<8x512xbf16>
    %cst_111 = arith.constant dense<0.000000e+00> : vector<4x512xf32>
    %106 = tpu.matmul %104, %105, %cst_111 {dimension_numbers = #tpu.dot_dimension_numbers<[1], [0], [0], [1], [0, 0, 1, 1], [], []>} : vector<4x8xbf16>, vector<8x512xbf16>, vector<4x512xf32> -> vector<4x512xf32>
    %107 = arith.addf %102, %106 : vector<4x512xf32>
    %c1_112 = arith.constant 1 : index
    %c0_113 = arith.constant 0 : index
    %c32_114 = arith.constant 32 : index
    %108 = vector.load %arg4[%c1_112, %c0_113, %c32_114] : memref<6x8x72xbf16, #tpu.memory_space<vmem>>, vector<1x4x8xbf16>
    %109 = vector.shape_cast %108 : vector<1x4x8xbf16> to vector<4x8xbf16>
    %c0_115 = arith.constant 0 : index
    %c128_116 = arith.constant 128 : index
    %110 = vector.load %arg7[%c0_115, %c128_116] : memref<8x768xbf16, #tpu.memory_space<vmem>>, vector<8x512xbf16>
    %cst_117 = arith.constant dense<0.000000e+00> : vector<4x512xf32>
    %111 = tpu.matmul %109, %110, %cst_117 {dimension_numbers = #tpu.dot_dimension_numbers<[1], [0], [0], [1], [0, 0, 1, 1], [], []>} : vector<4x8xbf16>, vector<8x512xbf16>, vector<4x512xf32> -> vector<4x512xf32>
    %112 = arith.addf %107, %111 : vector<4x512xf32>
    %c1_118 = arith.constant 1 : index
    %c0_119 = arith.constant 0 : index
    %c40 = arith.constant 40 : index
    %113 = vector.load %arg4[%c1_118, %c0_119, %c40] : memref<6x8x72xbf16, #tpu.memory_space<vmem>>, vector<1x4x8xbf16>
    %114 = vector.shape_cast %113 : vector<1x4x8xbf16> to vector<4x8xbf16>
    %c0_120 = arith.constant 0 : index
    %c129_121 = arith.constant 129 : index
    %115 = vector.load %arg7[%c0_120, %c129_121] : memref<8x768xbf16, #tpu.memory_space<vmem>>, vector<8x512xbf16>
    %cst_122 = arith.constant dense<0.000000e+00> : vector<4x512xf32>
    %116 = tpu.matmul %114, %115, %cst_122 {dimension_numbers = #tpu.dot_dimension_numbers<[1], [0], [0], [1], [0, 0, 1, 1], [], []>} : vector<4x8xbf16>, vector<8x512xbf16>, vector<4x512xf32> -> vector<4x512xf32>
    %117 = arith.addf %112, %116 : vector<4x512xf32>
    %c1_123 = arith.constant 1 : index
    %c0_124 = arith.constant 0 : index
    %c48 = arith.constant 48 : index
    %118 = vector.load %arg4[%c1_123, %c0_124, %c48] : memref<6x8x72xbf16, #tpu.memory_space<vmem>>, vector<1x4x8xbf16>
    %119 = vector.shape_cast %118 : vector<1x4x8xbf16> to vector<4x8xbf16>
    %c0_125 = arith.constant 0 : index
    %c147_126 = arith.constant 147 : index
    %120 = vector.load %arg7[%c0_125, %c147_126] : memref<8x768xbf16, #tpu.memory_space<vmem>>, vector<8x512xbf16>
    %cst_127 = arith.constant dense<0.000000e+00> : vector<4x512xf32>
    %121 = tpu.matmul %119, %120, %cst_127 {dimension_numbers = #tpu.dot_dimension_numbers<[1], [0], [0], [1], [0, 0, 1, 1], [], []>} : vector<4x8xbf16>, vector<8x512xbf16>, vector<4x512xf32> -> vector<4x512xf32>
    %122 = arith.addf %117, %121 : vector<4x512xf32>
    %c1_128 = arith.constant 1 : index
    %c0_129 = arith.constant 0 : index
    %c56 = arith.constant 56 : index
    %123 = vector.load %arg4[%c1_128, %c0_129, %c56] : memref<6x8x72xbf16, #tpu.memory_space<vmem>>, vector<1x4x8xbf16>
    %124 = vector.shape_cast %123 : vector<1x4x8xbf16> to vector<4x8xbf16>
    %c0_130 = arith.constant 0 : index
    %c148_131 = arith.constant 148 : index
    %125 = vector.load %arg7[%c0_130, %c148_131] : memref<8x768xbf16, #tpu.memory_space<vmem>>, vector<8x512xbf16>
    %cst_132 = arith.constant dense<0.000000e+00> : vector<4x512xf32>
    %126 = tpu.matmul %124, %125, %cst_132 {dimension_numbers = #tpu.dot_dimension_numbers<[1], [0], [0], [1], [0, 0, 1, 1], [], []>} : vector<4x8xbf16>, vector<8x512xbf16>, vector<4x512xf32> -> vector<4x512xf32>
    %127 = arith.addf %122, %126 : vector<4x512xf32>
    %c1_133 = arith.constant 1 : index
    %c0_134 = arith.constant 0 : index
    %c64 = arith.constant 64 : index
    %128 = vector.load %arg4[%c1_133, %c0_134, %c64] : memref<6x8x72xbf16, #tpu.memory_space<vmem>>, vector<1x4x8xbf16>
    %129 = vector.shape_cast %128 : vector<1x4x8xbf16> to vector<4x8xbf16>
    %c0_135 = arith.constant 0 : index
    %c149_136 = arith.constant 149 : index
    %130 = vector.load %arg7[%c0_135, %c149_136] : memref<8x768xbf16, #tpu.memory_space<vmem>>, vector<8x512xbf16>
    %cst_137 = arith.constant dense<0.000000e+00> : vector<4x512xf32>
    %131 = tpu.matmul %129, %130, %cst_137 {dimension_numbers = #tpu.dot_dimension_numbers<[1], [0], [0], [1], [0, 0, 1, 1], [], []>} : vector<4x8xbf16>, vector<8x512xbf16>, vector<4x512xf32> -> vector<4x512xf32>
    %132 = arith.addf %127, %131 : vector<4x512xf32>
    %c1_138 = arith.constant 1 : index
    %c0_139 = arith.constant 0 : index
    %c0_140 = arith.constant 0 : index
    %133 = vector.load %arg5[%c1_138, %c0_139, %c0_140] : memref<6x8x1xf32, #tpu.memory_space<vmem>>, vector<1x4x1xf32>
    %134 = vector.shape_cast %133 : vector<1x4x1xf32> to vector<4x1xf32>
    %135 = vector.broadcast %134 : vector<4x1xf32> to vector<4x512xf32>
    %136 = arith.addf %132, %135 : vector<4x512xf32>
    %cst_141 = arith.constant 0.000000e+00 : f32
    %137 = vector.broadcast %cst_141 : f32 to vector<4x512xf32>
    %138 = arith.maximumf %136, %137 : vector<4x512xf32>
    %139 = vector.broadcast %25 : vector<1x512xf32> to vector<4x512xf32>
    %140 = arith.mulf %138, %139 : vector<4x512xf32>
    %141 = arith.truncf %140 : vector<4x512xf32> to vector<4x512xbf16>
    %c0_142 = arith.constant 0 : index
    %c0_143 = arith.constant 0 : index
    %c128_144 = arith.constant 128 : index
    %142 = vector.load %arg8[%c0_142, %c0_143, %c128_144] : memref<2x4x768xbf16, #tpu.memory_space<vmem>>, vector<1x4x512xbf16>
    %143 = vector.shape_cast %142 : vector<1x4x512xbf16> to vector<4x512xbf16>
    %144 = vector.shape_cast %141 : vector<4x512xbf16> to vector<1x4x512xbf16>
    tpu.vector_store %arg8[%c0_142, %c0_143, %c128_144], %144 {strides = array<i32>} : memref<2x4x768xbf16, #tpu.memory_space<vmem>>, vector<1x4x512xbf16>,
    %c2 = arith.constant 2 : index
    %c0_145 = arith.constant 0 : index
    %c0_146 = arith.constant 0 : index
    %145 = vector.load %arg4[%c2, %c0_145, %c0_146] : memref<6x8x72xbf16, #tpu.memory_space<vmem>>, vector<1x4x4xbf16>
    %146 = vector.shape_cast %145 : vector<1x4x4xbf16> to vector<4x4xbf16>
    %c0_147 = arith.constant 0 : index
    %c0_148 = arith.constant 0 : index
    %c107_149 = arith.constant 107 : index
    %147 = vector.load %arg8[%c0_147, %c0_148, %c107_149] : memref<2x4x768xbf16, #tpu.memory_space<vmem>>, vector<1x4x512xbf16>
    %148 = vector.shape_cast %147 : vector<1x4x512xbf16> to vector<4x512xbf16>
    %cst_150 = arith.constant dense<0.000000e+00> : vector<4x512xf32>
    %149 = tpu.matmul %146, %148, %cst_150 {dimension_numbers = #tpu.dot_dimension_numbers<[1], [0], [0], [1], [0, 0, 1, 1], [], []>} : vector<4x4xbf16>, vector<4x512xbf16>, vector<4x512xf32> -> vector<4x512xf32>
    %c2_151 = arith.constant 2 : index
    %c0_152 = arith.constant 0 : index
    %c4_153 = arith.constant 4 : index
    %150 = vector.load %arg4[%c2_151, %c0_152, %c4_153] : memref<6x8x72xbf16, #tpu.memory_space<vmem>>, vector<1x4x4xbf16>
    %151 = vector.shape_cast %150 : vector<1x4x4xbf16> to vector<4x4xbf16>
    %c0_154 = arith.constant 0 : index
    %c0_155 = arith.constant 0 : index
    %c108_156 = arith.constant 108 : index
    %152 = vector.load %arg8[%c0_154, %c0_155, %c108_156] : memref<2x4x768xbf16, #tpu.memory_space<vmem>>, vector<1x4x512xbf16>
    %153 = vector.shape_cast %152 : vector<1x4x512xbf16> to vector<4x512xbf16>
    %cst_157 = arith.constant dense<0.000000e+00> : vector<4x512xf32>
    %154 = tpu.matmul %151, %153, %cst_157 {dimension_numbers = #tpu.dot_dimension_numbers<[1], [0], [0], [1], [0, 0, 1, 1], [], []>} : vector<4x4xbf16>, vector<4x512xbf16>, vector<4x512xf32> -> vector<4x512xf32>
    %155 = arith.addf %149, %154 : vector<4x512xf32>
    %c2_158 = arith.constant 2 : index
    %c0_159 = arith.constant 0 : index
    %c8_160 = arith.constant 8 : index
    %156 = vector.load %arg4[%c2_158, %c0_159, %c8_160] : memref<6x8x72xbf16, #tpu.memory_space<vmem>>, vector<1x4x4xbf16>
    %157 = vector.shape_cast %156 : vector<1x4x4xbf16> to vector<4x4xbf16>
    %c0_161 = arith.constant 0 : index
    %c0_162 = arith.constant 0 : index
    %c109_163 = arith.constant 109 : index
    %158 = vector.load %arg8[%c0_161, %c0_162, %c109_163] : memref<2x4x768xbf16, #tpu.memory_space<vmem>>, vector<1x4x512xbf16>
    %159 = vector.shape_cast %158 : vector<1x4x512xbf16> to vector<4x512xbf16>
    %cst_164 = arith.constant dense<0.000000e+00> : vector<4x512xf32>
    %160 = tpu.matmul %157, %159, %cst_164 {dimension_numbers = #tpu.dot_dimension_numbers<[1], [0], [0], [1], [0, 0, 1, 1], [], []>} : vector<4x4xbf16>, vector<4x512xbf16>, vector<4x512xf32> -> vector<4x512xf32>
    %161 = arith.addf %155, %160 : vector<4x512xf32>
    %c2_165 = arith.constant 2 : index
    %c0_166 = arith.constant 0 : index
    %c12_167 = arith.constant 12 : index
    %162 = vector.load %arg4[%c2_165, %c0_166, %c12_167] : memref<6x8x72xbf16, #tpu.memory_space<vmem>>, vector<1x4x4xbf16>
    %163 = vector.shape_cast %162 : vector<1x4x4xbf16> to vector<4x4xbf16>
    %c0_168 = arith.constant 0 : index
    %c0_169 = arith.constant 0 : index
    %c127_170 = arith.constant 127 : index
    %164 = vector.load %arg8[%c0_168, %c0_169, %c127_170] : memref<2x4x768xbf16, #tpu.memory_space<vmem>>, vector<1x4x512xbf16>
    %165 = vector.shape_cast %164 : vector<1x4x512xbf16> to vector<4x512xbf16>
    %cst_171 = arith.constant dense<0.000000e+00> : vector<4x512xf32>
    %166 = tpu.matmul %163, %165, %cst_171 {dimension_numbers = #tpu.dot_dimension_numbers<[1], [0], [0], [1], [0, 0, 1, 1], [], []>} : vector<4x4xbf16>, vector<4x512xbf16>, vector<4x512xf32> -> vector<4x512xf32>
    %167 = arith.addf %161, %166 : vector<4x512xf32>
    %c2_172 = arith.constant 2 : index
    %c0_173 = arith.constant 0 : index
    %c16_174 = arith.constant 16 : index
    %168 = vector.load %arg4[%c2_172, %c0_173, %c16_174] : memref<6x8x72xbf16, #tpu.memory_space<vmem>>, vector<1x4x4xbf16>
    %169 = vector.shape_cast %168 : vector<1x4x4xbf16> to vector<4x4xbf16>
    %c0_175 = arith.constant 0 : index
    %c0_176 = arith.constant 0 : index
    %c128_177 = arith.constant 128 : index
    %170 = vector.load %arg8[%c0_175, %c0_176, %c128_177] : memref<2x4x768xbf16, #tpu.memory_space<vmem>>, vector<1x4x512xbf16>
    %171 = vector.shape_cast %170 : vector<1x4x512xbf16> to vector<4x512xbf16>
    %cst_178 = arith.constant dense<0.000000e+00> : vector<4x512xf32>
    %172 = tpu.matmul %169, %171, %cst_178 {dimension_numbers = #tpu.dot_dimension_numbers<[1], [0], [0], [1], [0, 0, 1, 1], [], []>} : vector<4x4xbf16>, vector<4x512xbf16>, vector<4x512xf32> -> vector<4x512xf32>
    %173 = arith.addf %167, %172 : vector<4x512xf32>
    %c2_179 = arith.constant 2 : index
    %c0_180 = arith.constant 0 : index
    %c20_181 = arith.constant 20 : index
    %174 = vector.load %arg4[%c2_179, %c0_180, %c20_181] : memref<6x8x72xbf16, #tpu.memory_space<vmem>>, vector<1x4x4xbf16>
    %175 = vector.shape_cast %174 : vector<1x4x4xbf16> to vector<4x4xbf16>
    %c0_182 = arith.constant 0 : index
    %c0_183 = arith.constant 0 : index
    %c129_184 = arith.constant 129 : index
    %176 = vector.load %arg8[%c0_182, %c0_183, %c129_184] : memref<2x4x768xbf16, #tpu.memory_space<vmem>>, vector<1x4x512xbf16>
    %177 = vector.shape_cast %176 : vector<1x4x512xbf16> to vector<4x512xbf16>
    %cst_185 = arith.constant dense<0.000000e+00> : vector<4x512xf32>
    %178 = tpu.matmul %175, %177, %cst_185 {dimension_numbers = #tpu.dot_dimension_numbers<[1], [0], [0], [1], [0, 0, 1, 1], [], []>} : vector<4x4xbf16>, vector<4x512xbf16>, vector<4x512xf32> -> vector<4x512xf32>
    %179 = arith.addf %173, %178 : vector<4x512xf32>
    %c2_186 = arith.constant 2 : index
    %c0_187 = arith.constant 0 : index
    %c24_188 = arith.constant 24 : index
    %180 = vector.load %arg4[%c2_186, %c0_187, %c24_188] : memref<6x8x72xbf16, #tpu.memory_space<vmem>>, vector<1x4x4xbf16>
    %181 = vector.shape_cast %180 : vector<1x4x4xbf16> to vector<4x4xbf16>
    %c0_189 = arith.constant 0 : index
    %c0_190 = arith.constant 0 : index
    %c147_191 = arith.constant 147 : index
    %182 = vector.load %arg8[%c0_189, %c0_190, %c147_191] : memref<2x4x768xbf16, #tpu.memory_space<vmem>>, vector<1x4x512xbf16>
    %183 = vector.shape_cast %182 : vector<1x4x512xbf16> to vector<4x512xbf16>
    %cst_192 = arith.constant dense<0.000000e+00> : vector<4x512xf32>
    %184 = tpu.matmul %181, %183, %cst_192 {dimension_numbers = #tpu.dot_dimension_numbers<[1], [0], [0], [1], [0, 0, 1, 1], [], []>} : vector<4x4xbf16>, vector<4x512xbf16>, vector<4x512xf32> -> vector<4x512xf32>
    %185 = arith.addf %179, %184 : vector<4x512xf32>
    %c2_193 = arith.constant 2 : index
    %c0_194 = arith.constant 0 : index
    %c28_195 = arith.constant 28 : index
    %186 = vector.load %arg4[%c2_193, %c0_194, %c28_195] : memref<6x8x72xbf16, #tpu.memory_space<vmem>>, vector<1x4x4xbf16>
    %187 = vector.shape_cast %186 : vector<1x4x4xbf16> to vector<4x4xbf16>
    %c0_196 = arith.constant 0 : index
    %c0_197 = arith.constant 0 : index
    %c148_198 = arith.constant 148 : index
    %188 = vector.load %arg8[%c0_196, %c0_197, %c148_198] : memref<2x4x768xbf16, #tpu.memory_space<vmem>>, vector<1x4x512xbf16>
    %189 = vector.shape_cast %188 : vector<1x4x512xbf16> to vector<4x512xbf16>
    %cst_199 = arith.constant dense<0.000000e+00> : vector<4x512xf32>
    %190 = tpu.matmul %187, %189, %cst_199 {dimension_numbers = #tpu.dot_dimension_numbers<[1], [0], [0], [1], [0, 0, 1, 1], [], []>} : vector<4x4xbf16>, vector<4x512xbf16>, vector<4x512xf32> -> vector<4x512xf32>
    %191 = arith.addf %185, %190 : vector<4x512xf32>
    %c2_200 = arith.constant 2 : index
    %c0_201 = arith.constant 0 : index
    %c32_202 = arith.constant 32 : index
    %192 = vector.load %arg4[%c2_200, %c0_201, %c32_202] : memref<6x8x72xbf16, #tpu.memory_space<vmem>>, vector<1x4x4xbf16>
    %193 = vector.shape_cast %192 : vector<1x4x4xbf16> to vector<4x4xbf16>
    %c0_203 = arith.constant 0 : index
    %c0_204 = arith.constant 0 : index
    %c149_205 = arith.constant 149 : index
    %194 = vector.load %arg8[%c0_203, %c0_204, %c149_205] : memref<2x4x768xbf16, #tpu.memory_space<vmem>>, vector<1x4x512xbf16>
    %195 = vector.shape_cast %194 : vector<1x4x512xbf16> to vector<4x512xbf16>
    %cst_206 = arith.constant dense<0.000000e+00> : vector<4x512xf32>
    %196 = tpu.matmul %193, %195, %cst_206 {dimension_numbers = #tpu.dot_dimension_numbers<[1], [0], [0], [1], [0, 0, 1, 1], [], []>} : vector<4x4xbf16>, vector<4x512xbf16>, vector<4x512xf32> -> vector<4x512xf32>
    %197 = arith.addf %191, %196 : vector<4x512xf32>
    %c2_207 = arith.constant 2 : index
    %c0_208 = arith.constant 0 : index
    %c0_209 = arith.constant 0 : index
    %198 = vector.load %arg5[%c2_207, %c0_208, %c0_209] : memref<6x8x1xf32, #tpu.memory_space<vmem>>, vector<1x4x1xf32>
    %199 = vector.shape_cast %198 : vector<1x4x1xf32> to vector<4x1xf32>
    %200 = vector.broadcast %199 : vector<4x1xf32> to vector<4x512xf32>
    %201 = arith.addf %197, %200 : vector<4x512xf32>
    %cst_210 = arith.constant 0.000000e+00 : f32
    %202 = vector.broadcast %cst_210 : f32 to vector<4x512xf32>
    %203 = arith.maximumf %201, %202 : vector<4x512xf32>
    %204 = vector.broadcast %25 : vector<1x512xf32> to vector<4x512xf32>
    %205 = arith.mulf %203, %204 : vector<4x512xf32>
    %206 = arith.truncf %205 : vector<4x512xf32> to vector<4x512xbf16>
    %c1_211 = arith.constant 1 : index
    %c0_212 = arith.constant 0 : index
    %c128_213 = arith.constant 128 : index
    %207 = vector.load %arg8[%c1_211, %c0_212, %c128_213] : memref<2x4x768xbf16, #tpu.memory_space<vmem>>, vector<1x4x512xbf16>
    %208 = vector.shape_cast %207 : vector<1x4x512xbf16> to vector<4x512xbf16>
    %209 = vector.shape_cast %206 : vector<4x512xbf16> to vector<1x4x512xbf16>
    tpu.vector_store %arg8[%c1_211, %c0_212, %c128_213], %209 {strides = array<i32>} : memref<2x4x768xbf16, #tpu.memory_space<vmem>>, vector<1x4x512xbf16>,
    %c3 = arith.constant 3 : index
    %c0_214 = arith.constant 0 : index
    %c0_215 = arith.constant 0 : index
    %210 = vector.load %arg4[%c3, %c0_214, %c0_215] : memref<6x8x72xbf16, #tpu.memory_space<vmem>>, vector<1x4x4xbf16>
    %211 = vector.shape_cast %210 : vector<1x4x4xbf16> to vector<4x4xbf16>
    %c1_216 = arith.constant 1 : index
    %c0_217 = arith.constant 0 : index
    %c86 = arith.constant 86 : index
    %212 = vector.load %arg8[%c1_216, %c0_217, %c86] : memref<2x4x768xbf16, #tpu.memory_space<vmem>>, vector<1x4x512xbf16>
    %213 = vector.shape_cast %212 : vector<1x4x512xbf16> to vector<4x512xbf16>
    %cst_218 = arith.constant dense<0.000000e+00> : vector<4x512xf32>
    %214 = tpu.matmul %211, %213, %cst_218 {dimension_numbers = #tpu.dot_dimension_numbers<[1], [0], [0], [1], [0, 0, 1, 1], [], []>} : vector<4x4xbf16>, vector<4x512xbf16>, vector<4x512xf32> -> vector<4x512xf32>
    %c3_219 = arith.constant 3 : index
    %c0_220 = arith.constant 0 : index
    %c4_221 = arith.constant 4 : index
    %215 = vector.load %arg4[%c3_219, %c0_220, %c4_221] : memref<6x8x72xbf16, #tpu.memory_space<vmem>>, vector<1x4x4xbf16>
    %216 = vector.shape_cast %215 : vector<1x4x4xbf16> to vector<4x4xbf16>
    %c1_222 = arith.constant 1 : index
    %c0_223 = arith.constant 0 : index
    %c88 = arith.constant 88 : index
    %217 = vector.load %arg8[%c1_222, %c0_223, %c88] : memref<2x4x768xbf16, #tpu.memory_space<vmem>>, vector<1x4x512xbf16>
    %218 = vector.shape_cast %217 : vector<1x4x512xbf16> to vector<4x512xbf16>
    %cst_224 = arith.constant dense<0.000000e+00> : vector<4x512xf32>
    %219 = tpu.matmul %216, %218, %cst_224 {dimension_numbers = #tpu.dot_dimension_numbers<[1], [0], [0], [1], [0, 0, 1, 1], [], []>} : vector<4x4xbf16>, vector<4x512xbf16>, vector<4x512xf32> -> vector<4x512xf32>
    %220 = arith.addf %214, %219 : vector<4x512xf32>
    %c3_225 = arith.constant 3 : index
    %c0_226 = arith.constant 0 : index
    %c8_227 = arith.constant 8 : index
    %221 = vector.load %arg4[%c3_225, %c0_226, %c8_227] : memref<6x8x72xbf16, #tpu.memory_space<vmem>>, vector<1x4x4xbf16>
    %222 = vector.shape_cast %221 : vector<1x4x4xbf16> to vector<4x4xbf16>
    %c1_228 = arith.constant 1 : index
    %c0_229 = arith.constant 0 : index
    %c90 = arith.constant 90 : index
    %223 = vector.load %arg8[%c1_228, %c0_229, %c90] : memref<2x4x768xbf16, #tpu.memory_space<vmem>>, vector<1x4x512xbf16>
    %224 = vector.shape_cast %223 : vector<1x4x512xbf16> to vector<4x512xbf16>
    %cst_230 = arith.constant dense<0.000000e+00> : vector<4x512xf32>
    %225 = tpu.matmul %222, %224, %cst_230 {dimension_numbers = #tpu.dot_dimension_numbers<[1], [0], [0], [1], [0, 0, 1, 1], [], []>} : vector<4x4xbf16>, vector<4x512xbf16>, vector<4x512xf32> -> vector<4x512xf32>
    %226 = arith.addf %220, %225 : vector<4x512xf32>
    %c3_231 = arith.constant 3 : index
    %c0_232 = arith.constant 0 : index
    %c12_233 = arith.constant 12 : index
    %227 = vector.load %arg4[%c3_231, %c0_232, %c12_233] : memref<6x8x72xbf16, #tpu.memory_space<vmem>>, vector<1x4x4xbf16>
    %228 = vector.shape_cast %227 : vector<1x4x4xbf16> to vector<4x4xbf16>
    %c1_234 = arith.constant 1 : index
    %c0_235 = arith.constant 0 : index
    %c126 = arith.constant 126 : index
    %229 = vector.load %arg8[%c1_234, %c0_235, %c126] : memref<2x4x768xbf16, #tpu.memory_space<vmem>>, vector<1x4x512xbf16>
    %230 = vector.shape_cast %229 : vector<1x4x512xbf16> to vector<4x512xbf16>
    %cst_236 = arith.constant dense<0.000000e+00> : vector<4x512xf32>
    %231 = tpu.matmul %228, %230, %cst_236 {dimension_numbers = #tpu.dot_dimension_numbers<[1], [0], [0], [1], [0, 0, 1, 1], [], []>} : vector<4x4xbf16>, vector<4x512xbf16>, vector<4x512xf32> -> vector<4x512xf32>
    %232 = arith.addf %226, %231 : vector<4x512xf32>
    %c3_237 = arith.constant 3 : index
    %c0_238 = arith.constant 0 : index
    %c16_239 = arith.constant 16 : index
    %233 = vector.load %arg4[%c3_237, %c0_238, %c16_239] : memref<6x8x72xbf16, #tpu.memory_space<vmem>>, vector<1x4x4xbf16>
    %234 = vector.shape_cast %233 : vector<1x4x4xbf16> to vector<4x4xbf16>
    %c1_240 = arith.constant 1 : index
    %c0_241 = arith.constant 0 : index
    %c128_242 = arith.constant 128 : index
    %235 = vector.load %arg8[%c1_240, %c0_241, %c128_242] : memref<2x4x768xbf16, #tpu.memory_space<vmem>>, vector<1x4x512xbf16>
    %236 = vector.shape_cast %235 : vector<1x4x512xbf16> to vector<4x512xbf16>
    %cst_243 = arith.constant dense<0.000000e+00> : vector<4x512xf32>
    %237 = tpu.matmul %234, %236, %cst_243 {dimension_numbers = #tpu.dot_dimension_numbers<[1], [0], [0], [1], [0, 0, 1, 1], [], []>} : vector<4x4xbf16>, vector<4x512xbf16>, vector<4x512xf32> -> vector<4x512xf32>
    %238 = arith.addf %232, %237 : vector<4x512xf32>
    %c3_244 = arith.constant 3 : index
    %c0_245 = arith.constant 0 : index
    %c20_246 = arith.constant 20 : index
    %239 = vector.load %arg4[%c3_244, %c0_245, %c20_246] : memref<6x8x72xbf16, #tpu.memory_space<vmem>>, vector<1x4x4xbf16>
    %240 = vector.shape_cast %239 : vector<1x4x4xbf16> to vector<4x4xbf16>
    %c1_247 = arith.constant 1 : index
    %c0_248 = arith.constant 0 : index
    %c130 = arith.constant 130 : index
    %241 = vector.load %arg8[%c1_247, %c0_248, %c130] : memref<2x4x768xbf16, #tpu.memory_space<vmem>>, vector<1x4x512xbf16>
    %242 = vector.shape_cast %241 : vector<1x4x512xbf16> to vector<4x512xbf16>
    %cst_249 = arith.constant dense<0.000000e+00> : vector<4x512xf32>
    %243 = tpu.matmul %240, %242, %cst_249 {dimension_numbers = #tpu.dot_dimension_numbers<[1], [0], [0], [1], [0, 0, 1, 1], [], []>} : vector<4x4xbf16>, vector<4x512xbf16>, vector<4x512xf32> -> vector<4x512xf32>
    %244 = arith.addf %238, %243 : vector<4x512xf32>
    %c3_250 = arith.constant 3 : index
    %c0_251 = arith.constant 0 : index
    %c24_252 = arith.constant 24 : index
    %245 = vector.load %arg4[%c3_250, %c0_251, %c24_252] : memref<6x8x72xbf16, #tpu.memory_space<vmem>>, vector<1x4x4xbf16>
    %246 = vector.shape_cast %245 : vector<1x4x4xbf16> to vector<4x4xbf16>
    %c1_253 = arith.constant 1 : index
    %c0_254 = arith.constant 0 : index
    %c166 = arith.constant 166 : index
    %247 = vector.load %arg8[%c1_253, %c0_254, %c166] : memref<2x4x768xbf16, #tpu.memory_space<vmem>>, vector<1x4x512xbf16>
    %248 = vector.shape_cast %247 : vector<1x4x512xbf16> to vector<4x512xbf16>
    %cst_255 = arith.constant dense<0.000000e+00> : vector<4x512xf32>
    %249 = tpu.matmul %246, %248, %cst_255 {dimension_numbers = #tpu.dot_dimension_numbers<[1], [0], [0], [1], [0, 0, 1, 1], [], []>} : vector<4x4xbf16>, vector<4x512xbf16>, vector<4x512xf32> -> vector<4x512xf32>
    %250 = arith.addf %244, %249 : vector<4x512xf32>
    %c3_256 = arith.constant 3 : index
    %c0_257 = arith.constant 0 : index
    %c28_258 = arith.constant 28 : index
    %251 = vector.load %arg4[%c3_256, %c0_257, %c28_258] : memref<6x8x72xbf16, #tpu.memory_space<vmem>>, vector<1x4x4xbf16>
    %252 = vector.shape_cast %251 : vector<1x4x4xbf16> to vector<4x4xbf16>
    %c1_259 = arith.constant 1 : index
    %c0_260 = arith.constant 0 : index
    %c168 = arith.constant 168 : index
    %253 = vector.load %arg8[%c1_259, %c0_260, %c168] : memref<2x4x768xbf16, #tpu.memory_space<vmem>>, vector<1x4x512xbf16>
    %254 = vector.shape_cast %253 : vector<1x4x512xbf16> to vector<4x512xbf16>
    %cst_261 = arith.constant dense<0.000000e+00> : vector<4x512xf32>
    %255 = tpu.matmul %252, %254, %cst_261 {dimension_numbers = #tpu.dot_dimension_numbers<[1], [0], [0], [1], [0, 0, 1, 1], [], []>} : vector<4x4xbf16>, vector<4x512xbf16>, vector<4x512xf32> -> vector<4x512xf32>
    %256 = arith.addf %250, %255 : vector<4x512xf32>
    %c3_262 = arith.constant 3 : index
    %c0_263 = arith.constant 0 : index
    %c32_264 = arith.constant 32 : index
    %257 = vector.load %arg4[%c3_262, %c0_263, %c32_264] : memref<6x8x72xbf16, #tpu.memory_space<vmem>>, vector<1x4x4xbf16>
    %258 = vector.shape_cast %257 : vector<1x4x4xbf16> to vector<4x4xbf16>
    %c1_265 = arith.constant 1 : index
    %c0_266 = arith.constant 0 : index
    %c170 = arith.constant 170 : index
    %259 = vector.load %arg8[%c1_265, %c0_266, %c170] : memref<2x4x768xbf16, #tpu.memory_space<vmem>>, vector<1x4x512xbf16>
    %260 = vector.shape_cast %259 : vector<1x4x512xbf16> to vector<4x512xbf16>
    %cst_267 = arith.constant dense<0.000000e+00> : vector<4x512xf32>
    %261 = tpu.matmul %258, %260, %cst_267 {dimension_numbers = #tpu.dot_dimension_numbers<[1], [0], [0], [1], [0, 0, 1, 1], [], []>} : vector<4x4xbf16>, vector<4x512xbf16>, vector<4x512xf32> -> vector<4x512xf32>
    %262 = arith.addf %256, %261 : vector<4x512xf32>
    %c3_268 = arith.constant 3 : index
    %c0_269 = arith.constant 0 : index
    %c0_270 = arith.constant 0 : index
    %263 = vector.load %arg5[%c3_268, %c0_269, %c0_270] : memref<6x8x1xf32, #tpu.memory_space<vmem>>, vector<1x4x1xf32>
    %264 = vector.shape_cast %263 : vector<1x4x1xf32> to vector<4x1xf32>
    %265 = vector.broadcast %264 : vector<4x1xf32> to vector<4x512xf32>
    %266 = arith.addf %262, %265 : vector<4x512xf32>
    %cst_271 = arith.constant 0.000000e+00 : f32
    %267 = vector.broadcast %cst_271 : f32 to vector<4x512xf32>
    %268 = arith.maximumf %266, %267 : vector<4x512xf32>
    %269 = vector.broadcast %25 : vector<1x512xf32> to vector<4x512xf32>
    %270 = arith.mulf %268, %269 : vector<4x512xf32>
    %271 = arith.truncf %270 : vector<4x512xf32> to vector<4x512xbf16>
    %c0_272 = arith.constant 0 : index
    %c128_273 = arith.constant 128 : index
    %272 = vector.load %arg9[%c0_272, %c128_273] : memref<4x768xbf16, #tpu.memory_space<vmem>>, vector<4x512xbf16>
    tpu.vector_store %arg9[%c0_272, %c128_273], %271 {strides = array<i32>} : memref<4x768xbf16, #tpu.memory_space<vmem>>, vector<4x512xbf16>,
    %c4_274 = arith.constant 4 : index
    %c0_275 = arith.constant 0 : index
    %c0_276 = arith.constant 0 : index
    %273 = vector.load %arg4[%c4_274, %c0_275, %c0_276] : memref<6x8x72xbf16, #tpu.memory_space<vmem>>, vector<1x4x4xbf16>
    %274 = vector.shape_cast %273 : vector<1x4x4xbf16> to vector<4x4xbf16>
    %c1_277 = arith.constant 1 : index
    %c0_278 = arith.constant 0 : index
    %c107_279 = arith.constant 107 : index
    %275 = vector.load %arg8[%c1_277, %c0_278, %c107_279] : memref<2x4x768xbf16, #tpu.memory_space<vmem>>, vector<1x4x512xbf16>
    %276 = vector.shape_cast %275 : vector<1x4x512xbf16> to vector<4x512xbf16>
    %cst_280 = arith.constant dense<0.000000e+00> : vector<4x512xf32>
    %277 = tpu.matmul %274, %276, %cst_280 {dimension_numbers = #tpu.dot_dimension_numbers<[1], [0], [0], [1], [0, 0, 1, 1], [], []>} : vector<4x4xbf16>, vector<4x512xbf16>, vector<4x512xf32> -> vector<4x512xf32>
    %c4_281 = arith.constant 4 : index
    %c0_282 = arith.constant 0 : index
    %c4_283 = arith.constant 4 : index
    %278 = vector.load %arg4[%c4_281, %c0_282, %c4_283] : memref<6x8x72xbf16, #tpu.memory_space<vmem>>, vector<1x4x4xbf16>
    %279 = vector.shape_cast %278 : vector<1x4x4xbf16> to vector<4x4xbf16>
    %c0_284 = arith.constant 0 : index
    %c107_285 = arith.constant 107 : index
    %280 = vector.load %arg9[%c0_284, %c107_285] : memref<4x768xbf16, #tpu.memory_space<vmem>>, vector<4x512xbf16>
    %cst_286 = arith.constant dense<0.000000e+00> : vector<4x512xf32>
    %281 = tpu.matmul %279, %280, %cst_286 {dimension_numbers = #tpu.dot_dimension_numbers<[1], [0], [0], [1], [0, 0, 1, 1], [], []>} : vector<4x4xbf16>, vector<4x512xbf16>, vector<4x512xf32> -> vector<4x512xf32>
    %282 = arith.addf %277, %281 : vector<4x512xf32>
    %c4_287 = arith.constant 4 : index
    %c0_288 = arith.constant 0 : index
    %c8_289 = arith.constant 8 : index
    %283 = vector.load %arg4[%c4_287, %c0_288, %c8_289] : memref<6x8x72xbf16, #tpu.memory_space<vmem>>, vector<1x4x4xbf16>
    %284 = vector.shape_cast %283 : vector<1x4x4xbf16> to vector<4x4xbf16>
    %c1_290 = arith.constant 1 : index
    %c0_291 = arith.constant 0 : index
    %c108_292 = arith.constant 108 : index
    %285 = vector.load %arg8[%c1_290, %c0_291, %c108_292] : memref<2x4x768xbf16, #tpu.memory_space<vmem>>, vector<1x4x512xbf16>
    %286 = vector.shape_cast %285 : vector<1x4x512xbf16> to vector<4x512xbf16>
    %cst_293 = arith.constant dense<0.000000e+00> : vector<4x512xf32>
    %287 = tpu.matmul %284, %286, %cst_293 {dimension_numbers = #tpu.dot_dimension_numbers<[1], [0], [0], [1], [0, 0, 1, 1], [], []>} : vector<4x4xbf16>, vector<4x512xbf16>, vector<4x512xf32> -> vector<4x512xf32>
    %288 = arith.addf %282, %287 : vector<4x512xf32>
    %c4_294 = arith.constant 4 : index
    %c0_295 = arith.constant 0 : index
    %c12_296 = arith.constant 12 : index
    %289 = vector.load %arg4[%c4_294, %c0_295, %c12_296] : memref<6x8x72xbf16, #tpu.memory_space<vmem>>, vector<1x4x4xbf16>
    %290 = vector.shape_cast %289 : vector<1x4x4xbf16> to vector<4x4xbf16>
    %c0_297 = arith.constant 0 : index
    %c108_298 = arith.constant 108 : index
    %291 = vector.load %arg9[%c0_297, %c108_298] : memref<4x768xbf16, #tpu.memory_space<vmem>>, vector<4x512xbf16>
    %cst_299 = arith.constant dense<0.000000e+00> : vector<4x512xf32>
    %292 = tpu.matmul %290, %291, %cst_299 {dimension_numbers = #tpu.dot_dimension_numbers<[1], [0], [0], [1], [0, 0, 1, 1], [], []>} : vector<4x4xbf16>, vector<4x512xbf16>, vector<4x512xf32> -> vector<4x512xf32>
    %293 = arith.addf %288, %292 : vector<4x512xf32>
    %c4_300 = arith.constant 4 : index
    %c0_301 = arith.constant 0 : index
    %c16_302 = arith.constant 16 : index
    %294 = vector.load %arg4[%c4_300, %c0_301, %c16_302] : memref<6x8x72xbf16, #tpu.memory_space<vmem>>, vector<1x4x4xbf16>
    %295 = vector.shape_cast %294 : vector<1x4x4xbf16> to vector<4x4xbf16>
    %c1_303 = arith.constant 1 : index
    %c0_304 = arith.constant 0 : index
    %c109_305 = arith.constant 109 : index
    %296 = vector.load %arg8[%c1_303, %c0_304, %c109_305] : memref<2x4x768xbf16, #tpu.memory_space<vmem>>, vector<1x4x512xbf16>
    %297 = vector.shape_cast %296 : vector<1x4x512xbf16> to vector<4x512xbf16>
    %cst_306 = arith.constant dense<0.000000e+00> : vector<4x512xf32>
    %298 = tpu.matmul %295, %297, %cst_306 {dimension_numbers = #tpu.dot_dimension_numbers<[1], [0], [0], [1], [0, 0, 1, 1], [], []>} : vector<4x4xbf16>, vector<4x512xbf16>, vector<4x512xf32> -> vector<4x512xf32>
    %299 = arith.addf %293, %298 : vector<4x512xf32>
    %c4_307 = arith.constant 4 : index
    %c0_308 = arith.constant 0 : index
    %c20_309 = arith.constant 20 : index
    %300 = vector.load %arg4[%c4_307, %c0_308, %c20_309] : memref<6x8x72xbf16, #tpu.memory_space<vmem>>, vector<1x4x4xbf16>
    %301 = vector.shape_cast %300 : vector<1x4x4xbf16> to vector<4x4xbf16>
    %c0_310 = arith.constant 0 : index
    %c109_311 = arith.constant 109 : index
    %302 = vector.load %arg9[%c0_310, %c109_311] : memref<4x768xbf16, #tpu.memory_space<vmem>>, vector<4x512xbf16>
    %cst_312 = arith.constant dense<0.000000e+00> : vector<4x512xf32>
    %303 = tpu.matmul %301, %302, %cst_312 {dimension_numbers = #tpu.dot_dimension_numbers<[1], [0], [0], [1], [0, 0, 1, 1], [], []>} : vector<4x4xbf16>, vector<4x512xbf16>, vector<4x512xf32> -> vector<4x512xf32>
    %304 = arith.addf %299, %303 : vector<4x512xf32>
    %c4_313 = arith.constant 4 : index
    %c0_314 = arith.constant 0 : index
    %c24_315 = arith.constant 24 : index
    %305 = vector.load %arg4[%c4_313, %c0_314, %c24_315] : memref<6x8x72xbf16, #tpu.memory_space<vmem>>, vector<1x4x4xbf16>
    %306 = vector.shape_cast %305 : vector<1x4x4xbf16> to vector<4x4xbf16>
    %c1_316 = arith.constant 1 : index
    %c0_317 = arith.constant 0 : index
    %c127_318 = arith.constant 127 : index
    %307 = vector.load %arg8[%c1_316, %c0_317, %c127_318] : memref<2x4x768xbf16, #tpu.memory_space<vmem>>, vector<1x4x512xbf16>
    %308 = vector.shape_cast %307 : vector<1x4x512xbf16> to vector<4x512xbf16>
    %cst_319 = arith.constant dense<0.000000e+00> : vector<4x512xf32>
    %309 = tpu.matmul %306, %308, %cst_319 {dimension_numbers = #tpu.dot_dimension_numbers<[1], [0], [0], [1], [0, 0, 1, 1], [], []>} : vector<4x4xbf16>, vector<4x512xbf16>, vector<4x512xf32> -> vector<4x512xf32>
    %310 = arith.addf %304, %309 : vector<4x512xf32>
    %c4_320 = arith.constant 4 : index
    %c0_321 = arith.constant 0 : index
    %c28_322 = arith.constant 28 : index
    %311 = vector.load %arg4[%c4_320, %c0_321, %c28_322] : memref<6x8x72xbf16, #tpu.memory_space<vmem>>, vector<1x4x4xbf16>
    %312 = vector.shape_cast %311 : vector<1x4x4xbf16> to vector<4x4xbf16>
    %c0_323 = arith.constant 0 : index
    %c127_324 = arith.constant 127 : index
    %313 = vector.load %arg9[%c0_323, %c127_324] : memref<4x768xbf16, #tpu.memory_space<vmem>>, vector<4x512xbf16>
    %cst_325 = arith.constant dense<0.000000e+00> : vector<4x512xf32>
    %314 = tpu.matmul %312, %313, %cst_325 {dimension_numbers = #tpu.dot_dimension_numbers<[1], [0], [0], [1], [0, 0, 1, 1], [], []>} : vector<4x4xbf16>, vector<4x512xbf16>, vector<4x512xf32> -> vector<4x512xf32>
    %315 = arith.addf %310, %314 : vector<4x512xf32>
    %c4_326 = arith.constant 4 : index
    %c0_327 = arith.constant 0 : index
    %c32_328 = arith.constant 32 : index
    %316 = vector.load %arg4[%c4_326, %c0_327, %c32_328] : memref<6x8x72xbf16, #tpu.memory_space<vmem>>, vector<1x4x4xbf16>
    %317 = vector.shape_cast %316 : vector<1x4x4xbf16> to vector<4x4xbf16>
    %c1_329 = arith.constant 1 : index
    %c0_330 = arith.constant 0 : index
    %c128_331 = arith.constant 128 : index
    %318 = vector.load %arg8[%c1_329, %c0_330, %c128_331] : memref<2x4x768xbf16, #tpu.memory_space<vmem>>, vector<1x4x512xbf16>
    %319 = vector.shape_cast %318 : vector<1x4x512xbf16> to vector<4x512xbf16>
    %cst_332 = arith.constant dense<0.000000e+00> : vector<4x512xf32>
    %320 = tpu.matmul %317, %319, %cst_332 {dimension_numbers = #tpu.dot_dimension_numbers<[1], [0], [0], [1], [0, 0, 1, 1], [], []>} : vector<4x4xbf16>, vector<4x512xbf16>, vector<4x512xf32> -> vector<4x512xf32>
    %321 = arith.addf %315, %320 : vector<4x512xf32>
    %c4_333 = arith.constant 4 : index
    %c0_334 = arith.constant 0 : index
    %c36 = arith.constant 36 : index
    %322 = vector.load %arg4[%c4_333, %c0_334, %c36] : memref<6x8x72xbf16, #tpu.memory_space<vmem>>, vector<1x4x4xbf16>
    %323 = vector.shape_cast %322 : vector<1x4x4xbf16> to vector<4x4xbf16>
    %c0_335 = arith.constant 0 : index
    %c128_336 = arith.constant 128 : index
    %324 = vector.load %arg9[%c0_335, %c128_336] : memref<4x768xbf16, #tpu.memory_space<vmem>>, vector<4x512xbf16>
    %cst_337 = arith.constant dense<0.000000e+00> : vector<4x512xf32>
    %325 = tpu.matmul %323, %324, %cst_337 {dimension_numbers = #tpu.dot_dimension_numbers<[1], [0], [0], [1], [0, 0, 1, 1], [], []>} : vector<4x4xbf16>, vector<4x512xbf16>, vector<4x512xf32> -> vector<4x512xf32>
    %326 = arith.addf %321, %325 : vector<4x512xf32>
    %c4_338 = arith.constant 4 : index
    %c0_339 = arith.constant 0 : index
    %c40_340 = arith.constant 40 : index
    %327 = vector.load %arg4[%c4_338, %c0_339, %c40_340] : memref<6x8x72xbf16, #tpu.memory_space<vmem>>, vector<1x4x4xbf16>
    %328 = vector.shape_cast %327 : vector<1x4x4xbf16> to vector<4x4xbf16>
    %c1_341 = arith.constant 1 : index
    %c0_342 = arith.constant 0 : index
    %c129_343 = arith.constant 129 : index
    %329 = vector.load %arg8[%c1_341, %c0_342, %c129_343] : memref<2x4x768xbf16, #tpu.memory_space<vmem>>, vector<1x4x512xbf16>
    %330 = vector.shape_cast %329 : vector<1x4x512xbf16> to vector<4x512xbf16>
    %cst_344 = arith.constant dense<0.000000e+00> : vector<4x512xf32>
    %331 = tpu.matmul %328, %330, %cst_344 {dimension_numbers = #tpu.dot_dimension_numbers<[1], [0], [0], [1], [0, 0, 1, 1], [], []>} : vector<4x4xbf16>, vector<4x512xbf16>, vector<4x512xf32> -> vector<4x512xf32>
    %332 = arith.addf %326, %331 : vector<4x512xf32>
    %c4_345 = arith.constant 4 : index
    %c0_346 = arith.constant 0 : index
    %c44 = arith.constant 44 : index
    %333 = vector.load %arg4[%c4_345, %c0_346, %c44] : memref<6x8x72xbf16, #tpu.memory_space<vmem>>, vector<1x4x4xbf16>
    %334 = vector.shape_cast %333 : vector<1x4x4xbf16> to vector<4x4xbf16>
    %c0_347 = arith.constant 0 : index
    %c129_348 = arith.constant 129 : index
    %335 = vector.load %arg9[%c0_347, %c129_348] : memref<4x768xbf16, #tpu.memory_space<vmem>>, vector<4x512xbf16>
    %cst_349 = arith.constant dense<0.000000e+00> : vector<4x512xf32>
    %336 = tpu.matmul %334, %335, %cst_349 {dimension_numbers = #tpu.dot_dimension_numbers<[1], [0], [0], [1], [0, 0, 1, 1], [], []>} : vector<4x4xbf16>, vector<4x512xbf16>, vector<4x512xf32> -> vector<4x512xf32>
    %337 = arith.addf %332, %336 : vector<4x512xf32>
    %c4_350 = arith.constant 4 : index
    %c0_351 = arith.constant 0 : index
    %c48_352 = arith.constant 48 : index
    %338 = vector.load %arg4[%c4_350, %c0_351, %c48_352] : memref<6x8x72xbf16, #tpu.memory_space<vmem>>, vector<1x4x4xbf16>
    %339 = vector.shape_cast %338 : vector<1x4x4xbf16> to vector<4x4xbf16>
    %c1_353 = arith.constant 1 : index
    %c0_354 = arith.constant 0 : index
    %c147_355 = arith.constant 147 : index
    %340 = vector.load %arg8[%c1_353, %c0_354, %c147_355] : memref<2x4x768xbf16, #tpu.memory_space<vmem>>, vector<1x4x512xbf16>
    %341 = vector.shape_cast %340 : vector<1x4x512xbf16> to vector<4x512xbf16>
    %cst_356 = arith.constant dense<0.000000e+00> : vector<4x512xf32>
    %342 = tpu.matmul %339, %341, %cst_356 {dimension_numbers = #tpu.dot_dimension_numbers<[1], [0], [0], [1], [0, 0, 1, 1], [], []>} : vector<4x4xbf16>, vector<4x512xbf16>, vector<4x512xf32> -> vector<4x512xf32>
    %343 = arith.addf %337, %342 : vector<4x512xf32>
    %c4_357 = arith.constant 4 : index
    %c0_358 = arith.constant 0 : index
    %c52 = arith.constant 52 : index
    %344 = vector.load %arg4[%c4_357, %c0_358, %c52] : memref<6x8x72xbf16, #tpu.memory_space<vmem>>, vector<1x4x4xbf16>
    %345 = vector.shape_cast %344 : vector<1x4x4xbf16> to vector<4x4xbf16>
    %c0_359 = arith.constant 0 : index
    %c147_360 = arith.constant 147 : index
    %346 = vector.load %arg9[%c0_359, %c147_360] : memref<4x768xbf16, #tpu.memory_space<vmem>>, vector<4x512xbf16>
    %cst_361 = arith.constant dense<0.000000e+00> : vector<4x512xf32>
    %347 = tpu.matmul %345, %346, %cst_361 {dimension_numbers = #tpu.dot_dimension_numbers<[1], [0], [0], [1], [0, 0, 1, 1], [], []>} : vector<4x4xbf16>, vector<4x512xbf16>, vector<4x512xf32> -> vector<4x512xf32>
    %348 = arith.addf %343, %347 : vector<4x512xf32>
    %c4_362 = arith.constant 4 : index
    %c0_363 = arith.constant 0 : index
    %c56_364 = arith.constant 56 : index
    %349 = vector.load %arg4[%c4_362, %c0_363, %c56_364] : memref<6x8x72xbf16, #tpu.memory_space<vmem>>, vector<1x4x4xbf16>
    %350 = vector.shape_cast %349 : vector<1x4x4xbf16> to vector<4x4xbf16>
    %c1_365 = arith.constant 1 : index
    %c0_366 = arith.constant 0 : index
    %c148_367 = arith.constant 148 : index
    %351 = vector.load %arg8[%c1_365, %c0_366, %c148_367] : memref<2x4x768xbf16, #tpu.memory_space<vmem>>, vector<1x4x512xbf16>
    %352 = vector.shape_cast %351 : vector<1x4x512xbf16> to vector<4x512xbf16>
    %cst_368 = arith.constant dense<0.000000e+00> : vector<4x512xf32>
    %353 = tpu.matmul %350, %352, %cst_368 {dimension_numbers = #tpu.dot_dimension_numbers<[1], [0], [0], [1], [0, 0, 1, 1], [], []>} : vector<4x4xbf16>, vector<4x512xbf16>, vector<4x512xf32> -> vector<4x512xf32>
    %354 = arith.addf %348, %353 : vector<4x512xf32>
    %c4_369 = arith.constant 4 : index
    %c0_370 = arith.constant 0 : index
    %c60 = arith.constant 60 : index
    %355 = vector.load %arg4[%c4_369, %c0_370, %c60] : memref<6x8x72xbf16, #tpu.memory_space<vmem>>, vector<1x4x4xbf16>
    %356 = vector.shape_cast %355 : vector<1x4x4xbf16> to vector<4x4xbf16>
    %c0_371 = arith.constant 0 : index
    %c148_372 = arith.constant 148 : index
    %357 = vector.load %arg9[%c0_371, %c148_372] : memref<4x768xbf16, #tpu.memory_space<vmem>>, vector<4x512xbf16>
    %cst_373 = arith.constant dense<0.000000e+00> : vector<4x512xf32>
    %358 = tpu.matmul %356, %357, %cst_373 {dimension_numbers = #tpu.dot_dimension_numbers<[1], [0], [0], [1], [0, 0, 1, 1], [], []>} : vector<4x4xbf16>, vector<4x512xbf16>, vector<4x512xf32> -> vector<4x512xf32>
    %359 = arith.addf %354, %358 : vector<4x512xf32>
    %c4_374 = arith.constant 4 : index
    %c0_375 = arith.constant 0 : index
    %c64_376 = arith.constant 64 : index
    %360 = vector.load %arg4[%c4_374, %c0_375, %c64_376] : memref<6x8x72xbf16, #tpu.memory_space<vmem>>, vector<1x4x4xbf16>
    %361 = vector.shape_cast %360 : vector<1x4x4xbf16> to vector<4x4xbf16>
    %c1_377 = arith.constant 1 : index
    %c0_378 = arith.constant 0 : index
    %c149_379 = arith.constant 149 : index
    %362 = vector.load %arg8[%c1_377, %c0_378, %c149_379] : memref<2x4x768xbf16, #tpu.memory_space<vmem>>, vector<1x4x512xbf16>
    %363 = vector.shape_cast %362 : vector<1x4x512xbf16> to vector<4x512xbf16>
    %cst_380 = arith.constant dense<0.000000e+00> : vector<4x512xf32>
    %364 = tpu.matmul %361, %363, %cst_380 {dimension_numbers = #tpu.dot_dimension_numbers<[1], [0], [0], [1], [0, 0, 1, 1], [], []>} : vector<4x4xbf16>, vector<4x512xbf16>, vector<4x512xf32> -> vector<4x512xf32>
    %365 = arith.addf %359, %364 : vector<4x512xf32>
    %c4_381 = arith.constant 4 : index
    %c0_382 = arith.constant 0 : index
    %c68 = arith.constant 68 : index
    %366 = vector.load %arg4[%c4_381, %c0_382, %c68] : memref<6x8x72xbf16, #tpu.memory_space<vmem>>, vector<1x4x4xbf16>
    %367 = vector.shape_cast %366 : vector<1x4x4xbf16> to vector<4x4xbf16>
    %c0_383 = arith.constant 0 : index
    %c149_384 = arith.constant 149 : index
    %368 = vector.load %arg9[%c0_383, %c149_384] : memref<4x768xbf16, #tpu.memory_space<vmem>>, vector<4x512xbf16>
    %cst_385 = arith.constant dense<0.000000e+00> : vector<4x512xf32>
    %369 = tpu.matmul %367, %368, %cst_385 {dimension_numbers = #tpu.dot_dimension_numbers<[1], [0], [0], [1], [0, 0, 1, 1], [], []>} : vector<4x4xbf16>, vector<4x512xbf16>, vector<4x512xf32> -> vector<4x512xf32>
    %370 = arith.addf %365, %369 : vector<4x512xf32>
    %c4_386 = arith.constant 4 : index
    %c0_387 = arith.constant 0 : index
    %c0_388 = arith.constant 0 : index
    %371 = vector.load %arg5[%c4_386, %c0_387, %c0_388] : memref<6x8x1xf32, #tpu.memory_space<vmem>>, vector<1x4x1xf32>
    %372 = vector.shape_cast %371 : vector<1x4x1xf32> to vector<4x1xf32>
    %373 = vector.broadcast %372 : vector<4x1xf32> to vector<4x512xf32>
    %374 = arith.addf %370, %373 : vector<4x512xf32>
    %cst_389 = arith.constant 0.000000e+00 : f32
    %375 = vector.broadcast %cst_389 : f32 to vector<4x512xf32>
    %376 = arith.maximumf %374, %375 : vector<4x512xf32>
    %377 = vector.broadcast %25 : vector<1x512xf32> to vector<4x512xf32>
    %378 = arith.mulf %376, %377 : vector<4x512xf32>
    %379 = arith.truncf %378 : vector<4x512xf32> to vector<4x512xbf16>
    %c0_390 = arith.constant 0 : index
    %c128_391 = arith.constant 128 : index
    %380 = vector.load %arg9[%c0_390, %c128_391] : memref<4x768xbf16, #tpu.memory_space<vmem>>, vector<4x512xbf16>
    tpu.vector_store %arg9[%c0_390, %c128_391], %379 {strides = array<i32>} : memref<4x768xbf16, #tpu.memory_space<vmem>>, vector<4x512xbf16>,
    %c5 = arith.constant 5 : index
    %c0_392 = arith.constant 0 : index
    %c0_393 = arith.constant 0 : index
    %381 = vector.load %arg4[%c5, %c0_392, %c0_393] : memref<6x8x72xbf16, #tpu.memory_space<vmem>>, vector<1x8x4xbf16>
    %382 = vector.shape_cast %381 : vector<1x8x4xbf16> to vector<8x4xbf16>
    %c0_394 = arith.constant 0 : index
    %c0_395 = arith.constant 0 : index
    %c107_396 = arith.constant 107 : index
    %383 = vector.load %arg8[%c0_394, %c0_395, %c107_396] : memref<2x4x768xbf16, #tpu.memory_space<vmem>>, vector<1x4x512xbf16>
    %384 = vector.shape_cast %383 : vector<1x4x512xbf16> to vector<4x512xbf16>
    %cst_397 = arith.constant dense<0.000000e+00> : vector<8x512xf32>
    %385 = tpu.matmul %382, %384, %cst_397 {dimension_numbers = #tpu.dot_dimension_numbers<[1], [0], [0], [1], [0, 0, 1, 1], [], []>} : vector<8x4xbf16>, vector<4x512xbf16>, vector<8x512xf32> -> vector<8x512xf32>
    %c5_398 = arith.constant 5 : index
    %c0_399 = arith.constant 0 : index
    %c4_400 = arith.constant 4 : index
    %386 = vector.load %arg4[%c5_398, %c0_399, %c4_400] : memref<6x8x72xbf16, #tpu.memory_space<vmem>>, vector<1x8x4xbf16>
    %387 = vector.shape_cast %386 : vector<1x8x4xbf16> to vector<8x4xbf16>
    %c0_401 = arith.constant 0 : index
    %c107_402 = arith.constant 107 : index
    %388 = vector.load %arg9[%c0_401, %c107_402] : memref<4x768xbf16, #tpu.memory_space<vmem>>, vector<4x512xbf16>
    %cst_403 = arith.constant dense<0.000000e+00> : vector<8x512xf32>
    %389 = tpu.matmul %387, %388, %cst_403 {dimension_numbers = #tpu.dot_dimension_numbers<[1], [0], [0], [1], [0, 0, 1, 1], [], []>} : vector<8x4xbf16>, vector<4x512xbf16>, vector<8x512xf32> -> vector<8x512xf32>
    %390 = arith.addf %385, %389 : vector<8x512xf32>
    %c5_404 = arith.constant 5 : index
    %c0_405 = arith.constant 0 : index
    %c8_406 = arith.constant 8 : index
    %391 = vector.load %arg4[%c5_404, %c0_405, %c8_406] : memref<6x8x72xbf16, #tpu.memory_space<vmem>>, vector<1x8x4xbf16>
    %392 = vector.shape_cast %391 : vector<1x8x4xbf16> to vector<8x4xbf16>
    %c0_407 = arith.constant 0 : index
    %c0_408 = arith.constant 0 : index
    %c108_409 = arith.constant 108 : index
    %393 = vector.load %arg8[%c0_407, %c0_408, %c108_409] : memref<2x4x768xbf16, #tpu.memory_space<vmem>>, vector<1x4x512xbf16>
    %394 = vector.shape_cast %393 : vector<1x4x512xbf16> to vector<4x512xbf16>
    %cst_410 = arith.constant dense<0.000000e+00> : vector<8x512xf32>
    %395 = tpu.matmul %392, %394, %cst_410 {dimension_numbers = #tpu.dot_dimension_numbers<[1], [0], [0], [1], [0, 0, 1, 1], [], []>} : vector<8x4xbf16>, vector<4x512xbf16>, vector<8x512xf32> -> vector<8x512xf32>
    %396 = arith.addf %390, %395 : vector<8x512xf32>
    %c5_411 = arith.constant 5 : index
    %c0_412 = arith.constant 0 : index
    %c12_413 = arith.constant 12 : index
    %397 = vector.load %arg4[%c5_411, %c0_412, %c12_413] : memref<6x8x72xbf16, #tpu.memory_space<vmem>>, vector<1x8x4xbf16>
    %398 = vector.shape_cast %397 : vector<1x8x4xbf16> to vector<8x4xbf16>
    %c0_414 = arith.constant 0 : index
    %c108_415 = arith.constant 108 : index
    %399 = vector.load %arg9[%c0_414, %c108_415] : memref<4x768xbf16, #tpu.memory_space<vmem>>, vector<4x512xbf16>
    %cst_416 = arith.constant dense<0.000000e+00> : vector<8x512xf32>
    %400 = tpu.matmul %398, %399, %cst_416 {dimension_numbers = #tpu.dot_dimension_numbers<[1], [0], [0], [1], [0, 0, 1, 1], [], []>} : vector<8x4xbf16>, vector<4x512xbf16>, vector<8x512xf32> -> vector<8x512xf32>
    %401 = arith.addf %396, %400 : vector<8x512xf32>
    %c5_417 = arith.constant 5 : index
    %c0_418 = arith.constant 0 : index
    %c16_419 = arith.constant 16 : index
    %402 = vector.load %arg4[%c5_417, %c0_418, %c16_419] : memref<6x8x72xbf16, #tpu.memory_space<vmem>>, vector<1x8x4xbf16>
    %403 = vector.shape_cast %402 : vector<1x8x4xbf16> to vector<8x4xbf16>
    %c0_420 = arith.constant 0 : index
    %c0_421 = arith.constant 0 : index
    %c109_422 = arith.constant 109 : index
    %404 = vector.load %arg8[%c0_420, %c0_421, %c109_422] : memref<2x4x768xbf16, #tpu.memory_space<vmem>>, vector<1x4x512xbf16>
    %405 = vector.shape_cast %404 : vector<1x4x512xbf16> to vector<4x512xbf16>
    %cst_423 = arith.constant dense<0.000000e+00> : vector<8x512xf32>
    %406 = tpu.matmul %403, %405, %cst_423 {dimension_numbers = #tpu.dot_dimension_numbers<[1], [0], [0], [1], [0, 0, 1, 1], [], []>} : vector<8x4xbf16>, vector<4x512xbf16>, vector<8x512xf32> -> vector<8x512xf32>
    %407 = arith.addf %401, %406 : vector<8x512xf32>
    %c5_424 = arith.constant 5 : index
    %c0_425 = arith.constant 0 : index
    %c20_426 = arith.constant 20 : index
    %408 = vector.load %arg4[%c5_424, %c0_425, %c20_426] : memref<6x8x72xbf16, #tpu.memory_space<vmem>>, vector<1x8x4xbf16>
    %409 = vector.shape_cast %408 : vector<1x8x4xbf16> to vector<8x4xbf16>
    %c0_427 = arith.constant 0 : index
    %c109_428 = arith.constant 109 : index
    %410 = vector.load %arg9[%c0_427, %c109_428] : memref<4x768xbf16, #tpu.memory_space<vmem>>, vector<4x512xbf16>
    %cst_429 = arith.constant dense<0.000000e+00> : vector<8x512xf32>
    %411 = tpu.matmul %409, %410, %cst_429 {dimension_numbers = #tpu.dot_dimension_numbers<[1], [0], [0], [1], [0, 0, 1, 1], [], []>} : vector<8x4xbf16>, vector<4x512xbf16>, vector<8x512xf32> -> vector<8x512xf32>
    %412 = arith.addf %407, %411 : vector<8x512xf32>
    %c5_430 = arith.constant 5 : index
    %c0_431 = arith.constant 0 : index
    %c24_432 = arith.constant 24 : index
    %413 = vector.load %arg4[%c5_430, %c0_431, %c24_432] : memref<6x8x72xbf16, #tpu.memory_space<vmem>>, vector<1x8x4xbf16>
    %414 = vector.shape_cast %413 : vector<1x8x4xbf16> to vector<8x4xbf16>
    %c0_433 = arith.constant 0 : index
    %c0_434 = arith.constant 0 : index
    %c127_435 = arith.constant 127 : index
    %415 = vector.load %arg8[%c0_433, %c0_434, %c127_435] : memref<2x4x768xbf16, #tpu.memory_space<vmem>>, vector<1x4x512xbf16>
    %416 = vector.shape_cast %415 : vector<1x4x512xbf16> to vector<4x512xbf16>
    %cst_436 = arith.constant dense<0.000000e+00> : vector<8x512xf32>
    %417 = tpu.matmul %414, %416, %cst_436 {dimension_numbers = #tpu.dot_dimension_numbers<[1], [0], [0], [1], [0, 0, 1, 1], [], []>} : vector<8x4xbf16>, vector<4x512xbf16>, vector<8x512xf32> -> vector<8x512xf32>
    %418 = arith.addf %412, %417 : vector<8x512xf32>
    %c5_437 = arith.constant 5 : index
    %c0_438 = arith.constant 0 : index
    %c28_439 = arith.constant 28 : index
    %419 = vector.load %arg4[%c5_437, %c0_438, %c28_439] : memref<6x8x72xbf16, #tpu.memory_space<vmem>>, vector<1x8x4xbf16>
    %420 = vector.shape_cast %419 : vector<1x8x4xbf16> to vector<8x4xbf16>
    %c0_440 = arith.constant 0 : index
    %c127_441 = arith.constant 127 : index
    %421 = vector.load %arg9[%c0_440, %c127_441] : memref<4x768xbf16, #tpu.memory_space<vmem>>, vector<4x512xbf16>
    %cst_442 = arith.constant dense<0.000000e+00> : vector<8x512xf32>
    %422 = tpu.matmul %420, %421, %cst_442 {dimension_numbers = #tpu.dot_dimension_numbers<[1], [0], [0], [1], [0, 0, 1, 1], [], []>} : vector<8x4xbf16>, vector<4x512xbf16>, vector<8x512xf32> -> vector<8x512xf32>
    %423 = arith.addf %418, %422 : vector<8x512xf32>
    %c5_443 = arith.constant 5 : index
    %c0_444 = arith.constant 0 : index
    %c32_445 = arith.constant 32 : index
    %424 = vector.load %arg4[%c5_443, %c0_444, %c32_445] : memref<6x8x72xbf16, #tpu.memory_space<vmem>>, vector<1x8x4xbf16>
    %425 = vector.shape_cast %424 : vector<1x8x4xbf16> to vector<8x4xbf16>
    %c0_446 = arith.constant 0 : index
    %c0_447 = arith.constant 0 : index
    %c128_448 = arith.constant 128 : index
    %426 = vector.load %arg8[%c0_446, %c0_447, %c128_448] : memref<2x4x768xbf16, #tpu.memory_space<vmem>>, vector<1x4x512xbf16>
    %427 = vector.shape_cast %426 : vector<1x4x512xbf16> to vector<4x512xbf16>
    %cst_449 = arith.constant dense<0.000000e+00> : vector<8x512xf32>
    %428 = tpu.matmul %425, %427, %cst_449 {dimension_numbers = #tpu.dot_dimension_numbers<[1], [0], [0], [1], [0, 0, 1, 1], [], []>} : vector<8x4xbf16>, vector<4x512xbf16>, vector<8x512xf32> -> vector<8x512xf32>
    %429 = arith.addf %423, %428 : vector<8x512xf32>
    %c5_450 = arith.constant 5 : index
    %c0_451 = arith.constant 0 : index
    %c36_452 = arith.constant 36 : index
    %430 = vector.load %arg4[%c5_450, %c0_451, %c36_452] : memref<6x8x72xbf16, #tpu.memory_space<vmem>>, vector<1x8x4xbf16>
    %431 = vector.shape_cast %430 : vector<1x8x4xbf16> to vector<8x4xbf16>
    %c0_453 = arith.constant 0 : index
    %c128_454 = arith.constant 128 : index
    %432 = vector.load %arg9[%c0_453, %c128_454] : memref<4x768xbf16, #tpu.memory_space<vmem>>, vector<4x512xbf16>
    %cst_455 = arith.constant dense<0.000000e+00> : vector<8x512xf32>
    %433 = tpu.matmul %431, %432, %cst_455 {dimension_numbers = #tpu.dot_dimension_numbers<[1], [0], [0], [1], [0, 0, 1, 1], [], []>} : vector<8x4xbf16>, vector<4x512xbf16>, vector<8x512xf32> -> vector<8x512xf32>
    %434 = arith.addf %429, %433 : vector<8x512xf32>
    %c5_456 = arith.constant 5 : index
    %c0_457 = arith.constant 0 : index
    %c40_458 = arith.constant 40 : index
    %435 = vector.load %arg4[%c5_456, %c0_457, %c40_458] : memref<6x8x72xbf16, #tpu.memory_space<vmem>>, vector<1x8x4xbf16>
    %436 = vector.shape_cast %435 : vector<1x8x4xbf16> to vector<8x4xbf16>
    %c0_459 = arith.constant 0 : index
    %c0_460 = arith.constant 0 : index
    %c129_461 = arith.constant 129 : index
    %437 = vector.load %arg8[%c0_459, %c0_460, %c129_461] : memref<2x4x768xbf16, #tpu.memory_space<vmem>>, vector<1x4x512xbf16>
    %438 = vector.shape_cast %437 : vector<1x4x512xbf16> to vector<4x512xbf16>
    %cst_462 = arith.constant dense<0.000000e+00> : vector<8x512xf32>
    %439 = tpu.matmul %436, %438, %cst_462 {dimension_numbers = #tpu.dot_dimension_numbers<[1], [0], [0], [1], [0, 0, 1, 1], [], []>} : vector<8x4xbf16>, vector<4x512xbf16>, vector<8x512xf32> -> vector<8x512xf32>
    %440 = arith.addf %434, %439 : vector<8x512xf32>
    %c5_463 = arith.constant 5 : index
    %c0_464 = arith.constant 0 : index
    %c44_465 = arith.constant 44 : index
    %441 = vector.load %arg4[%c5_463, %c0_464, %c44_465] : memref<6x8x72xbf16, #tpu.memory_space<vmem>>, vector<1x8x4xbf16>
    %442 = vector.shape_cast %441 : vector<1x8x4xbf16> to vector<8x4xbf16>
    %c0_466 = arith.constant 0 : index
    %c129_467 = arith.constant 129 : index
    %443 = vector.load %arg9[%c0_466, %c129_467] : memref<4x768xbf16, #tpu.memory_space<vmem>>, vector<4x512xbf16>
    %cst_468 = arith.constant dense<0.000000e+00> : vector<8x512xf32>
    %444 = tpu.matmul %442, %443, %cst_468 {dimension_numbers = #tpu.dot_dimension_numbers<[1], [0], [0], [1], [0, 0, 1, 1], [], []>} : vector<8x4xbf16>, vector<4x512xbf16>, vector<8x512xf32> -> vector<8x512xf32>
    %445 = arith.addf %440, %444 : vector<8x512xf32>
    %c5_469 = arith.constant 5 : index
    %c0_470 = arith.constant 0 : index
    %c48_471 = arith.constant 48 : index
    %446 = vector.load %arg4[%c5_469, %c0_470, %c48_471] : memref<6x8x72xbf16, #tpu.memory_space<vmem>>, vector<1x8x4xbf16>
    %447 = vector.shape_cast %446 : vector<1x8x4xbf16> to vector<8x4xbf16>
    %c0_472 = arith.constant 0 : index
    %c0_473 = arith.constant 0 : index
    %c147_474 = arith.constant 147 : index
    %448 = vector.load %arg8[%c0_472, %c0_473, %c147_474] : memref<2x4x768xbf16, #tpu.memory_space<vmem>>, vector<1x4x512xbf16>
    %449 = vector.shape_cast %448 : vector<1x4x512xbf16> to vector<4x512xbf16>
    %cst_475 = arith.constant dense<0.000000e+00> : vector<8x512xf32>
    %450 = tpu.matmul %447, %449, %cst_475 {dimension_numbers = #tpu.dot_dimension_numbers<[1], [0], [0], [1], [0, 0, 1, 1], [], []>} : vector<8x4xbf16>, vector<4x512xbf16>, vector<8x512xf32> -> vector<8x512xf32>
    %451 = arith.addf %445, %450 : vector<8x512xf32>
    %c5_476 = arith.constant 5 : index
    %c0_477 = arith.constant 0 : index
    %c52_478 = arith.constant 52 : index
    %452 = vector.load %arg4[%c5_476, %c0_477, %c52_478] : memref<6x8x72xbf16, #tpu.memory_space<vmem>>, vector<1x8x4xbf16>
    %453 = vector.shape_cast %452 : vector<1x8x4xbf16> to vector<8x4xbf16>
    %c0_479 = arith.constant 0 : index
    %c147_480 = arith.constant 147 : index
    %454 = vector.load %arg9[%c0_479, %c147_480] : memref<4x768xbf16, #tpu.memory_space<vmem>>, vector<4x512xbf16>
    %cst_481 = arith.constant dense<0.000000e+00> : vector<8x512xf32>
    %455 = tpu.matmul %453, %454, %cst_481 {dimension_numbers = #tpu.dot_dimension_numbers<[1], [0], [0], [1], [0, 0, 1, 1], [], []>} : vector<8x4xbf16>, vector<4x512xbf16>, vector<8x512xf32> -> vector<8x512xf32>
    %456 = arith.addf %451, %455 : vector<8x512xf32>
    %c5_482 = arith.constant 5 : index
    %c0_483 = arith.constant 0 : index
    %c56_484 = arith.constant 56 : index
    %457 = vector.load %arg4[%c5_482, %c0_483, %c56_484] : memref<6x8x72xbf16, #tpu.memory_space<vmem>>, vector<1x8x4xbf16>
    %458 = vector.shape_cast %457 : vector<1x8x4xbf16> to vector<8x4xbf16>
    %c0_485 = arith.constant 0 : index
    %c0_486 = arith.constant 0 : index
    %c148_487 = arith.constant 148 : index
    %459 = vector.load %arg8[%c0_485, %c0_486, %c148_487] : memref<2x4x768xbf16, #tpu.memory_space<vmem>>, vector<1x4x512xbf16>
    %460 = vector.shape_cast %459 : vector<1x4x512xbf16> to vector<4x512xbf16>
    %cst_488 = arith.constant dense<0.000000e+00> : vector<8x512xf32>
    %461 = tpu.matmul %458, %460, %cst_488 {dimension_numbers = #tpu.dot_dimension_numbers<[1], [0], [0], [1], [0, 0, 1, 1], [], []>} : vector<8x4xbf16>, vector<4x512xbf16>, vector<8x512xf32> -> vector<8x512xf32>
    %462 = arith.addf %456, %461 : vector<8x512xf32>
    %c5_489 = arith.constant 5 : index
    %c0_490 = arith.constant 0 : index
    %c60_491 = arith.constant 60 : index
    %463 = vector.load %arg4[%c5_489, %c0_490, %c60_491] : memref<6x8x72xbf16, #tpu.memory_space<vmem>>, vector<1x8x4xbf16>
    %464 = vector.shape_cast %463 : vector<1x8x4xbf16> to vector<8x4xbf16>
    %c0_492 = arith.constant 0 : index
    %c148_493 = arith.constant 148 : index
    %465 = vector.load %arg9[%c0_492, %c148_493] : memref<4x768xbf16, #tpu.memory_space<vmem>>, vector<4x512xbf16>
    %cst_494 = arith.constant dense<0.000000e+00> : vector<8x512xf32>
    %466 = tpu.matmul %464, %465, %cst_494 {dimension_numbers = #tpu.dot_dimension_numbers<[1], [0], [0], [1], [0, 0, 1, 1], [], []>} : vector<8x4xbf16>, vector<4x512xbf16>, vector<8x512xf32> -> vector<8x512xf32>
    %467 = arith.addf %462, %466 : vector<8x512xf32>
    %c5_495 = arith.constant 5 : index
    %c0_496 = arith.constant 0 : index
    %c64_497 = arith.constant 64 : index
    %468 = vector.load %arg4[%c5_495, %c0_496, %c64_497] : memref<6x8x72xbf16, #tpu.memory_space<vmem>>, vector<1x8x4xbf16>
    %469 = vector.shape_cast %468 : vector<1x8x4xbf16> to vector<8x4xbf16>
    %c0_498 = arith.constant 0 : index
    %c0_499 = arith.constant 0 : index
    %c149_500 = arith.constant 149 : index
    %470 = vector.load %arg8[%c0_498, %c0_499, %c149_500] : memref<2x4x768xbf16, #tpu.memory_space<vmem>>, vector<1x4x512xbf16>
    %471 = vector.shape_cast %470 : vector<1x4x512xbf16> to vector<4x512xbf16>
    %cst_501 = arith.constant dense<0.000000e+00> : vector<8x512xf32>
    %472 = tpu.matmul %469, %471, %cst_501 {dimension_numbers = #tpu.dot_dimension_numbers<[1], [0], [0], [1], [0, 0, 1, 1], [], []>} : vector<8x4xbf16>, vector<4x512xbf16>, vector<8x512xf32> -> vector<8x512xf32>
    %473 = arith.addf %467, %472 : vector<8x512xf32>
    %c5_502 = arith.constant 5 : index
    %c0_503 = arith.constant 0 : index
    %c68_504 = arith.constant 68 : index
    %474 = vector.load %arg4[%c5_502, %c0_503, %c68_504] : memref<6x8x72xbf16, #tpu.memory_space<vmem>>, vector<1x8x4xbf16>
    %475 = vector.shape_cast %474 : vector<1x8x4xbf16> to vector<8x4xbf16>
    %c0_505 = arith.constant 0 : index
    %c149_506 = arith.constant 149 : index
    %476 = vector.load %arg9[%c0_505, %c149_506] : memref<4x768xbf16, #tpu.memory_space<vmem>>, vector<4x512xbf16>
    %cst_507 = arith.constant dense<0.000000e+00> : vector<8x512xf32>
    %477 = tpu.matmul %475, %476, %cst_507 {dimension_numbers = #tpu.dot_dimension_numbers<[1], [0], [0], [1], [0, 0, 1, 1], [], []>} : vector<8x4xbf16>, vector<4x512xbf16>, vector<8x512xf32> -> vector<8x512xf32>
    %478 = arith.addf %473, %477 : vector<8x512xf32>
    %c5_508 = arith.constant 5 : index
    %c0_509 = arith.constant 0 : index
    %c0_510 = arith.constant 0 : index
    %479 = vector.load %arg5[%c5_508, %c0_509, %c0_510] : memref<6x8x1xf32, #tpu.memory_space<vmem>>, vector<1x8x1xf32>
    %480 = vector.shape_cast %479 : vector<1x8x1xf32> to vector<8x1xf32>
    %481 = vector.broadcast %480 : vector<8x1xf32> to vector<8x512xf32>
    %482 = arith.addf %478, %481 : vector<8x512xf32>
    %cst_511 = arith.constant 0.000000e+00 : f32
    %483 = vector.broadcast %cst_511 : f32 to vector<8x512xf32>
    %484 = arith.maximumf %482, %483 : vector<8x512xf32>
    %485 = vector.broadcast %25 : vector<1x512xf32> to vector<8x512xf32>
    %486 = arith.mulf %484, %485 : vector<8x512xf32>
    %c0_512 = arith.constant 0 : index
    %c128_513 = arith.constant 128 : index
    %487 = vector.load %arg7[%c0_512, %c128_513] : memref<8x768xbf16, #tpu.memory_space<vmem>>, vector<8x512xbf16>
    %488 = arith.extf %487 : vector<8x512xbf16> to vector<8x512xf32>
    %489 = arith.addf %486, %488 : vector<8x512xf32>
    %c0_514 = arith.constant 0 : index
    %c0_515 = arith.constant 0 : index
    %c0_516 = arith.constant 0 : index
    %c0_517 = arith.constant 0 : index
    %490 = vector.load %arg6[%c0_514, %c0_515, %c0_516, %c0_517] : memref<1x1x8x512xf32, #tpu.memory_space<vmem>>, vector<1x1x8x512xf32>
    %491 = vector.shape_cast %490 : vector<1x1x8x512xf32> to vector<8x512xf32>
    %492 = vector.shape_cast %489 : vector<8x512xf32> to vector<1x1x8x512xf32>
    tpu.vector_store %arg6[%c0_514, %c0_515, %c0_516, %c0_517], %492 {strides = array<i32>} : memref<1x1x8x512xf32, #tpu.memory_space<vmem>>, vector<1x1x8x512xf32>,
    return
  }
  func.func @transform_0(%arg0: i32, %arg1: i32) -> (i32, i32, i32, i32) {
    %c0_i32 = arith.constant 0 : i32
    %c0_i32_0 = arith.constant 0 : i32
    %c0_i32_1 = arith.constant 0 : i32
    return %arg0, %arg1, %c0_i32, %c0_i32_0 : i32, i32, i32, i32
  }
  func.func @transform_1(%arg0: i32, %arg1: i32) -> (i32, i32, i32) {
    %c0_i32 = arith.constant 0 : i32
    %c0_i32_0 = arith.constant 0 : i32
    %c0_i32_1 = arith.constant 0 : i32
    return %arg1, %c0_i32, %c0_i32_0 : i32, i32, i32
  }
  func.func @transform_2(%arg0: i32, %arg1: i32) -> (i32, i32, i32) {
    %c0_i32 = arith.constant 0 : i32
    %c0_i32_0 = arith.constant 0 : i32
    %c0_i32_1 = arith.constant 0 : i32
    %c0_i32_2 = arith.constant 0 : i32
    return %c0_i32, %c0_i32_0, %c0_i32_1 : i32, i32, i32
  }
  func.func @transform_3(%arg0: i32, %arg1: i32) -> (i32, i32, i32) {
    %c0_i32 = arith.constant 0 : i32
    %c0_i32_0 = arith.constant 0 : i32
    %c0_i32_1 = arith.constant 0 : i32
    %c0_i32_2 = arith.constant 0 : i32
    return %c0_i32, %c0_i32_0, %c0_i32_1 : i32, i32, i32
  }
  func.func @transform_4(%arg0: i32, %arg1: i32) -> (i32, i32, i32, i32) {
    %c0_i32 = arith.constant 0 : i32
    %c0_i32_0 = arith.constant 0 : i32
    %c0_i32_1 = arith.constant 0 : i32
    return %arg0, %arg1, %c0_i32, %c0_i32_0 : i32, i32, i32, i32
  }
}

</mosaic_0001>

<bundles_post_ra>
// kernel: rsu_forward.1
= control target key start
LH: loop header
LB: loop body
LE: loop exit
PB: predicated region body
PF: predicated region fallthrough
CT: control target
= control target key end

     0   :  { %s8464_s15 = smov 0   ;;  %s8466_s16 = smov 0   ;;  %s10614_s0 = inlined_call_operand.vmem [shape: bf16[2,3,4,768], index: 0, kind: input, shape index: {}]   ;;  %s10615_s1 = inlined_call_operand.vmem [shape: f32[3,1,512], index: 1, kind: input, shape index: {}]   ;;  %s10616_s2 = inlined_call_operand.vmem [shape: bf16[6,8,72], index: 2, kind: input, shape index: {}]   ;;  %s10617_s3 = inlined_call_operand.vmem [shape: f32[6,8,1], index: 3, kind: input, shape index: {}]   ;;  %s10618_s4 = inlined_call_operand.vmem [shape: f32[2,3,8,512], index: 4, kind: output, shape index: {}]  }
   0x1   :  { %s8468_s17 = smov 0   ;;  %s8470_s18 = smov 0  }
   0x2   :  { %s8472_s19 = smov 0  }
   0x3 LB: > { %s23_s20 = sadd.s32 1, %s8397_s17  ;;  %s26_s21 = sadd.s32 1, %s8401_s18  ;;  %s8405_s19 = sphi %s8472_s19, %s14_s19   ;;  %s8401_s18 = sphi %s8470_s18, %s10657_s18   ;;  %s8397_s17 = sphi %s8468_s17, %s10656_s17   ;;  %s8393_s16 = sphi %s8466_s16, %s10655_s16   ;;  %s8389_s15 = sphi %s8464_s15, %s10654_s15  }
   0x4   : > { %p24_p0 = scmp.ge.s32.totalorder %s23_s20, 3  ;;  %p7936_p1 = scmp.ge.s32.totalorder %s8405_s19, 1 }
   0x5   : > { %p191_p2 = scmp.lt.s32.totalorder %s8405_s19, 7 }
   0x6   : > { %s10659_s20 = smov (%p24_p0, %s23_s20), 0  ;;  %s10661_s21 = smov (!%p24_p0, %s26_s21), %s8401_s18 }
   0x7   : > { %p192_p3 = pnand %p7936_p1, %p191_p2  ;;  %p28_p4 = scmp.ge.s32.totalorder %s10661_s21, 2 }
   0x8   : > { %p229_p5 = scmp.lt.s32.totalorder (!%p192_p3), %s8393_s16, 1  ;;  %p231_p6 = scmp.lt.s32.totalorder (!%p192_p3), %s8389_s15, 2 }
   0x9   : > { %s10663_s21 = smov (%p28_p4, %s10661_s21), 0  ;;  %195 = sbr.rel (%p192_p3) target bundleno = 2794 (0xaea), region = 36 }
   0xa   : > { %s10626_s5 = smov (!%p192_p3), 20   ;;  %s8408_s6 = smov (!%p192_p3), 124  }
   0xb   : > { %s8409_s7 = smov (!%p192_p3), 21   ;;  %s8410_s8 = smov (!%p192_p3), 19  }
   0xc   : > { %s8411_s11 = smov (!%p192_p3), 120   ;;  %s8412_s14 = smov (!%p192_p3), 1  }
   0xd   : > { %s10636_s29 = smov (!%p192_p3), 127   ;;  %s8416_s30 = smov (!%p192_p3), 108  }
   0xe   : > { %s10665_s16 = smov (!%p229_p5, %s8393_s16), 1  ;;  %s10667_s15 = smov (!%p231_p6, %s8389_s15), 2  ;;  %v8510_v2 = vld [vmem:[%s10616_s2] sm:$0xf]  ;;  %vm295_vm0 = vcmask 162816   ;;  %vm304_vm1 = vcmask 1041408  }
   0xf   : > { %s8288_s22 = smul.u32 18, %s10665_s16  ;;  %v266_v6 = vunpack.c.l.b16 %v8510_v2  ;;  %v464_v22 = vld [vmem:[%s10616_s2] sm:$0xf]  ;;  %s10630_s12 = smov 109   ;;  %vm300_vm2 = vcmask 31744   ;;  %vm392_vm3 = vcmask 171008  }
  0x10   : > { %s8287_s23 = smul.u32 6, %s10667_s15  ;;  %v468_v24 = vunpack.c.l.b16 %v464_v22  ;;  %v573_v30 = vld [vmem:[%s10616_s2] sm:$0xf]  ;;  %s8418_s13 = smov 104   ;;  %vm497_vm4 = vcmask 154624   ;;  %vm606_vm5 = vcmask 7168  }
  0x11   : > { %v267_v9 = vpack.c.b16 %v266_v6, %v266_v6  ;;  %v577_v35 = vunpack.c.l.b16 %v573_v30  ;;  %v682_v38 = vld [vmem:[%s10616_s2] sm:$0xf]  ;;  %s8419_s26 = smov 100   ;;  %s10628_s10 = smov 107   ;;  %vm795_vm6 = vcmask 1039360   ;;  %vm904_vm7 = vcmask 891904  }
  0x12   : > { %s235_s24 = sadd.s32 %s8288_s22, %s8287_s23  ;;  %v469_v28 = vpack.c.b16 %v468_v24, %v468_v24  ;;  %v685_v44 = vunpack.c.l.b16 %v682_v38  ;;  %v762_v51 = vld [vmem:[%s10616_s2] sm:$0xf]  ;;  %vm1013_vm8 = vcmask 883712   ;;  %vm1122_vm9 = vcmask 875520   ;;  %s10619_s27 = sshll.u32 %s10667_s15, 2 }
  0x13   : > { %s7937_s25 = sshll.u32 %s235_s24, 1  ;;  %v578_v37 = vpack.c.b16 %v577_v35, %v577_v35  ;;  %s8413_s24 = smov 116   ;;  %v766_v52 = vunpack.c.l.b16 %v762_v51  ;;  %v871_v55 = vld [vmem:[%s10616_s2] sm:$0xf]  ;;  %vm1270_vm10 = vcmask 1043456   ;;  %vm1266_vm11 = vcmask 64512  }
  0x14   : > { %s8503_s28 = scalar_lea.vmem %s10614_s0, %s7937_s25  ;;  %v686_v45 = vpack.c.b16 %v685_v44, %v685_v44  ;;  %s8414_s25 = smov 112   ;;  %v875_v56 = vunpack.c.l.b16 %v871_v55  ;;  %vm2068_vm12 = vcmask 1045508   ;;  %vm3071_vm13 = vcmask 326656  }
  0x15   : > { %v264_v0 = vld [vmem:[%s8503_s28 + $0x8] sm:$0x3]  ;;  %v465_v1 = vld [vmem:[%s8503_s28] sm:$0xff]  ;;  %v764_v43 = vld [vmem:[%s8503_s28 + $0xa] sm:$0x3]  ;;  %v767_v53 = vpack.c.b16 %v766_v52, %v766_v52  ;;  %s241_s23 = scalar_lea.vmem %s10615_s1, %s10619_s27  ;;  %s10624_s9 = smov 80  }
  0x16   : > { %274 = vst [vmem:[#allocation1 + $0x20] ss:$4 sm:$0xff] %v264_v0  ;;  %v466_v10 = vld [vmem:[%s8503_s28 + $0x8] sm:$0x3]  ;;  %v873_v54 = vld [vmem:[%s8503_s28 + $0xa] sm:$0x3]  ;;  %v876_v58 = vpack.c.b16 %v875_v56, %v875_v56 }
  0x17   : > { %271 = vst [vmem:[#allocation1] ss:$4 sm:$0xff] %v465_v1  ;;  %v575_v16 = vld [vmem:[%s8503_s28 + $0x8] sm:$0x3]  ;;  %s10622_s22 = smov 72   ;;  %s10620_s27 = smov 64  }
  0x18   : > { %v8531_v23 = vld [vmem:[%s8503_s28 + $0x2] sm:$0xff]  ;;  %vm3166_vm14 = vcmask 343040   ;;  %vm3271_vm15 = vcmask 310272  }
  0x1d   : > { %v283_v3 = vld.sshfl [vmem:[#allocation1 + $0x20] sm:$0xff pattern:$0x73625140] }
  0x1e   : > { %293 = vrot.lane.b32.xlu1 %v283_v3, %s10626_s5  ;;  %v275_v4 = vld.sshfl [vmem:[#allocation1] sm:$0xff pattern:$0x73625140]  ;;  %v277_v5 = vld.sshfl [vmem:[#allocation1 + $0x8] sm:$0xff pattern:$0x73625140] }
  0x1f   : > { %v279_v7 = vld.sshfl [vmem:[#allocation1 + $0x10] sm:$0xff pattern:$0x73625140]  ;;  %v281_v8 = vld.sshfl [vmem:[#allocation1 + $0x18] sm:$0xff pattern:$0x73625140]  ;;  %285 = vrot.lane.b32.xlu2 %v275_v4, %s10626_s5 }
  0x20   : > { %369 = vst [vmem:[#allocation1] ss:$4 sm:$0xff] %v465_v1  ;;  %289 = vrot.lane.b32.xlu0 %v279_v7, %s10626_s5 }
  0x21   : > { %371 = vst [vmem:[#allocation1 + $0x20] ss:$4 sm:$0xff] %v264_v0  ;;  %v982_v0 = vld [vmem:[%s8503_s28 + $0xa] sm:$0x3] }
  0x26   : > { %268 = vrot.lane.b32.xlu1 %v267_v9, %s8408_s6 }
  0x27   : > { %v372_v11 = vld.sshfl [vmem:[#allocation1] sm:$0xff pattern:$0x73625140]  ;;  %v374_v12 = vld.sshfl [vmem:[#allocation1 + $0x8] sm:$0xff pattern:$0x73625140]  ;;  %287 = vrot.lane.b32.xlu2 %v277_v5, %s10626_s5 }
  0x28   : > { %v376_v13 = vld.sshfl [vmem:[#allocation1 + $0x10] sm:$0xff pattern:$0x73625140]  ;;  %v378_v14 = vld.sshfl [vmem:[#allocation1 + $0x18] sm:$0xff pattern:$0x73625140]  ;;  %291 = vrot.lane.b32.xlu0 %v281_v8, %s10626_s5 }
  0x29   : > { %473 = vst [vmem:[#allocation1] ss:$4 sm:$0xff] %v465_v1  ;;  %v380_v15 = vld.sshfl [vmem:[#allocation1 + $0x20] sm:$0xff pattern:$0x73625140] }
  0x2a   : > { %476 = vst [vmem:[#allocation1 + $0x20] ss:$4 sm:$0xff] %v466_v10 }
  0x2e   : > { %388 = vrot.lane.b32.xlu1 %v378_v14, %s8409_s7 }
  0x2f   : > { %390 = vrot.lane.b32.xlu2 %v380_v15, %s8409_s7 }
  0x30   : > { %v481_v17 = vld.sshfl [vmem:[#allocation1 + $0x10] sm:$0xff pattern:$0x73625140]  ;;  %386 = vrot.lane.b32.xlu0 %v376_v13, %s8409_s7  ;;  %v483_v18 = vld.sshfl [vmem:[#allocation1 + $0x18] sm:$0xff pattern:$0x73625140] }
  0x31   : > { %v485_v19 = vld.sshfl [vmem:[#allocation1 + $0x20] sm:$0xff pattern:$0x73625140]  ;;  %v479_v20 = vld.sshfl [vmem:[#allocation1 + $0x8] sm:$0xff pattern:$0x73625140] }
  0x32   : > { %v477_v21 = vld.sshfl [vmem:[#allocation1] sm:$0xff pattern:$0x73625140]  ;;  %585 = vst [vmem:[#allocation1 + $0x20] ss:$4 sm:$0xff] %v575_v16 }
  0x33   : > { %582 = vst [vmem:[#allocation1] ss:$4 sm:$0xff] %v465_v1  ;;  %v980_v1 = vld [vmem:[%s10616_s2] sm:$0xf]  ;;  %v1091_v13 = vld [vmem:[%s8503_s28 + $0xa] sm:$0x3] }
  0x34   : > { %v984_v3 = vunpack.c.l.b16 %v980_v1  ;;  %s10639_s28 = smov 96  }
  0x36   : > { %384 = vrot.lane.b32.xlu1 %v374_v12, %s8409_s7  ;;  %v985_v7 = vpack.c.b16 %v984_v3, %v984_v3  ;;  %v1089_v12 = vld [vmem:[%s10616_s2] sm:$0xf] }
  0x37   : > { %491 = vrot.lane.b32.xlu2 %v481_v17, %s8410_s8  ;;  %v1093_v15 = vunpack.c.l.b16 %v1089_v12 }
  0x38   : > { %382 = vrot.lane.b32.xlu0 %v372_v11, %s8409_s7 }
  0x39   : > { %v594_v36 = vld.sshfl [vmem:[#allocation1 + $0x20] sm:$0xff pattern:$0x73625140] }
  0x3a   : > { %v592_v25 = vld.sshfl [vmem:[#allocation1 + $0x18] sm:$0xff pattern:$0x73625140]  ;;  %v588_v26 = vld.sshfl [vmem:[#allocation1 + $0x8] sm:$0xff pattern:$0x73625140] }
  0x3b   : > { %v586_v27 = vld.sshfl [vmem:[#allocation1] sm:$0xff pattern:$0x73625140]  ;;  %v590_v29 = vld.sshfl [vmem:[#allocation1 + $0x10] sm:$0xff pattern:$0x73625140] }
  0x3c   : > { %690 = vst [vmem:[#allocation1] ss:$4 sm:$0xff] %v8531_v23 }
  0x3d   : > { %774 = vst [vmem:[#allocation1 + $0x20] ss:$4 sm:$0xff] %v764_v43 }
  0x3e   : > { %495 = vrot.lane.b32.xlu1 %v485_v19, %s8410_s8 }
  0x3f   : > { %470 = vrot.lane.b32.xlu2 %v469_v28, %s8411_s11 }
  0x40   : > { %493 = vrot.lane.b32.xlu0 %v483_v18, %s8410_s8 }
  0x43   : > { %v8540_v31 = vld.sshfl [vmem:[#allocation1] sm:$0xff pattern:$0x73625140]  ;;  %v8542_v32 = vld.sshfl [vmem:[#allocation1 + $0x8] sm:$0xff pattern:$0x73625140] }
  0x44   : > { %v8544_v33 = vld.sshfl [vmem:[#allocation1 + $0x10] sm:$0xff pattern:$0x73625140]  ;;  %v8546_v34 = vld.sshfl [vmem:[#allocation1 + $0x18] sm:$0xff pattern:$0x73625140] }
  0x45   : > { %771 = vst [vmem:[#allocation1] ss:$4 sm:$0xff] %v8531_v23  ;;  %v783_v50 = vld.sshfl [vmem:[#allocation1 + $0x20] sm:$0xff pattern:$0x73625140]  ;;  %v702_v3 = vsel %vm304_vm1, %v8544_v33, 0 }
  0x46   : > { %489 = vrot.lane.b32.xlu1 %v479_v20, %s8410_s8  ;;  %883 = vst [vmem:[#allocation1 + $0x20] ss:$4 sm:$0xff] %v873_v54  ;;  %v698_v12 = vsel %vm304_vm1, %v8540_v31, 0 }
  0x47   : > { %600 = vrot.lane.b32.xlu2 %v590_v29, %s8412_s14 }
  0x48   : > { %487 = vrot.lane.b32.xlu0 %v477_v21, %s8410_s8  ;;  %v1094_v21 = vpack.c.b16 %v1093_v15, %v1093_v15 }
  0x4c   : > { %v781_v39 = vld.sshfl [vmem:[#allocation1 + $0x18] sm:$0xff pattern:$0x73625140]  ;;  %v777_v40 = vld.sshfl [vmem:[#allocation1 + $0x8] sm:$0xff pattern:$0x73625140] }
  0x4d   : > { %v779_v41 = vld.sshfl [vmem:[#allocation1 + $0x10] sm:$0xff pattern:$0x73625140]  ;;  %v775_v42 = vld.sshfl [vmem:[#allocation1] sm:$0xff pattern:$0x73625140] }
  0x4e   : > { %604 = vrot.lane.b32.xlu1 %v594_v36, %s8412_s14  ;;  %880 = vst [vmem:[#allocation1] ss:$4 sm:$0xff] %v8531_v23  ;;  %v892_v60 = vld.sshfl [vmem:[#allocation1 + $0x20] sm:$0xff pattern:$0x73625140] }
  0x4f   : > { %579 = vrot.lane.b32.xlu2 %v578_v37, %s8413_s24  ;;  %992 = vst [vmem:[#allocation1 + $0x20] ss:$4 sm:$0xff] %v982_v0 }
  0x50   : > { %602 = vrot.lane.b32.xlu0 %v592_v25, %s8412_s14 }
  0x55   : > { %v886_v46 = vld.sshfl [vmem:[#allocation1 + $0x8] sm:$0xff pattern:$0x73625140]  ;;  %v890_v47 = vld.sshfl [vmem:[#allocation1 + $0x18] sm:$0xff pattern:$0x73625140] }
  0x56   : > { %598 = vrot.lane.b32.xlu1 %v588_v26, %s8412_s14  ;;  %v888_v48 = vld.sshfl [vmem:[#allocation1 + $0x10] sm:$0xff pattern:$0x73625140]  ;;  %v884_v49 = vld.sshfl [vmem:[#allocation1] sm:$0xff pattern:$0x73625140] }
  0x57   : > { %687 = vrot.lane.b32.xlu2 %v686_v45, %s8414_s25  ;;  %989 = vst [vmem:[#allocation1] ss:$4 sm:$0xff] %v8531_v23  ;;  %v1001_v8 = vld.sshfl [vmem:[#allocation1 + $0x20] sm:$0xff pattern:$0x73625140] }
  0x58   : > { %596 = vrot.lane.b32.xlu0 %v586_v27, %s8412_s14  ;;  %1101 = vst [vmem:[#allocation1 + $0x20] ss:$4 sm:$0xff] %v1091_v13 }
  0x5e   : > { %791 = vrot.lane.b32.xlu1 %v781_v39, %s10636_s29  ;;  %v995_v57 = vld.sshfl [vmem:[#allocation1 + $0x8] sm:$0xff pattern:$0x73625140]  ;;  %v999_v59 = vld.sshfl [vmem:[#allocation1 + $0x18] sm:$0xff pattern:$0x73625140] }
  0x5f   : > { %793 = vrot.lane.b32.xlu2 %v783_v50, %s10636_s29  ;;  %v997_v61 = vld.sshfl [vmem:[#allocation1 + $0x10] sm:$0xff pattern:$0x73625140]  ;;  %v993_v62 = vld.sshfl [vmem:[#allocation1] sm:$0xff pattern:$0x73625140] }
  0x60   : > { %789 = vrot.lane.b32.xlu0 %v779_v41, %s10636_s29  ;;  %1098 = vst [vmem:[#allocation1] ss:$4 sm:$0xff] %v8531_v23  ;;  %v1110_v22 = vld.sshfl [vmem:[#allocation1 + $0x20] sm:$0xff pattern:$0x73625140] }
  0x66   : > { %785 = vrot.lane.b32.xlu1 %v775_v42, %s10636_s29 }
  0x67   : > { %787 = vrot.lane.b32.xlu2 %v777_v40, %s10636_s29  ;;  %v1108_v9 = vld.sshfl [vmem:[#allocation1 + $0x18] sm:$0xff pattern:$0x73625140]  ;;  %v1106_v11 = vld.sshfl [vmem:[#allocation1 + $0x10] sm:$0xff pattern:$0x73625140] }
  0x68   : > { %768 = vrot.lane.b32.xlu0 %v767_v53, %s8416_s30  ;;  %v1102_v18 = vld.sshfl [vmem:[#allocation1] sm:$0xff pattern:$0x73625140]  ;;  %v1104_v29 = vld.sshfl [vmem:[#allocation1 + $0x8] sm:$0xff pattern:$0x73625140] }
  0x6e   : > { %900 = vrot.lane.b32.xlu1 %v890_v47, %s10630_s12 }
  0x6f   : > { %902 = vrot.lane.b32.xlu2 %v892_v60, %s10630_s12 }
  0x70   : > { %898 = vrot.lane.b32.xlu0 %v888_v48, %s10630_s12 }
  0x76   : > { %894 = vrot.lane.b32.xlu1 %v884_v49, %s10630_s12 }
  0x77   : > { %896 = vrot.lane.b32.xlu2 %v886_v46, %s10630_s12 }
  0x78   : > { %877 = vrot.lane.b32.xlu0 %v876_v58, %s8418_s13 }
  0x79   : > { %v286_v63 = vpop.permute.xlu2 %285 }
  0x7e   : > { %1009 = vrot.lane.b32.xlu1 %v999_v59, %s8416_s30 }
  0x7f   : > { %1011 = vrot.lane.b32.xlu2 %v1001_v8, %s8416_s30 }
  0x80   : > { %1007 = vrot.lane.b32.xlu0 %v997_v61, %s8416_s30 }
  0x81   : > { %v288_v4 = vpop.permute.xlu2 %287 }
  0x82   : > { %v296_v5 = vsel %vm295_vm0, %v286_v63, %v288_v4 }
  0x83   : > { %v306_v6 = vsel %vm304_vm1, %v296_v5, 0 }
  0x84   : > { %324 = vmatpush.bf16.msra.mxu0 %v306_v6 }
  0x86   : > { %1003 = vrot.lane.b32.xlu1 %v993_v62, %s8416_s30 }
  0x87   : > { %1005 = vrot.lane.b32.xlu2 %v995_v57, %s8416_s30 }
  0x88   : > { %986 = vrot.lane.b32.xlu0 %v985_v7, %s8419_s26 }
  0x89   : > { %v391_v10 = vpop.permute.xlu2 %390 }
  0x8e   : > { %1118 = vrot.lane.b32.xlu1 %v1108_v9, %s10628_s10 }
  0x8f   : > { %1120 = vrot.lane.b32.xlu2 %v1110_v22, %s10628_s10 }
  0x90   : > { %v294_v14 = vpop.permute.xlu1 %293  ;;  %1116 = vrot.lane.b32.xlu0 %v1106_v11, %s10628_s10 }
  0x91   : > { %v492_v19 = vpop.permute.xlu2 %491 }
  0x92   : > { %v290_v16 = vpop.permute.xlu0 %289 }
  0x93   : > { %v297_v17 = vsel %vm295_vm0, %v288_v4, %v290_v16  ;;  %v704_v4 = vsel %vm304_vm1, %v8546_v34, 0 }
  0x94   : > { %v309_v20 = vsel %vm304_vm1, %v297_v17, 0 }
  0x95   : > { %337 = vmatpush.bf16.msra.mxu1 %v309_v20 }
  0x96   : > { %1112 = vrot.lane.b32.xlu1 %v1102_v18, %s10628_s10 }
  0x97   : > { %1114 = vrot.lane.b32.xlu2 %v1104_v29, %s10628_s10 }
  0x98   : > { %v269_v23 = vpop.permute.xlu1 %268  ;;  %1095 = vrot.lane.b32.xlu0 %v1094_v21, %s10639_s28 }
  0x99   : > { %7941 = vmatmul.msk.bf16.vlgmr.msra.gmra.mxu0 %vm300_vm2, %v269_v23  ;;  %7942 = vmatmul.msk.bf16.vlgmr.msra.gmra.mxu1 %vm300_vm2, %v269_v23  ;;  %v471_v30 = vpop.permute.xlu2 %470 }
  0x9a   : > { %v292_v24 = vpop.permute.xlu0 %291 }
  0x9b   : > { %v298_v25 = vsel %vm295_vm0, %v290_v16, %v292_v24  ;;  %v299_v26 = vsel %vm295_vm0, %v292_v24, %v294_v14 }
  0x9c   : > { %v312_v27 = vsel %vm304_vm1, %v298_v25, 0  ;;  %v315_v28 = vsel %vm304_vm1, %v299_v26, 0 }
  0x9d   : > { %350 = vmatpush.bf16.msra.mxu2 %v312_v27  ;;  %363 = vmatpush.bf16.msra.mxu3 %v315_v28 }
  0xa0   : > { %7943 = vmatmul.msk.bf16.vlgmr.msra.gmra.mxu2 %vm300_vm2, %v269_v23  ;;  %7944 = vmatmul.msk.bf16.vlgmr.msra.gmra.mxu3 %vm300_vm2, %v269_v23  ;;  %v389_v35 = vpop.permute.xlu1 %388 }
  0xa1   : > { %v396_v36 = vsel %vm392_vm3, %v389_v35, %v391_v10  ;;  %v601_v41 = vpop.permute.xlu2 %600  ;;  %v700_v10 = vsel %vm304_vm1, %v8542_v32, 0 }
  0xa2   : > { %v387_v37 = vpop.permute.xlu0 %386  ;;  %v410_v38 = vsel %vm304_vm1, %v396_v36, 0 }
  0xa3   : > { %v395_v39 = vsel %vm392_vm3, %v387_v37, %v389_v35  ;;  %458 = vmatpush.bf16.msrb.mxu3 %v410_v38 }
  0xa4   : > { %v407_v40 = vsel %vm304_vm1, %v395_v39, 0 }
  0xa5   : > { %445 = vmatpush.bf16.msrb.mxu2 %v407_v40 }
  0xa8   : > { %v385_v42 = vpop.permute.xlu1 %384 }
  0xa9   : > { %v394_v43 = vsel %vm392_vm3, %v385_v42, %v387_v37  ;;  %v580_v48 = vpop.permute.xlu2 %579 }
  0xaa   : > { %v383_v44 = vpop.permute.xlu0 %382  ;;  %v404_v45 = vsel %vm304_vm1, %v394_v43, 0 }
  0xab   : > { %v393_v46 = vsel %vm392_vm3, %v383_v44, %v385_v42  ;;  %432 = vmatpush.bf16.msrb.mxu1 %v404_v45 }
  0xac   : > { %v401_v47 = vsel %vm304_vm1, %v393_v46, 0 }
  0xad   : > { %419 = vmatpush.bf16.msrb.mxu0 %v401_v47 }
  0xae   : > { %7946 = vmatmul.msk.bf16.vlgmr.msrb.gmra.mxu1 %vm300_vm2, %v8510_v2 }
  0xb0   : > { %7945 = vmatmul.msk.bf16.vlgmr.msrb.gmra.mxu0 %vm300_vm2, %v8510_v2  ;;  %7947 = vmatmul.msk.bf16.vlgmr.msrb.gmra.mxu2 %vm300_vm2, %v8510_v2  ;;  %v496_v49 = vpop.permute.xlu1 %495 }
  0xb1   : > { %7948 = vmatmul.msk.bf16.vlgmr.msrb.gmra.mxu3 %vm300_vm2, %v8510_v2  ;;  %v8636_v55 = vpop.permute.xlu2 %687 }
  0xb2   : > { %v494_v50 = vpop.permute.xlu0 %493 }
  0xb3   : > { %v501_v51 = vsel %vm497_vm4, %v494_v50, %v496_v49  ;;  %v500_v52 = vsel %vm497_vm4, %v492_v19, %v494_v50 }
  0xb4   : > { %v512_v53 = vsel %vm304_vm1, %v500_v52, 0  ;;  %v515_v54 = vsel %vm304_vm1, %v501_v51, 0 }
  0xb5   : > { %550 = vmatpush.bf16.msra.mxu2 %v512_v53  ;;  %563 = vmatpush.bf16.msra.mxu3 %v515_v54 }
  0xb8   : > { %v490_v56 = vpop.permute.xlu1 %489 }
  0xb9   : > { %v499_v57 = vsel %vm497_vm4, %v490_v56, %v492_v19  ;;  %v794_v61 = vpop.permute.xlu2 %793 }
  0xba   : > { %v488_v58 = vpop.permute.xlu0 %487  ;;  %v509_v59 = vsel %vm304_vm1, %v499_v57, 0 }
  0xbb   : > { %v498_v2 = vsel %vm497_vm4, %v488_v58, %v490_v56  ;;  %537 = vmatpush.bf16.msra.mxu1 %v509_v59 }
  0xbc   : > { %v506_v60 = vsel %vm304_vm1, %v498_v2, 0 }
  0xbd   : > { %524 = vmatpush.bf16.msra.mxu0 %v506_v60 }
  0xbe   : > { %7950 = vmatmul.msk.bf16.vlgmr.msra.gmra.mxu1 %vm300_vm2, %v471_v30 }
  0xc0   : > { %7949 = vmatmul.msk.bf16.vlgmr.msra.gmra.mxu0 %vm300_vm2, %v471_v30  ;;  %7951 = vmatmul.msk.bf16.vlgmr.msra.gmra.mxu2 %vm300_vm2, %v471_v30  ;;  %v605_v62 = vpop.permute.xlu1 %604 }
  0xc1   : > { %7952 = vmatmul.msk.bf16.vlgmr.msra.gmra.mxu3 %vm300_vm2, %v471_v30  ;;  %v788_v7 = vpop.permute.xlu2 %787 }
  0xc2   : > { %v603_v63 = vpop.permute.xlu0 %602 }
  0xc3   : > { %v610_v0 = vsel %vm606_vm5, %v603_v63, %v605_v62  ;;  %v609_v1 = vsel %vm606_vm5, %v601_v41, %v603_v63 }
  0xc4   : > { %v621_v5 = vsel %vm304_vm1, %v609_v1, 0  ;;  %v624_v6 = vsel %vm304_vm1, %v610_v0, 0 }
  0xc5   : > { %659 = vmatpush.bf16.msrb.mxu2 %v621_v5  ;;  %672 = vmatpush.bf16.msrb.mxu3 %v624_v6  ;;  %v8422_v5 = vmov 0   ;;  %v1198_v6 = vld [vmem:[%s10617_s3] sm:$0xff] }
  0xc6   : > { %8362 = vset.pattern.permute.xlu0 %v8422_v5  ;;  %254 = vst [vmem:[#allocation4] sm:$0x3] %v8422_v5  ;;  %8363 = vset.pattern.permute.xlu2 %v8422_v5 }
  0xc7   : > { %255 = vst [vmem:[#allocation4 + $0xa] sm:$0x3] %v8422_v5  ;;  %8364 = vset.pattern.permute.xlu1 %v8422_v5  ;;  %1201 = vperm.xlu0 %8362, %v1198_v6  }
  0xc8   : > { %v599_v8 = vpop.permute.xlu1 %598  ;;  %256 = vst [vmem:[#allocation3] sm:$0x3] %v8422_v5 }
  0xc9   : > { %739 = vmatpush.bf16.msra.mxu2 %v702_v3  ;;  %752 = vmatpush.bf16.msra.mxu3 %v704_v4  ;;  %v608_v9 = vsel %vm606_vm5, %v599_v8, %v601_v41  ;;  %v903_v14 = vpop.permute.xlu2 %902  ;;  %257 = vst [vmem:[#allocation3 + $0xa] sm:$0x3] %v8422_v5 }
  0xca   : > { %v597_v11 = vpop.permute.xlu0 %596  ;;  %v618_v33 = vsel %vm304_vm1, %v608_v9, 0  ;;  %259 = vst [vmem:[#allocation3 + $0xc] sm:$0x3] %v8422_v5 }
  0xcb   : > { %v607_v34 = vsel %vm606_vm5, %v597_v11, %v599_v8  ;;  %646 = vmatpush.bf16.msrb.mxu1 %v618_v33  ;;  %260 = vst [vmem:[#allocation3 + $0x16] sm:$0x3] %v8422_v5 }
  0xcc   : > { %v615_v13 = vsel %vm304_vm1, %v607_v34, 0  ;;  %252 = vst [vmem:[#allocation2] sm:$0xf] %v8422_v5 }
  0xcd   : > { %633 = vmatpush.bf16.msrb.mxu0 %v615_v13  ;;  %253 = vst [vmem:[#allocation2 + $0x14] sm:$0xf] %v8422_v5 }
  0xce   : > { %7954 = vmatmul.msk.bf16.vlgmr.msrb.gmra.mxu1 %vm300_vm2, %v580_v48 }
  0xcf   : > { %726 = vmatpush.bf16.msra.mxu1 %v700_v10 }
  0xd0   : > { %7953 = vmatmul.msk.bf16.vlgmr.msrb.gmra.mxu0 %vm300_vm2, %v580_v48  ;;  %7955 = vmatmul.msk.bf16.vlgmr.msrb.gmra.mxu2 %vm300_vm2, %v580_v48  ;;  %v792_v32 = vpop.permute.xlu1 %791 }
  0xd1   : > { %713 = vmatpush.bf16.msra.mxu0 %v698_v12  ;;  %7956 = vmatmul.msk.bf16.vlgmr.msrb.gmra.mxu3 %vm300_vm2, %v580_v48  ;;  %v799_v15 = vsel %vm795_vm6, %v792_v32, %v794_v61  ;;  %v897_v22 = vpop.permute.xlu2 %896 }
  0xd2   : > { %v790_v16 = vpop.permute.xlu0 %789  ;;  %v813_v31 = vsel %vm304_vm1, %v799_v15, 0 }
  0xd3   : > { %v798_v17 = vsel %vm795_vm6, %v790_v16, %v792_v32  ;;  %v797_v18 = vsel %vm795_vm6, %v788_v7, %v790_v16  ;;  %861 = vmatpush.bf16.msrb.mxu3 %v813_v31 }
  0xd4   : > { %v807_v19 = vsel %vm304_vm1, %v797_v18, 0  ;;  %v810_v20 = vsel %vm304_vm1, %v798_v17, 0 }
  0xd5   : > { %835 = vmatpush.bf16.msrb.mxu1 %v807_v19  ;;  %848 = vmatpush.bf16.msrb.mxu2 %v810_v20 }
  0xd8   : > { %v786_v21 = vpop.permute.xlu1 %785 }
  0xd9   : > { %v796_v23 = vsel %vm795_vm6, %v786_v21, %v788_v7  ;;  %v1012_v30 = vpop.permute.xlu2 %1011 }
  0xda   : > { %v804_v24 = vsel %vm304_vm1, %v796_v23, 0  ;;  %v769_v25 = vpop.permute.xlu0 %768 }
  0xdb   : > { %822 = vmatpush.bf16.msrb.mxu0 %v804_v24 }
  0xde   : > { %7958 = vmatmul.msk.bf16.vlgmr.msra.gmra.mxu1 %vm300_vm2, %v8636_v55 }
  0xe0   : > { %7957 = vmatmul.msk.bf16.vlgmr.msra.gmra.mxu0 %vm300_vm2, %v8636_v55  ;;  %7959 = vmatmul.msk.bf16.vlgmr.msra.gmra.mxu2 %vm300_vm2, %v8636_v55  ;;  %v901_v26 = vpop.permute.xlu1 %900 }
  0xe1   : > { %7960 = vmatmul.msk.bf16.vlgmr.msra.gmra.mxu3 %vm300_vm2, %v8636_v55  ;;  %v908_v27 = vsel %vm904_vm7, %v901_v26, %v903_v14  ;;  %v1006_v43 = vpop.permute.xlu2 %1005 }
  0xe2   : > { %v899_v28 = vpop.permute.xlu0 %898  ;;  %v922_v29 = vsel %vm304_vm1, %v908_v27, 0 }
  0xe3   : > { %v907_v35 = vsel %vm904_vm7, %v899_v28, %v901_v26  ;;  %v906_v36 = vsel %vm904_vm7, %v897_v22, %v899_v28  ;;  %970 = vmatpush.bf16.msra.mxu3 %v922_v29 }
  0xe4   : > { %v916_v37 = vsel %vm304_vm1, %v906_v36, 0  ;;  %v919_v38 = vsel %vm304_vm1, %v907_v35, 0 }
  0xe5   : > { %944 = vmatpush.bf16.msra.mxu1 %v916_v37  ;;  %957 = vmatpush.bf16.msra.mxu2 %v919_v38 }
  0xe8   : > { %v895_v39 = vpop.permute.xlu1 %894 }
  0xe9   : > { %v905_v40 = vsel %vm904_vm7, %v895_v39, %v897_v22  ;;  %v1121_v52 = vpop.permute.xlu2 %1120 }
  0xea   : > { %v913_v41 = vsel %vm304_vm1, %v905_v40, 0  ;;  %v878_v42 = vpop.permute.xlu0 %877 }
  0xeb   : > { %931 = vmatpush.bf16.msra.mxu0 %v913_v41 }
  0xee   : > { %7962 = vmatmul.msk.bf16.vlgmr.msrb.gmra.mxu1 %vm300_vm2, %v769_v25 }
  0xf0   : > { %7961 = vmatmul.msk.bf16.vlgmr.msrb.gmra.mxu0 %vm300_vm2, %v769_v25  ;;  %7963 = vmatmul.msk.bf16.vlgmr.msrb.gmra.mxu2 %vm300_vm2, %v769_v25  ;;  %v1010_v44 = vpop.permute.xlu1 %1009 }
  0xf1   : > { %7964 = vmatmul.msk.bf16.vlgmr.msrb.gmra.mxu3 %vm300_vm2, %v769_v25  ;;  %v1017_v45 = vsel %vm1013_vm8, %v1010_v44, %v1012_v30  ;;  %v1115_v58 = vpop.permute.xlu2 %1114 }
  0xf2   : > { %v1008_v46 = vpop.permute.xlu0 %1007  ;;  %v1031_v47 = vsel %vm304_vm1, %v1017_v45, 0 }
  0xf3   : > { %v1016_v48 = vsel %vm1013_vm8, %v1008_v46, %v1010_v44  ;;  %v1015_v49 = vsel %vm1013_vm8, %v1006_v43, %v1008_v46  ;;  %1079 = vmatpush.bf16.msrb.mxu3 %v1031_v47 }
  0xf4   : > { %v1025_v50 = vsel %vm304_vm1, %v1015_v49, 0  ;;  %v1028_v51 = vsel %vm304_vm1, %v1016_v48, 0 }
  0xf5   : > { %1053 = vmatpush.bf16.msrb.mxu1 %v1025_v50  ;;  %1066 = vmatpush.bf16.msrb.mxu2 %v1028_v51 }
  0xf8   : > { %v1004_v53 = vpop.permute.xlu1 %1003 }
  0xf9   : > { %v1014_v54 = vsel %vm1013_vm8, %v1004_v53, %v1006_v43 }
  0xfa   : > { %v1022_v55 = vsel %vm304_vm1, %v1014_v54, 0  ;;  %v987_v56 = vpop.permute.xlu0 %986 }
  0xfb   : > { %1040 = vmatpush.bf16.msrb.mxu0 %v1022_v55 }
  0xfe   : > { %7966 = vmatmul.msk.bf16.vlgmr.msra.gmra.mxu1 %vm300_vm2, %v878_v42 }
 0x100   : > { %7965 = vmatmul.msk.bf16.vlgmr.msra.gmra.mxu0 %vm300_vm2, %v878_v42  ;;  %7967 = vmatmul.msk.bf16.vlgmr.msra.gmra.mxu2 %vm300_vm2, %v878_v42  ;;  %v1119_v57 = vpop.permute.xlu1 %1118 }
 0x101   : > { %7968 = vmatmul.msk.bf16.vlgmr.msra.gmra.mxu3 %vm300_vm2, %v878_v42  ;;  %v1126_v59 = vsel %vm1122_vm9, %v1119_v57, %v1121_v52 }
 0x102   : > { %v1117_v2 = vpop.permute.xlu0 %1116  ;;  %v1140_v60 = vsel %vm304_vm1, %v1126_v59, 0 }
 0x103   : > { %v1125_v61 = vsel %vm1122_vm9, %v1117_v2, %v1119_v57  ;;  %v1124_v62 = vsel %vm1122_vm9, %v1115_v58, %v1117_v2  ;;  %1188 = vmatpush.bf16.msra.mxu3 %v1140_v60 }
 0x104   : > { %v1134_v63 = vsel %vm304_vm1, %v1124_v62, 0  ;;  %v1137_v0 = vsel %vm304_vm1, %v1125_v61, 0 }
 0x105   : > { %1162 = vmatpush.bf16.msra.mxu1 %v1134_v63  ;;  %1175 = vmatpush.bf16.msra.mxu2 %v1137_v0 }
 0x108   : > { %v1113_v1 = vpop.permute.xlu1 %1112 }
 0x109   : > { %v1123_v3 = vsel %vm1122_vm9, %v1113_v1, %v1115_v58 }
 0x10a   : > { %v1131_v4 = vsel %vm304_vm1, %v1123_v3, 0  ;;  %v1096_v9 = vpop.permute.xlu0 %1095 }
 0x10b   : > { %1149 = vmatpush.bf16.msra.mxu0 %v1131_v4 }
 0x10e   : > { %7970 = vmatmul.msk.bf16.vlgmr.msrb.gmra.mxu1 %vm300_vm2, %v987_v56 }
 0x110   : > { %7969 = vmatmul.msk.bf16.vlgmr.msrb.gmra.mxu0 %vm300_vm2, %v987_v56  ;;  %7971 = vmatmul.msk.bf16.vlgmr.msrb.gmra.mxu2 %vm300_vm2, %v987_v56 }
 0x111   : > { %7972 = vmatmul.msk.bf16.vlgmr.msrb.gmra.mxu3 %vm300_vm2, %v987_v56 }
 0x116   : > { %v326_v7 = vpop.f32.mrf.mxu0  ;;  %v339_v8 = vpop.f32.mrf.mxu1 }
 0x11e   : > { %v328_v10 = vpop.f32.mrf.mxu0  ;;  %v341_v11 = vpop.f32.mrf.mxu1  ;;  %7974 = vmatmul.msk.bf16.vlgmr.msra.gmra.mxu1 %vm300_vm2, %v1096_v9 }
 0x120   : > { %7973 = vmatmul.msk.bf16.vlgmr.msra.gmra.mxu0 %vm300_vm2, %v1096_v9  ;;  %7975 = vmatmul.msk.bf16.vlgmr.msra.gmra.mxu2 %vm300_vm2, %v1096_v9 }
 0x121   : > { %7976 = vmatmul.msk.bf16.vlgmr.msra.gmra.mxu3 %vm300_vm2, %v1096_v9 }
 0x123   : > { %v352_v33 = vpop.f32.mrf.mxu2  ;;  %v365_v34 = vpop.f32.mrf.mxu3 }
 0x12b   : > { %v354_v12 = vpop.f32.mrf.mxu2  ;;  %v367_v13 = vpop.f32.mrf.mxu3 }
 0x12c   : > { %v434_v14 = vpop.f32.mrf.mxu1 }
 0x12d   : > { %v421_v32 = vpop.f32.mrf.mxu0  ;;  %v435_v15 = vadd.f32 %v434_v14, %v339_v8 }
 0x12e   : > { %v422_v16 = vadd.f32 %v421_v32, %v326_v7 }
 0x133   : > { %v447_v31 = vpop.f32.mrf.mxu2 }
 0x134   : > { %v448_v17 = vadd.f32 %v447_v31, %v352_v33  ;;  %v460_v18 = vpop.f32.mrf.mxu3  ;;  %v436_v19 = vpop.f32.mrf.mxu1 }
 0x135   : > { %v461_v20 = vadd.f32 %v460_v18, %v365_v34  ;;  %v423_v21 = vpop.f32.mrf.mxu0 }
 0x13b   : > { %v449_v22 = vpop.f32.mrf.mxu2 }
 0x13c   : > { %v462_v23 = vpop.f32.mrf.mxu3  ;;  %v539_v24 = vpop.f32.mrf.mxu1 }
 0x13d   : > { %v526_v25 = vpop.f32.mrf.mxu0  ;;  %v570_v26 = vadd.f32 %v539_v24, %v435_v15  ;;  %v1202_v22 = vpop.permute.xlu0 %1201 }
 0x13e   : > { %v569_v27 = vadd.f32 %v526_v25, %v422_v16 }
 0x143   : > { %v552_v28 = vpop.f32.mrf.mxu2 }
 0x144   : > { %v571_v29 = vadd.f32 %v552_v28, %v448_v17  ;;  %v565_v30 = vpop.f32.mrf.mxu3  ;;  %v541_v35 = vpop.f32.mrf.mxu1 }
 0x145   : > { %v572_v36 = vadd.f32 %v565_v30, %v461_v20  ;;  %v528_v37 = vpop.f32.mrf.mxu0 }
 0x14b   : > { %v554_v38 = vpop.f32.mrf.mxu2 }
 0x14c   : > { %v567_v39 = vpop.f32.mrf.mxu3  ;;  %v648_v40 = vpop.f32.mrf.mxu1 }
 0x14d   : > { %v635_v41 = vpop.f32.mrf.mxu0  ;;  %v679_v42 = vadd.f32 %v648_v40, %v570_v26 }
 0x14e   : > { %v678_v43 = vadd.f32 %v635_v41, %v569_v27  ;;  %v261_v27 = vld [vmem:[%s241_s23] sm:$0xf]  ;;  %s10634_s23 = smov 88  }
 0x14f   : > { %v8731_v38 = vperm.slane %v261_v27, 1  ;;  %v8733_v41 = vperm.slane %v261_v27, 0 }
 0x153   : > { %v661_v44 = vpop.f32.mrf.mxu2 }
 0x154   : > { %v680_v45 = vadd.f32 %v661_v44, %v571_v29  ;;  %v674_v46 = vpop.f32.mrf.mxu3  ;;  %v650_v47 = vpop.f32.mrf.mxu1 }
 0x155   : > { %v681_v48 = vadd.f32 %v674_v46, %v572_v36  ;;  %v637_v49 = vpop.f32.mrf.mxu0 }
 0x15b   : > { %v663_v50 = vpop.f32.mrf.mxu2 }
 0x15c   : > { %v676_v51 = vpop.f32.mrf.mxu3  ;;  %v728_v52 = vpop.f32.mrf.mxu1 }
 0x15d   : > { %v715_v53 = vpop.f32.mrf.mxu0  ;;  %v759_v32 = vadd.f32 %v728_v52, %v679_v42 }
 0x15e   : > { %v758_v16 = vadd.f32 %v715_v53, %v678_v43 }
 0x163   : > { %v741_v54 = vpop.f32.mrf.mxu2 }
 0x164   : > { %v754_v55 = vpop.f32.mrf.mxu3  ;;  %v730_v56 = vpop.f32.mrf.mxu1  ;;  %v760_v23 = vadd.f32 %v741_v54, %v680_v45 }
 0x165   : > { %v717_v57 = vpop.f32.mrf.mxu0  ;;  %v761_v28 = vadd.f32 %v754_v55, %v681_v48 }
 0x16b   : > { %v743_v58 = vpop.f32.mrf.mxu2 }
 0x16c   : > { %v756_v59 = vpop.f32.mrf.mxu3  ;;  %v837_v2 = vpop.f32.mrf.mxu1  ;;  %v8739_v58 = vperm.slane %v261_v27, 2 }
 0x16d   : > { %v824_v60 = vpop.f32.mrf.mxu0  ;;  %v868_v31 = vadd.f32 %v837_v2, %v759_v32  ;;  %v8741_v2 = vperm.slane %v261_v27, 3 }
 0x16e   : > { %v867_v17 = vadd.f32 %v824_v60, %v758_v16 }
 0x173   : > { %v850_v61 = vpop.f32.mrf.mxu2 }
 0x174   : > { %v863_v62 = vpop.f32.mrf.mxu3  ;;  %v839_v63 = vpop.f32.mrf.mxu1  ;;  %v869_v35 = vadd.f32 %v850_v61, %v760_v23 }
 0x175   : > { %v826_v0 = vpop.f32.mrf.mxu0  ;;  %v870_v37 = vadd.f32 %v863_v62, %v761_v28 }
 0x17b   : > { %v852_v1 = vpop.f32.mrf.mxu2 }
 0x17c   : > { %v865_v3 = vpop.f32.mrf.mxu3  ;;  %v946_v4 = vpop.f32.mrf.mxu1 }
 0x17d   : > { %v933_v5 = vpop.f32.mrf.mxu0  ;;  %v977_v18 = vadd.f32 %v946_v4, %v868_v31 }
 0x17e   : > { %v976_v19 = vadd.f32 %v933_v5, %v867_v17 }
 0x183   : > { %v959_v6 = vpop.f32.mrf.mxu2 }
 0x184   : > { %v972_v7 = vpop.f32.mrf.mxu3  ;;  %v948_v8 = vpop.f32.mrf.mxu1  ;;  %v978_v40 = vadd.f32 %v959_v6, %v869_v35 }
 0x185   : > { %v935_v9 = vpop.f32.mrf.mxu0  ;;  %v979_v43 = vadd.f32 %v972_v7, %v870_v37 }
 0x18b   : > { %v961_v10 = vpop.f32.mrf.mxu2 }
 0x18c   : > { %v974_v11 = vpop.f32.mrf.mxu3  ;;  %v1055_v33 = vpop.f32.mrf.mxu1  ;;  %v8750_v10 = vld [vmem:[%s10616_s2 + $0x4] sm:$0x3] }
 0x18d   : > { %v1042_v34 = vpop.f32.mrf.mxu0  ;;  %v1086_v20 = vadd.f32 %v1055_v33, %v977_v18 }
 0x18e   : > { %v1085_v24 = vadd.f32 %v1042_v34, %v976_v19 }
 0x193   : > { %v1068_v12 = vpop.f32.mrf.mxu2 }
 0x194   : > { %v1081_v13 = vpop.f32.mrf.mxu3  ;;  %v1057_v14 = vpop.f32.mrf.mxu1  ;;  %v1087_v45 = vadd.f32 %v1068_v12, %v978_v40  ;;  %v1235_v12 = vunpack.c.l.b16 %v8750_v10 }
 0x195   : > { %v1044_v15 = vpop.f32.mrf.mxu0  ;;  %v1088_v47 = vadd.f32 %v1081_v13, %v979_v43 }
 0x196   : > { %v8756_v32 = vpack.c.b16 %v1235_v12, %v1235_v12 }
 0x19b   : > { %v1070_v21 = vpop.f32.mrf.mxu2 }
 0x19c   : > { %v1083_v25 = vpop.f32.mrf.mxu3  ;;  %v1164_v26 = vpop.f32.mrf.mxu1 }
 0x19d   : > { %v1151_v29 = vpop.f32.mrf.mxu0  ;;  %v1195_v30 = vadd.f32 %v1164_v26, %v1086_v20 }
 0x19e   : > { %v1194_v36 = vadd.f32 %v1151_v29, %v1085_v24 }
 0x19f   : > { %v1205_v39 = vadd.f32 %v1202_v22, %v1195_v30 }
 0x1a0   : > { %v1204_v42 = vadd.f32 %v1202_v22, %v1194_v36 }
 0x1a1   : > { %v1209_v44 = vmax.f32 %v1205_v39, 0.0 }
 0x1a2   : > { %v1208_v46 = vmax.f32 %v1204_v42, 0.0 }
 0x1a3   : > { %v1222_v49 = vmul.f32 %v8731_v38, %v1209_v44  ;;  %v1177_v48 = vpop.f32.mrf.mxu2 }
 0x1a4   : > { %v1221_v50 = vmul.f32 %v8733_v41, %v1208_v46  ;;  %v1196_v51 = vadd.f32 %v1177_v48, %v1087_v45  ;;  %v1190_v52 = vpop.f32.mrf.mxu3  ;;  %v1166_v53 = vpop.f32.mrf.mxu1 }
 0x1a5   : > { %v1197_v54 = vadd.f32 %v1190_v52, %v1088_v47  ;;  %v1153_v55 = vpop.f32.mrf.mxu0 }
 0x1a6   : > { %v8737_v56 = vpack.c.bf16 %v1222_v49, %v1221_v50  ;;  %v1206_v57 = vadd.f32 %v1202_v22, %v1196_v51 }
 0x1a7   : > { %v1207_v59 = vadd.f32 %v1202_v22, %v1197_v54 }
 0x1a8   : > { %1227 = vst [vmem:[#allocation2 + $0x4] sm:$0xff] %v8737_v56  ;;  %v1210_v60 = vmax.f32 %v1206_v57, 0.0  ;;  %v1683_v18 = vunpack.c.l.b16 %v8737_v56  ;;  %v1684_v24 = vunpack.c.h.b16 %v8737_v56 }
 0x1a9   : > { %v1211_v61 = vmax.f32 %v1207_v59, 0.0 }
 0x1aa   : > { %v1223_v62 = vmul.f32 %v8739_v58, %v1210_v60  ;;  %v8782_v19 = vpack.c.b16 %v1683_v18, %v1683_v18  ;;  %v8803_v25 = vpack.c.b16 %v1684_v24, %v1684_v24 }
 0x1ab   : > { %v1224_v63 = vmul.f32 %v8741_v2, %v1211_v61  ;;  %v1179_v0 = vpop.f32.mrf.mxu2 }
 0x1ac   : > { %v1192_v1 = vpop.f32.mrf.mxu3 }
 0x1ad   : > { %v1226_v3 = vpack.c.bf16 %v1224_v63, %v1223_v62 }
 0x1af   : > { %1228 = vst [vmem:[#allocation2 + $0xc] sm:$0xff] %v1226_v3  ;;  %v1231_v4 = vld [vmem:[#allocation2] sm:$0xff]  ;;  %v1686_v31 = vunpack.c.h.b16 %v1226_v3  ;;  %v1685_v20 = vunpack.c.l.b16 %v1226_v3 }
 0x1b0   : > { %v1242_v5 = vunpack.c.l.b16 %v1231_v4  ;;  %v1243_v14 = vunpack.c.h.b16 %v1231_v4 }
 0x1b1   : > { %v8775_v17 = vpack.c.b16 %v1686_v31, %v1686_v31  ;;  %v8789_v21 = vpack.c.b16 %v1685_v20, %v1685_v20 }
 0x1b2   : > { %v1247_v6 = vpack.c.b16 %v1242_v5, %v1242_v5  ;;  %v1248_v16 = vpack.c.b16 %v1243_v14, %v1243_v14 }
 0x1b3   : > { %v1617_v18 = vsel %vm1270_vm10, %v8775_v17, 0 }
 0x1b4   : > { %1252 = vrot.lane.b32.xlu0 %v1247_v6, %s10626_s5 }
 0x1b6   : > { %v1232_v7 = vld [vmem:[#allocation2 + $0x8] sm:$0xff]  ;;  %v1233_v34 = vld [vmem:[#allocation2 + $0x10] sm:$0xff]  }
 0x1b7   : > { %v1245_v8 = vunpack.c.h.b16 %v1232_v7  ;;  %v1244_v9 = vunpack.c.l.b16 %v1232_v7  ;;  %v1246_v13 = vunpack.c.l.b16 %v1233_v34  ;;  %v1687_v22 = vunpack.c.h.b16 %v1233_v34 }
 0x1b9   : > { %v1250_v11 = vpack.c.b16 %v1245_v8, %v1245_v8  ;;  %v1249_v33 = vpack.c.b16 %v1244_v9, %v1244_v9  ;;  %v1251_v15 = vpack.c.b16 %v1246_v13, %v1246_v13  ;;  %v1692_v23 = vpack.c.b16 %v1687_v22, %v1687_v22 }
 0x1bb   : > { %1258 = vrot.lane.b32.xlu2 %v1250_v11, %s10626_s5  ;;  %1256 = vrot.lane.b32.xlu1 %v1249_v33, %s10626_s5 }
 0x1bc   : > { %1341 = vrot.lane.b32.xlu0 %v1250_v11, %s8409_s7 }
 0x1c3   : > { %1237 = vrot.lane.b32.xlu2 %v8756_v32, %s8411_s11  ;;  %1260 = vrot.lane.b32.xlu1 %v1251_v15, %s10626_s5 }
 0x1c4   : > { %1337 = vrot.lane.b32.xlu0 %v1248_v16, %s8409_s7 }
 0x1cb   : > { %1339 = vrot.lane.b32.xlu2 %v1249_v33, %s8409_s7  ;;  %1254 = vrot.lane.b32.xlu1 %v1248_v16, %s10626_s5 }
 0x1cc   : > { %1426 = vrot.lane.b32.xlu0 %v1251_v15, %s8410_s8 }
 0x1d3   : > { %1343 = vrot.lane.b32.xlu1 %v1251_v15, %s8409_s7  ;;  %1335 = vrot.lane.b32.xlu2 %v1247_v6, %s8409_s7 }
 0x1d4   : > { %1420 = vrot.lane.b32.xlu0 %v1248_v16, %s8410_s8 }
 0x1db   : > { %1422 = vrot.lane.b32.xlu1 %v1249_v33, %s8410_s8  ;;  %1424 = vrot.lane.b32.xlu2 %v1250_v11, %s8410_s8 }
 0x1dc   : > { %1513 = vrot.lane.b32.xlu0 %v1251_v15, %s8412_s14 }
 0x1e3   : > { %1416 = vrot.lane.b32.xlu1 %v8756_v32, %s8414_s25  ;;  %1418 = vrot.lane.b32.xlu2 %v1247_v6, %s8410_s8 }
 0x1e4   : > { %1507 = vrot.lane.b32.xlu0 %v1248_v16, %s8412_s14 }
 0x1eb   : > { %1509 = vrot.lane.b32.xlu1 %v1249_v33, %s8412_s14  ;;  %1511 = vrot.lane.b32.xlu2 %v1250_v11, %s8412_s14 }
 0x1ec   : > { %1699 = vrot.lane.b32.xlu0 %v8775_v17, %s10636_s29 }
 0x1f3   : > { %1503 = vrot.lane.b32.xlu1 %v8756_v32, %s8418_s13  ;;  %1505 = vrot.lane.b32.xlu2 %v1247_v6, %s8412_s14 }
 0x1f4   : > { %1693 = vrot.lane.b32.xlu0 %v8782_v19, %s10636_s29 }
 0x1fb   : > { %1592 = vrot.lane.b32.xlu1 %v8756_v32, %s10639_s28  ;;  %1697 = vrot.lane.b32.xlu2 %v8789_v21, %s10636_s29 }
 0x1fc   : > { %1786 = vrot.lane.b32.xlu0 %v8775_v17, %s10630_s12 }
 0x203   : > { %1701 = vrot.lane.b32.xlu1 %v1692_v23, %s10636_s29  ;;  %1678 = vrot.lane.b32.xlu2 %v8756_v32, %s10634_s23 }
 0x204   : > { %1780 = vrot.lane.b32.xlu0 %v8782_v19, %s10630_s12 }
 0x20b   : > { %1695 = vrot.lane.b32.xlu1 %v8803_v25, %s10636_s29  ;;  %1784 = vrot.lane.b32.xlu2 %v8789_v21, %s10630_s12 }
 0x20c   : > { %1873 = vrot.lane.b32.xlu0 %v8775_v17, %s8416_s30 }
 0x213   : > { %1788 = vrot.lane.b32.xlu1 %v1692_v23, %s10630_s12  ;;  %1778 = vrot.lane.b32.xlu2 %v8756_v32, %s10624_s9  ;;  %s8428_s9 = smov 42  }
 0x214   : > { %1867 = vrot.lane.b32.xlu0 %v8782_v19, %s8416_s30 }
 0x215   : > { %v1259_v26 = vpop.permute.xlu2 %1258 }
 0x21b   : > { %1782 = vrot.lane.b32.xlu1 %v8803_v25, %s10630_s12  ;;  %1871 = vrot.lane.b32.xlu2 %v8789_v21, %s8416_s30 }
 0x21c   : > { %1960 = vrot.lane.b32.xlu0 %v8775_v17, %s10628_s10 }
 0x21d   : > { %v1238_v27 = vpop.permute.xlu2 %1237 }
 0x223   : > { %1875 = vrot.lane.b32.xlu1 %v1692_v23, %s8416_s30  ;;  %1865 = vrot.lane.b32.xlu2 %v8756_v32, %s10622_s22  ;;  %s8431_s22 = smov 126  }
 0x224   : > { %1954 = vrot.lane.b32.xlu0 %v8782_v19, %s10628_s10 }
 0x225   : > { %v1340_v28 = vpop.permute.xlu2 %1339 }
 0x226   : > { %v1253_v29 = vpop.permute.xlu0 %1252 }
 0x22b   : > { %1869 = vrot.lane.b32.xlu1 %v8803_v25, %s8416_s30  ;;  %1958 = vrot.lane.b32.xlu2 %v8789_v21, %s10628_s10 }
 0x22d   : > { %v1257_v30 = vpop.permute.xlu1 %1256  ;;  %v1336_v35 = vpop.permute.xlu2 %1335 }
 0x22e   : > { %v1264_v36 = vsel %vm295_vm0, %v1257_v30, %v1259_v26  ;;  %v1342_v37 = vpop.permute.xlu0 %1341 }
 0x22f   : > { %v1347_v39 = vsel %vm392_vm3, %v1340_v28, %v1342_v37  ;;  %v1278_v40 = vsel %vm1270_vm10, %v1264_v36, 0 }
 0x230   : > { %1316 = vmatpush.bf16.msrb.mxu2 %v1278_v40  ;;  %v1359_v42 = vsel %vm1270_vm10, %v1347_v39, 0 }
 0x233   : > { %7980 = vmatmul.msk.bf16.vlgmr.msrb.gmra.mxu2 %vm1266_vm11, %v1238_v27  ;;  %1962 = vrot.lane.b32.xlu1 %v1692_v23, %s10628_s10 }
 0x234   : > { %1397 = vmatpush.bf16.msra.mxu2 %v1359_v42  ;;  %1952 = vrot.lane.b32.xlu2 %v8756_v32, %s10620_s27  ;;  %s10638_s27 = smov 92  }
 0x235   : > { %v1261_v43 = vpop.permute.xlu1 %1260  ;;  %v1425_v44 = vpop.permute.xlu2 %1424 }
 0x236   : > { %v1265_v45 = vsel %vm295_vm0, %v1259_v26, %v1261_v43  ;;  %v1338_v46 = vpop.permute.xlu0 %1337 }
 0x237   : > { %v1281_v47 = vsel %vm1270_vm10, %v1265_v45, 0  ;;  %v1345_v49 = vsel %vm392_vm3, %v1336_v35, %v1338_v46  ;;  %v1346_v48 = vsel %vm392_vm3, %v1338_v46, %v1340_v28  ;;  %v1614_v28 = vsel %vm1270_vm10, %v8789_v21, 0 }
 0x238   : > { %1329 = vmatpush.bf16.msrb.mxu3 %v1281_v47  ;;  %v1353_v57 = vsel %vm1270_vm10, %v1345_v49, 0  ;;  %v1356_v59 = vsel %vm1270_vm10, %v1346_v48, 0 }
 0x23b   : > { %7981 = vmatmul.msk.bf16.vlgmr.msrb.gmra.mxu3 %vm1266_vm11, %v1238_v27  ;;  %1956 = vrot.lane.b32.xlu1 %v8803_v25, %s10628_s10 }
 0x23d   : > { %v1255_v50 = vpop.permute.xlu1 %1254  ;;  %v1419_v51 = vpop.permute.xlu2 %1418 }
 0x23e   : > { %v1262_v52 = vsel %vm295_vm0, %v1253_v29, %v1255_v50  ;;  %v1263_v53 = vsel %vm295_vm0, %v1255_v50, %v1257_v30  ;;  %v1427_v54 = vpop.permute.xlu0 %1426  ;;  %v1608_v29 = vsel %vm1270_vm10, %v8782_v19, 0  ;;  %v1611_v30 = vsel %vm1270_vm10, %v8803_v25, 0 }
 0x23f   : > { %v1272_v55 = vsel %vm1270_vm10, %v1262_v52, 0  ;;  %v1275_v56 = vsel %vm1270_vm10, %v1263_v53, 0  ;;  %v1431_v60 = vsel %vm497_vm4, %v1425_v44, %v1427_v54 }
 0x240   : > { %1290 = vmatpush.bf16.msrb.mxu0 %v1272_v55  ;;  %1303 = vmatpush.bf16.msrb.mxu1 %v1275_v56  ;;  %v1445_v4 = vsel %vm1270_vm10, %v1431_v60, 0 }
 0x243   : > { %7978 = vmatmul.msk.bf16.vlgmr.msrb.gmra.mxu0 %vm1266_vm11, %v1238_v27  ;;  %7979 = vmatmul.msk.bf16.vlgmr.msrb.gmra.mxu1 %vm1266_vm11, %v1238_v27 }
 0x244   : > { %1371 = vmatpush.bf16.msra.mxu0 %v1353_v57  ;;  %1384 = vmatpush.bf16.msra.mxu1 %v1356_v59 }
 0x245   : > { %7984 = vmatmul.msk.bf16.vlgmr.msra.gmra.mxu2 %vm1266_vm11, %v8750_v10  ;;  %v1344_v61 = vpop.permute.xlu1 %1343  ;;  %v1512_v62 = vpop.permute.xlu2 %1511 }
 0x246   : > { %v1348_v63 = vsel %vm392_vm3, %v1342_v37, %v1344_v61  ;;  %v1421_v0 = vpop.permute.xlu0 %1420 }
 0x247   : > { %v1362_v1 = vsel %vm1270_vm10, %v1348_v63, 0  ;;  %v1428_v3 = vsel %vm497_vm4, %v1419_v51, %v1421_v0 }
 0x248   : > { %1410 = vmatpush.bf16.msra.mxu3 %v1362_v1  ;;  %v1436_v5 = vsel %vm1270_vm10, %v1428_v3, 0 }
 0x249   : > { %1454 = vmatpush.bf16.msrb.mxu0 %v1436_v5 }
 0x24b   : > { %7985 = vmatmul.msk.bf16.vlgmr.msra.gmra.mxu3 %vm1266_vm11, %v8750_v10 }
 0x24c   : > { %1493 = vmatpush.bf16.msrb.mxu3 %v1445_v4 }
 0x24d   : > { %v1423_v6 = vpop.permute.xlu1 %1422  ;;  %v1506_v7 = vpop.permute.xlu2 %1505 }
 0x24e   : > { %v1429_v8 = vsel %vm497_vm4, %v1421_v0, %v1423_v6  ;;  %v1430_v9 = vsel %vm497_vm4, %v1423_v6, %v1425_v44  ;;  %v1514_v11 = vpop.permute.xlu0 %1513 }
 0x24f   : > { %v1518_v33 = vsel %vm606_vm5, %v1512_v62, %v1514_v11  ;;  %v1439_v34 = vsel %vm1270_vm10, %v1429_v8, 0  ;;  %v1442_v12 = vsel %vm1270_vm10, %v1430_v9, 0 }
 0x250   : > { %v1532_v13 = vsel %vm1270_vm10, %v1518_v33, 0  ;;  %1467 = vmatpush.bf16.msrb.mxu1 %v1439_v34  ;;  %1480 = vmatpush.bf16.msrb.mxu2 %v1442_v12 }
 0x251   : > { %1580 = vmatpush.bf16.msra.mxu3 %v1532_v13 }
 0x253   : > { %7982 = vmatmul.msk.bf16.vlgmr.msra.gmra.mxu0 %vm1266_vm11, %v8750_v10  ;;  %7983 = vmatmul.msk.bf16.vlgmr.msra.gmra.mxu1 %vm1266_vm11, %v8750_v10 }
 0x255   : > { %v1417_v14 = vpop.permute.xlu1 %1416  ;;  %v1698_v32 = vpop.permute.xlu2 %1697 }
 0x256   : > { %7988 = vmatmul.msk.bf16.vlgmr.msrb.gmra.mxu2 %vm1266_vm11, %v1417_v14  ;;  %v1508_v15 = vpop.permute.xlu0 %1507 }
 0x257   : > { %v1515_v16 = vsel %vm606_vm5, %v1506_v7, %v1508_v15 }
 0x258   : > { %v1523_v31 = vsel %vm1270_vm10, %v1515_v16, 0 }
 0x259   : > { %1541 = vmatpush.bf16.msra.mxu0 %v1523_v31 }
 0x25b   : > { %7989 = vmatmul.msk.bf16.vlgmr.msrb.gmra.mxu3 %vm1266_vm11, %v1417_v14 }
 0x25c   : > { %1665 = vmatpush.bf16.msrb.mxu3 %v1617_v18 }
 0x25d   : > { %v1510_v20 = vpop.permute.xlu1 %1509  ;;  %v8884_v27 = vpop.permute.xlu2 %1678 }
 0x25e   : > { %v1516_v22 = vsel %vm606_vm5, %v1508_v15, %v1510_v20  ;;  %v1517_v10 = vsel %vm606_vm5, %v1510_v20, %v1512_v62  ;;  %v1700_v23 = vpop.permute.xlu0 %1699 }
 0x25f   : > { %v1526_v24 = vsel %vm1270_vm10, %v1516_v22, 0  ;;  %v1529_v26 = vsel %vm1270_vm10, %v1517_v10, 0  ;;  %v1705_v17 = vsel %vm795_vm6, %v1698_v32, %v1700_v23 }
 0x260   : > { %1554 = vmatpush.bf16.msra.mxu1 %v1526_v24  ;;  %1567 = vmatpush.bf16.msra.mxu2 %v1529_v26  ;;  %v1717_v21 = vsel %vm1270_vm10, %v1705_v17, 0 }
 0x263   : > { %7986 = vmatmul.msk.bf16.vlgmr.msrb.gmra.mxu0 %vm1266_vm11, %v1417_v14  ;;  %7987 = vmatmul.msk.bf16.vlgmr.msrb.gmra.mxu1 %vm1266_vm11, %v1417_v14 }
 0x264   : > { %1652 = vmatpush.bf16.msrb.mxu2 %v1614_v28  ;;  %1626 = vmatpush.bf16.msrb.mxu0 %v1608_v29 }
 0x265   : > { %1639 = vmatpush.bf16.msrb.mxu1 %v1611_v30  ;;  %v1504_v35 = vpop.permute.xlu1 %1503  ;;  %v1785_v37 = vpop.permute.xlu2 %1784  ;;  %v8014_v30 = vld [vmem:[%s10617_s3 + $0x8] sm:$0xf] }
 0x266   : > { %7992 = vmatmul.msk.bf16.vlgmr.msra.gmra.mxu2 %vm1266_vm11, %v1504_v35  ;;  %v1694_v36 = vpop.permute.xlu0 %1693  ;;  %2043 = vperm.xlu2 %8363, %v8014_v30  }
 0x268   : > { %1755 = vmatpush.bf16.msra.mxu2 %v1717_v21 }
 0x26b   : > { %7993 = vmatmul.msk.bf16.vlgmr.msra.gmra.mxu3 %vm1266_vm11, %v1504_v35 }
 0x26d   : > { %v1593_v39 = vpop.permute.xlu1 %1592  ;;  %v1779_v19 = vpop.permute.xlu2 %1778 }
 0x26e   : > { %v1787_v40 = vpop.permute.xlu0 %1786 }
 0x26f   : > { %v1792_v42 = vsel %vm904_vm7, %v1785_v37, %v1787_v40 }
 0x270   : > { %v1804_v44 = vsel %vm1270_vm10, %v1792_v42, 0 }
 0x273   : > { %7990 = vmatmul.msk.bf16.vlgmr.msra.gmra.mxu0 %vm1266_vm11, %v1504_v35  ;;  %7991 = vmatmul.msk.bf16.vlgmr.msra.gmra.mxu1 %vm1266_vm11, %v1504_v35 }
 0x275   : > { %v1702_v25 = vpop.permute.xlu1 %1701  ;;  %v1872_v49 = vpop.permute.xlu2 %1871 }
 0x276   : > { %v1706_v43 = vsel %vm795_vm6, %v1700_v23, %v1702_v25  ;;  %7996 = vmatmul.msk.bf16.vlgmr.msrb.gmra.mxu2 %vm1266_vm11, %v1593_v39  ;;  %v1781_v45 = vpop.permute.xlu0 %1780 }
 0x277   : > { %v1720_v46 = vsel %vm1270_vm10, %v1706_v43, 0  ;;  %1842 = vmatpush.bf16.msrb.mxu2 %v1804_v44 }
 0x278   : > { %1768 = vmatpush.bf16.msra.mxu3 %v1720_v46 }
 0x27b   : > { %7997 = vmatmul.msk.bf16.vlgmr.msrb.gmra.mxu3 %vm1266_vm11, %v1593_v39 }
 0x27d   : > { %v1696_v47 = vpop.permute.xlu1 %1695  ;;  %v1866_v61 = vpop.permute.xlu2 %1865 }
 0x27e   : > { %v1703_v48 = vsel %vm795_vm6, %v1694_v36, %v1696_v47  ;;  %v1704_v50 = vsel %vm795_vm6, %v1696_v47, %v1698_v32  ;;  %v1874_v51 = vpop.permute.xlu0 %1873 }
 0x27f   : > { %v1711_v52 = vsel %vm1270_vm10, %v1703_v48, 0  ;;  %v1714_v53 = vsel %vm1270_vm10, %v1704_v50, 0  ;;  %v1879_v54 = vsel %vm1013_vm8, %v1872_v49, %v1874_v51 }
 0x280   : > { %1729 = vmatpush.bf16.msra.mxu0 %v1711_v52  ;;  %1742 = vmatpush.bf16.msra.mxu1 %v1714_v53  ;;  %v1891_v57 = vsel %vm1270_vm10, %v1879_v54, 0 }
 0x283   : > { %7994 = vmatmul.msk.bf16.vlgmr.msrb.gmra.mxu0 %vm1266_vm11, %v1593_v39  ;;  %7995 = vmatmul.msk.bf16.vlgmr.msrb.gmra.mxu1 %vm1266_vm11, %v1593_v39 }
 0x285   : > { %v1789_v55 = vpop.permute.xlu1 %1788  ;;  %v1959_v5 = vpop.permute.xlu2 %1958 }
 0x286   : > { %v1793_v56 = vsel %vm904_vm7, %v1787_v40, %v1789_v55  ;;  %8000 = vmatmul.msk.bf16.vlgmr.msra.gmra.mxu2 %vm1266_vm11, %v8884_v27  ;;  %v1868_v59 = vpop.permute.xlu0 %1867 }
 0x287   : > { %v1807_v60 = vsel %vm1270_vm10, %v1793_v56, 0  ;;  %1929 = vmatpush.bf16.msra.mxu2 %v1891_v57 }
 0x288   : > { %1855 = vmatpush.bf16.msrb.mxu3 %v1807_v60 }
 0x28b   : > { %8001 = vmatmul.msk.bf16.vlgmr.msra.gmra.mxu3 %vm1266_vm11, %v8884_v27 }
 0x28d   : > { %v1783_v62 = vpop.permute.xlu1 %1782 }
 0x28e   : > { %v1790_v63 = vsel %vm904_vm7, %v1781_v45, %v1783_v62  ;;  %v1791_v0 = vsel %vm904_vm7, %v1783_v62, %v1785_v37  ;;  %v1961_v4 = vpop.permute.xlu0 %1960  ;;  %v1953_v24 = vpop.permute.xlu2 %1952 }
 0x28f   : > { %v1798_v1 = vsel %vm1270_vm10, %v1790_v63, 0  ;;  %v1801_v3 = vsel %vm1270_vm10, %v1791_v0, 0  ;;  %v1966_v6 = vsel %vm1122_vm9, %v1959_v5, %v1961_v4 }
 0x290   : > { %1816 = vmatpush.bf16.msrb.mxu0 %v1798_v1  ;;  %1829 = vmatpush.bf16.msrb.mxu1 %v1801_v3  ;;  %v1978_v9 = vsel %vm1270_vm10, %v1966_v6, 0 }
 0x293   : > { %7998 = vmatmul.msk.bf16.vlgmr.msra.gmra.mxu0 %vm1266_vm11, %v8884_v27  ;;  %7999 = vmatmul.msk.bf16.vlgmr.msra.gmra.mxu1 %vm1266_vm11, %v8884_v27 }
 0x295   : > { %v1876_v7 = vpop.permute.xlu1 %1875 }
 0x296   : > { %v1880_v8 = vsel %vm1013_vm8, %v1874_v51, %v1876_v7  ;;  %8004 = vmatmul.msk.bf16.vlgmr.msrb.gmra.mxu2 %vm1266_vm11, %v1779_v19  ;;  %v1955_v31 = vpop.permute.xlu0 %1954 }
 0x297   : > { %v1894_v11 = vsel %vm1270_vm10, %v1880_v8, 0  ;;  %2016 = vmatpush.bf16.msrb.mxu2 %v1978_v9 }
 0x298   : > { %1942 = vmatpush.bf16.msra.mxu3 %v1894_v11 }
 0x29b   : > { %8005 = vmatmul.msk.bf16.vlgmr.msrb.gmra.mxu3 %vm1266_vm11, %v1779_v19 }
 0x29d   : > { %v1870_v33 = vpop.permute.xlu1 %1869 }
 0x29e   : > { %v1877_v34 = vsel %vm1013_vm8, %v1868_v59, %v1870_v33  ;;  %v1878_v12 = vsel %vm1013_vm8, %v1870_v33, %v1872_v49 }
 0x29f   : > { %v1885_v13 = vsel %vm1270_vm10, %v1877_v34, 0  ;;  %v1888_v14 = vsel %vm1270_vm10, %v1878_v12, 0 }
 0x2a0   : > { %1903 = vmatpush.bf16.msra.mxu0 %v1885_v13  ;;  %1916 = vmatpush.bf16.msra.mxu1 %v1888_v14 }
 0x2a3   : > { %8002 = vmatmul.msk.bf16.vlgmr.msrb.gmra.mxu0 %vm1266_vm11, %v1779_v19  ;;  %8003 = vmatmul.msk.bf16.vlgmr.msrb.gmra.mxu1 %vm1266_vm11, %v1779_v19 }
 0x2a5   : > { %v1963_v32 = vpop.permute.xlu1 %1962 }
 0x2a6   : > { %v1967_v15 = vsel %vm1122_vm9, %v1961_v4, %v1963_v32  ;;  %8008 = vmatmul.msk.bf16.vlgmr.msra.gmra.mxu2 %vm1266_vm11, %v1866_v61 }
 0x2a7   : > { %v1981_v16 = vsel %vm1270_vm10, %v1967_v15, 0 }
 0x2a8   : > { %2029 = vmatpush.bf16.msrb.mxu3 %v1981_v16 }
 0x2ab   : > { %8009 = vmatmul.msk.bf16.vlgmr.msra.gmra.mxu3 %vm1266_vm11, %v1866_v61 }
 0x2ad   : > { %v1957_v18 = vpop.permute.xlu1 %1956 }
 0x2ae   : > { %v1964_v20 = vsel %vm1122_vm9, %v1955_v31, %v1957_v18  ;;  %v1965_v22 = vsel %vm1122_vm9, %v1957_v18, %v1959_v5 }
 0x2af   : > { %v1972_v10 = vsel %vm1270_vm10, %v1964_v20, 0  ;;  %v1975_v23 = vsel %vm1270_vm10, %v1965_v22, 0 }
 0x2b0   : > { %1990 = vmatpush.bf16.msrb.mxu0 %v1972_v10  ;;  %2003 = vmatpush.bf16.msrb.mxu1 %v1975_v23 }
 0x2b3   : > { %8006 = vmatmul.msk.bf16.vlgmr.msra.gmra.mxu0 %vm1266_vm11, %v1866_v61  ;;  %8007 = vmatmul.msk.bf16.vlgmr.msra.gmra.mxu1 %vm1266_vm11, %v1866_v61 }
 0x2b6   : > { %v1318_v26 = vpop.f32.mrf.mxu2  ;;  %8012 = vmatmul.msk.bf16.vlgmr.msrb.gmra.mxu2 %vm1266_vm11, %v1953_v24 }
 0x2bb   : > { %8013 = vmatmul.msk.bf16.vlgmr.msrb.gmra.mxu3 %vm1266_vm11, %v1953_v24 }
 0x2be   : > { %v1320_v27 = vpop.f32.mrf.mxu2  ;;  %v1331_v28 = vpop.f32.mrf.mxu3 }
 0x2c0   : > { %v1292_v17 = vpop.f32.mrf.mxu0  ;;  %v1305_v29 = vpop.f32.mrf.mxu1 }
 0x2c3   : > { %8010 = vmatmul.msk.bf16.vlgmr.msrb.gmra.mxu0 %vm1266_vm11, %v1953_v24  ;;  %8011 = vmatmul.msk.bf16.vlgmr.msrb.gmra.mxu1 %vm1266_vm11, %v1953_v24  ;;  %vm3380_vm11 = vcmask 15360  }
 0x2c6   : > { %v1333_v35 = vpop.f32.mrf.mxu3 }
 0x2c8   : > { %v1399_v21 = vpop.f32.mrf.mxu2  ;;  %v1294_v37 = vpop.f32.mrf.mxu0 }
 0x2c9   : > { %v1400_v36 = vadd.f32 %v1399_v21, %v1318_v26  ;;  %v1307_v39 = vpop.f32.mrf.mxu1 }
 0x2ce   : > { %v1412_v40 = vpop.f32.mrf.mxu3 }
 0x2cf   : > { %v1413_v42 = vadd.f32 %v1412_v40, %v1331_v28 }
 0x2d0   : > { %v1401_v19 = vpop.f32.mrf.mxu2  ;;  %v1373_v25 = vpop.f32.mrf.mxu0 }
 0x2d1   : > { %v1386_v43 = vpop.f32.mrf.mxu1  ;;  %v1374_v44 = vadd.f32 %v1373_v25, %v1292_v17 }
 0x2d2   : > { %v1387_v45 = vadd.f32 %v1386_v43, %v1305_v29 }
 0x2d6   : > { %v1414_v46 = vpop.f32.mrf.mxu3 }
 0x2d8   : > { %v1375_v47 = vpop.f32.mrf.mxu0 }
 0x2d9   : > { %v1388_v49 = vpop.f32.mrf.mxu1  ;;  %v1482_v48 = vpop.f32.mrf.mxu2 }
 0x2da   : > { %v1501_v50 = vadd.f32 %v1482_v48, %v1400_v36 }
 0x2de   : > { %v1495_v51 = vpop.f32.mrf.mxu3 }
 0x2df   : > { %v1502_v52 = vadd.f32 %v1495_v51, %v1413_v42 }
 0x2e0   : > { %v1456_v53 = vpop.f32.mrf.mxu0 }
 0x2e1   : > { %v1469_v54 = vpop.f32.mrf.mxu1  ;;  %v1499_v55 = vadd.f32 %v1456_v53, %v1374_v44  ;;  %v1484_v57 = vpop.f32.mrf.mxu2 }
 0x2e2   : > { %v1500_v56 = vadd.f32 %v1469_v54, %v1387_v45 }
 0x2e6   : > { %v1497_v59 = vpop.f32.mrf.mxu3 }
 0x2e8   : > { %v1458_v60 = vpop.f32.mrf.mxu0 }
 0x2e9   : > { %v1471_v61 = vpop.f32.mrf.mxu1  ;;  %v1569_v62 = vpop.f32.mrf.mxu2 }
 0x2ea   : > { %v1588_v63 = vadd.f32 %v1569_v62, %v1501_v50 }
 0x2ee   : > { %v1582_v0 = vpop.f32.mrf.mxu3 }
 0x2ef   : > { %v1589_v1 = vadd.f32 %v1582_v0, %v1502_v52 }
 0x2f0   : > { %v1543_v3 = vpop.f32.mrf.mxu0 }
 0x2f1   : > { %v1556_v4 = vpop.f32.mrf.mxu1  ;;  %v1586_v5 = vadd.f32 %v1543_v3, %v1499_v55  ;;  %v1571_v7 = vpop.f32.mrf.mxu2 }
 0x2f2   : > { %v1587_v6 = vadd.f32 %v1556_v4, %v1500_v56  ;;  %v2044_v55 = vpop.permute.xlu2 %2043 }
 0x2f6   : > { %v1584_v8 = vpop.f32.mrf.mxu3 }
 0x2f8   : > { %v1545_v9 = vpop.f32.mrf.mxu0 }
 0x2f9   : > { %v1558_v11 = vpop.f32.mrf.mxu1  ;;  %v1654_v33 = vpop.f32.mrf.mxu2 }
 0x2fa   : > { %v1673_v25 = vadd.f32 %v1654_v33, %v1588_v63 }
 0x2fe   : > { %v1667_v34 = vpop.f32.mrf.mxu3 }
 0x2ff   : > { %v1674_v46 = vadd.f32 %v1667_v34, %v1589_v1 }
 0x300   : > { %v1628_v12 = vpop.f32.mrf.mxu0 }
 0x301   : > { %v1641_v13 = vpop.f32.mrf.mxu1  ;;  %v1656_v14 = vpop.f32.mrf.mxu2  ;;  %v1671_v50 = vadd.f32 %v1628_v12, %v1586_v5 }
 0x302   : > { %v1672_v51 = vadd.f32 %v1641_v13, %v1587_v6 }
 0x306   : > { %v1669_v32 = vpop.f32.mrf.mxu3 }
 0x308   : > { %v1630_v15 = vpop.f32.mrf.mxu0 }
 0x309   : > { %v1643_v16 = vpop.f32.mrf.mxu1  ;;  %v1757_v31 = vpop.f32.mrf.mxu2 }
 0x30a   : > { %v1776_v43 = vadd.f32 %v1757_v31, %v1673_v25 }
 0x30e   : > { %v1770_v18 = vpop.f32.mrf.mxu3 }
 0x30f   : > { %v1777_v52 = vadd.f32 %v1770_v18, %v1674_v46 }
 0x310   : > { %v1731_v20 = vpop.f32.mrf.mxu0 }
 0x311   : > { %v1744_v22 = vpop.f32.mrf.mxu1  ;;  %v1759_v10 = vpop.f32.mrf.mxu2  ;;  %v1774_v56 = vadd.f32 %v1731_v20, %v1671_v50 }
 0x312   : > { %v1775_v57 = vadd.f32 %v1744_v22, %v1672_v51 }
 0x316   : > { %v1772_v23 = vpop.f32.mrf.mxu3 }
 0x318   : > { %v1733_v24 = vpop.f32.mrf.mxu0 }
 0x319   : > { %v1746_v26 = vpop.f32.mrf.mxu1  ;;  %v1844_v27 = vpop.f32.mrf.mxu2 }
 0x31a   : > { %v1863_v44 = vadd.f32 %v1844_v27, %v1776_v43 }
 0x31e   : > { %v1857_v28 = vpop.f32.mrf.mxu3 }
 0x31f   : > { %v1864_v59 = vadd.f32 %v1857_v28, %v1777_v52 }
 0x320   : > { %v1818_v17 = vpop.f32.mrf.mxu0 }
 0x321   : > { %v1831_v29 = vpop.f32.mrf.mxu1  ;;  %v1846_v30 = vpop.f32.mrf.mxu2  ;;  %v1861_v60 = vadd.f32 %v1818_v17, %v1774_v56  ;;  %v8024_v56 = vld [vmem:[%s10616_s2 + $0x8] sm:$0x3] }
 0x322   : > { %v1862_v61 = vadd.f32 %v1831_v29, %v1775_v57  ;;  %v2572_v57 = vld [vmem:[#allocation3 + $0xa] sm:$0x3] }
 0x326   : > { %v1859_v35 = vpop.f32.mrf.mxu3 }
 0x328   : > { %v1820_v21 = vpop.f32.mrf.mxu0 }
 0x329   : > { %v1833_v36 = vpop.f32.mrf.mxu1  ;;  %v1931_v37 = vpop.f32.mrf.mxu2 }
 0x32a   : > { %v1950_v47 = vadd.f32 %v1931_v37, %v1863_v44  ;;  %v8973_v36 = vld [vmem:[%s10616_s2 + $0x8] sm:$0x3] }
 0x32b   : > { %v2080_v25 = vunpack.c.l.b16 %v8973_v36 }
 0x32d   : > { %v2081_v43 = vpack.c.b16 %v2080_v25, %v2080_v25  ;;  %v8049_v25 = vld [vmem:[%s10616_s2 + $0x8] sm:$0x3] }
 0x32e   : > { %v1944_v39 = vpop.f32.mrf.mxu3 }
 0x32f   : > { %v1951_v62 = vadd.f32 %v1944_v39, %v1864_v59 }
 0x330   : > { %v1905_v40 = vpop.f32.mrf.mxu0 }
 0x331   : > { %v1918_v42 = vpop.f32.mrf.mxu1  ;;  %v1933_v19 = vpop.f32.mrf.mxu2  ;;  %v1948_v3 = vadd.f32 %v1905_v40, %v1861_v60 }
 0x332   : > { %v1949_v4 = vadd.f32 %v1918_v42, %v1862_v61  ;;  %v2278_v61 = vunpack.c.l.b16 %v8024_v56 }
 0x336   : > { %v1946_v45 = vpop.f32.mrf.mxu3 }
 0x338   : > { %v1907_v49 = vpop.f32.mrf.mxu0 }
 0x339   : > { %v1920_v48 = vpop.f32.mrf.mxu1  ;;  %v2018_v53 = vpop.f32.mrf.mxu2 }
 0x33a   : > { %v2037_v54 = vadd.f32 %v2018_v53, %v1950_v47 }
 0x33c   : > { %v2048_v63 = vadd.f32 %v2044_v55, %v2037_v54 }
 0x33e   : > { %v2031_v0 = vpop.f32.mrf.mxu3  ;;  %v2052_v9 = vmax.f32 %v2048_v63, 0.0 }
 0x33f   : > { %v2038_v1 = vadd.f32 %v2031_v0, %v1951_v62 }
 0x340   : > { %v1992_v7 = vpop.f32.mrf.mxu0  ;;  %v2056_v14 = vmul.f32 %v2052_v9, %v8739_v58 }
 0x341   : > { %v2005_v8 = vpop.f32.mrf.mxu1  ;;  %v2049_v5 = vadd.f32 %v2044_v55, %v2038_v1  ;;  %v2035_v6 = vadd.f32 %v1992_v7, %v1948_v3  ;;  %v2020_v33 = vpop.f32.mrf.mxu2  ;;  %v2279_v3 = vpack.c.b16 %v2278_v61, %v2278_v61 }
 0x342   : > { %v2036_v11 = vadd.f32 %v2005_v8, %v1949_v4  ;;  %v2680_v4 = vld [vmem:[#allocation3 + $0xa] sm:$0x3] }
 0x343   : > { %v2053_v34 = vmax.f32 %v2049_v5, 0.0  ;;  %v2046_v12 = vadd.f32 %v2044_v55, %v2035_v6  ;;  %v8029_v6 = vld [vmem:[%s10616_s2 + $0x8] sm:$0x3]  ;;  %v2788_v33 = vld [vmem:[#allocation3 + $0xa] sm:$0x3] }
 0x344   : > { %v2047_v13 = vadd.f32 %v2044_v55, %v2036_v11  ;;  %v2386_v11 = vunpack.c.l.b16 %v8029_v6 }
 0x345   : > { %v2057_v32 = vmul.f32 %v2053_v34, %v8741_v2  ;;  %v2050_v15 = vmax.f32 %v2046_v12, 0.0 }
 0x346   : > { %v2051_v16 = vmax.f32 %v2047_v13, 0.0  ;;  %v2033_v31 = vpop.f32.mrf.mxu3 }
 0x347   : > { %v2059_v18 = vpack.c.bf16 %v2057_v32, %v2056_v14  ;;  %v2054_v20 = vmul.f32 %v2050_v15, %v8733_v41  ;;  %v2387_v32 = vpack.c.b16 %v2386_v11, %v2386_v11 }
 0x348   : > { %v2055_v22 = vmul.f32 %v2051_v16, %v8731_v38  ;;  %v1994_v10 = vpop.f32.mrf.mxu0  ;;  %v8034_v16 = vld [vmem:[%s10616_s2 + $0x8] sm:$0x3] }
 0x349   : > { %v2007_v23 = vpop.f32.mrf.mxu1  ;;  %v2063_v24 = vrot.slane %v2059_v18, 4  ;;  %v2064_v26 = vrot.slane %v2059_v18, 6  ;;  %v2493_v31 = vunpack.c.l.b16 %v8034_v16  ;;  %v2896_v18 = vld [vmem:[#allocation3 + $0xa] sm:$0x3] }
 0x34a   : > { %v2058_v27 = vpack.c.bf16 %v2055_v22, %v2054_v20 }
 0x34b   : > { %v2071_v17 = vsel %vm2068_vm12, %v2063_v24, %v2064_v26  ;;  %v2494_v22 = vpack.c.b16 %v2493_v31, %v2493_v31 }
 0x34c   : > { %v2062_v28 = vrot.slane %v2058_v27, 2 }
 0x34e   : > { %v2067_v29 = vsel %vm304_vm1, %v2058_v27, %v2062_v28  ;;  %v8039_v27 = vld [vmem:[%s10616_s2 + $0x8] sm:$0x3] }
 0x34f   : > { %v8964_v30 = vsel %vm1270_vm10, %v2067_v29, %v2071_v17  ;;  %v2574_v29 = vunpack.c.l.b16 %v8039_v27 }
 0x350   : > { %2074 = vst [vmem:[#allocation3 + $0x2] sm:$0xff] %v8964_v30 }
 0x357   : > { %v8967_v35 = vld [vmem:[#allocation3] sm:$0xff]  ;;  %v2078_v21 = vld [vmem:[#allocation3 + $0x8] sm:$0x3] }
 0x358   : > { %2085 = vst [vmem:[#allocation1] ss:$4 sm:$0xff] %v8967_v35  ;;  %v2276_v46 = vld [vmem:[#allocation3 + $0x8] sm:$0x3] }
 0x359   : > { %2088 = vst [vmem:[#allocation1 + $0x20] ss:$4 sm:$0xff] %v2078_v21  ;;  %v2384_v52 = vld [vmem:[#allocation3 + $0x8] sm:$0x3] }
 0x35f   : > { %v2089_v37 = vld.sshfl [vmem:[#allocation1] sm:$0xff pattern:$0x73625140]  ;;  %v2091_v39 = vld.sshfl [vmem:[#allocation1 + $0x8] sm:$0xff pattern:$0x73625140] }
 0x360   : > { %v2093_v40 = vld.sshfl [vmem:[#allocation1 + $0x10] sm:$0xff pattern:$0x73625140]  ;;  %v2095_v42 = vld.sshfl [vmem:[#allocation1 + $0x18] sm:$0xff pattern:$0x73625140] }
 0x361   : > { %v2097_v19 = vld.sshfl [vmem:[#allocation1 + $0x20] sm:$0xff pattern:$0x73625140]  ;;  %2180 = vst [vmem:[#allocation1] ss:$4 sm:$0xff] %v8967_v35  ;;  %2105 = vrot.lane.b32.xlu1 %v2095_v42, %s10626_s5  ;;  %2103 = vrot.lane.b32.xlu0 %v2093_v40, %s10626_s5 }
 0x362   : > { %2182 = vst [vmem:[#allocation1 + $0x20] ss:$4 sm:$0xff] %v2078_v21  ;;  %2107 = vrot.lane.b32.xlu2 %v2097_v19, %s10626_s5  ;;  %v8044_v40 = vld [vmem:[%s10616_s2 + $0x8] sm:$0x3] }
 0x363   : > { %v2682_v42 = vunpack.c.l.b16 %v8044_v40 }
 0x365   : > { %v2683_v19 = vpack.c.b16 %v2682_v42, %v2682_v42 }
 0x368   : > { %v2183_v44 = vld.sshfl [vmem:[#allocation1] sm:$0xff pattern:$0x73625140]  ;;  %v2185_v45 = vld.sshfl [vmem:[#allocation1 + $0x8] sm:$0xff pattern:$0x73625140] }
 0x369   : > { %v2187_v47 = vld.sshfl [vmem:[#allocation1 + $0x10] sm:$0xff pattern:$0x73625140]  ;;  %v2189_v49 = vld.sshfl [vmem:[#allocation1 + $0x18] sm:$0xff pattern:$0x73625140]  ;;  %2082 = vrot.lane.b32.xlu0 %v2081_v43, %s8408_s6  ;;  %2099 = vrot.lane.b32.xlu1 %v2089_v37, %s10626_s5  ;;  %v2790_v43 = vunpack.c.l.b16 %v8049_v25 }
 0x36a   : > { %v2191_v48 = vld.sshfl [vmem:[#allocation1 + $0x20] sm:$0xff pattern:$0x73625140]  ;;  %2283 = vst [vmem:[#allocation1] ss:$4 sm:$0xff] %v8967_v35  ;;  %2101 = vrot.lane.b32.xlu2 %v2091_v39, %s10626_s5  ;;  %v2575_v39 = vpack.c.b16 %v2574_v29, %v2574_v29  ;;  %s8427_s5 = smov 40  }
 0x36b   : > { %2286 = vst [vmem:[#allocation1 + $0x20] ss:$4 sm:$0xff] %v2276_v46 }
 0x371   : > { %v2287_v50 = vld.sshfl [vmem:[#allocation1] sm:$0xff pattern:$0x73625140]  ;;  %v2289_v51 = vld.sshfl [vmem:[#allocation1 + $0x8] sm:$0xff pattern:$0x73625140]  ;;  %2199 = vrot.lane.b32.xlu1 %v2189_v49, %s8409_s7  ;;  %2197 = vrot.lane.b32.xlu0 %v2187_v47, %s8409_s7 }
 0x372   : > { %v2291_v53 = vld.sshfl [vmem:[#allocation1 + $0x10] sm:$0xff pattern:$0x73625140]  ;;  %v2293_v54 = vld.sshfl [vmem:[#allocation1 + $0x18] sm:$0xff pattern:$0x73625140]  ;;  %2201 = vrot.lane.b32.xlu2 %v2191_v48, %s8409_s7 }
 0x373   : > { %v2295_v55 = vld.sshfl [vmem:[#allocation1 + $0x20] sm:$0xff pattern:$0x73625140]  ;;  %2391 = vst [vmem:[#allocation1] ss:$4 sm:$0xff] %v8967_v35 }
 0x374   : > { %2394 = vst [vmem:[#allocation1 + $0x20] ss:$4 sm:$0xff] %v2384_v52  ;;  %v8054_v47 = vld [vmem:[%s10616_s2 + $0x8] sm:$0x3] }
 0x379   : > { %2195 = vrot.lane.b32.xlu1 %v2185_v45, %s8409_s7  ;;  %2193 = vrot.lane.b32.xlu0 %v2183_v44, %s8409_s7  ;;  %v2791_v45 = vpack.c.b16 %v2790_v43, %v2790_v43 }
 0x37a   : > { %v2395_v59 = vld.sshfl [vmem:[#allocation1] sm:$0xff pattern:$0x73625140]  ;;  %v2397_v60 = vld.sshfl [vmem:[#allocation1 + $0x8] sm:$0xff pattern:$0x73625140]  ;;  %2301 = vrot.lane.b32.xlu2 %v2291_v53, %s8410_s8 }
 0x37b   : > { %v2399_v62 = vld.sshfl [vmem:[#allocation1 + $0x10] sm:$0xff pattern:$0x73625140]  ;;  %v2401_v63 = vld.sshfl [vmem:[#allocation1 + $0x18] sm:$0xff pattern:$0x73625140] }
 0x37c   : > { %v2403_v0 = vld.sshfl [vmem:[#allocation1 + $0x20] sm:$0xff pattern:$0x73625140]  ;;  %2498 = vst [vmem:[#allocation1] ss:$4 sm:$0xff] %v8964_v30 }
 0x37d   : > { %2582 = vst [vmem:[#allocation1 + $0x20] ss:$4 sm:$0xff] %v2572_v57 }
 0x381   : > { %2305 = vrot.lane.b32.xlu1 %v2295_v55, %s8410_s8  ;;  %2303 = vrot.lane.b32.xlu0 %v2293_v54, %s8410_s8 }
 0x382   : > { %2280 = vrot.lane.b32.xlu2 %v2279_v3, %s8411_s11 }
 0x383   : > { %v8998_v1 = vld.sshfl [vmem:[#allocation1] sm:$0xff pattern:$0x73625140]  ;;  %v9000_v7 = vld.sshfl [vmem:[#allocation1 + $0x8] sm:$0xff pattern:$0x73625140] }
 0x384   : > { %v9002_v8 = vld.sshfl [vmem:[#allocation1 + $0x10] sm:$0xff pattern:$0x73625140]  ;;  %v9004_v9 = vld.sshfl [vmem:[#allocation1 + $0x18] sm:$0xff pattern:$0x73625140] }
 0x385   : > { %v2591_v5 = vld.sshfl [vmem:[#allocation1 + $0x20] sm:$0xff pattern:$0x73625140]  ;;  %2579 = vst [vmem:[#allocation1] ss:$4 sm:$0xff] %v8964_v30 }
 0x386   : > { %2690 = vst [vmem:[#allocation1 + $0x20] ss:$4 sm:$0xff] %v2680_v4 }
 0x389   : > { %2299 = vrot.lane.b32.xlu1 %v2289_v51, %s8410_s8  ;;  %2297 = vrot.lane.b32.xlu0 %v2287_v50, %s8410_s8  ;;  %v2898_v51 = vunpack.c.l.b16 %v8054_v47 }
 0x38a   : > { %2409 = vrot.lane.b32.xlu2 %v2399_v62, %s8412_s14 }
 0x38b   : > { %v2899_v62 = vpack.c.b16 %v2898_v51, %v2898_v51  ;;  %v2512_v51 = vsel %vm304_vm1, %v9004_v9, 0  ;;  %v2508_v9 = vsel %vm304_vm1, %v9000_v7, 0 }
 0x38c   : > { %v2589_v34 = vld.sshfl [vmem:[#allocation1 + $0x18] sm:$0xff pattern:$0x73625140]  ;;  %v2587_v12 = vld.sshfl [vmem:[#allocation1 + $0x10] sm:$0xff pattern:$0x73625140] }
 0x38d   : > { %v2699_v13 = vld.sshfl [vmem:[#allocation1 + $0x20] sm:$0xff pattern:$0x73625140]  ;;  %v2585_v14 = vld.sshfl [vmem:[#allocation1 + $0x8] sm:$0xff pattern:$0x73625140] }
 0x38e   : > { %2798 = vst [vmem:[#allocation1 + $0x20] ss:$4 sm:$0xff] %v2788_v33  ;;  %v2583_v15 = vld.sshfl [vmem:[#allocation1] sm:$0xff pattern:$0x73625140] }
 0x38f   : > { %2687 = vst [vmem:[#allocation1] ss:$4 sm:$0xff] %v8964_v30  ;;  %v8059_v33 = vld [vmem:[%s10617_s3 + $0x10] sm:$0xf] }
 0x391   : > { %2413 = vrot.lane.b32.xlu1 %v2403_v0, %s8412_s14  ;;  %2411 = vrot.lane.b32.xlu0 %v2401_v63, %s8412_s14 }
 0x392   : > { %2388 = vrot.lane.b32.xlu2 %v2387_v32, %s8413_s24 }
 0x395   : > { %v2807_v20 = vld.sshfl [vmem:[#allocation1 + $0x20] sm:$0xff pattern:$0x73625140] }
 0x396   : > { %2906 = vst [vmem:[#allocation1 + $0x20] ss:$4 sm:$0xff] %v2896_v18  ;;  %v2697_v10 = vld.sshfl [vmem:[#allocation1 + $0x18] sm:$0xff pattern:$0x73625140] }
 0x397   : > { %v2695_v23 = vld.sshfl [vmem:[#allocation1 + $0x10] sm:$0xff pattern:$0x73625140]  ;;  %v2693_v24 = vld.sshfl [vmem:[#allocation1 + $0x8] sm:$0xff pattern:$0x73625140] }
 0x398   : > { %v2691_v26 = vld.sshfl [vmem:[#allocation1] sm:$0xff pattern:$0x73625140] }
 0x399   : > { %2407 = vrot.lane.b32.xlu1 %v2397_v60, %s8412_s14  ;;  %2405 = vrot.lane.b32.xlu0 %v2395_v59, %s8412_s14  ;;  %2795 = vst [vmem:[#allocation1] ss:$4 sm:$0xff] %v8964_v30 }
 0x39a   : > { %2495 = vrot.lane.b32.xlu2 %v2494_v22, %s8414_s25 }
 0x39d   : > { %v2915_v49 = vld.sshfl [vmem:[#allocation1 + $0x20] sm:$0xff pattern:$0x73625140] }
 0x3a0   : > { %v2805_v28 = vld.sshfl [vmem:[#allocation1 + $0x18] sm:$0xff pattern:$0x73625140]  ;;  %v2803_v17 = vld.sshfl [vmem:[#allocation1 + $0x10] sm:$0xff pattern:$0x73625140] }
 0x3a1   : > { %2599 = vrot.lane.b32.xlu1 %v2589_v34, %s10636_s29  ;;  %2597 = vrot.lane.b32.xlu0 %v2587_v12, %s10636_s29  ;;  %v2801_v21 = vld.sshfl [vmem:[#allocation1 + $0x8] sm:$0xff pattern:$0x73625140]  ;;  %v2799_v37 = vld.sshfl [vmem:[#allocation1] sm:$0xff pattern:$0x73625140] }
 0x3a2   : > { %2601 = vrot.lane.b32.xlu2 %v2591_v5, %s10636_s29  ;;  %2903 = vst [vmem:[#allocation1] ss:$4 sm:$0xff] %v8964_v30 }
 0x3a9   : > { %2576 = vrot.lane.b32.xlu0 %v2575_v39, %s8416_s30  ;;  %2593 = vrot.lane.b32.xlu1 %v2583_v15, %s10636_s29  ;;  %v2913_v48 = vld.sshfl [vmem:[#allocation1 + $0x18] sm:$0xff pattern:$0x73625140]  ;;  %v2911_v50 = vld.sshfl [vmem:[#allocation1 + $0x10] sm:$0xff pattern:$0x73625140] }
 0x3aa   : > { %2595 = vrot.lane.b32.xlu2 %v2585_v14, %s10636_s29  ;;  %v2907_v63 = vld.sshfl [vmem:[#allocation1] sm:$0xff pattern:$0x73625140]  ;;  %v2909_v0 = vld.sshfl [vmem:[#allocation1 + $0x8] sm:$0xff pattern:$0x73625140] }
 0x3b1   : > { %2707 = vrot.lane.b32.xlu1 %v2697_v10, %s10630_s12  ;;  %2705 = vrot.lane.b32.xlu0 %v2695_v23, %s10630_s12 }
 0x3b2   : > { %2709 = vrot.lane.b32.xlu2 %v2699_v13, %s10630_s12 }
 0x3b9   : > { %2684 = vrot.lane.b32.xlu0 %v2683_v19, %s8418_s13  ;;  %2701 = vrot.lane.b32.xlu1 %v2691_v26, %s10630_s12 }
 0x3ba   : > { %2703 = vrot.lane.b32.xlu2 %v2693_v24, %s10630_s12  ;;  %s10641_s12 = smov 109  }
 0x3bc   : > { %v2108_v30 = vpop.permute.xlu2 %2107 }
 0x3c1   : > { %2815 = vrot.lane.b32.xlu1 %v2805_v28, %s8416_s30  ;;  %2813 = vrot.lane.b32.xlu0 %v2803_v17, %s8416_s30 }
 0x3c2   : > { %2817 = vrot.lane.b32.xlu2 %v2807_v20, %s8416_s30 }
 0x3c4   : > { %v2102_v44 = vpop.permute.xlu2 %2101 }
 0x3c9   : > { %2792 = vrot.lane.b32.xlu0 %v2791_v45, %s8419_s26  ;;  %2809 = vrot.lane.b32.xlu1 %v2799_v37, %s8416_s30 }
 0x3ca   : > { %2811 = vrot.lane.b32.xlu2 %v2801_v21, %s8416_s30 }
 0x3cc   : > { %v2202_v46 = vpop.permute.xlu2 %2201 }
 0x3d1   : > { %2923 = vrot.lane.b32.xlu1 %v2913_v48, %s10628_s10  ;;  %2921 = vrot.lane.b32.xlu0 %v2911_v50, %s10628_s10  ;;  %v2510_v50 = vsel %vm304_vm1, %v9002_v8, 0  ;;  %v2506_v8 = vsel %vm304_vm1, %v8998_v1, 0 }
 0x3d2   : > { %2925 = vrot.lane.b32.xlu2 %v2915_v49, %s10628_s10 }
 0x3d3   : > { %v2106_v52 = vpop.permute.xlu1 %2105  ;;  %v2104_v53 = vpop.permute.xlu0 %2103 }
 0x3d4   : > { %v2112_v54 = vsel %vm295_vm0, %v2106_v52, %v2108_v30  ;;  %v2110_v55 = vsel %vm295_vm0, %v2102_v44, %v2104_v53  ;;  %v2111_v56 = vsel %vm295_vm0, %v2104_v53, %v2106_v52  ;;  %v2302_v57 = vpop.permute.xlu2 %2301 }
 0x3d5   : > { %v2120_v59 = vsel %vm304_vm1, %v2110_v55, 0  ;;  %v2123_v60 = vsel %vm304_vm1, %v2111_v56, 0  ;;  %v2126_v61 = vsel %vm304_vm1, %v2112_v54, 0 }
 0x3d6   : > { %2148 = vmatpush.bf16.msra.mxu1 %v2120_v59  ;;  %2161 = vmatpush.bf16.msra.mxu2 %v2123_v60 }
 0x3d7   : > { %2174 = vmatpush.bf16.msra.mxu3 %v2126_v61 }
 0x3d9   : > { %2900 = vrot.lane.b32.xlu0 %v2899_v62, %s10639_s28  ;;  %2917 = vrot.lane.b32.xlu1 %v2907_v63, %s10628_s10 }
 0x3da   : > { %2919 = vrot.lane.b32.xlu2 %v2909_v0, %s10628_s10  ;;  %s10644_s10 = smov 107  }
 0x3db   : > { %v2083_v3 = vpop.permute.xlu0 %2082  ;;  %v2100_v4 = vpop.permute.xlu1 %2099 }
 0x3dc   : > { %v2109_v5 = vsel %vm295_vm0, %v2100_v4, %v2102_v44  ;;  %v2281_v6 = vpop.permute.xlu2 %2280  ;;  %8017 = vmatmul.msk.bf16.vlgmr.msra.gmra.mxu1 %vm300_vm2, %v2083_v3  ;;  %8018 = vmatmul.msk.bf16.vlgmr.msra.gmra.mxu2 %vm300_vm2, %v2083_v3 }
 0x3dd   : > { %v2117_v11 = vsel %vm304_vm1, %v2109_v5, 0  ;;  %8019 = vmatmul.msk.bf16.vlgmr.msra.gmra.mxu3 %vm300_vm2, %v2083_v3 }
 0x3de   : > { %2135 = vmatpush.bf16.msra.mxu0 %v2117_v11 }
 0x3e1   : > { %8016 = vmatmul.msk.bf16.vlgmr.msra.gmra.mxu0 %vm300_vm2, %v2083_v3  ;;  %3006 = vperm.xlu0 %8362, %v8059_v33  }
 0x3e3   : > { %v2200_v34 = vpop.permute.xlu1 %2199  ;;  %v2198_v12 = vpop.permute.xlu0 %2197 }
 0x3e4   : > { %v2206_v13 = vsel %vm392_vm3, %v2200_v34, %v2202_v46  ;;  %v2205_v14 = vsel %vm392_vm3, %v2198_v12, %v2200_v34  ;;  %v2410_v32 = vpop.permute.xlu2 %2409 }
 0x3e5   : > { %v2217_v15 = vsel %vm304_vm1, %v2205_v14, 0  ;;  %v2220_v16 = vsel %vm304_vm1, %v2206_v13, 0 }
 0x3e6   : > { %2255 = vmatpush.bf16.msrb.mxu2 %v2217_v15  ;;  %2268 = vmatpush.bf16.msrb.mxu3 %v2220_v16 }
 0x3eb   : > { %v2196_v31 = vpop.permute.xlu1 %2195  ;;  %v2194_v18 = vpop.permute.xlu0 %2193 }
 0x3ec   : > { %v2204_v20 = vsel %vm392_vm3, %v2196_v31, %v2198_v12  ;;  %v2203_v22 = vsel %vm392_vm3, %v2194_v18, %v2196_v31  ;;  %v2389_v10 = vpop.permute.xlu2 %2388  ;;  %8022 = vmatmul.msk.bf16.vlgmr.msrb.gmra.mxu2 %vm300_vm2, %v8973_v36 }
 0x3ed   : > { %v2211_v23 = vsel %vm304_vm1, %v2203_v22, 0  ;;  %8023 = vmatmul.msk.bf16.vlgmr.msrb.gmra.mxu3 %vm300_vm2, %v8973_v36  ;;  %v2214_v24 = vsel %vm304_vm1, %v2204_v20, 0 }
 0x3ee   : > { %2229 = vmatpush.bf16.msrb.mxu0 %v2211_v23  ;;  %2242 = vmatpush.bf16.msrb.mxu1 %v2214_v24 }
 0x3f1   : > { %8020 = vmatmul.msk.bf16.vlgmr.msrb.gmra.mxu0 %vm300_vm2, %v8973_v36  ;;  %8021 = vmatmul.msk.bf16.vlgmr.msrb.gmra.mxu1 %vm300_vm2, %v8973_v36 }
 0x3f3   : > { %v2306_v26 = vpop.permute.xlu1 %2305  ;;  %v2304_v27 = vpop.permute.xlu0 %2303 }
 0x3f4   : > { %v2309_v28 = vsel %vm497_vm4, %v2302_v57, %v2304_v27  ;;  %v2310_v17 = vsel %vm497_vm4, %v2304_v27, %v2306_v26  ;;  %v9094_v29 = vpop.permute.xlu2 %2495 }
 0x3f5   : > { %v2321_v21 = vsel %vm304_vm1, %v2309_v28, 0  ;;  %v2324_v37 = vsel %vm304_vm1, %v2310_v17, 0 }
 0x3f6   : > { %2359 = vmatpush.bf16.msra.mxu2 %v2321_v21  ;;  %2372 = vmatpush.bf16.msra.mxu3 %v2324_v37 }
 0x3fb   : > { %v2300_v39 = vpop.permute.xlu1 %2299  ;;  %v2298_v40 = vpop.permute.xlu0 %2297 }
 0x3fc   : > { %v2308_v42 = vsel %vm497_vm4, %v2300_v39, %v2302_v57  ;;  %v2307_v36 = vsel %vm497_vm4, %v2298_v40, %v2300_v39  ;;  %v2602_v19 = vpop.permute.xlu2 %2601  ;;  %8027 = vmatmul.msk.bf16.vlgmr.msra.gmra.mxu2 %vm300_vm2, %v2281_v6 }
 0x3fd   : > { %v2315_v30 = vsel %vm304_vm1, %v2307_v36, 0  ;;  %8028 = vmatmul.msk.bf16.vlgmr.msra.gmra.mxu3 %vm300_vm2, %v2281_v6  ;;  %v2318_v25 = vsel %vm304_vm1, %v2308_v42, 0 }
 0x3fe   : > { %2333 = vmatpush.bf16.msra.mxu0 %v2315_v30  ;;  %2346 = vmatpush.bf16.msra.mxu1 %v2318_v25 }
 0x401   : > { %8025 = vmatmul.msk.bf16.vlgmr.msra.gmra.mxu0 %vm300_vm2, %v2281_v6  ;;  %8026 = vmatmul.msk.bf16.vlgmr.msra.gmra.mxu1 %vm300_vm2, %v2281_v6 }
 0x403   : > { %v2414_v43 = vpop.permute.xlu1 %2413  ;;  %v2412_v44 = vpop.permute.xlu0 %2411 }
 0x404   : > { %v2417_v45 = vsel %vm606_vm5, %v2410_v32, %v2412_v44  ;;  %v2418_v46 = vsel %vm606_vm5, %v2412_v44, %v2414_v43  ;;  %v2596_v48 = vpop.permute.xlu2 %2595 }
 0x405   : > { %v2429_v47 = vsel %vm304_vm1, %v2417_v45, 0  ;;  %v2432_v49 = vsel %vm304_vm1, %v2418_v46, 0 }
 0x406   : > { %2467 = vmatpush.bf16.msrb.mxu2 %v2429_v47  ;;  %2480 = vmatpush.bf16.msrb.mxu3 %v2432_v49 }
 0x40a   : > { %2547 = vmatpush.bf16.msra.mxu2 %v2510_v50  ;;  %2560 = vmatpush.bf16.msra.mxu3 %v2512_v51 }
 0x40b   : > { %v2408_v52 = vpop.permute.xlu1 %2407  ;;  %v2406_v53 = vpop.permute.xlu0 %2405 }
 0x40c   : > { %v2416_v54 = vsel %vm606_vm5, %v2408_v52, %v2410_v32  ;;  %v2415_v55 = vsel %vm606_vm5, %v2406_v53, %v2408_v52  ;;  %8032 = vmatmul.msk.bf16.vlgmr.msrb.gmra.mxu2 %vm300_vm2, %v2389_v10  ;;  %v2710_v59 = vpop.permute.xlu2 %2709 }
 0x40d   : > { %v2423_v56 = vsel %vm304_vm1, %v2415_v55, 0  ;;  %8033 = vmatmul.msk.bf16.vlgmr.msrb.gmra.mxu3 %vm300_vm2, %v2389_v10  ;;  %v2426_v57 = vsel %vm304_vm1, %v2416_v54, 0 }
 0x40e   : > { %2441 = vmatpush.bf16.msrb.mxu0 %v2423_v56  ;;  %2454 = vmatpush.bf16.msrb.mxu1 %v2426_v57 }
 0x411   : > { %8030 = vmatmul.msk.bf16.vlgmr.msrb.gmra.mxu0 %vm300_vm2, %v2389_v10  ;;  %8031 = vmatmul.msk.bf16.vlgmr.msrb.gmra.mxu1 %vm300_vm2, %v2389_v10 }
 0x412   : > { %2521 = vmatpush.bf16.msra.mxu0 %v2506_v8  ;;  %2534 = vmatpush.bf16.msra.mxu1 %v2508_v9 }
 0x413   : > { %v2600_v60 = vpop.permute.xlu1 %2599  ;;  %v2598_v61 = vpop.permute.xlu0 %2597 }
 0x414   : > { %v2606_v62 = vsel %vm795_vm6, %v2600_v60, %v2602_v19  ;;  %v2604_v63 = vsel %vm795_vm6, %v2596_v48, %v2598_v61  ;;  %v2605_v0 = vsel %vm795_vm6, %v2598_v61, %v2600_v60  ;;  %v2704_v4 = vpop.permute.xlu2 %2703 }
 0x415   : > { %v2614_v1 = vsel %vm304_vm1, %v2604_v63, 0  ;;  %v2617_v3 = vsel %vm304_vm1, %v2605_v0, 0  ;;  %v2620_v7 = vsel %vm304_vm1, %v2606_v62, 0 }
 0x416   : > { %2642 = vmatpush.bf16.msrb.mxu1 %v2614_v1  ;;  %2655 = vmatpush.bf16.msrb.mxu2 %v2617_v3 }
 0x417   : > { %2668 = vmatpush.bf16.msrb.mxu3 %v2620_v7 }
 0x41b   : > { %v2577_v5 = vpop.permute.xlu0 %2576  ;;  %v2594_v6 = vpop.permute.xlu1 %2593 }
 0x41c   : > { %v2603_v11 = vsel %vm795_vm6, %v2594_v6, %v2596_v48  ;;  %8037 = vmatmul.msk.bf16.vlgmr.msra.gmra.mxu2 %vm300_vm2, %v9094_v29  ;;  %v2818_v13 = vpop.permute.xlu2 %2817 }
 0x41d   : > { %v2611_v33 = vsel %vm304_vm1, %v2603_v11, 0  ;;  %8038 = vmatmul.msk.bf16.vlgmr.msra.gmra.mxu3 %vm300_vm2, %v9094_v29 }
 0x41e   : > { %2629 = vmatpush.bf16.msrb.mxu0 %v2611_v33 }
 0x421   : > { %8035 = vmatmul.msk.bf16.vlgmr.msra.gmra.mxu0 %vm300_vm2, %v9094_v29  ;;  %8036 = vmatmul.msk.bf16.vlgmr.msra.gmra.mxu1 %vm300_vm2, %v9094_v29 }
 0x423   : > { %v2708_v34 = vpop.permute.xlu1 %2707  ;;  %v2706_v12 = vpop.permute.xlu0 %2705 }
 0x424   : > { %v2714_v14 = vsel %vm904_vm7, %v2708_v34, %v2710_v59  ;;  %v2712_v32 = vsel %vm904_vm7, %v2704_v4, %v2706_v12  ;;  %v2713_v15 = vsel %vm904_vm7, %v2706_v12, %v2708_v34  ;;  %v2812_v24 = vpop.permute.xlu2 %2811 }
 0x425   : > { %v2722_v16 = vsel %vm304_vm1, %v2712_v32, 0  ;;  %v2725_v31 = vsel %vm304_vm1, %v2713_v15, 0  ;;  %v2728_v18 = vsel %vm304_vm1, %v2714_v14, 0 }
 0x426   : > { %2750 = vmatpush.bf16.msra.mxu1 %v2722_v16  ;;  %2763 = vmatpush.bf16.msra.mxu2 %v2725_v31 }
 0x427   : > { %2776 = vmatpush.bf16.msra.mxu3 %v2728_v18 }
 0x42b   : > { %v2685_v20 = vpop.permute.xlu0 %2684  ;;  %v2702_v22 = vpop.permute.xlu1 %2701 }
 0x42c   : > { %v2711_v10 = vsel %vm904_vm7, %v2702_v22, %v2704_v4  ;;  %8042 = vmatmul.msk.bf16.vlgmr.msrb.gmra.mxu2 %vm300_vm2, %v2577_v5  ;;  %v2926_v40 = vpop.permute.xlu2 %2925 }
 0x42d   : > { %v2719_v23 = vsel %vm304_vm1, %v2711_v10, 0  ;;  %8043 = vmatmul.msk.bf16.vlgmr.msrb.gmra.mxu3 %vm300_vm2, %v2577_v5 }
 0x42e   : > { %2737 = vmatpush.bf16.msra.mxu0 %v2719_v23 }
 0x431   : > { %8040 = vmatmul.msk.bf16.vlgmr.msrb.gmra.mxu0 %vm300_vm2, %v2577_v5  ;;  %8041 = vmatmul.msk.bf16.vlgmr.msrb.gmra.mxu1 %vm300_vm2, %v2577_v5 }
 0x433   : > { %v2816_v26 = vpop.permute.xlu1 %2815  ;;  %v2814_v27 = vpop.permute.xlu0 %2813 }
 0x434   : > { %v2822_v28 = vsel %vm1013_vm8, %v2816_v26, %v2818_v13  ;;  %v2820_v17 = vsel %vm1013_vm8, %v2812_v24, %v2814_v27  ;;  %v2821_v29 = vsel %vm1013_vm8, %v2814_v27, %v2816_v26  ;;  %v2920_v25 = vpop.permute.xlu2 %2919 }
 0x435   : > { %v2830_v21 = vsel %vm304_vm1, %v2820_v17, 0  ;;  %v2833_v37 = vsel %vm304_vm1, %v2821_v29, 0  ;;  %v2836_v39 = vsel %vm304_vm1, %v2822_v28, 0 }
 0x436   : > { %2858 = vmatpush.bf16.msrb.mxu1 %v2830_v21  ;;  %2871 = vmatpush.bf16.msrb.mxu2 %v2833_v37 }
 0x437   : > { %2884 = vmatpush.bf16.msrb.mxu3 %v2836_v39 }
 0x43b   : > { %v2793_v42 = vpop.permute.xlu0 %2792  ;;  %v2810_v36 = vpop.permute.xlu1 %2809 }
 0x43c   : > { %v2819_v19 = vsel %vm1013_vm8, %v2810_v36, %v2812_v24  ;;  %8047 = vmatmul.msk.bf16.vlgmr.msra.gmra.mxu2 %vm300_vm2, %v2685_v20 }
 0x43d   : > { %v2827_v30 = vsel %vm304_vm1, %v2819_v19, 0  ;;  %8048 = vmatmul.msk.bf16.vlgmr.msra.gmra.mxu3 %vm300_vm2, %v2685_v20 }
 0x43e   : > { %2845 = vmatpush.bf16.msrb.mxu0 %v2827_v30 }
 0x441   : > { %8045 = vmatmul.msk.bf16.vlgmr.msra.gmra.mxu0 %vm300_vm2, %v2685_v20  ;;  %8046 = vmatmul.msk.bf16.vlgmr.msra.gmra.mxu1 %vm300_vm2, %v2685_v20 }
 0x443   : > { %v2924_v43 = vpop.permute.xlu1 %2923  ;;  %v2922_v44 = vpop.permute.xlu0 %2921 }
 0x444   : > { %v2930_v45 = vsel %vm1122_vm9, %v2924_v43, %v2926_v40  ;;  %v2928_v46 = vsel %vm1122_vm9, %v2920_v25, %v2922_v44  ;;  %v2929_v47 = vsel %vm1122_vm9, %v2922_v44, %v2924_v43 }
 0x445   : > { %v2938_v49 = vsel %vm304_vm1, %v2928_v46, 0  ;;  %v2941_v48 = vsel %vm304_vm1, %v2929_v47, 0  ;;  %v2944_v50 = vsel %vm304_vm1, %v2930_v45, 0 }
 0x446   : > { %2966 = vmatpush.bf16.msra.mxu1 %v2938_v49  ;;  %2979 = vmatpush.bf16.msra.mxu2 %v2941_v48 }
 0x447   : > { %2992 = vmatpush.bf16.msra.mxu3 %v2944_v50 }
 0x44b   : > { %v2918_v51 = vpop.permute.xlu1 %2917  ;;  %v2901_v55 = vpop.permute.xlu0 %2900 }
 0x44c   : > { %v2927_v52 = vsel %vm1122_vm9, %v2918_v51, %v2920_v25  ;;  %8052 = vmatmul.msk.bf16.vlgmr.msrb.gmra.mxu2 %vm300_vm2, %v2793_v42 }
 0x44d   : > { %v2935_v53 = vsel %vm304_vm1, %v2927_v52, 0  ;;  %8053 = vmatmul.msk.bf16.vlgmr.msrb.gmra.mxu3 %vm300_vm2, %v2793_v42 }
 0x44e   : > { %2953 = vmatpush.bf16.msra.mxu0 %v2935_v53 }
 0x451   : > { %8050 = vmatmul.msk.bf16.vlgmr.msrb.gmra.mxu0 %vm300_vm2, %v2793_v42  ;;  %8051 = vmatmul.msk.bf16.vlgmr.msrb.gmra.mxu1 %vm300_vm2, %v2793_v42 }
 0x459   : > { %v2150_v54 = vpop.f32.mrf.mxu1 }
 0x45c   : > { %8057 = vmatmul.msk.bf16.vlgmr.msra.gmra.mxu2 %vm300_vm2, %v2901_v55 }
 0x45d   : > { %8058 = vmatmul.msk.bf16.vlgmr.msra.gmra.mxu3 %vm300_vm2, %v2901_v55 }
 0x45e   : > { %v2137_v56 = vpop.f32.mrf.mxu0 }
 0x45f   : > { %v2163_v57 = vpop.f32.mrf.mxu2 }
 0x460   : > { %v2176_v8 = vpop.f32.mrf.mxu3 }
 0x461   : > { %v2152_v9 = vpop.f32.mrf.mxu1  ;;  %8055 = vmatmul.msk.bf16.vlgmr.msra.gmra.mxu0 %vm300_vm2, %v2901_v55  ;;  %8056 = vmatmul.msk.bf16.vlgmr.msra.gmra.mxu1 %vm300_vm2, %v2901_v55 }
 0x466   : > { %v2139_v59 = vpop.f32.mrf.mxu0 }
 0x467   : > { %v2165_v60 = vpop.f32.mrf.mxu2 }
 0x468   : > { %v2178_v61 = vpop.f32.mrf.mxu3 }
 0x46e   : > { %v2231_v62 = vpop.f32.mrf.mxu0  ;;  %v2244_v63 = vpop.f32.mrf.mxu1 }
 0x46f   : > { %v2232_v0 = vadd.f32 %v2231_v62, %v2137_v56  ;;  %v2245_v1 = vadd.f32 %v2244_v63, %v2150_v54  ;;  %v2257_v3 = vpop.f32.mrf.mxu2 }
 0x470   : > { %v2258_v7 = vadd.f32 %v2257_v3, %v2163_v57  ;;  %v2270_v4 = vpop.f32.mrf.mxu3 }
 0x471   : > { %v2271_v5 = vadd.f32 %v2270_v4, %v2176_v8 }
 0x476   : > { %v2233_v6 = vpop.f32.mrf.mxu0  ;;  %v2246_v11 = vpop.f32.mrf.mxu1 }
 0x477   : > { %v2259_v33 = vpop.f32.mrf.mxu2 }
 0x478   : > { %v2272_v34 = vpop.f32.mrf.mxu3 }
 0x47e   : > { %v2335_v12 = vpop.f32.mrf.mxu0  ;;  %v2348_v13 = vpop.f32.mrf.mxu1 }
 0x47f   : > { %v2378_v14 = vadd.f32 %v2335_v12, %v2232_v0  ;;  %v2379_v32 = vadd.f32 %v2348_v13, %v2245_v1  ;;  %v2361_v15 = vpop.f32.mrf.mxu2 }
 0x480   : > { %v2380_v16 = vadd.f32 %v2361_v15, %v2258_v7  ;;  %v2374_v31 = vpop.f32.mrf.mxu3 }
 0x481   : > { %v2381_v18 = vadd.f32 %v2374_v31, %v2271_v5 }
 0x486   : > { %v2337_v20 = vpop.f32.mrf.mxu0  ;;  %v2350_v22 = vpop.f32.mrf.mxu1 }
 0x487   : > { %v2363_v10 = vpop.f32.mrf.mxu2 }
 0x488   : > { %v2376_v23 = vpop.f32.mrf.mxu3 }
 0x48e   : > { %v2443_v24 = vpop.f32.mrf.mxu0  ;;  %v2456_v26 = vpop.f32.mrf.mxu1 }
 0x48f   : > { %v2486_v27 = vadd.f32 %v2443_v24, %v2378_v14  ;;  %v2487_v28 = vadd.f32 %v2456_v26, %v2379_v32  ;;  %v2469_v17 = vpop.f32.mrf.mxu2 }
 0x490   : > { %v2488_v29 = vadd.f32 %v2469_v17, %v2380_v16  ;;  %v2482_v21 = vpop.f32.mrf.mxu3 }
 0x491   : > { %v2489_v37 = vadd.f32 %v2482_v21, %v2381_v18 }
 0x496   : > { %v2445_v39 = vpop.f32.mrf.mxu0  ;;  %v2458_v40 = vpop.f32.mrf.mxu1 }
 0x497   : > { %v2471_v42 = vpop.f32.mrf.mxu2 }
 0x498   : > { %v2484_v36 = vpop.f32.mrf.mxu3 }
 0x49e   : > { %v2523_v19 = vpop.f32.mrf.mxu0  ;;  %v2536_v30 = vpop.f32.mrf.mxu1 }
 0x49f   : > { %v2549_v25 = vpop.f32.mrf.mxu2  ;;  %v2566_v5 = vadd.f32 %v2523_v19, %v2486_v27  ;;  %v2567_v6 = vadd.f32 %v2536_v30, %v2487_v28 }
 0x4a0   : > { %v2562_v43 = vpop.f32.mrf.mxu3  ;;  %v2568_v33 = vadd.f32 %v2549_v25, %v2488_v29  ;;  %v3007_v29 = vpop.permute.xlu0 %3006 }
 0x4a1   : > { %v2569_v12 = vadd.f32 %v2562_v43, %v2489_v37 }
 0x4a6   : > { %v2525_v44 = vpop.f32.mrf.mxu0  ;;  %v2538_v45 = vpop.f32.mrf.mxu1 }
 0x4a7   : > { %v2551_v46 = vpop.f32.mrf.mxu2 }
 0x4a8   : > { %v2564_v47 = vpop.f32.mrf.mxu3 }
 0x4ae   : > { %v2631_v49 = vpop.f32.mrf.mxu0  ;;  %v2644_v48 = vpop.f32.mrf.mxu1 }
 0x4af   : > { %v2657_v50 = vpop.f32.mrf.mxu2  ;;  %v2674_v13 = vadd.f32 %v2631_v49, %v2566_v5  ;;  %v2675_v14 = vadd.f32 %v2644_v48, %v2567_v6 }
 0x4b0   : > { %v2670_v51 = vpop.f32.mrf.mxu3  ;;  %v2676_v32 = vadd.f32 %v2657_v50, %v2568_v33 }
 0x4b1   : > { %v2677_v15 = vadd.f32 %v2670_v51, %v2569_v12 }
 0x4b6   : > { %v2633_v52 = vpop.f32.mrf.mxu0  ;;  %v2646_v53 = vpop.f32.mrf.mxu1 }
 0x4b7   : > { %v2659_v54 = vpop.f32.mrf.mxu2 }
 0x4b8   : > { %v2672_v55 = vpop.f32.mrf.mxu3 }
 0x4be   : > { %v2739_v56 = vpop.f32.mrf.mxu0  ;;  %v2752_v57 = vpop.f32.mrf.mxu1 }
 0x4bf   : > { %v2765_v8 = vpop.f32.mrf.mxu2  ;;  %v2782_v16 = vadd.f32 %v2739_v56, %v2674_v13  ;;  %v2783_v31 = vadd.f32 %v2752_v57, %v2675_v14 }
 0x4c0   : > { %v2778_v9 = vpop.f32.mrf.mxu3  ;;  %v2784_v18 = vadd.f32 %v2765_v8, %v2676_v32 }
 0x4c1   : > { %v2785_v20 = vadd.f32 %v2778_v9, %v2677_v15 }
 0x4c6   : > { %v2741_v59 = vpop.f32.mrf.mxu0  ;;  %v2754_v60 = vpop.f32.mrf.mxu1 }
 0x4c7   : > { %v2767_v61 = vpop.f32.mrf.mxu2 }
 0x4c8   : > { %v2780_v62 = vpop.f32.mrf.mxu3 }
 0x4ce   : > { %v2847_v63 = vpop.f32.mrf.mxu0  ;;  %v2860_v0 = vpop.f32.mrf.mxu1 }
 0x4cf   : > { %v2873_v1 = vpop.f32.mrf.mxu2  ;;  %v2890_v22 = vadd.f32 %v2847_v63, %v2782_v16  ;;  %v2891_v10 = vadd.f32 %v2860_v0, %v2783_v31  ;;  %v9198_v0 = vld [vmem:[%s10616_s2 + $0xc] sm:$0x3]  ;;  %v3538_v16 = vld [vmem:[#allocation3 + $0x16] sm:$0x3] }
 0x4d0   : > { %v2886_v3 = vpop.f32.mrf.mxu3  ;;  %v2892_v23 = vadd.f32 %v2873_v1, %v2784_v18 }
 0x4d1   : > { %v2893_v17 = vadd.f32 %v2886_v3, %v2785_v20 }
 0x4d6   : > { %v2849_v7 = vpop.f32.mrf.mxu0  ;;  %v2862_v4 = vpop.f32.mrf.mxu1 }
 0x4d7   : > { %v2875_v11 = vpop.f32.mrf.mxu2  ;;  %v3042_v7 = vunpack.c.l.b16 %v9198_v0 }
 0x4d8   : > { %v2888_v34 = vpop.f32.mrf.mxu3 }
 0x4d9   : > { %v3043_v6 = vpack.c.b16 %v3042_v7, %v3042_v7  ;;  %v8089_v7 = vld [vmem:[%s10616_s2 + $0xc] sm:$0x3] }
 0x4de   : > { %v2955_v24 = vpop.f32.mrf.mxu0  ;;  %v2968_v26 = vpop.f32.mrf.mxu1 }
 0x4df   : > { %v2998_v27 = vadd.f32 %v2955_v24, %v2890_v22  ;;  %v2999_v28 = vadd.f32 %v2968_v26, %v2891_v10  ;;  %v2981_v21 = vpop.f32.mrf.mxu2  ;;  %v8069_v10 = vld [vmem:[%s10616_s2 + $0xc] sm:$0x3]  ;;  %v3647_v26 = vld [vmem:[#allocation3 + $0x16] sm:$0x3] }
 0x4e0   : > { %v3000_v39 = vadd.f32 %v2981_v21, %v2892_v23  ;;  %v2994_v37 = vpop.f32.mrf.mxu3  ;;  %v3242_v24 = vunpack.c.l.b16 %v8069_v10 }
 0x4e1   : > { %v3009_v40 = vadd.f32 %v3007_v29, %v2998_v27  ;;  %v3010_v42 = vadd.f32 %v3007_v29, %v2999_v28  ;;  %v3001_v36 = vadd.f32 %v2994_v37, %v2893_v17  ;;  %v8074_v37 = vld [vmem:[%s10616_s2 + $0xc] sm:$0x3] }
 0x4e2   : > { %v3011_v19 = vadd.f32 %v3007_v29, %v3000_v39  ;;  %v3243_v17 = vpack.c.b16 %v3242_v24, %v3242_v24 }
 0x4e3   : > { %v3013_v30 = vmax.f32 %v3009_v40, 0.0  ;;  %v3014_v25 = vmax.f32 %v3010_v42, 0.0  ;;  %v3012_v43 = vadd.f32 %v3007_v29, %v3001_v36 }
 0x4e4   : > { %v3015_v44 = vmax.f32 %v3011_v19, 0.0 }
 0x4e5   : > { %v3017_v45 = vmul.f32 %v3013_v30, %v8733_v41  ;;  %v3018_v46 = vmul.f32 %v3014_v25, %v8731_v38  ;;  %v3016_v47 = vmax.f32 %v3012_v43, 0.0  ;;  %v3756_v30 = vld [vmem:[#allocation3 + $0x16] sm:$0x3]  ;;  %v3351_v25 = vunpack.c.l.b16 %v8074_v37 }
 0x4e6   : > { %v3019_v49 = vmul.f32 %v3015_v44, %v8739_v58  ;;  %v2957_v48 = vpop.f32.mrf.mxu0  ;;  %v2970_v50 = vpop.f32.mrf.mxu1 }
 0x4e7   : > { %v3021_v51 = vpack.c.bf16 %v3018_v46, %v3017_v45  ;;  %v3020_v52 = vmul.f32 %v3016_v47, %v8741_v2  ;;  %v2983_v53 = vpop.f32.mrf.mxu2  ;;  %v3352_v44 = vpack.c.b16 %v3351_v25, %v3351_v25  ;;  %v8079_v45 = vld [vmem:[%s10616_s2 + $0xc] sm:$0x3] }
 0x4e8   : > { %v2996_v54 = vpop.f32.mrf.mxu3  ;;  %v3459_v50 = vunpack.c.l.b16 %v8079_v45 }
 0x4e9   : > { %v3025_v55 = vrot.slane %v3021_v51, 2  ;;  %v3022_v56 = vpack.c.bf16 %v3020_v52, %v3019_v49 }
 0x4eb   : > { %v3030_v57 = vsel %vm304_vm1, %v3021_v51, %v3025_v55  ;;  %v3026_v8 = vrot.slane %v3022_v56, 4  ;;  %v3027_v9 = vrot.slane %v3022_v56, 6  ;;  %v3460_v51 = vpack.c.b16 %v3459_v50, %v3459_v50  ;;  %v3865_v56 = vld [vmem:[#allocation3 + $0x16] sm:$0x3] }
 0x4ed   : > { %v3033_v59 = vsel %vm2068_vm12, %v3026_v8, %v3027_v9  ;;  %v8084_v8 = vld [vmem:[%s10616_s2 + $0xc] sm:$0x3] }
 0x4ee   : > { %v9189_v60 = vsel %vm1270_vm10, %v3030_v57, %v3033_v59 }
 0x4ef   : > { %3036 = vst [vmem:[#allocation3 + $0xe] sm:$0xff] %v9189_v60 }
 0x4f6   : > { %v9192_v61 = vld [vmem:[#allocation3 + $0xc] sm:$0xff]  ;;  %v3040_v62 = vld [vmem:[#allocation3 + $0x14] sm:$0x3] }
 0x4f7   : > { %3050 = vst [vmem:[#allocation1 + $0x20] ss:$4 sm:$0xff] %v3040_v62  ;;  %v3240_v33 = vld [vmem:[#allocation3 + $0x14] sm:$0x3] }
 0x4f8   : > { %3047 = vst [vmem:[#allocation1] ss:$4 sm:$0xff] %v9192_v61  ;;  %v3349_v15 = vld [vmem:[#allocation3 + $0x14] sm:$0x3] }
 0x4fe   : > { %v3059_v63 = vld.sshfl [vmem:[#allocation1 + $0x20] sm:$0xff pattern:$0x73625140] }
 0x4ff   : > { %3145 = vst [vmem:[#allocation1 + $0x20] ss:$4 sm:$0xff] %v3040_v62  ;;  %3069 = vrot.lane.b32.xlu0 %v3059_v63, %s8427_s5  ;;  %v3057_v1 = vld.sshfl [vmem:[#allocation1 + $0x18] sm:$0xff pattern:$0x73625140] }
 0x500   : > { %v3055_v3 = vld.sshfl [vmem:[#allocation1 + $0x10] sm:$0xff pattern:$0x73625140]  ;;  %3067 = vrot.lane.b32.xlu2 %v3057_v1, %s8427_s5  ;;  %v3053_v4 = vld.sshfl [vmem:[#allocation1 + $0x8] sm:$0xff pattern:$0x73625140]  ;;  %v3540_v1 = vunpack.c.l.b16 %v8084_v8 }
 0x501   : > { %3065 = vrot.lane.b32.xlu1 %v3055_v3, %s8427_s5  ;;  %v3051_v5 = vld.sshfl [vmem:[#allocation1] sm:$0xff pattern:$0x73625140] }
 0x502   : > { %3143 = vst [vmem:[#allocation1] ss:$4 sm:$0xff] %v9192_v61  ;;  %v3541_v3 = vpack.c.b16 %v3540_v1, %v3540_v1 }
 0x506   : > { %v3154_v11 = vld.sshfl [vmem:[#allocation1 + $0x20] sm:$0xff pattern:$0x73625140] }
 0x507   : > { %3250 = vst [vmem:[#allocation1 + $0x20] ss:$4 sm:$0xff] %v3240_v33  ;;  %3063 = vrot.lane.b32.xlu0 %v3053_v4, %s8427_s5  ;;  %v3649_v4 = vunpack.c.l.b16 %v8089_v7 }
 0x508   : > { %3061 = vrot.lane.b32.xlu2 %v3051_v5, %s8427_s5  ;;  %s8429_s5 = smov 38  }
 0x509   : > { %3044 = vrot.lane.b32.xlu1 %v3043_v6, %s8408_s6  ;;  %v3152_v34 = vld.sshfl [vmem:[#allocation1 + $0x18] sm:$0xff pattern:$0x73625140]  ;;  %v3150_v12 = vld.sshfl [vmem:[#allocation1 + $0x10] sm:$0xff pattern:$0x73625140]  ;;  %v3650_v5 = vpack.c.b16 %v3649_v4, %v3649_v4 }
 0x50a   : > { %v3148_v13 = vld.sshfl [vmem:[#allocation1 + $0x8] sm:$0xff pattern:$0x73625140]  ;;  %v3146_v14 = vld.sshfl [vmem:[#allocation1] sm:$0xff pattern:$0x73625140] }
 0x50b   : > { %3247 = vst [vmem:[#allocation1] ss:$4 sm:$0xff] %v9192_v61  ;;  %v8094_v6 = vld [vmem:[%s10616_s2 + $0xc] sm:$0x3] }
 0x50e   : > { %v3259_v32 = vld.sshfl [vmem:[#allocation1 + $0x20] sm:$0xff pattern:$0x73625140] }
 0x50f   : > { %3359 = vst [vmem:[#allocation1 + $0x20] ss:$4 sm:$0xff] %v3349_v15  ;;  %3164 = vrot.lane.b32.xlu0 %v3154_v11, %s8428_s9  ;;  %v3758_v11 = vunpack.c.l.b16 %v8094_v6 }
 0x510   : > { %3162 = vrot.lane.b32.xlu2 %v3152_v34, %s8428_s9 }
 0x511   : > { %3160 = vrot.lane.b32.xlu1 %v3150_v12, %s8428_s9  ;;  %v3759_v34 = vpack.c.b16 %v3758_v11, %v3758_v11 }
 0x512   : > { %v3255_v31 = vld.sshfl [vmem:[#allocation1 + $0x10] sm:$0xff pattern:$0x73625140]  ;;  %v3257_v18 = vld.sshfl [vmem:[#allocation1 + $0x18] sm:$0xff pattern:$0x73625140] }
 0x513   : > { %v3253_v20 = vld.sshfl [vmem:[#allocation1 + $0x8] sm:$0xff pattern:$0x73625140]  ;;  %v3251_v22 = vld.sshfl [vmem:[#allocation1] sm:$0xff pattern:$0x73625140] }
 0x514   : > { %3356 = vst [vmem:[#allocation1] ss:$4 sm:$0xff] %v9192_v61 }
 0x516   : > { %v3368_v23 = vld.sshfl [vmem:[#allocation1 + $0x20] sm:$0xff pattern:$0x73625140] }
 0x517   : > { %3548 = vst [vmem:[#allocation1 + $0x20] ss:$4 sm:$0xff] %v3538_v16  ;;  %3265 = vrot.lane.b32.xlu0 %v3255_v31, %s8429_s5 }
 0x518   : > { %3158 = vrot.lane.b32.xlu2 %v3148_v13, %s8428_s9 }
 0x519   : > { %3156 = vrot.lane.b32.xlu1 %v3146_v14, %s8428_s9  ;;  %s8430_s9 = smov 2   ;;  %v8099_v14 = vld [vmem:[%s10616_s2 + $0xc] sm:$0x3] }
 0x51a   : > { %v3867_v31 = vunpack.c.l.b16 %v8099_v14 }
 0x51b   : > { %v3364_v27 = vld.sshfl [vmem:[#allocation1 + $0x10] sm:$0xff pattern:$0x73625140]  ;;  %v3366_v28 = vld.sshfl [vmem:[#allocation1 + $0x18] sm:$0xff pattern:$0x73625140] }
 0x51c   : > { %v3360_v21 = vld.sshfl [vmem:[#allocation1] sm:$0xff pattern:$0x73625140]  ;;  %v3362_v29 = vld.sshfl [vmem:[#allocation1 + $0x8] sm:$0xff pattern:$0x73625140] }
 0x51d   : > { %3464 = vst [vmem:[#allocation1] ss:$4 sm:$0xff] %v9189_v60 }
 0x51e   : > { %v3557_v39 = vld.sshfl [vmem:[#allocation1 + $0x20] sm:$0xff pattern:$0x73625140] }
 0x51f   : > { %3657 = vst [vmem:[#allocation1 + $0x20] ss:$4 sm:$0xff] %v3647_v26  ;;  %3244 = vrot.lane.b32.xlu0 %v3243_v17, %s8411_s11  ;;  %v3868_v26 = vpack.c.b16 %v3867_v31, %v3867_v31 }
 0x520   : > { %3269 = vrot.lane.b32.xlu2 %v3259_v32, %s8429_s5 }
 0x521   : > { %3267 = vrot.lane.b32.xlu1 %v3257_v18, %s8429_s5 }
 0x524   : > { %v9213_v40 = vld.sshfl [vmem:[#allocation1] sm:$0xff pattern:$0x73625140]  ;;  %v9215_v42 = vld.sshfl [vmem:[#allocation1 + $0x8] sm:$0xff pattern:$0x73625140] }
 0x525   : > { %v9217_v36 = vld.sshfl [vmem:[#allocation1 + $0x10] sm:$0xff pattern:$0x73625140]  ;;  %v9219_v19 = vld.sshfl [vmem:[#allocation1 + $0x18] sm:$0xff pattern:$0x73625140] }
 0x526   : > { %3545 = vst [vmem:[#allocation1] ss:$4 sm:$0xff] %v9189_v60  ;;  %v3666_v43 = vld.sshfl [vmem:[#allocation1 + $0x20] sm:$0xff pattern:$0x73625140]  ;;  %v3476_v31 = vsel %vm304_vm1, %v9217_v36, 0 }
 0x527   : > { %3374 = vrot.lane.b32.xlu0 %v3364_v27, %s8430_s9  ;;  %3766 = vst [vmem:[#allocation1 + $0x20] ss:$4 sm:$0xff] %v3756_v30  ;;  %v3472_v36 = vsel %vm304_vm1, %v9213_v40, 0 }
 0x528   : > { %3263 = vrot.lane.b32.xlu2 %v3253_v20, %s8429_s5 }
 0x529   : > { %3261 = vrot.lane.b32.xlu1 %v3251_v22, %s8429_s5  ;;  %s8432_s5 = smov 90  }
 0x52d   : > { %v3555_v46 = vld.sshfl [vmem:[#allocation1 + $0x18] sm:$0xff pattern:$0x73625140]  ;;  %v3553_v47 = vld.sshfl [vmem:[#allocation1 + $0x10] sm:$0xff pattern:$0x73625140] }
 0x52e   : > { %v3551_v49 = vld.sshfl [vmem:[#allocation1 + $0x8] sm:$0xff pattern:$0x73625140]  ;;  %v3549_v48 = vld.sshfl [vmem:[#allocation1] sm:$0xff pattern:$0x73625140] }
 0x52f   : > { %3353 = vrot.lane.b32.xlu0 %v3352_v44, %s8413_s24  ;;  %3654 = vst [vmem:[#allocation1] ss:$4 sm:$0xff] %v9189_v60  ;;  %v3775_v57 = vld.sshfl [vmem:[#allocation1 + $0x20] sm:$0xff pattern:$0x73625140] }
 0x530   : > { %3378 = vrot.lane.b32.xlu2 %v3368_v23, %s8430_s9  ;;  %3875 = vst [vmem:[#allocation1 + $0x20] ss:$4 sm:$0xff] %v3865_v56 }
 0x531   : > { %3376 = vrot.lane.b32.xlu1 %v3366_v28, %s8430_s9 }
 0x536   : > { %v3664_v52 = vld.sshfl [vmem:[#allocation1 + $0x18] sm:$0xff pattern:$0x73625140]  ;;  %v3662_v53 = vld.sshfl [vmem:[#allocation1 + $0x10] sm:$0xff pattern:$0x73625140] }
 0x537   : > { %3461 = vrot.lane.b32.xlu0 %v3460_v51, %s8414_s25  ;;  %v3660_v54 = vld.sshfl [vmem:[#allocation1 + $0x8] sm:$0xff pattern:$0x73625140]  ;;  %v3658_v55 = vld.sshfl [vmem:[#allocation1] sm:$0xff pattern:$0x73625140] }
 0x538   : > { %3763 = vst [vmem:[#allocation1] ss:$4 sm:$0xff] %v9189_v60  ;;  %3372 = vrot.lane.b32.xlu2 %v3362_v29, %s8430_s9  ;;  %v3884_v13 = vld.sshfl [vmem:[#allocation1 + $0x20] sm:$0xff pattern:$0x73625140] }
 0x539   : > { %3370 = vrot.lane.b32.xlu1 %v3360_v21, %s8430_s9  ;;  %s10640_s9 = smov 20  }
 0x53f   : > { %3567 = vrot.lane.b32.xlu0 %v3557_v39, %s8431_s22  ;;  %v3773_v9 = vld.sshfl [vmem:[#allocation1 + $0x18] sm:$0xff pattern:$0x73625140]  ;;  %v3771_v59 = vld.sshfl [vmem:[#allocation1 + $0x10] sm:$0xff pattern:$0x73625140] }
 0x540   : > { %v3769_v62 = vld.sshfl [vmem:[#allocation1 + $0x8] sm:$0xff pattern:$0x73625140]  ;;  %v3767_v63 = vld.sshfl [vmem:[#allocation1] sm:$0xff pattern:$0x73625140]  ;;  %3565 = vrot.lane.b32.xlu2 %v3555_v46, %s8431_s22 }
 0x541   : > { %3563 = vrot.lane.b32.xlu1 %v3553_v47, %s8431_s22  ;;  %3872 = vst [vmem:[#allocation1] ss:$4 sm:$0xff] %v9189_v60 }
 0x547   : > { %3561 = vrot.lane.b32.xlu0 %v3551_v49, %s8431_s22 }
 0x548   : > { %3559 = vrot.lane.b32.xlu2 %v3549_v48, %s8431_s22  ;;  %s8433_s22 = smov 86   ;;  %v3882_v32 = vld.sshfl [vmem:[#allocation1 + $0x18] sm:$0xff pattern:$0x73625140] }
 0x549   : > { %3542 = vrot.lane.b32.xlu1 %v3541_v3, %s8416_s30  ;;  %v3880_v15 = vld.sshfl [vmem:[#allocation1 + $0x10] sm:$0xff pattern:$0x73625140]  ;;  %v3878_v17 = vld.sshfl [vmem:[#allocation1 + $0x8] sm:$0xff pattern:$0x73625140] }
 0x54a   : > { %v3876_v27 = vld.sshfl [vmem:[#allocation1] sm:$0xff pattern:$0x73625140] }
 0x54f   : > { %3676 = vrot.lane.b32.xlu0 %v3666_v43, %s8432_s5 }
 0x550   : > { %3674 = vrot.lane.b32.xlu2 %v3664_v52, %s8432_s5 }
 0x551   : > { %3672 = vrot.lane.b32.xlu1 %v3662_v53, %s8432_s5 }
 0x557   : > { %3670 = vrot.lane.b32.xlu0 %v3660_v54, %s8432_s5 }
 0x558   : > { %3668 = vrot.lane.b32.xlu2 %v3658_v55, %s8432_s5  ;;  %s10642_s5 = smov 80  }
 0x559   : > { %3651 = vrot.lane.b32.xlu1 %v3650_v5, %s8418_s13 }
 0x55a   : > { %v3068_v60 = vpop.permute.xlu2 %3067 }
 0x55f   : > { %3785 = vrot.lane.b32.xlu0 %v3775_v57, %s10634_s23 }
 0x560   : > { %3783 = vrot.lane.b32.xlu2 %v3773_v9, %s10634_s23 }
 0x561   : > { %3781 = vrot.lane.b32.xlu1 %v3771_v59, %s10634_s23 }
 0x562   : > { %v3062_v33 = vpop.permute.xlu2 %3061 }
 0x567   : > { %3779 = vrot.lane.b32.xlu0 %v3769_v62, %s10634_s23 }
 0x568   : > { %3777 = vrot.lane.b32.xlu2 %v3767_v63, %s10634_s23 }
 0x569   : > { %3760 = vrot.lane.b32.xlu1 %v3759_v34, %s8419_s26 }
 0x56a   : > { %v3163_v12 = vpop.permute.xlu2 %3162 }
 0x56f   : > { %3894 = vrot.lane.b32.xlu0 %v3884_v13, %s8433_s22 }
 0x570   : > { %3892 = vrot.lane.b32.xlu2 %v3882_v32, %s8433_s22 }
 0x571   : > { %3890 = vrot.lane.b32.xlu1 %v3880_v15, %s8433_s22  ;;  %v3070_v16 = vpop.permute.xlu0 %3069 }
 0x572   : > { %v3075_v18 = vsel %vm3071_vm13, %v3068_v60, %v3070_v16  ;;  %v3159_v10 = vpop.permute.xlu2 %3158 }
 0x573   : > { %v3089_v20 = vsel %vm304_vm1, %v3075_v18, 0  ;;  %v3066_v22 = vpop.permute.xlu1 %3065 }
 0x574   : > { %v3074_v23 = vsel %vm3071_vm13, %v3066_v22, %v3068_v60  ;;  %3137 = vmatpush.bf16.msrb.mxu3 %v3089_v20 }
 0x575   : > { %v3086_v24 = vsel %vm304_vm1, %v3074_v23, 0 }
 0x576   : > { %3124 = vmatpush.bf16.msrb.mxu2 %v3086_v24 }
 0x577   : > { %3888 = vrot.lane.b32.xlu0 %v3878_v17, %s8433_s22 }
 0x578   : > { %3886 = vrot.lane.b32.xlu2 %v3876_v27, %s8433_s22  ;;  %s10632_s22 = smov 84  }
 0x579   : > { %v3064_v28 = vpop.permute.xlu0 %3063  ;;  %3869 = vrot.lane.b32.xlu1 %v3868_v26, %s10639_s28 }
 0x57a   : > { %v3072_v21 = vsel %vm3071_vm13, %v3062_v33, %v3064_v28  ;;  %v3073_v29 = vsel %vm3071_vm13, %v3064_v28, %v3066_v22  ;;  %v3270_v37 = vpop.permute.xlu2 %3269  ;;  %v3474_v33 = vsel %vm304_vm1, %v9215_v42, 0  ;;  %v3478_v42 = vsel %vm304_vm1, %v9219_v19, 0 }
 0x57b   : > { %v3045_v39 = vpop.permute.xlu1 %3044  ;;  %v3080_v30 = vsel %vm304_vm1, %v3072_v21, 0  ;;  %v3083_v25 = vsel %vm304_vm1, %v3073_v29, 0  ;;  %vm3569_vm13 = vcmask 1031168  }
 0x57c   : > { %8063 = vmatmul.msk.bf16.vlgmr.msrb.gmra.mxu2 %vm300_vm2, %v3045_v39  ;;  %8064 = vmatmul.msk.bf16.vlgmr.msrb.gmra.mxu3 %vm300_vm2, %v3045_v39 }
 0x57d   : > { %3098 = vmatpush.bf16.msrb.mxu0 %v3080_v30  ;;  %3111 = vmatpush.bf16.msrb.mxu1 %v3083_v25 }
 0x580   : > { %8061 = vmatmul.msk.bf16.vlgmr.msrb.gmra.mxu0 %vm300_vm2, %v3045_v39  ;;  %8062 = vmatmul.msk.bf16.vlgmr.msrb.gmra.mxu1 %vm300_vm2, %v3045_v39 }
 0x581   : > { %v3165_v43 = vpop.permute.xlu0 %3164 }
 0x582   : > { %v3170_v44 = vsel %vm3166_vm14, %v3163_v12, %v3165_v43  ;;  %v3264_v48 = vpop.permute.xlu2 %3263 }
 0x583   : > { %v3184_v45 = vsel %vm304_vm1, %v3170_v44, 0  ;;  %v3161_v46 = vpop.permute.xlu1 %3160 }
 0x584   : > { %v3168_v47 = vsel %vm3166_vm14, %v3159_v10, %v3161_v46  ;;  %v3169_v49 = vsel %vm3166_vm14, %v3161_v46, %v3163_v12  ;;  %3232 = vmatpush.bf16.msra.mxu3 %v3184_v45 }
 0x585   : > { %v3178_v50 = vsel %vm304_vm1, %v3168_v47, 0  ;;  %v3181_v51 = vsel %vm304_vm1, %v3169_v49, 0 }
 0x586   : > { %3206 = vmatpush.bf16.msra.mxu1 %v3178_v50  ;;  %3219 = vmatpush.bf16.msra.mxu2 %v3181_v51 }
 0x589   : > { %v3266_v52 = vpop.permute.xlu0 %3265 }
 0x58a   : > { %v3273_v53 = vsel %vm3271_vm15, %v3264_v48, %v3266_v52  ;;  %v3379_v8 = vpop.permute.xlu2 %3378 }
 0x58b   : > { %v3157_v54 = vpop.permute.xlu1 %3156  ;;  %v3283_v55 = vsel %vm304_vm1, %v3273_v53, 0 }
 0x58c   : > { %v3167_v56 = vsel %vm3166_vm14, %v3157_v54, %v3159_v10  ;;  %8067 = vmatmul.msk.bf16.vlgmr.msra.gmra.mxu2 %vm300_vm2, %v9198_v0  ;;  %8068 = vmatmul.msk.bf16.vlgmr.msra.gmra.mxu3 %vm300_vm2, %v9198_v0  ;;  %vm3678_vm14 = vcmask 736256  }
 0x58d   : > { %v3175_v57 = vsel %vm304_vm1, %v3167_v56, 0  ;;  %3311 = vmatpush.bf16.msrb.mxu1 %v3283_v55 }
 0x58e   : > { %3193 = vmatpush.bf16.msra.mxu0 %v3175_v57 }
 0x590   : > { %8066 = vmatmul.msk.bf16.vlgmr.msra.gmra.mxu1 %vm300_vm2, %v9198_v0 }
 0x591   : > { %8065 = vmatmul.msk.bf16.vlgmr.msra.gmra.mxu0 %vm300_vm2, %v9198_v0  ;;  %v3245_v9 = vpop.permute.xlu0 %3244 }
 0x592   : > { %v3373_v7 = vpop.permute.xlu2 %3372 }
 0x593   : > { %v3268_v59 = vpop.permute.xlu1 %3267 }
 0x594   : > { %v3274_v62 = vsel %vm3271_vm15, %v3266_v52, %v3268_v59  ;;  %v3275_v63 = vsel %vm3271_vm15, %v3268_v59, %v3270_v37 }
 0x595   : > { %v3286_v1 = vsel %vm304_vm1, %v3274_v62, 0  ;;  %v3289_v3 = vsel %vm304_vm1, %v3275_v63, 0 }
 0x596   : > { %3324 = vmatpush.bf16.msrb.mxu2 %v3286_v1  ;;  %3337 = vmatpush.bf16.msrb.mxu3 %v3289_v3 }
 0x599   : > { %v3375_v4 = vpop.permute.xlu0 %3374 }
 0x59a   : > { %v3382_v5 = vsel %vm3380_vm11, %v3373_v7, %v3375_v4  ;;  %v3566_v12 = vpop.permute.xlu2 %3565 }
 0x59b   : > { %v3262_v60 = vpop.permute.xlu1 %3261  ;;  %v3392_v0 = vsel %vm304_vm1, %v3382_v5, 0 }
 0x59c   : > { %v3272_v6 = vsel %vm3271_vm15, %v3262_v60, %v3264_v48  ;;  %8072 = vmatmul.msk.bf16.vlgmr.msrb.gmra.mxu2 %vm300_vm2, %v3245_v9  ;;  %8073 = vmatmul.msk.bf16.vlgmr.msrb.gmra.mxu3 %vm300_vm2, %v3245_v9  ;;  %vm3787_vm15 = vcmask 719872  }
 0x59d   : > { %v3280_v11 = vsel %vm304_vm1, %v3272_v6, 0  ;;  %3420 = vmatpush.bf16.msra.mxu1 %v3392_v0 }
 0x59e   : > { %3298 = vmatpush.bf16.msrb.mxu0 %v3280_v11 }
 0x5a0   : > { %8071 = vmatmul.msk.bf16.vlgmr.msrb.gmra.mxu1 %vm300_vm2, %v3245_v9 }
 0x5a1   : > { %8070 = vmatmul.msk.bf16.vlgmr.msrb.gmra.mxu0 %vm300_vm2, %v3245_v9  ;;  %3500 = vmatpush.bf16.msrb.mxu1 %v3474_v33  ;;  %v3354_v34 = vpop.permute.xlu0 %3353 }
 0x5a2   : > { %v3560_v10 = vpop.permute.xlu2 %3559 }
 0x5a3   : > { %v3377_v13 = vpop.permute.xlu1 %3376 }
 0x5a4   : > { %v3383_v14 = vsel %vm3380_vm11, %v3375_v4, %v3377_v13  ;;  %v3384_v32 = vsel %vm3380_vm11, %v3377_v13, %v3379_v8 }
 0x5a5   : > { %v3395_v15 = vsel %vm304_vm1, %v3383_v14, 0  ;;  %v3398_v16 = vsel %vm304_vm1, %v3384_v32, 0 }
 0x5a6   : > { %3433 = vmatpush.bf16.msra.mxu2 %v3395_v15  ;;  %3446 = vmatpush.bf16.msra.mxu3 %v3398_v16 }
 0x5a9   : > { %v3462_v18 = vpop.permute.xlu0 %3461 }
 0x5aa   : > { %3513 = vmatpush.bf16.msrb.mxu2 %v3476_v31  ;;  %3526 = vmatpush.bf16.msrb.mxu3 %v3478_v42  ;;  %v3675_v21 = vpop.permute.xlu2 %3674 }
 0x5ab   : > { %v3371_v20 = vpop.permute.xlu1 %3370 }
 0x5ac   : > { %v3381_v22 = vsel %vm3380_vm11, %v3371_v20, %v3373_v7  ;;  %8077 = vmatmul.msk.bf16.vlgmr.msra.gmra.mxu2 %vm300_vm2, %v3354_v34  ;;  %8078 = vmatmul.msk.bf16.vlgmr.msra.gmra.mxu3 %vm300_vm2, %v3354_v34  ;;  %vm3896_vm11 = vcmask 703488   ;;  %v8104_v20 = vld [vmem:[%s10617_s3 + $0x18] sm:$0xf] }
 0x5ad   : > { %v3389_v23 = vsel %vm304_vm1, %v3381_v22, 0  ;;  %3976 = vperm.xlu1 %8364, %v8104_v20  }
 0x5ae   : > { %3407 = vmatpush.bf16.msra.mxu0 %v3389_v23 }
 0x5b0   : > { %8076 = vmatmul.msk.bf16.vlgmr.msra.gmra.mxu1 %vm300_vm2, %v3354_v34 }
 0x5b1   : > { %8075 = vmatmul.msk.bf16.vlgmr.msra.gmra.mxu0 %vm300_vm2, %v3354_v34  ;;  %v3568_v19 = vpop.permute.xlu0 %3567 }
 0x5b2   : > { %3487 = vmatpush.bf16.msrb.mxu0 %v3472_v36  ;;  %v3573_v24 = vsel %vm3569_vm13, %v3566_v12, %v3568_v19  ;;  %v3669_v43 = vpop.permute.xlu2 %3668 }
 0x5b3   : > { %v3587_v26 = vsel %vm304_vm1, %v3573_v24, 0  ;;  %v3564_v17 = vpop.permute.xlu1 %3563 }
 0x5b4   : > { %v3572_v27 = vsel %vm3569_vm13, %v3564_v17, %v3566_v12  ;;  %3635 = vmatpush.bf16.msra.mxu3 %v3587_v26 }
 0x5b5   : > { %v3584_v28 = vsel %vm304_vm1, %v3572_v27, 0 }
 0x5b6   : > { %3622 = vmatpush.bf16.msra.mxu2 %v3584_v28 }
 0x5b9   : > { %v3562_v29 = vpop.permute.xlu0 %3561 }
 0x5ba   : > { %v3570_v39 = vsel %vm3569_vm13, %v3560_v10, %v3562_v29  ;;  %v3571_v40 = vsel %vm3569_vm13, %v3562_v29, %v3564_v17  ;;  %v3784_v53 = vpop.permute.xlu2 %3783 }
 0x5bb   : > { %v3543_v37 = vpop.permute.xlu1 %3542  ;;  %v3578_v30 = vsel %vm304_vm1, %v3570_v39, 0  ;;  %v3581_v25 = vsel %vm304_vm1, %v3571_v40, 0 }
 0x5bc   : > { %8082 = vmatmul.msk.bf16.vlgmr.msrb.gmra.mxu2 %vm300_vm2, %v3462_v18  ;;  %8083 = vmatmul.msk.bf16.vlgmr.msrb.gmra.mxu3 %vm300_vm2, %v3462_v18 }
 0x5bd   : > { %3596 = vmatpush.bf16.msra.mxu0 %v3578_v30  ;;  %3609 = vmatpush.bf16.msra.mxu1 %v3581_v25 }
 0x5c0   : > { %8081 = vmatmul.msk.bf16.vlgmr.msrb.gmra.mxu1 %vm300_vm2, %v3462_v18 }
 0x5c1   : > { %8080 = vmatmul.msk.bf16.vlgmr.msrb.gmra.mxu0 %vm300_vm2, %v3462_v18  ;;  %v3677_v44 = vpop.permute.xlu0 %3676 }
 0x5c2   : > { %v3682_v45 = vsel %vm3678_vm14, %v3675_v21, %v3677_v44  ;;  %v3778_v63 = vpop.permute.xlu2 %3777 }
 0x5c3   : > { %v3696_v46 = vsel %vm304_vm1, %v3682_v45, 0  ;;  %v3673_v47 = vpop.permute.xlu1 %3672 }
 0x5c4   : > { %v3681_v49 = vsel %vm3678_vm14, %v3673_v47, %v3675_v21  ;;  %3744 = vmatpush.bf16.msrb.mxu3 %v3696_v46 }
 0x5c5   : > { %v3693_v48 = vsel %vm304_vm1, %v3681_v49, 0 }
 0x5c6   : > { %3731 = vmatpush.bf16.msrb.mxu2 %v3693_v48 }
 0x5c9   : > { %v3671_v50 = vpop.permute.xlu0 %3670 }
 0x5ca   : > { %v3679_v51 = vsel %vm3678_vm14, %v3669_v43, %v3671_v50  ;;  %v3680_v52 = vsel %vm3678_vm14, %v3671_v50, %v3673_v47  ;;  %v3893_v6 = vpop.permute.xlu2 %3892 }
 0x5cb   : > { %v3652_v54 = vpop.permute.xlu1 %3651  ;;  %v3687_v55 = vsel %vm304_vm1, %v3679_v51, 0  ;;  %v3690_v56 = vsel %vm304_vm1, %v3680_v52, 0 }
 0x5cc   : > { %8087 = vmatmul.msk.bf16.vlgmr.msra.gmra.mxu2 %vm300_vm2, %v3543_v37  ;;  %8088 = vmatmul.msk.bf16.vlgmr.msra.gmra.mxu3 %vm300_vm2, %v3543_v37 }
 0x5cd   : > { %3705 = vmatpush.bf16.msrb.mxu0 %v3687_v55  ;;  %3718 = vmatpush.bf16.msrb.mxu1 %v3690_v56 }
 0x5d0   : > { %8086 = vmatmul.msk.bf16.vlgmr.msra.gmra.mxu1 %vm300_vm2, %v3543_v37 }
 0x5d1   : > { %8085 = vmatmul.msk.bf16.vlgmr.msra.gmra.mxu0 %vm300_vm2, %v3543_v37  ;;  %v3786_v57 = vpop.permute.xlu0 %3785 }
 0x5d2   : > { %v3791_v8 = vsel %vm3787_vm15, %v3784_v53, %v3786_v57  ;;  %v3887_v32 = vpop.permute.xlu2 %3886 }
 0x5d3   : > { %v3805_v9 = vsel %vm304_vm1, %v3791_v8, 0  ;;  %v3782_v59 = vpop.permute.xlu1 %3781 }
 0x5d4   : > { %v3790_v62 = vsel %vm3787_vm15, %v3782_v59, %v3784_v53  ;;  %3853 = vmatpush.bf16.msra.mxu3 %v3805_v9 }
 0x5d5   : > { %v3802_v1 = vsel %vm304_vm1, %v3790_v62, 0 }
 0x5d6   : > { %3840 = vmatpush.bf16.msra.mxu2 %v3802_v1 }
 0x5d9   : > { %v3780_v3 = vpop.permute.xlu0 %3779 }
 0x5da   : > { %v3788_v7 = vsel %vm3787_vm15, %v3778_v63, %v3780_v3  ;;  %v3789_v4 = vsel %vm3787_vm15, %v3780_v3, %v3782_v59 }
 0x5db   : > { %v3761_v5 = vpop.permute.xlu1 %3760  ;;  %v3796_v60 = vsel %vm304_vm1, %v3788_v7, 0  ;;  %v3799_v0 = vsel %vm304_vm1, %v3789_v4, 0 }
 0x5dc   : > { %8092 = vmatmul.msk.bf16.vlgmr.msrb.gmra.mxu2 %vm300_vm2, %v3652_v54  ;;  %8093 = vmatmul.msk.bf16.vlgmr.msrb.gmra.mxu3 %vm300_vm2, %v3652_v54 }
 0x5dd   : > { %3814 = vmatpush.bf16.msra.mxu0 %v3796_v60  ;;  %3827 = vmatpush.bf16.msra.mxu1 %v3799_v0 }
 0x5e0   : > { %8091 = vmatmul.msk.bf16.vlgmr.msrb.gmra.mxu1 %vm300_vm2, %v3652_v54 }
 0x5e1   : > { %8090 = vmatmul.msk.bf16.vlgmr.msrb.gmra.mxu0 %vm300_vm2, %v3652_v54  ;;  %v3895_v11 = vpop.permute.xlu0 %3894 }
 0x5e2   : > { %v3900_v33 = vsel %vm3896_vm11, %v3893_v6, %v3895_v11 }
 0x5e3   : > { %v3914_v34 = vsel %vm304_vm1, %v3900_v33, 0  ;;  %v3891_v12 = vpop.permute.xlu1 %3890 }
 0x5e4   : > { %v3899_v13 = vsel %vm3896_vm11, %v3891_v12, %v3893_v6  ;;  %3962 = vmatpush.bf16.msrb.mxu3 %v3914_v34 }
 0x5e5   : > { %v3911_v14 = vsel %vm304_vm1, %v3899_v13, 0 }
 0x5e6   : > { %3949 = vmatpush.bf16.msrb.mxu2 %v3911_v14 }
 0x5e9   : > { %v3889_v15 = vpop.permute.xlu0 %3888 }
 0x5ea   : > { %v3897_v16 = vsel %vm3896_vm11, %v3887_v32, %v3889_v15  ;;  %v3898_v31 = vsel %vm3896_vm11, %v3889_v15, %v3891_v12 }
 0x5eb   : > { %v3905_v42 = vsel %vm304_vm1, %v3897_v16, 0  ;;  %v3908_v18 = vsel %vm304_vm1, %v3898_v31, 0  ;;  %v3870_v22 = vpop.permute.xlu1 %3869 }
 0x5ec   : > { %8097 = vmatmul.msk.bf16.vlgmr.msra.gmra.mxu2 %vm300_vm2, %v3761_v5  ;;  %8098 = vmatmul.msk.bf16.vlgmr.msra.gmra.mxu3 %vm300_vm2, %v3761_v5 }
 0x5ed   : > { %3923 = vmatpush.bf16.msrb.mxu0 %v3905_v42  ;;  %3936 = vmatpush.bf16.msrb.mxu1 %v3908_v18 }
 0x5f0   : > { %8096 = vmatmul.msk.bf16.vlgmr.msra.gmra.mxu1 %vm300_vm2, %v3761_v5 }
 0x5f1   : > { %8095 = vmatmul.msk.bf16.vlgmr.msra.gmra.mxu0 %vm300_vm2, %v3761_v5 }
 0x5fc   : > { %8102 = vmatmul.msk.bf16.vlgmr.msrb.gmra.mxu2 %vm300_vm2, %v3870_v22  ;;  %8103 = vmatmul.msk.bf16.vlgmr.msrb.gmra.mxu3 %vm300_vm2, %v3870_v22 }
 0x5fd   : > { %v3100_v10 = vpop.f32.mrf.mxu0  ;;  %v3113_v23 = vpop.f32.mrf.mxu1 }
 0x5ff   : > { %v3126_v36 = vpop.f32.mrf.mxu2  ;;  %v3139_v19 = vpop.f32.mrf.mxu3 }
 0x600   : > { %8101 = vmatmul.msk.bf16.vlgmr.msrb.gmra.mxu1 %vm300_vm2, %v3870_v22 }
 0x601   : > { %8100 = vmatmul.msk.bf16.vlgmr.msrb.gmra.mxu0 %vm300_vm2, %v3870_v22 }
 0x605   : > { %v3102_v24 = vpop.f32.mrf.mxu0  ;;  %v3115_v26 = vpop.f32.mrf.mxu1 }
 0x607   : > { %v3128_v17 = vpop.f32.mrf.mxu2  ;;  %v3141_v27 = vpop.f32.mrf.mxu3 }
 0x60d   : > { %v3208_v28 = vpop.f32.mrf.mxu1 }
 0x60e   : > { %v3209_v21 = vadd.f32 %v3208_v28, %v3113_v23  ;;  %v3195_v29 = vpop.f32.mrf.mxu0 }
 0x60f   : > { %v3196_v39 = vadd.f32 %v3195_v29, %v3100_v10  ;;  %v3221_v40 = vpop.f32.mrf.mxu2  ;;  %v3234_v37 = vpop.f32.mrf.mxu3 }
 0x610   : > { %v3222_v30 = vadd.f32 %v3221_v40, %v3126_v36  ;;  %v3235_v25 = vadd.f32 %v3234_v37, %v3139_v19 }
 0x615   : > { %v3210_v43 = vpop.f32.mrf.mxu1 }
 0x616   : > { %v3197_v44 = vpop.f32.mrf.mxu0 }
 0x617   : > { %v3223_v45 = vpop.f32.mrf.mxu2  ;;  %v3236_v46 = vpop.f32.mrf.mxu3 }
 0x61d   : > { %v3313_v47 = vpop.f32.mrf.mxu1 }
 0x61e   : > { %v3300_v49 = vpop.f32.mrf.mxu0  ;;  %v3344_v48 = vadd.f32 %v3313_v47, %v3209_v21 }
 0x61f   : > { %v3343_v50 = vadd.f32 %v3300_v49, %v3196_v39  ;;  %v3326_v51 = vpop.f32.mrf.mxu2  ;;  %v3339_v52 = vpop.f32.mrf.mxu3 }
 0x620   : > { %v3345_v53 = vadd.f32 %v3326_v51, %v3222_v30  ;;  %v3346_v54 = vadd.f32 %v3339_v52, %v3235_v25 }
 0x625   : > { %v3315_v55 = vpop.f32.mrf.mxu1 }
 0x626   : > { %v3302_v56 = vpop.f32.mrf.mxu0 }
 0x627   : > { %v3328_v57 = vpop.f32.mrf.mxu2  ;;  %v3341_v8 = vpop.f32.mrf.mxu3 }
 0x62d   : > { %v3422_v9 = vpop.f32.mrf.mxu1 }
 0x62e   : > { %v3409_v59 = vpop.f32.mrf.mxu0  ;;  %v3453_v62 = vadd.f32 %v3422_v9, %v3344_v48 }
 0x62f   : > { %v3452_v63 = vadd.f32 %v3409_v59, %v3343_v50  ;;  %v3435_v1 = vpop.f32.mrf.mxu2  ;;  %v3448_v3 = vpop.f32.mrf.mxu3 }
 0x630   : > { %v3454_v7 = vadd.f32 %v3435_v1, %v3345_v53  ;;  %v3455_v4 = vadd.f32 %v3448_v3, %v3346_v54  ;;  %v3977_v59 = vpop.permute.xlu1 %3976 }
 0x635   : > { %v3424_v5 = vpop.f32.mrf.mxu1 }
 0x636   : > { %v3411_v60 = vpop.f32.mrf.mxu0 }
 0x637   : > { %v3437_v0 = vpop.f32.mrf.mxu2  ;;  %v3450_v6 = vpop.f32.mrf.mxu3 }
 0x63d   : > { %v3502_v11 = vpop.f32.mrf.mxu1 }
 0x63e   : > { %v3489_v33 = vpop.f32.mrf.mxu0  ;;  %v3533_v25 = vadd.f32 %v3502_v11, %v3453_v62 }
 0x63f   : > { %v3515_v34 = vpop.f32.mrf.mxu2  ;;  %v3528_v12 = vpop.f32.mrf.mxu3  ;;  %v3532_v44 = vadd.f32 %v3489_v33, %v3452_v63 }
 0x640   : > { %v3534_v47 = vadd.f32 %v3515_v34, %v3454_v7  ;;  %v3535_v49 = vadd.f32 %v3528_v12, %v3455_v4 }
 0x645   : > { %v3504_v13 = vpop.f32.mrf.mxu1 }
 0x646   : > { %v3491_v14 = vpop.f32.mrf.mxu0 }
 0x647   : > { %v3517_v32 = vpop.f32.mrf.mxu2  ;;  %v3530_v15 = vpop.f32.mrf.mxu3 }
 0x64d   : > { %v3611_v16 = vpop.f32.mrf.mxu1 }
 0x64e   : > { %v3598_v31 = vpop.f32.mrf.mxu0  ;;  %v3642_v48 = vadd.f32 %v3611_v16, %v3533_v25 }
 0x64f   : > { %v3624_v42 = vpop.f32.mrf.mxu2  ;;  %v3637_v18 = vpop.f32.mrf.mxu3  ;;  %v3641_v50 = vadd.f32 %v3598_v31, %v3532_v44 }
 0x650   : > { %v3643_v51 = vadd.f32 %v3624_v42, %v3534_v47  ;;  %v3644_v52 = vadd.f32 %v3637_v18, %v3535_v49  ;;  %v4212_v47 = vld [vmem:[#allocation3 + $0x14] sm:$0x3] }
 0x655   : > { %v3613_v20 = vpop.f32.mrf.mxu1 }
 0x656   : > { %v3600_v22 = vpop.f32.mrf.mxu0 }
 0x657   : > { %v3626_v10 = vpop.f32.mrf.mxu2  ;;  %v3639_v23 = vpop.f32.mrf.mxu3 }
 0x65d   : > { %v3720_v36 = vpop.f32.mrf.mxu1 }
 0x65e   : > { %v3707_v19 = vpop.f32.mrf.mxu0  ;;  %v3751_v53 = vadd.f32 %v3720_v36, %v3642_v48 }
 0x65f   : > { %v3733_v24 = vpop.f32.mrf.mxu2  ;;  %v3746_v26 = vpop.f32.mrf.mxu3  ;;  %v3750_v54 = vadd.f32 %v3707_v19, %v3641_v50 }
 0x660   : > { %v3752_v55 = vadd.f32 %v3733_v24, %v3643_v51  ;;  %v3753_v56 = vadd.f32 %v3746_v26, %v3644_v52 }
 0x665   : > { %v3722_v17 = vpop.f32.mrf.mxu1 }
 0x666   : > { %v3709_v27 = vpop.f32.mrf.mxu0 }
 0x667   : > { %v3735_v28 = vpop.f32.mrf.mxu2  ;;  %v3748_v21 = vpop.f32.mrf.mxu3 }
 0x66d   : > { %v3829_v29 = vpop.f32.mrf.mxu1 }
 0x66e   : > { %v3816_v39 = vpop.f32.mrf.mxu0  ;;  %v3860_v57 = vadd.f32 %v3829_v29, %v3751_v53 }
 0x66f   : > { %v3842_v40 = vpop.f32.mrf.mxu2  ;;  %v3855_v37 = vpop.f32.mrf.mxu3  ;;  %v3859_v8 = vadd.f32 %v3816_v39, %v3750_v54  ;;  %v4010_v39 = vld [vmem:[#allocation3 + $0x14] sm:$0x3] }
 0x670   : > { %v3861_v1 = vadd.f32 %v3842_v40, %v3752_v55  ;;  %v3862_v62 = vadd.f32 %v3855_v37, %v3753_v56  ;;  %v9366_v37 = vld [vmem:[%s10616_s2 + $0x10] sm:$0x3] }
 0x671   : > { %v4014_v44 = vunpack.c.l.b16 %v9366_v37 }
 0x675   : > { %v3831_v30 = vpop.f32.mrf.mxu1 }
 0x676   : > { %v3818_v43 = vpop.f32.mrf.mxu0 }
 0x677   : > { %v3844_v45 = vpop.f32.mrf.mxu2  ;;  %v3857_v46 = vpop.f32.mrf.mxu3 }
 0x678   : > { %v4015_v46 = vpack.c.b16 %v4014_v44, %v4014_v44 }
 0x67d   : > { %v3938_v9 = vpop.f32.mrf.mxu1 }
 0x67e   : > { %v3925_v3 = vpop.f32.mrf.mxu0  ;;  %v3969_v63 = vadd.f32 %v3938_v9, %v3860_v57  ;;  %v8114_v9 = vld [vmem:[%s10616_s2 + $0x10] sm:$0x3] }
 0x67f   : > { %v3968_v5 = vadd.f32 %v3925_v3, %v3859_v8  ;;  %v3951_v60 = vpop.f32.mrf.mxu2  ;;  %v3964_v7 = vpop.f32.mrf.mxu3 }
 0x680   : > { %v3970_v4 = vadd.f32 %v3951_v60, %v3861_v1  ;;  %v3971_v0 = vadd.f32 %v3964_v7, %v3862_v62  ;;  %v3980_v6 = vadd.f32 %v3977_v59, %v3969_v63  ;;  %v4214_v62 = vunpack.c.l.b16 %v8114_v9 }
 0x681   : > { %v3979_v11 = vadd.f32 %v3977_v59, %v3968_v5 }
 0x682   : > { %v3981_v33 = vadd.f32 %v3977_v59, %v3970_v4  ;;  %v3982_v34 = vadd.f32 %v3977_v59, %v3971_v0  ;;  %v3984_v12 = vmax.f32 %v3980_v6, 0.0  ;;  %v4428_v59 = vld [vmem:[#allocation3 + $0x14] sm:$0x3]  ;;  %v4215_v3 = vpack.c.b16 %v4214_v62, %v4214_v62  ;;  %v8119_v6 = vld [vmem:[%s10616_s2 + $0x10] sm:$0x3] }
 0x683   : > { %v3983_v13 = vmax.f32 %v3979_v11, 0.0  ;;  %v4644_v11 = vld [vmem:[#allocation3 + $0x14] sm:$0x3]  ;;  %v8139_v62 = vld [vmem:[%s10616_s2 + $0x10] sm:$0x3] }
 0x684   : > { %v3985_v14 = vmax.f32 %v3981_v33, 0.0  ;;  %v3986_v32 = vmax.f32 %v3982_v34, 0.0  ;;  %v3988_v15 = vmul.f32 %v3984_v12, %v8731_v38 }
 0x685   : > { %v3987_v16 = vmul.f32 %v3983_v13, %v8733_v41  ;;  %v3940_v31 = vpop.f32.mrf.mxu1 }
 0x686   : > { %v3989_v42 = vmul.f32 %v3985_v14, %v8739_v58  ;;  %v3990_v18 = vmul.f32 %v3986_v32, %v8741_v2  ;;  %v3927_v20 = vpop.f32.mrf.mxu0  ;;  %v4322_v32 = vunpack.c.l.b16 %v8119_v6 }
 0x687   : > { %v3991_v22 = vpack.c.bf16 %v3988_v15, %v3987_v16  ;;  %v3953_v10 = vpop.f32.mrf.mxu2  ;;  %v3966_v23 = vpop.f32.mrf.mxu3 }
 0x688   : > { %v3992_v36 = vpack.c.bf16 %v3990_v18, %v3989_v42  ;;  %v4323_v15 = vpack.c.b16 %v4322_v32, %v4322_v32  ;;  %v8124_v10 = vld [vmem:[%s10616_s2 + $0x10] sm:$0x3]  ;;  %v5020_v23 = vld [vmem:[#allocation3 + $0x16] sm:$0x3] }
 0x689   : > { %v3995_v19 = vrot.slane %v3991_v22, 2 }
 0x68a   : > { %v3996_v24 = vrot.slane %v3992_v36, 4  ;;  %v3997_v26 = vrot.slane %v3992_v36, 6 }
 0x68b   : > { %v4000_v17 = vsel %vm304_vm1, %v3991_v22, %v3995_v19 }
 0x68c   : > { %v4003_v27 = vsel %vm2068_vm12, %v3996_v24, %v3997_v26  ;;  %v4430_v24 = vunpack.c.l.b16 %v8124_v10 }
 0x68d   : > { %v9357_v28 = vsel %vm1270_vm10, %v4000_v17, %v4003_v27 }
 0x68e   : > { %4006 = vst [vmem:[#allocation4 + $0x2] sm:$0xff] %v9357_v28  ;;  %v4431_v27 = vpack.c.b16 %v4430_v24, %v4430_v24 }
 0x695   : > { %v9360_v21 = vld [vmem:[#allocation4] sm:$0xff]  ;;  %v4012_v29 = vld [vmem:[#allocation4 + $0x8] sm:$0x3] }
 0x696   : > { %4022 = vst [vmem:[#allocation1 + $0x20] ss:$4 sm:$0xff] %v4012_v29  ;;  %v4320_v53 = vld [vmem:[#allocation4 + $0x8] sm:$0x3] }
 0x697   : > { %4019 = vst [vmem:[#allocation1] ss:$4 sm:$0xff] %v9360_v21  ;;  %v4536_v4 = vld [vmem:[#allocation4 + $0x8] sm:$0x3] }
 0x698   : > { %v4752_v16 = vld [vmem:[#allocation4 + $0x8] sm:$0x3] }
 0x69d   : > { %v4031_v40 = vld.sshfl [vmem:[#allocation1 + $0x20] sm:$0xff pattern:$0x73625140] }
 0x69e   : > { %4118 = vst [vmem:[#allocation1 + $0x20] ss:$4 sm:$0xff] %v4010_v39  ;;  %4041 = vrot.lane.b32.xlu1 %v4031_v40, %s8409_s7  ;;  %v4029_v30 = vld.sshfl [vmem:[#allocation1 + $0x18] sm:$0xff pattern:$0x73625140] }
 0x69f   : > { %4039 = vrot.lane.b32.xlu0 %v4029_v30, %s8409_s7  ;;  %v4027_v25 = vld.sshfl [vmem:[#allocation1 + $0x10] sm:$0xff pattern:$0x73625140]  ;;  %v4025_v43 = vld.sshfl [vmem:[#allocation1 + $0x8] sm:$0xff pattern:$0x73625140] }
 0x6a0   : > { %4037 = vrot.lane.b32.xlu2 %v4027_v25, %s8409_s7  ;;  %v4023_v45 = vld.sshfl [vmem:[#allocation1] sm:$0xff pattern:$0x73625140]  ;;  %v8129_v25 = vld [vmem:[%s10616_s2 + $0x10] sm:$0x3] }
 0x6a1   : > { %4115 = vst [vmem:[#allocation1] ss:$4 sm:$0xff] %v9192_v61 }
 0x6a5   : > { %v4127_v49 = vld.sshfl [vmem:[#allocation1 + $0x20] sm:$0xff pattern:$0x73625140] }
 0x6a6   : > { %4035 = vrot.lane.b32.xlu1 %v4025_v43, %s8409_s7  ;;  %4222 = vst [vmem:[#allocation1 + $0x20] ss:$4 sm:$0xff] %v4212_v47  ;;  %v4538_v43 = vunpack.c.l.b16 %v8129_v25 }
 0x6a7   : > { %4033 = vrot.lane.b32.xlu0 %v4023_v45, %s8409_s7 }
 0x6a8   : > { %4016 = vrot.lane.b32.xlu2 %v4015_v46, %s8408_s6  ;;  %v4125_v48 = vld.sshfl [vmem:[#allocation1 + $0x18] sm:$0xff pattern:$0x73625140]  ;;  %v4123_v50 = vld.sshfl [vmem:[#allocation1 + $0x10] sm:$0xff pattern:$0x73625140] }
 0x6a9   : > { %v4121_v51 = vld.sshfl [vmem:[#allocation1 + $0x8] sm:$0xff pattern:$0x73625140]  ;;  %v4119_v52 = vld.sshfl [vmem:[#allocation1] sm:$0xff pattern:$0x73625140] }
 0x6aa   : > { %4219 = vst [vmem:[#allocation1] ss:$4 sm:$0xff] %v9192_v61 }
 0x6ad   : > { %v4231_v54 = vld.sshfl [vmem:[#allocation1 + $0x20] sm:$0xff pattern:$0x73625140] }
 0x6ae   : > { %4137 = vrot.lane.b32.xlu1 %v4127_v49, %s8409_s7  ;;  %4330 = vst [vmem:[#allocation1 + $0x20] ss:$4 sm:$0xff] %v4320_v53  ;;  %v4539_v49 = vpack.c.b16 %v4538_v43, %v4538_v43  ;;  %v8134_v53 = vld [vmem:[%s10616_s2 + $0x10] sm:$0x3] }
 0x6af   : > { %4135 = vrot.lane.b32.xlu0 %v4125_v48, %s8409_s7 }
 0x6b0   : > { %4133 = vrot.lane.b32.xlu2 %v4123_v50, %s8409_s7 }
 0x6b1   : > { %v4227_v55 = vld.sshfl [vmem:[#allocation1 + $0x10] sm:$0xff pattern:$0x73625140]  ;;  %v4229_v56 = vld.sshfl [vmem:[#allocation1 + $0x18] sm:$0xff pattern:$0x73625140] }
 0x6b2   : > { %v4225_v57 = vld.sshfl [vmem:[#allocation1 + $0x8] sm:$0xff pattern:$0x73625140]  ;;  %v4223_v8 = vld.sshfl [vmem:[#allocation1] sm:$0xff pattern:$0x73625140] }
 0x6b3   : > { %4327 = vst [vmem:[#allocation1] ss:$4 sm:$0xff] %v9360_v21 }
 0x6b5   : > { %v4339_v1 = vld.sshfl [vmem:[#allocation1 + $0x20] sm:$0xff pattern:$0x73625140] }
 0x6b6   : > { %4237 = vrot.lane.b32.xlu1 %v4227_v55, %s10640_s9  ;;  %4438 = vst [vmem:[#allocation1 + $0x20] ss:$4 sm:$0xff] %v4428_v59 }
 0x6b7   : > { %4131 = vrot.lane.b32.xlu0 %v4121_v51, %s8409_s7 }
 0x6b8   : > { %4129 = vrot.lane.b32.xlu2 %v4119_v52, %s8409_s7 }
 0x6ba   : > { %v4335_v63 = vld.sshfl [vmem:[#allocation1 + $0x10] sm:$0xff pattern:$0x73625140]  ;;  %v4337_v5 = vld.sshfl [vmem:[#allocation1 + $0x18] sm:$0xff pattern:$0x73625140] }
 0x6bb   : > { %v4333_v60 = vld.sshfl [vmem:[#allocation1 + $0x8] sm:$0xff pattern:$0x73625140]  ;;  %v4331_v7 = vld.sshfl [vmem:[#allocation1] sm:$0xff pattern:$0x73625140] }
 0x6bc   : > { %4435 = vst [vmem:[#allocation1] ss:$4 sm:$0xff] %v9192_v61 }
 0x6bd   : > { %v4447_v0 = vld.sshfl [vmem:[#allocation1 + $0x20] sm:$0xff pattern:$0x73625140] }
 0x6be   : > { %4216 = vrot.lane.b32.xlu1 %v4215_v3, %s8411_s11  ;;  %4546 = vst [vmem:[#allocation1 + $0x20] ss:$4 sm:$0xff] %v4536_v4  ;;  %v4754_v4 = vunpack.c.l.b16 %v8139_v62 }
 0x6bf   : > { %4241 = vrot.lane.b32.xlu0 %v4231_v54, %s10640_s9  ;;  %v4646_v54 = vunpack.c.l.b16 %v8134_v53 }
 0x6c0   : > { %4239 = vrot.lane.b32.xlu2 %v4229_v56, %s10640_s9 }
 0x6c1   : > { %v4647_v56 = vpack.c.b16 %v4646_v54, %v4646_v54 }
 0x6c3   : > { %v4443_v33 = vld.sshfl [vmem:[#allocation1 + $0x10] sm:$0xff pattern:$0x73625140]  ;;  %v4445_v34 = vld.sshfl [vmem:[#allocation1 + $0x18] sm:$0xff pattern:$0x73625140] }
 0x6c4   : > { %v4441_v12 = vld.sshfl [vmem:[#allocation1 + $0x8] sm:$0xff pattern:$0x73625140]  ;;  %v4439_v13 = vld.sshfl [vmem:[#allocation1] sm:$0xff pattern:$0x73625140] }
 0x6c5   : > { %4543 = vst [vmem:[#allocation1] ss:$4 sm:$0xff] %v9360_v21  ;;  %v4555_v14 = vld.sshfl [vmem:[#allocation1 + $0x20] sm:$0xff pattern:$0x73625140] }
 0x6c6   : > { %4345 = vrot.lane.b32.xlu1 %v4335_v63, %s10640_s9  ;;  %4654 = vst [vmem:[#allocation1 + $0x20] ss:$4 sm:$0xff] %v4644_v11  ;;  %v4755_v11 = vpack.c.b16 %v4754_v4, %v4754_v4 }
 0x6c7   : > { %4235 = vrot.lane.b32.xlu0 %v4225_v57, %s10640_s9 }
 0x6c8   : > { %4233 = vrot.lane.b32.xlu2 %v4223_v8, %s10640_s9 }
 0x6cc   : > { %v4551_v31 = vld.sshfl [vmem:[#allocation1 + $0x10] sm:$0xff pattern:$0x73625140]  ;;  %v4553_v42 = vld.sshfl [vmem:[#allocation1 + $0x18] sm:$0xff pattern:$0x73625140] }
 0x6cd   : > { %v4549_v18 = vld.sshfl [vmem:[#allocation1 + $0x8] sm:$0xff pattern:$0x73625140]  ;;  %v4547_v20 = vld.sshfl [vmem:[#allocation1] sm:$0xff pattern:$0x73625140] }
 0x6ce   : > { %4324 = vrot.lane.b32.xlu1 %v4323_v15, %s8413_s24  ;;  %4651 = vst [vmem:[#allocation1] ss:$4 sm:$0xff] %v9192_v61  ;;  %v4663_v22 = vld.sshfl [vmem:[#allocation1 + $0x20] sm:$0xff pattern:$0x73625140] }
 0x6cf   : > { %4349 = vrot.lane.b32.xlu0 %v4339_v1, %s10640_s9  ;;  %4762 = vst [vmem:[#allocation1 + $0x20] ss:$4 sm:$0xff] %v4752_v16 }
 0x6d0   : > { %4347 = vrot.lane.b32.xlu2 %v4337_v5, %s10640_s9 }
 0x6d5   : > { %v4659_v36 = vld.sshfl [vmem:[#allocation1 + $0x10] sm:$0xff pattern:$0x73625140]  ;;  %v4661_v19 = vld.sshfl [vmem:[#allocation1 + $0x18] sm:$0xff pattern:$0x73625140] }
 0x6d6   : > { %4453 = vrot.lane.b32.xlu1 %v4443_v33, %s8410_s8  ;;  %v4657_v26 = vld.sshfl [vmem:[#allocation1 + $0x8] sm:$0xff pattern:$0x73625140]  ;;  %v4655_v17 = vld.sshfl [vmem:[#allocation1] sm:$0xff pattern:$0x73625140] }
 0x6d7   : > { %4343 = vrot.lane.b32.xlu0 %v4333_v60, %s10640_s9  ;;  %4759 = vst [vmem:[#allocation1] ss:$4 sm:$0xff] %v9360_v21  ;;  %v9408_v61 = vld.sshfl [vmem:[#allocation1 + $0x20] sm:$0xff pattern:$0x73625140]  ;;  %v9420_v21 = vld [vmem:[#allocation3 + $0xe] sm:$0xff] }
 0x6d8   : > { %4341 = vrot.lane.b32.xlu2 %v4331_v7, %s10640_s9  ;;  %5030 = vst [vmem:[#allocation1 + $0x20] ss:$4 sm:$0xff] %v5020_v23  ;;  %v5128_v7 = vld [vmem:[#allocation4 + $0xa] sm:$0x3]  ;;  %v8144_v33 = vld [vmem:[%s10616_s2 + $0x10] sm:$0x3] }
 0x6d9   : > { %v4861_v32 = vunpack.c.l.b16 %v8144_v33  ;;  %v5236_v23 = vld [vmem:[#allocation3 + $0x16] sm:$0x3] }
 0x6de   : > { %4432 = vrot.lane.b32.xlu1 %v4431_v27, %s8414_s25  ;;  %v4767_v29 = vld.sshfl [vmem:[#allocation1 + $0x10] sm:$0xff pattern:$0x73625140]  ;;  %v9412_v39 = vld.sshfl [vmem:[#allocation1 + $0x18] sm:$0xff pattern:$0x73625140] }
 0x6df   : > { %4457 = vrot.lane.b32.xlu0 %v4447_v0, %s8410_s8  ;;  %v9415_v40 = vld.sshfl [vmem:[#allocation1 + $0x8] sm:$0xff pattern:$0x73625140]  ;;  %v9417_v30 = vld.sshfl [vmem:[#allocation1] sm:$0xff pattern:$0x73625140] }
 0x6e0   : > { %4455 = vrot.lane.b32.xlu2 %v4445_v34, %s8410_s8  ;;  %4866 = vst [vmem:[#allocation1] ss:$4 sm:$0xff] %v9420_v21  ;;  %v9486_v0 = vld.sshfl [vmem:[#allocation1 + $0x20] sm:$0xff pattern:$0x73625140] }
 0x6e1   : > { %5138 = vst [vmem:[#allocation1 + $0x20] ss:$4 sm:$0xff] %v5128_v7 }
 0x6e6   : > { %4561 = vrot.lane.b32.xlu1 %v4551_v31, %s8410_s8 }
 0x6e7   : > { %4451 = vrot.lane.b32.xlu0 %v4441_v12, %s8410_s8  ;;  %v9428_v44 = vld.sshfl [vmem:[#allocation1] sm:$0xff pattern:$0x73625140]  ;;  %v9430_v45 = vld.sshfl [vmem:[#allocation1 + $0x8] sm:$0xff pattern:$0x73625140] }
 0x6e8   : > { %4449 = vrot.lane.b32.xlu2 %v4439_v13, %s8410_s8  ;;  %v9433_v46 = vld.sshfl [vmem:[#allocation1 + $0x10] sm:$0xff pattern:$0x73625140]  ;;  %v9435_v47 = vld.sshfl [vmem:[#allocation1 + $0x18] sm:$0xff pattern:$0x73625140] }
 0x6e9   : > { %4946 = vst [vmem:[#allocation1] ss:$4 sm:$0xff] %v9357_v28 }
 0x6ee   : > { %4540 = vrot.lane.b32.xlu1 %v4539_v49, %s8416_s30 }
 0x6ef   : > { %4565 = vrot.lane.b32.xlu0 %v4555_v14, %s8410_s8 }
 0x6f0   : > { %4563 = vrot.lane.b32.xlu2 %v4553_v42, %s8410_s8  ;;  %v9441_v48 = vld.sshfl [vmem:[#allocation1] sm:$0xff pattern:$0x73625140]  ;;  %v9443_v50 = vld.sshfl [vmem:[#allocation1 + $0x8] sm:$0xff pattern:$0x73625140] }
 0x6f1   : > { %v9445_v51 = vld.sshfl [vmem:[#allocation1 + $0x10] sm:$0xff pattern:$0x73625140]  ;;  %v9447_v52 = vld.sshfl [vmem:[#allocation1 + $0x18] sm:$0xff pattern:$0x73625140] }
 0x6f2   : > { %5027 = vst [vmem:[#allocation1] ss:$4 sm:$0xff] %v9420_v21 }
 0x6f6   : > { %4669 = vrot.lane.b32.xlu1 %v4659_v36, %s8412_s14  ;;  %v8149_v36 = vld [vmem:[%s10616_s2 + $0x10] sm:$0x3] }
 0x6f7   : > { %4559 = vrot.lane.b32.xlu0 %v4549_v18, %s8410_s8 }
 0x6f8   : > { %4557 = vrot.lane.b32.xlu2 %v4547_v20, %s8410_s8  ;;  %v4862_v20 = vpack.c.b16 %v4861_v32, %v4861_v32 }
 0x6f9   : > { %v9458_v57 = vld.sshfl [vmem:[#allocation1 + $0x18] sm:$0xff pattern:$0x73625140]  ;;  %v9460_v8 = vld.sshfl [vmem:[#allocation1 + $0x10] sm:$0xff pattern:$0x73625140] }
 0x6fa   : > { %v9456_v55 = vpop.permute.xlu2 %4037  ;;  %v9462_v9 = vld.sshfl [vmem:[#allocation1] sm:$0xff pattern:$0x73625140]  ;;  %v9464_v59 = vld.sshfl [vmem:[#allocation1 + $0x8] sm:$0xff pattern:$0x73625140] }
 0x6fb   : > { %5135 = vst [vmem:[#allocation1] ss:$4 sm:$0xff] %v9357_v28 }
 0x6fe   : > { %4648 = vrot.lane.b32.xlu1 %v4647_v56, %s8418_s13 }
 0x6ff   : > { %4673 = vrot.lane.b32.xlu0 %v4663_v22, %s8412_s14 }
 0x700   : > { %4671 = vrot.lane.b32.xlu2 %v4661_v19, %s8412_s14 }
 0x702   : > { %v9470_v1 = vpop.permute.xlu2 %4016  ;;  %v9475_v3 = vld.sshfl [vmem:[#allocation1 + $0x18] sm:$0xff pattern:$0x73625140]  ;;  %v9477_v63 = vld.sshfl [vmem:[#allocation1 + $0x10] sm:$0xff pattern:$0x73625140] }
 0x703   : > { %v9479_v5 = vld.sshfl [vmem:[#allocation1] sm:$0xff pattern:$0x73625140]  ;;  %v9481_v60 = vld.sshfl [vmem:[#allocation1 + $0x8] sm:$0xff pattern:$0x73625140] }
 0x704   : > { %5243 = vst [vmem:[#allocation1] ss:$4 sm:$0xff] %v9420_v21 }
 0x706   : > { %4777 = vrot.lane.b32.xlu1 %v4767_v29, %s8412_s14  ;;  %v4941_v29 = vunpack.c.l.b16 %v8149_v36 }
 0x707   : > { %4667 = vrot.lane.b32.xlu0 %v4657_v26, %s8412_s14 }
 0x708   : > { %4665 = vrot.lane.b32.xlu2 %v4655_v17, %s8412_s14 }
 0x70a   : > { %v9489_v6 = vpop.permute.xlu2 %4133 }
 0x70b   : > { %v9494_v34 = vld.sshfl [vmem:[#allocation1 + $0x18] sm:$0xff pattern:$0x73625140]  ;;  %v9496_v12 = vld.sshfl [vmem:[#allocation1 + $0x10] sm:$0xff pattern:$0x73625140] }
 0x70c   : > { %v9498_v13 = vld.sshfl [vmem:[#allocation1] sm:$0xff pattern:$0x73625140]  ;;  %v9500_v14 = vld.sshfl [vmem:[#allocation1 + $0x8] sm:$0xff pattern:$0x73625140] }
 0x70d   : > { %5351 = vst [vmem:[#allocation1] ss:$4 sm:$0xff] %v9357_v28 }
 0x70e   : > { %4756 = vrot.lane.b32.xlu1 %v4755_v11, %s8419_s26 }
 0x70f   : > { %4781 = vrot.lane.b32.xlu0 %v9408_v61, %s8412_s14  ;;  %v9531_v61 = vld.sshfl [vmem:[#allocation1 + $0x20] sm:$0xff pattern:$0x73625140] }
 0x710   : > { %4779 = vrot.lane.b32.xlu2 %v9412_v39, %s8412_s14  ;;  %v4042_v15 = vpop.permute.xlu1 %4041  ;;  %5246 = vst [vmem:[#allocation1 + $0x20] ss:$4 sm:$0xff] %v5236_v23 }
 0x711   : > { %v4040_v16 = vpop.permute.xlu0 %4039 }
 0x712   : > { %v4045_v31 = vsel %vm392_vm3, %v9456_v55, %v4040_v16  ;;  %v4046_v42 = vsel %vm392_vm3, %v4040_v16, %v4042_v15  ;;  %v9511_v18 = vpop.permute.xlu2 %4129 }
 0x713   : > { %v4057_v22 = vsel %vm304_vm1, %v4045_v31, 0  ;;  %v4060_v10 = vsel %vm304_vm1, %v4046_v42, 0 }
 0x714   : > { %4095 = vmatpush.bf16.msra.mxu2 %v4057_v22  ;;  %4108 = vmatpush.bf16.msra.mxu3 %v4060_v10  ;;  %v9518_v19 = vld.sshfl [vmem:[#allocation1 + $0x18] sm:$0xff pattern:$0x73625140]  ;;  %v9520_v24 = vld.sshfl [vmem:[#allocation1 + $0x10] sm:$0xff pattern:$0x73625140] }
 0x715   : > { %v9523_v26 = vld.sshfl [vmem:[#allocation1] sm:$0xff pattern:$0x73625140]  ;;  %v9525_v17 = vld.sshfl [vmem:[#allocation1 + $0x8] sm:$0xff pattern:$0x73625140] }
 0x716   : > { %4863 = vrot.lane.b32.xlu1 %v4862_v20, %s10639_s28  ;;  %5459 = vst [vmem:[#allocation1] ss:$4 sm:$0xff] %v9420_v21  ;;  %s10649_s28 = smov 88  }
 0x717   : > { %8108 = vmatmul.msk.bf16.vlgmr.msra.gmra.mxu2 %vm300_vm2, %v9470_v1  ;;  %8109 = vmatmul.msk.bf16.vlgmr.msra.gmra.mxu3 %vm300_vm2, %v9470_v1  ;;  %v9579_v42 = vld.sshfl [vmem:[#allocation1 + $0x20] sm:$0xff pattern:$0x73625140] }
 0x718   : > { %4775 = vrot.lane.b32.xlu0 %v9415_v40, %s8412_s14  ;;  %4773 = vrot.lane.b32.xlu2 %v9417_v30, %s8412_s14  ;;  %v4036_v27 = vpop.permute.xlu1 %4035  ;;  %v4942_v40 = vpack.c.b16 %v4941_v29, %v4941_v29  ;;  %v8154_v30 = vld [vmem:[%s10616_s2 + $0x10] sm:$0x3] }
 0x719   : > { %v4044_v39 = vsel %vm392_vm3, %v4036_v27, %v9456_v55  ;;  %v4034_v25 = vpop.permute.xlu0 %4033  ;;  %v5022_v11 = vunpack.c.l.b16 %v8154_v30 }
 0x71a   : > { %v4043_v43 = vsel %vm392_vm3, %v4034_v25, %v4036_v27  ;;  %v9541_v49 = vpop.permute.xlu2 %4239  ;;  %v4054_v53 = vsel %vm304_vm1, %v4044_v39, 0 }
 0x71b   : > { %v4051_v54 = vsel %vm304_vm1, %v4043_v43, 0  ;;  %4082 = vmatpush.bf16.msra.mxu1 %v4054_v53  ;;  %v5023_v31 = vpack.c.b16 %v5022_v11, %v5022_v11 }
 0x71c   : > { %4069 = vmatpush.bf16.msra.mxu0 %v4051_v54 }
 0x71d   : > { %v9552_v55 = vld.sshfl [vmem:[#allocation1 + $0x18] sm:$0xff pattern:$0x73625140]  ;;  %v9554_v56 = vld.sshfl [vmem:[#allocation1 + $0x10] sm:$0xff pattern:$0x73625140] }
 0x71e   : > { %8107 = vmatmul.msk.bf16.vlgmr.msra.gmra.mxu1 %vm300_vm2, %v9470_v1  ;;  %5047 = vrot.lane.b32.xlu1 %v9458_v57, %s10636_s29  ;;  %v9558_v62 = vld.sshfl [vmem:[#allocation1] sm:$0xff pattern:$0x73625140]  ;;  %v9560_v7 = vld.sshfl [vmem:[#allocation1 + $0x8] sm:$0xff pattern:$0x73625140] }
 0x71f   : > { %8106 = vmatmul.msk.bf16.vlgmr.msra.gmra.mxu0 %vm300_vm2, %v9470_v1  ;;  %5567 = vst [vmem:[#allocation1] ss:$4 sm:$0xff] %v9357_v28 }
 0x720   : > { %4943 = vrot.lane.b32.xlu2 %v4942_v40, %s10638_s27  ;;  %5045 = vrot.lane.b32.xlu0 %v9460_v8, %s10636_s29  ;;  %v4138_v4 = vpop.permute.xlu1 %4137  ;;  %v5344_v8 = vld [vmem:[#allocation4 + $0xa] sm:$0x3]  ;;  %s8438_s27 = smov 60  }
 0x721   : > { %v4136_v57 = vpop.permute.xlu0 %4135  ;;  %5354 = vst [vmem:[#allocation1 + $0x20] ss:$4 sm:$0xff] %v5344_v8 }
 0x722   : > { %v4141_v33 = vsel %vm392_vm3, %v9489_v6, %v4136_v57  ;;  %v4142_v1 = vsel %vm392_vm3, %v4136_v57, %v4138_v4  ;;  %v9569_v32 = vpop.permute.xlu2 %4233 }
 0x723   : > { %v4153_v15 = vsel %vm304_vm1, %v4141_v33, 0  ;;  %v4156_v16 = vsel %vm304_vm1, %v4142_v1, 0 }
 0x724   : > { %4191 = vmatpush.bf16.msrb.mxu2 %v4153_v15  ;;  %4204 = vmatpush.bf16.msrb.mxu3 %v4156_v16 }
 0x726   : > { %5041 = vrot.lane.b32.xlu1 %v9462_v9, %s10636_s29  ;;  %v9584_v22 = vld.sshfl [vmem:[#allocation1 + $0x18] sm:$0xff pattern:$0x73625140]  ;;  %v9588_v23 = vld.sshfl [vmem:[#allocation1 + $0x10] sm:$0xff pattern:$0x73625140] }
 0x727   : > { %8112 = vmatmul.msk.bf16.vlgmr.msrb.gmra.mxu2 %vm300_vm2, %v9366_v37  ;;  %8113 = vmatmul.msk.bf16.vlgmr.msrb.gmra.mxu3 %vm300_vm2, %v9366_v37  ;;  %v9590_v36 = vld.sshfl [vmem:[#allocation1] sm:$0xff pattern:$0x73625140]  ;;  %v9597_v25 = vld.sshfl [vmem:[#allocation1 + $0x8] sm:$0xff pattern:$0x73625140] }
 0x728   : > { %5049 = vrot.lane.b32.xlu2 %v9486_v0, %s10636_s29  ;;  %5024 = vrot.lane.b32.xlu0 %v5023_v31, %s10634_s23  ;;  %v4238_v20 = vpop.permute.xlu1 %4237  ;;  %5675 = vst [vmem:[#allocation1] ss:$4 sm:$0xff] %v9420_v21  ;;  %s10635_s23 = smov 68  }
 0x729   : > { %v4132_v10 = vpop.permute.xlu0 %4131  ;;  %v4245_v9 = vsel %vm295_vm0, %v4238_v20, %v9541_v49 }
 0x72a   : > { %v4139_v27 = vsel %vm392_vm3, %v9511_v18, %v4132_v10  ;;  %v4140_v0 = vsel %vm392_vm3, %v4132_v10, %v9489_v6  ;;  %v4348_v29 = vpop.permute.xlu2 %4347  ;;  %v4257_v39 = vsel %vm304_vm1, %v4245_v9, 0  ;;  %v8159_v18 = vld [vmem:[%s10616_s2 + $0x10] sm:$0x3] }
 0x72b   : > { %v4147_v43 = vsel %vm304_vm1, %v4139_v27, 0  ;;  %v4150_v53 = vsel %vm304_vm1, %v4140_v0, 0  ;;  %4295 = vmatpush.bf16.msra.mxu2 %v4257_v39  ;;  %v5130_v6 = vunpack.c.l.b16 %v8159_v18  ;;  %v8164_v10 = vld [vmem:[%s10616_s2 + $0x10] sm:$0x3] }
 0x72c   : > { %4165 = vmatpush.bf16.msrb.mxu0 %v4147_v43  ;;  %4178 = vmatpush.bf16.msrb.mxu1 %v4150_v53  ;;  %v5560_v43 = vld [vmem:[#allocation4 + $0xa] sm:$0x3] }
 0x72e   : > { %5155 = vrot.lane.b32.xlu1 %v9475_v3, %s10636_s29 }
 0x72f   : > { %8110 = vmatmul.msk.bf16.vlgmr.msrb.gmra.mxu0 %vm300_vm2, %v9366_v37  ;;  %8111 = vmatmul.msk.bf16.vlgmr.msrb.gmra.mxu1 %vm300_vm2, %v9366_v37  ;;  %v9617_v3 = vld.sshfl [vmem:[#allocation1 + $0x18] sm:$0xff pattern:$0x73625140]  ;;  %v9619_v4 = vld.sshfl [vmem:[#allocation1 + $0x10] sm:$0xff pattern:$0x73625140] }
 0x730   : > { %5043 = vrot.lane.b32.xlu2 %v9464_v59, %s10636_s29  ;;  %5153 = vrot.lane.b32.xlu0 %v9477_v63, %s10636_s29  ;;  %v4217_v21 = vpop.permute.xlu1 %4216  ;;  %v9622_v37 = vld.sshfl [vmem:[#allocation1] sm:$0xff pattern:$0x73625140]  ;;  %v5131_v59 = vpack.c.b16 %v5130_v6, %v5130_v6  ;;  %v9624_v57 = vld.sshfl [vmem:[#allocation1 + $0x8] sm:$0xff pattern:$0x73625140] }
 0x731   : > { %v4242_v54 = vpop.permute.xlu0 %4241  ;;  %v5452_v63 = vld [vmem:[#allocation3 + $0x16] sm:$0x3]  ;;  %5783 = vst [vmem:[#allocation1] ss:$4 sm:$0xff] %v9357_v28 }
 0x732   : > { %v4246_v40 = vsel %vm295_vm0, %v9541_v49, %v4242_v54  ;;  %v4342_v30 = vpop.permute.xlu2 %4341  ;;  %v9631_v49 = vld.sshfl [vmem:[#allocation1 + $0x20] sm:$0xff pattern:$0x73625140] }
 0x733   : > { %v4260_v11 = vsel %vm304_vm1, %v4246_v40, 0  ;;  %5462 = vst [vmem:[#allocation1 + $0x20] ss:$4 sm:$0xff] %v5452_v63 }
 0x734   : > { %4308 = vmatpush.bf16.msra.mxu3 %v4260_v11 }
 0x736   : > { %5149 = vrot.lane.b32.xlu1 %v9479_v5, %s10636_s29 }
 0x737   : > { %8117 = vmatmul.msk.bf16.vlgmr.msra.gmra.mxu2 %vm300_vm2, %v4217_v21  ;;  %8118 = vmatmul.msk.bf16.vlgmr.msra.gmra.mxu3 %vm300_vm2, %v4217_v21 }
 0x738   : > { %5157 = vrot.lane.b32.xlu2 %v9531_v61, %s10636_s29  ;;  %5132 = vrot.lane.b32.xlu0 %v5131_v59, %s10632_s22  ;;  %v4346_v33 = vpop.permute.xlu1 %4345  ;;  %s10633_s22 = smov 76  }
 0x739   : > { %v4236_v1 = vpop.permute.xlu0 %4235  ;;  %v4353_v28 = vsel %vm295_vm0, %v4346_v33, %v4348_v29 }
 0x73a   : > { %v4243_v5 = vsel %vm295_vm0, %v9569_v32, %v4236_v1  ;;  %v4244_v15 = vsel %vm295_vm0, %v4236_v1, %v4238_v20  ;;  %v4456_v16 = vpop.permute.xlu2 %4455  ;;  %v4365_v31 = vsel %vm304_vm1, %v4353_v28, 0  ;;  %v5238_v20 = vunpack.c.l.b16 %v8164_v10  ;;  %v5668_v28 = vld [vmem:[#allocation3 + $0x16] sm:$0x3] }
 0x73b   : > { %v4251_v8 = vsel %vm304_vm1, %v4243_v5, 0  ;;  %v4254_v61 = vsel %vm304_vm1, %v4244_v15, 0  ;;  %4403 = vmatpush.bf16.msrb.mxu2 %v4365_v31 }
 0x73c   : > { %4269 = vmatpush.bf16.msra.mxu0 %v4251_v8  ;;  %4282 = vmatpush.bf16.msra.mxu1 %v4254_v61 }
 0x73e   : > { %5263 = vrot.lane.b32.xlu1 %v9494_v34, %s10641_s12  ;;  %v5239_v34 = vpack.c.b16 %v5238_v20, %v5238_v20 }
 0x73f   : > { %8115 = vmatmul.msk.bf16.vlgmr.msra.gmra.mxu0 %vm300_vm2, %v4217_v21  ;;  %8116 = vmatmul.msk.bf16.vlgmr.msra.gmra.mxu1 %vm300_vm2, %v4217_v21 }
 0x740   : > { %5151 = vrot.lane.b32.xlu2 %v9481_v60, %s10636_s29  ;;  %5261 = vrot.lane.b32.xlu0 %v9496_v12, %s10641_s12  ;;  %v4325_v32 = vpop.permute.xlu1 %4324  ;;  %v9660_v60 = vld.sshfl [vmem:[#allocation1 + $0x20] sm:$0xff pattern:$0x73625140]  ;;  %s10645_s29 = smov 64  }
 0x741   : > { %v4350_v9 = vpop.permute.xlu0 %4349  ;;  %5570 = vst [vmem:[#allocation1 + $0x20] ss:$4 sm:$0xff] %v5560_v43 }
 0x742   : > { %v4354_v27 = vsel %vm295_vm0, %v4348_v29, %v4350_v9  ;;  %v4450_v0 = vpop.permute.xlu2 %4449 }
 0x743   : > { %v4368_v39 = vsel %vm304_vm1, %v4354_v27, 0 }
 0x744   : > { %4416 = vmatpush.bf16.msrb.mxu3 %v4368_v39 }
 0x746   : > { %5257 = vrot.lane.b32.xlu1 %v9498_v13, %s10641_s12 }
 0x747   : > { %8122 = vmatmul.msk.bf16.vlgmr.msrb.gmra.mxu2 %vm300_vm2, %v4325_v32  ;;  %8123 = vmatmul.msk.bf16.vlgmr.msrb.gmra.mxu3 %vm300_vm2, %v4325_v32 }
 0x748   : > { %5265 = vrot.lane.b32.xlu2 %v9579_v42, %s10641_s12  ;;  %5240 = vrot.lane.b32.xlu0 %v5239_v34, %s10642_s5  ;;  %v4454_v12 = vpop.permute.xlu1 %4453  ;;  %v8169_v42 = vld [vmem:[%s10616_s2 + $0x10] sm:$0x3]  ;;  %v5776_v34 = vld [vmem:[#allocation4 + $0xa] sm:$0x3] }
 0x749   : > { %v4344_v29 = vpop.permute.xlu0 %4343  ;;  %v4461_v53 = vsel %vm497_vm4, %v4454_v12, %v4456_v16  ;;  %v5346_v11 = vunpack.c.l.b16 %v8169_v42 }
 0x74a   : > { %v4351_v18 = vsel %vm295_vm0, %v4342_v30, %v4344_v29  ;;  %v4352_v13 = vsel %vm295_vm0, %v4344_v29, %v4346_v33  ;;  %v4564_v21 = vpop.permute.xlu2 %4563  ;;  %v4473_v6 = vsel %vm304_vm1, %v4461_v53, 0 }
 0x74b   : > { %v4359_v54 = vsel %vm304_vm1, %v4351_v18, 0  ;;  %v4362_v40 = vsel %vm304_vm1, %v4352_v13, 0  ;;  %4511 = vmatpush.bf16.msra.mxu2 %v4473_v6 }
 0x74c   : > { %4377 = vmatpush.bf16.msrb.mxu0 %v4359_v54  ;;  %4390 = vmatpush.bf16.msrb.mxu1 %v4362_v40 }
 0x74e   : > { %5371 = vrot.lane.b32.xlu1 %v9518_v19, %s10641_s12  ;;  %v5347_v19 = vpack.c.b16 %v5346_v11, %v5346_v11 }
 0x74f   : > { %8120 = vmatmul.msk.bf16.vlgmr.msrb.gmra.mxu0 %vm300_vm2, %v4325_v32  ;;  %8121 = vmatmul.msk.bf16.vlgmr.msrb.gmra.mxu1 %vm300_vm2, %v4325_v32 }
 0x750   : > { %5259 = vrot.lane.b32.xlu2 %v9500_v14, %s10641_s12  ;;  %5369 = vrot.lane.b32.xlu0 %v9520_v24, %s10641_s12  ;;  %v4433_v30 = vpop.permute.xlu1 %4432  ;;  %v9688_v14 = vld.sshfl [vmem:[#allocation1 + $0x20] sm:$0xff pattern:$0x73625140] }
 0x751   : > { %v4458_v59 = vpop.permute.xlu0 %4457  ;;  %5678 = vst [vmem:[#allocation1 + $0x20] ss:$4 sm:$0xff] %v5668_v28 }
 0x752   : > { %v4462_v63 = vsel %vm497_vm4, %v4456_v16, %v4458_v59  ;;  %v4558_v33 = vpop.permute.xlu2 %4557 }
 0x753   : > { %v4476_v1 = vsel %vm304_vm1, %v4462_v63, 0 }
 0x754   : > { %4524 = vmatpush.bf16.msra.mxu3 %v4476_v1 }
 0x756   : > { %5365 = vrot.lane.b32.xlu1 %v9523_v26, %s10641_s12 }
 0x757   : > { %8127 = vmatmul.msk.bf16.vlgmr.msra.gmra.mxu2 %vm300_vm2, %v4433_v30  ;;  %8128 = vmatmul.msk.bf16.vlgmr.msra.gmra.mxu3 %vm300_vm2, %v4433_v30 }
 0x758   : > { %5373 = vrot.lane.b32.xlu2 %v9631_v49, %s10641_s12  ;;  %5348 = vrot.lane.b32.xlu0 %v5347_v19, %s10633_s22  ;;  %v4562_v24 = vpop.permute.xlu1 %4561  ;;  %v8174_v49 = vld [vmem:[%s10616_s2 + $0x10] sm:$0x3]  ;;  %s10643_s22 = smov 72  }
 0x759   : > { %v4452_v5 = vpop.permute.xlu0 %4451  ;;  %v4569_v15 = vsel %vm497_vm4, %v4562_v24, %v4564_v21  ;;  %v5454_v20 = vunpack.c.l.b16 %v8174_v49 }
 0x75a   : > { %v4459_v16 = vsel %vm497_vm4, %v4450_v0, %v4452_v5  ;;  %v4460_v26 = vsel %vm497_vm4, %v4452_v5, %v4454_v12  ;;  %v4672_v31 = vpop.permute.xlu2 %4671  ;;  %v4581_v8 = vsel %vm304_vm1, %v4569_v15, 0 }
 0x75b   : > { %v4467_v61 = vsel %vm304_vm1, %v4459_v16, 0  ;;  %v4470_v10 = vsel %vm304_vm1, %v4460_v26, 0  ;;  %4619 = vmatpush.bf16.msrb.mxu2 %v4581_v8 }
 0x75c   : > { %4485 = vmatpush.bf16.msra.mxu0 %v4467_v61  ;;  %4498 = vmatpush.bf16.msra.mxu1 %v4470_v10 }
 0x75e   : > { %5479 = vrot.lane.b32.xlu1 %v9552_v55, %s8416_s30  ;;  %v5455_v55 = vpack.c.b16 %v5454_v20, %v5454_v20  ;;  %v4874_v20 = vsel %vm304_vm1, %v9428_v44, 0  ;;  %v4954_v44 = vsel %vm304_vm1, %v9441_v48, 0 }
 0x75f   : > { %8125 = vmatmul.msk.bf16.vlgmr.msra.gmra.mxu0 %vm300_vm2, %v4433_v30  ;;  %8126 = vmatmul.msk.bf16.vlgmr.msra.gmra.mxu1 %vm300_vm2, %v4433_v30 }
 0x760   : > { %5367 = vrot.lane.b32.xlu2 %v9525_v17, %s10641_s12  ;;  %5477 = vrot.lane.b32.xlu0 %v9554_v56, %s8416_s30  ;;  %v4541_v32 = vpop.permute.xlu1 %4540  ;;  %v9719_v56 = vld.sshfl [vmem:[#allocation1 + $0x20] sm:$0xff pattern:$0x73625140] }
 0x761   : > { %v4566_v9 = vpop.permute.xlu0 %4565  ;;  %5786 = vst [vmem:[#allocation1 + $0x20] ss:$4 sm:$0xff] %v5776_v34 }
 0x762   : > { %v4570_v27 = vsel %vm497_vm4, %v4564_v21, %v4566_v9  ;;  %v4666_v0 = vpop.permute.xlu2 %4665  ;;  %v8179_v21 = vld [vmem:[%s10616_s2 + $0x10] sm:$0x3]  ;;  %v5793_v9 = vld.sshfl [vmem:[#allocation1 + $0x18] sm:$0xff pattern:$0x73625140] }
 0x763   : > { %v4584_v39 = vsel %vm304_vm1, %v4570_v27, 0  ;;  %v5562_v54 = vunpack.c.l.b16 %v8179_v21  ;;  %v8189_v27 = vld [vmem:[%s10616_s2 + $0x10] sm:$0x3] }
 0x764   : > { %4632 = vmatpush.bf16.msrb.mxu3 %v4584_v39 }
 0x766   : > { %5473 = vrot.lane.b32.xlu1 %v9558_v62, %s8416_s30 }
 0x767   : > { %8132 = vmatmul.msk.bf16.vlgmr.msrb.gmra.mxu2 %vm300_vm2, %v4541_v32  ;;  %8133 = vmatmul.msk.bf16.vlgmr.msrb.gmra.mxu3 %vm300_vm2, %v4541_v32 }
 0x768   : > { %5481 = vrot.lane.b32.xlu2 %v9660_v60, %s8416_s30  ;;  %5456 = vrot.lane.b32.xlu0 %v5455_v55, %s10643_s22  ;;  %v4670_v17 = vpop.permute.xlu1 %4669  ;;  %v5778_v55 = vunpack.c.l.b16 %v8189_v27 }
 0x769   : > { %v4560_v43 = vpop.permute.xlu0 %4559  ;;  %v4677_v12 = vsel %vm606_vm5, %v4670_v17, %v4672_v31 }
 0x76a   : > { %v4567_v29 = vsel %vm497_vm4, %v4558_v33, %v4560_v43  ;;  %v4568_v62 = vsel %vm497_vm4, %v4560_v43, %v4562_v24  ;;  %v4780_v53 = vpop.permute.xlu2 %4779  ;;  %v4689_v18 = vsel %vm304_vm1, %v4677_v12, 0  ;;  %v8184_v24 = vld [vmem:[%s10616_s2 + $0x10] sm:$0x3]  ;;  %v5779_v12 = vpack.c.b16 %v5778_v55, %v5778_v55 }
 0x76b   : > { %v4575_v13 = vsel %vm304_vm1, %v4567_v29, 0  ;;  %v4578_v60 = vsel %vm304_vm1, %v4568_v62, 0  ;;  %4727 = vmatpush.bf16.msra.mxu2 %v4689_v18  ;;  %v5670_v15 = vunpack.c.l.b16 %v8184_v24  ;;  %v5795_v29 = vld.sshfl [vmem:[#allocation1 + $0x20] sm:$0xff pattern:$0x73625140] }
 0x76c   : > { %4593 = vmatpush.bf16.msrb.mxu0 %v4575_v13  ;;  %4606 = vmatpush.bf16.msrb.mxu1 %v4578_v60 }
 0x76d   : > { %v5671_v8 = vpack.c.b16 %v5670_v15, %v5670_v15 }
 0x76e   : > { %5587 = vrot.lane.b32.xlu1 %v9584_v22, %s8416_s30  ;;  %v5563_v22 = vpack.c.b16 %v5562_v54, %v5562_v54 }
 0x76f   : > { %8130 = vmatmul.msk.bf16.vlgmr.msrb.gmra.mxu0 %vm300_vm2, %v4541_v32  ;;  %8131 = vmatmul.msk.bf16.vlgmr.msrb.gmra.mxu1 %vm300_vm2, %v4541_v32 }
 0x770   : > { %5475 = vrot.lane.b32.xlu2 %v9560_v7, %s8416_s30  ;;  %5585 = vrot.lane.b32.xlu0 %v9588_v23, %s8416_s30  ;;  %v4649_v6 = vpop.permute.xlu1 %4648 }
 0x771   : > { %v4674_v40 = vpop.permute.xlu0 %4673 }
 0x772   : > { %v4678_v42 = vsel %vm606_vm5, %v4672_v31, %v4674_v40  ;;  %v4774_v30 = vpop.permute.xlu2 %4773  ;;  %v4880_v31 = vsel %vm304_vm1, %v9435_v47, 0 }
 0x773   : > { %v4692_v11 = vsel %vm304_vm1, %v4678_v42, 0  ;;  %v8194_v42 = vld [vmem:[%s10617_s3 + $0x20] sm:$0xf] }
 0x774   : > { %4740 = vmatpush.bf16.msra.mxu3 %v4692_v11 }
 0x776   : > { %5581 = vrot.lane.b32.xlu1 %v9590_v36, %s8416_s30 }
 0x777   : > { %8137 = vmatmul.msk.bf16.vlgmr.msra.gmra.mxu2 %vm300_vm2, %v4649_v6  ;;  %8138 = vmatmul.msk.bf16.vlgmr.msra.gmra.mxu3 %vm300_vm2, %v4649_v6 }
 0x778   : > { %5589 = vrot.lane.b32.xlu2 %v9688_v14, %s8416_s30  ;;  %5564 = vrot.lane.b32.xlu0 %v5563_v22, %s10635_s23  ;;  %v4778_v7 = vpop.permute.xlu1 %4777  ;;  %v4878_v14 = vsel %vm304_vm1, %v9433_v46, 0 }
 0x779   : > { %v4668_v23 = vpop.permute.xlu0 %4667  ;;  %v4785_v59 = vsel %vm606_vm5, %v4778_v7, %v4780_v53 }
 0x77a   : > { %v4675_v63 = vsel %vm606_vm5, %v4666_v0, %v4668_v23  ;;  %v4676_v33 = vsel %vm606_vm5, %v4668_v23, %v4670_v17  ;;  %v9750_v1 = vpop.permute.xlu2 %4943  ;;  %v4797_v36 = vsel %vm304_vm1, %v4785_v59, 0  ;;  %v5791_v0 = vld.sshfl [vmem:[#allocation1 + $0x10] sm:$0xff pattern:$0x73625140] }
 0x77b   : > { %v4683_v19 = vsel %vm304_vm1, %v4675_v63, 0  ;;  %v4686_v28 = vsel %vm304_vm1, %v4676_v33, 0  ;;  %4835 = vmatpush.bf16.msrb.mxu2 %v4797_v36 }
 0x77c   : > { %4701 = vmatpush.bf16.msra.mxu0 %v4683_v19  ;;  %4714 = vmatpush.bf16.msra.mxu1 %v4686_v28 }
 0x77e   : > { %5695 = vrot.lane.b32.xlu1 %v9617_v3, %s10644_s10 }
 0x77f   : > { %4915 = vmatpush.bf16.msra.mxu2 %v4878_v14  ;;  %8135 = vmatmul.msk.bf16.vlgmr.msra.gmra.mxu0 %vm300_vm2, %v4649_v6 }
 0x780   : > { %8136 = vmatmul.msk.bf16.vlgmr.msra.gmra.mxu1 %vm300_vm2, %v4649_v6  ;;  %5583 = vrot.lane.b32.xlu2 %v9597_v25, %s8416_s30  ;;  %v4757_v5 = vpop.permute.xlu1 %4756  ;;  %v4958_v25 = vsel %vm304_vm1, %v9445_v51, 0 }
 0x781   : > { %5693 = vrot.lane.b32.xlu0 %v9619_v4, %s10644_s10  ;;  %v4782_v46 = vpop.permute.xlu0 %4781  ;;  %v4960_v4 = vsel %vm304_vm1, %v9447_v52, 0  ;;  %v4876_v52 = vsel %vm304_vm1, %v9430_v45, 0  ;;  %v4956_v45 = vsel %vm304_vm1, %v9443_v50, 0  ;;  %v5787_v50 = vld.sshfl [vmem:[#allocation1] sm:$0xff pattern:$0x73625140] }
 0x782   : > { %v4786_v16 = vsel %vm606_vm5, %v4780_v53, %v4782_v46  ;;  %v5050_v3 = vpop.permute.xlu2 %5049 }
 0x783   : > { %v4800_v26 = vsel %vm304_vm1, %v4786_v16, 0 }
 0x784   : > { %4848 = vmatpush.bf16.msrb.mxu3 %v4800_v26 }
 0x786   : > { %5689 = vrot.lane.b32.xlu1 %v9622_v37, %s10644_s10 }
 0x787   : > { %8142 = vmatmul.msk.bf16.vlgmr.msrb.gmra.mxu2 %vm300_vm2, %v4757_v5  ;;  %8143 = vmatmul.msk.bf16.vlgmr.msrb.gmra.mxu3 %vm300_vm2, %v4757_v5 }
 0x788   : > { %4928 = vmatpush.bf16.msra.mxu3 %v4880_v31  ;;  %4995 = vmatpush.bf16.msrb.mxu2 %v4958_v25  ;;  %v4864_v47 = vpop.permute.xlu1 %4863 }
 0x789   : > { %5697 = vrot.lane.b32.xlu2 %v9719_v56, %s10644_s10  ;;  %5672 = vrot.lane.b32.xlu0 %v5671_v8, %s10645_s29 }
 0x78a   : > { %v4776_v61 = vpop.permute.xlu0 %4775  ;;  %v5044_v37 = vpop.permute.xlu2 %5043 }
 0x78b   : > { %v4783_v10 = vsel %vm606_vm5, %v4774_v30, %v4776_v61  ;;  %v4784_v49 = vsel %vm606_vm5, %v4776_v61, %v4778_v7  ;;  %v5789_v7 = vld.sshfl [vmem:[#allocation1 + $0x8] sm:$0xff pattern:$0x73625140] }
 0x78c   : > { %5008 = vmatpush.bf16.msrb.mxu3 %v4960_v4  ;;  %v4791_v32 = vsel %vm304_vm1, %v4783_v10, 0  ;;  %v4794_v51 = vsel %vm304_vm1, %v4784_v49, 0 }
 0x78d   : > { %4809 = vmatpush.bf16.msrb.mxu0 %v4791_v32  ;;  %4822 = vmatpush.bf16.msrb.mxu1 %v4794_v51 }
 0x78e   : > { %5803 = vrot.lane.b32.xlu1 %v5793_v9, %s10644_s10 }
 0x790   : > { %8140 = vmatmul.msk.bf16.vlgmr.msrb.gmra.mxu0 %vm300_vm2, %v4757_v5  ;;  %8141 = vmatmul.msk.bf16.vlgmr.msrb.gmra.mxu1 %vm300_vm2, %v4757_v5  ;;  %v5048_v39 = vpop.permute.xlu1 %5047 }
 0x791   : > { %4889 = vmatpush.bf16.msra.mxu0 %v4874_v20  ;;  %4902 = vmatpush.bf16.msra.mxu1 %v4876_v52  ;;  %v5054_v56 = vsel %vm795_vm6, %v5048_v39, %v5050_v3 }
 0x792   : > { %5691 = vrot.lane.b32.xlu2 %v9624_v57, %s10644_s10  ;;  %5801 = vrot.lane.b32.xlu0 %v5791_v0, %s10644_s10  ;;  %v5046_v34 = vpop.permute.xlu0 %5045  ;;  %v5158_v17 = vpop.permute.xlu2 %5157  ;;  %v5068_v57 = vsel %vm304_vm1, %v5054_v56, 0 }
 0x793   : > { %v5053_v43 = vsel %vm795_vm6, %v5046_v34, %v5048_v39  ;;  %v5052_v54 = vsel %vm795_vm6, %v5044_v37, %v5046_v34 }
 0x794   : > { %v5065_v62 = vsel %vm304_vm1, %v5053_v43, 0  ;;  %v5062_v30 = vsel %vm304_vm1, %v5052_v54, 0 }
 0x795   : > { %4969 = vmatpush.bf16.msrb.mxu0 %v4954_v44  ;;  %4982 = vmatpush.bf16.msrb.mxu1 %v4956_v45 }
 0x796   : > { %5797 = vrot.lane.b32.xlu1 %v5787_v50, %s10644_s10 }
 0x797   : > { %8147 = vmatmul.msk.bf16.vlgmr.msra.gmra.mxu2 %vm300_vm2, %v4864_v47  ;;  %8148 = vmatmul.msk.bf16.vlgmr.msra.gmra.mxu3 %vm300_vm2, %v4864_v47 }
 0x798   : > { %5103 = vmatpush.bf16.msra.mxu2 %v5065_v62  ;;  %5116 = vmatpush.bf16.msra.mxu3 %v5068_v57  ;;  %v5042_v48 = vpop.permute.xlu1 %5041 }
 0x799   : > { %v5051_v40 = vsel %vm795_vm6, %v5042_v48, %v5044_v37 }
 0x79a   : > { %5805 = vrot.lane.b32.xlu2 %v5795_v29, %s10644_s10  ;;  %5780 = vrot.lane.b32.xlu0 %v5779_v12, %s8438_s27  ;;  %v9813_v53 = vpop.permute.xlu0 %5024  ;;  %v5152_v18 = vpop.permute.xlu2 %5151  ;;  %v5059_v22 = vsel %vm304_vm1, %v5051_v40, 0 }
 0x79b   : > { %v4097_v13 = vpop.f32.mrf.mxu2  ;;  %v4110_v60 = vpop.f32.mrf.mxu3 }
 0x79c   : > { %v4071_v21 = vpop.f32.mrf.mxu0  ;;  %v4084_v6 = vpop.f32.mrf.mxu1 }
 0x7a0   : > { %8146 = vmatmul.msk.bf16.vlgmr.msra.gmra.mxu1 %vm300_vm2, %v4864_v47  ;;  %8145 = vmatmul.msk.bf16.vlgmr.msra.gmra.mxu0 %vm300_vm2, %v4864_v47  ;;  %v5156_v11 = vpop.permute.xlu1 %5155 }
 0x7a1   : > { %5090 = vmatpush.bf16.msra.mxu1 %v5062_v30  ;;  %5077 = vmatpush.bf16.msra.mxu0 %v5059_v22  ;;  %v5162_v36 = vsel %vm795_vm6, %v5156_v11, %v5158_v17 }
 0x7a2   : > { %5886 = vperm.xlu0 %8362, %v8194_v42   ;;  %5799 = vrot.lane.b32.xlu2 %v5789_v7, %s10644_s10  ;;  %v5154_v23 = vpop.permute.xlu0 %5153  ;;  %v5266_v59 = vpop.permute.xlu2 %5265  ;;  %v5176_v24 = vsel %vm304_vm1, %v5162_v36, 0 }
 0x7a3   : > { %v4099_v63 = vpop.f32.mrf.mxu2  ;;  %v4112_v33 = vpop.f32.mrf.mxu3  ;;  %v5161_v19 = vsel %vm795_vm6, %v5154_v23, %v5156_v11  ;;  %v5160_v47 = vsel %vm795_vm6, %v5152_v18, %v5154_v23 }
 0x7a4   : > { %v4073_v28 = vpop.f32.mrf.mxu0  ;;  %v4086_v14 = vpop.f32.mrf.mxu1  ;;  %v5173_v5 = vsel %vm304_vm1, %v5161_v19, 0  ;;  %v5170_v49 = vsel %vm304_vm1, %v5160_v47, 0 }
 0x7a7   : > { %8152 = vmatmul.msk.bf16.vlgmr.msrb.gmra.mxu2 %vm300_vm2, %v9750_v1  ;;  %8153 = vmatmul.msk.bf16.vlgmr.msrb.gmra.mxu3 %vm300_vm2, %v9750_v1 }
 0x7a8   : > { %5211 = vmatpush.bf16.msrb.mxu2 %v5173_v5  ;;  %5224 = vmatpush.bf16.msrb.mxu3 %v5176_v24  ;;  %v5150_v46 = vpop.permute.xlu1 %5149 }
 0x7a9   : > { %v5159_v61 = vsel %vm795_vm6, %v5150_v46, %v5152_v18 }
 0x7aa   : > { %v9833_v15 = vpop.permute.xlu0 %5132  ;;  %v5260_v16 = vpop.permute.xlu2 %5259  ;;  %v5167_v32 = vsel %vm304_vm1, %v5159_v61, 0 }
 0x7ab   : > { %v4193_v3 = vpop.f32.mrf.mxu2  ;;  %v4206_v26 = vpop.f32.mrf.mxu3 }
 0x7ac   : > { %v4194_v31 = vadd.f32 %v4193_v3, %v4097_v13  ;;  %v4207_v8 = vadd.f32 %v4206_v26, %v4110_v60  ;;  %v4167_v25 = vpop.f32.mrf.mxu0  ;;  %v4180_v4 = vpop.f32.mrf.mxu1 }
 0x7ad   : > { %v4168_v37 = vadd.f32 %v4167_v25, %v4071_v21  ;;  %v4181_v10 = vadd.f32 %v4180_v4, %v4084_v6 }
 0x7b0   : > { %8150 = vmatmul.msk.bf16.vlgmr.msrb.gmra.mxu0 %vm300_vm2, %v9750_v1  ;;  %8151 = vmatmul.msk.bf16.vlgmr.msrb.gmra.mxu1 %vm300_vm2, %v9750_v1  ;;  %v5264_v51 = vpop.permute.xlu1 %5263 }
 0x7b1   : > { %5185 = vmatpush.bf16.msrb.mxu0 %v5167_v32  ;;  %5198 = vmatpush.bf16.msrb.mxu1 %v5170_v49  ;;  %v5270_v0 = vsel %vm904_vm7, %v5264_v51, %v5266_v59 }
 0x7b2   : > { %v5262_v20 = vpop.permute.xlu0 %5261  ;;  %v5374_v52 = vpop.permute.xlu2 %5373  ;;  %v5284_v55 = vsel %vm304_vm1, %v5270_v0, 0 }
 0x7b3   : > { %v4195_v9 = vpop.f32.mrf.mxu2  ;;  %v4208_v27 = vpop.f32.mrf.mxu3  ;;  %v5269_v39 = vsel %vm904_vm7, %v5262_v20, %v5264_v51  ;;  %v5268_v50 = vsel %vm904_vm7, %v5260_v16, %v5262_v20 }
 0x7b4   : > { %v4169_v44 = vpop.f32.mrf.mxu0  ;;  %v4182_v45 = vpop.f32.mrf.mxu1  ;;  %v5281_v34 = vsel %vm304_vm1, %v5269_v39, 0  ;;  %v5278_v21 = vsel %vm304_vm1, %v5268_v50, 0 }
 0x7b7   : > { %8157 = vmatmul.msk.bf16.vlgmr.msra.gmra.mxu2 %vm300_vm2, %v9813_v53  ;;  %8158 = vmatmul.msk.bf16.vlgmr.msra.gmra.mxu3 %vm300_vm2, %v9813_v53 }
 0x7b8   : > { %5319 = vmatpush.bf16.msra.mxu2 %v5281_v34  ;;  %5332 = vmatpush.bf16.msra.mxu3 %v5284_v55  ;;  %v5258_v1 = vpop.permute.xlu1 %5257 }
 0x7b9   : > { %v5267_v18 = vsel %vm904_vm7, %v5258_v1, %v5260_v16 }
 0x7ba   : > { %v9851_v17 = vpop.permute.xlu0 %5240  ;;  %v5368_v56 = vpop.permute.xlu2 %5367  ;;  %v5275_v6 = vsel %vm304_vm1, %v5267_v18, 0 }
 0x7bb   : > { %v4297_v43 = vpop.f32.mrf.mxu2  ;;  %v4310_v12 = vpop.f32.mrf.mxu3 }
 0x7bc   : > { %v4316_v29 = vadd.f32 %v4297_v43, %v4194_v31  ;;  %v4317_v57 = vadd.f32 %v4310_v12, %v4207_v8  ;;  %v4271_v62 = vpop.f32.mrf.mxu0  ;;  %v4284_v48 = vpop.f32.mrf.mxu1 }
 0x7bd   : > { %v4314_v13 = vadd.f32 %v4271_v62, %v4168_v37  ;;  %v4315_v60 = vadd.f32 %v4284_v48, %v4181_v10 }
 0x7c0   : > { %8155 = vmatmul.msk.bf16.vlgmr.msra.gmra.mxu0 %vm300_vm2, %v9813_v53  ;;  %8156 = vmatmul.msk.bf16.vlgmr.msra.gmra.mxu1 %vm300_vm2, %v9813_v53  ;;  %v5372_v54 = vpop.permute.xlu1 %5371 }
 0x7c1   : > { %5293 = vmatpush.bf16.msra.mxu0 %v5275_v6  ;;  %5306 = vmatpush.bf16.msra.mxu1 %v5278_v21  ;;  %v5378_v22 = vsel %vm904_vm7, %v5372_v54, %v5374_v52 }
 0x7c2   : > { %v5370_v40 = vpop.permute.xlu0 %5369  ;;  %v5482_v42 = vpop.permute.xlu2 %5481  ;;  %v5392_v63 = vsel %vm304_vm1, %v5378_v22, 0 }
 0x7c3   : > { %v4299_v30 = vpop.f32.mrf.mxu2  ;;  %v4312_v11 = vpop.f32.mrf.mxu3  ;;  %v5377_v7 = vsel %vm904_vm7, %v5370_v40, %v5372_v54  ;;  %v5376_v16 = vsel %vm904_vm7, %v5368_v56, %v5370_v40 }
 0x7c4   : > { %v4273_v23 = vpop.f32.mrf.mxu0  ;;  %v4286_v59 = vpop.f32.mrf.mxu1  ;;  %v5389_v33 = vsel %vm304_vm1, %v5377_v7, 0  ;;  %v5386_v25 = vsel %vm304_vm1, %v5376_v16, 0 }
 0x7c7   : > { %8162 = vmatmul.msk.bf16.vlgmr.msrb.gmra.mxu2 %vm300_vm2, %v9833_v15  ;;  %8163 = vmatmul.msk.bf16.vlgmr.msrb.gmra.mxu3 %vm300_vm2, %v9833_v15 }
 0x7c8   : > { %5427 = vmatpush.bf16.msrb.mxu2 %v5389_v33  ;;  %5440 = vmatpush.bf16.msrb.mxu3 %v5392_v63  ;;  %v5366_v53 = vpop.permute.xlu1 %5365 }
 0x7c9   : > { %v5375_v3 = vsel %vm904_vm7, %v5366_v53, %v5368_v56 }
 0x7ca   : > { %v9869_v36 = vpop.permute.xlu0 %5348  ;;  %v5476_v8 = vpop.permute.xlu2 %5475  ;;  %v5383_v4 = vsel %vm304_vm1, %v5375_v3, 0 }
 0x7cb   : > { %v4405_v19 = vpop.f32.mrf.mxu2  ;;  %v4418_v28 = vpop.f32.mrf.mxu3 }
 0x7cc   : > { %v4424_v14 = vadd.f32 %v4405_v19, %v4316_v29  ;;  %v4425_v24 = vadd.f32 %v4418_v28, %v4317_v57  ;;  %v4379_v5 = vpop.f32.mrf.mxu0  ;;  %v4392_v46 = vpop.f32.mrf.mxu1 }
 0x7cd   : > { %v4422_v26 = vadd.f32 %v4379_v5, %v4314_v13  ;;  %v4423_v31 = vadd.f32 %v4392_v46, %v4315_v60 }
 0x7d0   : > { %8160 = vmatmul.msk.bf16.vlgmr.msrb.gmra.mxu0 %vm300_vm2, %v9833_v15  ;;  %8161 = vmatmul.msk.bf16.vlgmr.msrb.gmra.mxu1 %vm300_vm2, %v9833_v15  ;;  %v5480_v47 = vpop.permute.xlu1 %5479 }
 0x7d1   : > { %5401 = vmatpush.bf16.msrb.mxu0 %v5383_v4  ;;  %5414 = vmatpush.bf16.msrb.mxu1 %v5386_v25  ;;  %v5486_v49 = vsel %vm1013_vm8, %v5480_v47, %v5482_v42 }
 0x7d2   : > { %v5478_v61 = vpop.permute.xlu0 %5477  ;;  %v5500_v52 = vsel %vm304_vm1, %v5486_v49, 0  ;;  %v5590_v15 = vpop.permute.xlu2 %5589 }
 0x7d3   : > { %v4407_v37 = vpop.f32.mrf.mxu2  ;;  %v4420_v10 = vpop.f32.mrf.mxu3  ;;  %v5485_v32 = vsel %vm1013_vm8, %v5478_v61, %v5480_v47  ;;  %v5484_v56 = vsel %vm1013_vm8, %v5476_v8, %v5478_v61 }
 0x7d4   : > { %v4381_v51 = vpop.f32.mrf.mxu0  ;;  %v4394_v20 = vpop.f32.mrf.mxu1  ;;  %v5497_v9 = vsel %vm304_vm1, %v5485_v32, 0  ;;  %v5494_v57 = vsel %vm304_vm1, %v5484_v56, 0 }
 0x7d7   : > { %8167 = vmatmul.msk.bf16.vlgmr.msra.gmra.mxu2 %vm300_vm2, %v9851_v17  ;;  %8168 = vmatmul.msk.bf16.vlgmr.msra.gmra.mxu3 %vm300_vm2, %v9851_v17 }
 0x7d8   : > { %5535 = vmatpush.bf16.msra.mxu2 %v5497_v9  ;;  %5548 = vmatpush.bf16.msra.mxu3 %v5500_v52  ;;  %v5474_v27 = vpop.permute.xlu1 %5473 }
 0x7d9   : > { %v5483_v43 = vsel %vm1013_vm8, %v5474_v27, %v5476_v8 }
 0x7da   : > { %v9887_v0 = vpop.permute.xlu0 %5456  ;;  %v5491_v62 = vsel %vm304_vm1, %v5483_v43, 0  ;;  %v5584_v50 = vpop.permute.xlu2 %5583 }
 0x7db   : > { %v4513_v39 = vpop.f32.mrf.mxu2  ;;  %v4526_v44 = vpop.f32.mrf.mxu3 }
 0x7dc   : > { %v4532_v45 = vadd.f32 %v4513_v39, %v4424_v14  ;;  %v4533_v55 = vadd.f32 %v4526_v44, %v4425_v24  ;;  %v4487_v34 = vpop.f32.mrf.mxu0  ;;  %v4500_v1 = vpop.f32.mrf.mxu1 }
 0x7dd   : > { %v4530_v12 = vadd.f32 %v4487_v34, %v4422_v26  ;;  %v4531_v29 = vadd.f32 %v4500_v1, %v4423_v31 }
 0x7e0   : > { %8165 = vmatmul.msk.bf16.vlgmr.msra.gmra.mxu0 %vm300_vm2, %v9851_v17  ;;  %8166 = vmatmul.msk.bf16.vlgmr.msra.gmra.mxu1 %vm300_vm2, %v9851_v17  ;;  %v5588_v48 = vpop.permute.xlu1 %5587 }
 0x7e1   : > { %5509 = vmatpush.bf16.msra.mxu0 %v5491_v62  ;;  %5522 = vmatpush.bf16.msra.mxu1 %v5494_v57  ;;  %v5594_v21 = vsel %vm1013_vm8, %v5588_v48, %v5590_v15 }
 0x7e2   : > { %v5586_v18 = vpop.permute.xlu0 %5585  ;;  %v5608_v42 = vsel %vm304_vm1, %v5594_v21, 0 }
 0x7e3   : > { %v4515_v13 = vpop.f32.mrf.mxu2  ;;  %v4528_v60 = vpop.f32.mrf.mxu3  ;;  %v5593_v6 = vsel %vm1013_vm8, %v5586_v18, %v5588_v48  ;;  %v5592_v63 = vsel %vm1013_vm8, %v5584_v50, %v5586_v18 }
 0x7e4   : > { %v4489_v54 = vpop.f32.mrf.mxu0  ;;  %v4502_v40 = vpop.f32.mrf.mxu1  ;;  %v5605_v30 = vsel %vm304_vm1, %v5593_v6, 0  ;;  %v5602_v5 = vsel %vm304_vm1, %v5592_v63, 0 }
 0x7e5   : > { %v5698_v33 = vpop.permute.xlu2 %5697 }
 0x7e7   : > { %8172 = vmatmul.msk.bf16.vlgmr.msrb.gmra.mxu2 %vm300_vm2, %v9869_v36  ;;  %8173 = vmatmul.msk.bf16.vlgmr.msrb.gmra.mxu3 %vm300_vm2, %v9869_v36 }
 0x7e8   : > { %5643 = vmatpush.bf16.msrb.mxu2 %v5605_v30  ;;  %5656 = vmatpush.bf16.msrb.mxu3 %v5608_v42  ;;  %v5582_v17 = vpop.permute.xlu1 %5581 }
 0x7e9   : > { %v5591_v53 = vsel %vm1013_vm8, %v5582_v17, %v5584_v50 }
 0x7ea   : > { %v9905_v11 = vpop.permute.xlu0 %5564  ;;  %v5599_v46 = vsel %vm304_vm1, %v5591_v53, 0 }
 0x7eb   : > { %v4621_v22 = vpop.f32.mrf.mxu2  ;;  %v4634_v23 = vpop.f32.mrf.mxu3 }
 0x7ec   : > { %v4640_v7 = vadd.f32 %v4621_v22, %v4532_v45  ;;  %v4595_v59 = vpop.f32.mrf.mxu0  ;;  %v4641_v19 = vadd.f32 %v4634_v23, %v4533_v55  ;;  %v4608_v14 = vpop.f32.mrf.mxu1 }
 0x7ed   : > { %v4638_v28 = vadd.f32 %v4595_v59, %v4530_v12  ;;  %v4639_v24 = vadd.f32 %v4608_v14, %v4531_v29  ;;  %v5692_v61 = vpop.permute.xlu2 %5691 }
 0x7f0   : > { %8170 = vmatmul.msk.bf16.vlgmr.msrb.gmra.mxu0 %vm300_vm2, %v9869_v36  ;;  %8171 = vmatmul.msk.bf16.vlgmr.msrb.gmra.mxu1 %vm300_vm2, %v9869_v36  ;;  %v5696_v16 = vpop.permute.xlu1 %5695 }
 0x7f1   : > { %5617 = vmatpush.bf16.msrb.mxu0 %v5599_v46  ;;  %5630 = vmatpush.bf16.msrb.mxu1 %v5602_v5  ;;  %v5702_v31 = vsel %vm1122_vm9, %v5696_v16, %v5698_v33 }
 0x7f2   : > { %v5716_v37 = vsel %vm304_vm1, %v5702_v31, 0 }
 0x7f3   : > { %v5694_v3 = vpop.permute.xlu0 %5693  ;;  %v4623_v26 = vpop.f32.mrf.mxu2 }
 0x7f4   : > { %v5701_v8 = vsel %vm1122_vm9, %v5694_v3, %v5696_v16  ;;  %v4636_v25 = vpop.f32.mrf.mxu3  ;;  %v4597_v4 = vpop.f32.mrf.mxu0  ;;  %v5700_v52 = vsel %vm1122_vm9, %v5692_v61, %v5694_v3 }
 0x7f5   : > { %v4610_v47 = vpop.f32.mrf.mxu1  ;;  %v5713_v10 = vsel %vm304_vm1, %v5701_v8, 0  ;;  %v5710_v55 = vsel %vm304_vm1, %v5700_v52, 0  ;;  %v5806_v1 = vpop.permute.xlu2 %5805 }
 0x7f7   : > { %8177 = vmatmul.msk.bf16.vlgmr.msra.gmra.mxu2 %vm300_vm2, %v9887_v0  ;;  %8178 = vmatmul.msk.bf16.vlgmr.msra.gmra.mxu3 %vm300_vm2, %v9887_v0 }
 0x7f8   : > { %5751 = vmatpush.bf16.msra.mxu2 %v5713_v10  ;;  %5764 = vmatpush.bf16.msra.mxu3 %v5716_v37  ;;  %v5690_v36 = vpop.permute.xlu1 %5689 }
 0x7f9   : > { %v5699_v9 = vsel %vm1122_vm9, %v5690_v36, %v5692_v61 }
 0x7fa   : > { %v5707_v34 = vsel %vm304_vm1, %v5699_v9, 0 }
 0x7fb   : > { %v9923_v49 = vpop.permute.xlu0 %5672  ;;  %v4729_v32 = vpop.f32.mrf.mxu2 }
 0x7fc   : > { %v4748_v51 = vadd.f32 %v4729_v32, %v4640_v7  ;;  %v4742_v20 = vpop.f32.mrf.mxu3  ;;  %v4703_v27 = vpop.f32.mrf.mxu0 }
 0x7fd   : > { %v4749_v15 = vadd.f32 %v4742_v20, %v4641_v19  ;;  %v4716_v39 = vpop.f32.mrf.mxu1  ;;  %v4746_v44 = vadd.f32 %v4703_v27, %v4638_v28 }
 0x7fe   : > { %v4747_v45 = vadd.f32 %v4716_v39, %v4639_v24 }
 0x800   : > { %8175 = vmatmul.msk.bf16.vlgmr.msra.gmra.mxu0 %vm300_vm2, %v9887_v0  ;;  %8176 = vmatmul.msk.bf16.vlgmr.msra.gmra.mxu1 %vm300_vm2, %v9887_v0  ;;  %v5804_v56 = vpop.permute.xlu1 %5803  ;;  %v5800_v0 = vpop.permute.xlu2 %5799 }
 0x801   : > { %5725 = vmatpush.bf16.msra.mxu0 %v5707_v34  ;;  %5738 = vmatpush.bf16.msra.mxu1 %v5710_v55  ;;  %v5810_v29 = vsel %vm1122_vm9, %v5804_v56, %v5806_v1 }
 0x802   : > { %v5824_v18 = vsel %vm304_vm1, %v5810_v29, 0 }
 0x803   : > { %v4731_v12 = vpop.f32.mrf.mxu2 }
 0x804   : > { %v5802_v43 = vpop.permute.xlu0 %5801  ;;  %v4744_v62 = vpop.f32.mrf.mxu3 }
 0x805   : > { %v5809_v57 = vsel %vm1122_vm9, %v5802_v43, %v5804_v56  ;;  %v4705_v48 = vpop.f32.mrf.mxu0  ;;  %v4718_v50 = vpop.f32.mrf.mxu1  ;;  %v5808_v40 = vsel %vm1122_vm9, %v5800_v0, %v5802_v43 }
 0x806   : > { %v5821_v13 = vsel %vm304_vm1, %v5809_v57, 0  ;;  %v5818_v59 = vsel %vm304_vm1, %v5808_v40, 0 }
 0x807   : > { %8182 = vmatmul.msk.bf16.vlgmr.msrb.gmra.mxu2 %vm300_vm2, %v9905_v11  ;;  %8183 = vmatmul.msk.bf16.vlgmr.msrb.gmra.mxu3 %vm300_vm2, %v9905_v11 }
 0x808   : > { %5859 = vmatpush.bf16.msrb.mxu2 %v5821_v13  ;;  %5872 = vmatpush.bf16.msrb.mxu3 %v5824_v18  ;;  %v5798_v21 = vpop.permute.xlu1 %5797 }
 0x809   : > { %v5807_v42 = vsel %vm1122_vm9, %v5798_v21, %v5800_v0 }
 0x80a   : > { %v5815_v63 = vsel %vm304_vm1, %v5807_v42, 0 }
 0x80b   : > { %v4837_v60 = vpop.f32.mrf.mxu2 }
 0x80c   : > { %v4856_v6 = vadd.f32 %v4837_v60, %v4748_v51  ;;  %v4850_v54 = vpop.f32.mrf.mxu3  ;;  %v5781_v47 = vpop.permute.xlu0 %5780 }
 0x80d   : > { %v4857_v30 = vadd.f32 %v4850_v54, %v4749_v15  ;;  %v4811_v17 = vpop.f32.mrf.mxu0  ;;  %v4824_v22 = vpop.f32.mrf.mxu1 }
 0x80e   : > { %v4854_v7 = vadd.f32 %v4811_v17, %v4746_v44  ;;  %v4855_v23 = vadd.f32 %v4824_v22, %v4747_v45 }
 0x810   : > { %8180 = vmatmul.msk.bf16.vlgmr.msrb.gmra.mxu0 %vm300_vm2, %v9905_v11  ;;  %8181 = vmatmul.msk.bf16.vlgmr.msrb.gmra.mxu1 %vm300_vm2, %v9905_v11 }
 0x811   : > { %5833 = vmatpush.bf16.msrb.mxu0 %v5815_v63  ;;  %5846 = vmatpush.bf16.msrb.mxu1 %v5818_v59 }
 0x813   : > { %v4839_v33 = vpop.f32.mrf.mxu2 }
 0x814   : > { %v4852_v53 = vpop.f32.mrf.mxu3 }
 0x815   : > { %v4813_v19 = vpop.f32.mrf.mxu0  ;;  %v4826_v28 = vpop.f32.mrf.mxu1 }
 0x817   : > { %8187 = vmatmul.msk.bf16.vlgmr.msra.gmra.mxu2 %vm300_vm2, %v9923_v49  ;;  %8188 = vmatmul.msk.bf16.vlgmr.msra.gmra.mxu3 %vm300_vm2, %v9923_v49 }
 0x81b   : > { %v4917_v14 = vpop.f32.mrf.mxu2 }
 0x81c   : > { %v4936_v24 = vadd.f32 %v4917_v14, %v4856_v6  ;;  %v4930_v5 = vpop.f32.mrf.mxu3 }
 0x81d   : > { %v4937_v46 = vadd.f32 %v4930_v5, %v4857_v30  ;;  %v4891_v16 = vpop.f32.mrf.mxu0  ;;  %v4904_v3 = vpop.f32.mrf.mxu1 }
 0x81e   : > { %v4934_v26 = vadd.f32 %v4891_v16, %v4854_v7  ;;  %v4935_v11 = vadd.f32 %v4904_v3, %v4855_v23 }
 0x820   : > { %8185 = vmatmul.msk.bf16.vlgmr.msra.gmra.mxu0 %vm300_vm2, %v9923_v49  ;;  %8186 = vmatmul.msk.bf16.vlgmr.msra.gmra.mxu1 %vm300_vm2, %v9923_v49 }
 0x823   : > { %v4919_v31 = vpop.f32.mrf.mxu2 }
 0x824   : > { %v4932_v8 = vpop.f32.mrf.mxu3 }
 0x825   : > { %v4893_v25 = vpop.f32.mrf.mxu0  ;;  %v4906_v4 = vpop.f32.mrf.mxu1 }
 0x827   : > { %8192 = vmatmul.msk.bf16.vlgmr.msrb.gmra.mxu2 %vm300_vm2, %v5781_v47  ;;  %8193 = vmatmul.msk.bf16.vlgmr.msrb.gmra.mxu3 %vm300_vm2, %v5781_v47 }
 0x82b   : > { %v4997_v61 = vpop.f32.mrf.mxu2 }
 0x82c   : > { %v5016_v37 = vadd.f32 %v4997_v61, %v4936_v24  ;;  %v5010_v10 = vpop.f32.mrf.mxu3 }
 0x82d   : > { %v5017_v36 = vadd.f32 %v5010_v10, %v4937_v46  ;;  %v4971_v32 = vpop.f32.mrf.mxu0  ;;  %v4984_v51 = vpop.f32.mrf.mxu1 }
 0x82e   : > { %v5014_v20 = vadd.f32 %v4971_v32, %v4934_v26  ;;  %v5015_v52 = vadd.f32 %v4984_v51, %v4935_v11 }
 0x830   : > { %8190 = vmatmul.msk.bf16.vlgmr.msrb.gmra.mxu0 %vm300_vm2, %v5781_v47  ;;  %8191 = vmatmul.msk.bf16.vlgmr.msrb.gmra.mxu1 %vm300_vm2, %v5781_v47 }
 0x833   : > { %v4999_v49 = vpop.f32.mrf.mxu2 }
 0x834   : > { %v5012_v9 = vpop.f32.mrf.mxu3 }
 0x835   : > { %v4973_v15 = vpop.f32.mrf.mxu0  ;;  %v4986_v27 = vpop.f32.mrf.mxu1 }
 0x83b   : > { %v5105_v39 = vpop.f32.mrf.mxu2 }
 0x83c   : > { %v5124_v44 = vadd.f32 %v5105_v39, %v5016_v37  ;;  %v5118_v45 = vpop.f32.mrf.mxu3 }
 0x83d   : > { %v5125_v55 = vadd.f32 %v5118_v45, %v5017_v36  ;;  %v5079_v34 = vpop.f32.mrf.mxu0  ;;  %v5092_v1 = vpop.f32.mrf.mxu1 }
 0x83e   : > { %v5122_v56 = vadd.f32 %v5079_v34, %v5014_v20  ;;  %v5123_v43 = vadd.f32 %v5092_v1, %v5015_v52 }
 0x843   : > { %v5107_v12 = vpop.f32.mrf.mxu2 }
 0x844   : > { %v5120_v29 = vpop.f32.mrf.mxu3 }
 0x845   : > { %v5081_v57 = vpop.f32.mrf.mxu0  ;;  %v5094_v62 = vpop.f32.mrf.mxu1 }
 0x84b   : > { %v5213_v48 = vpop.f32.mrf.mxu2 }
 0x84c   : > { %v5232_v50 = vadd.f32 %v5213_v48, %v5124_v44  ;;  %v5226_v18 = vpop.f32.mrf.mxu3 }
 0x84d   : > { %v5233_v13 = vadd.f32 %v5226_v18, %v5125_v55  ;;  %v5187_v0 = vpop.f32.mrf.mxu0  ;;  %v5200_v60 = vpop.f32.mrf.mxu1 }
 0x84e   : > { %v5230_v21 = vadd.f32 %v5187_v0, %v5122_v56  ;;  %v5231_v6 = vadd.f32 %v5200_v60, %v5123_v43 }
 0x853   : > { %v5215_v54 = vpop.f32.mrf.mxu2 }
 0x854   : > { %v5228_v40 = vpop.f32.mrf.mxu3 }
 0x855   : > { %v5189_v42 = vpop.f32.mrf.mxu0  ;;  %v5202_v30 = vpop.f32.mrf.mxu1 }
 0x85b   : > { %v5321_v17 = vpop.f32.mrf.mxu2 }
 0x85c   : > { %v5340_v22 = vadd.f32 %v5321_v17, %v5232_v50  ;;  %v5334_v7 = vpop.f32.mrf.mxu3  ;;  %v5887_v17 = vpop.permute.xlu0 %5886 }
 0x85d   : > { %v5341_v23 = vadd.f32 %v5334_v7, %v5233_v13  ;;  %v5295_v59 = vpop.f32.mrf.mxu0  ;;  %v5308_v63 = vpop.f32.mrf.mxu1 }
 0x85e   : > { %v5338_v33 = vadd.f32 %v5295_v59, %v5230_v21  ;;  %v5339_v53 = vadd.f32 %v5308_v63, %v5231_v6 }
 0x863   : > { %v5323_v19 = vpop.f32.mrf.mxu2 }
 0x864   : > { %v5336_v28 = vpop.f32.mrf.mxu3 }
 0x865   : > { %v5297_v14 = vpop.f32.mrf.mxu0  ;;  %v5310_v24 = vpop.f32.mrf.mxu1 }
 0x86b   : > { %v5429_v5 = vpop.f32.mrf.mxu2 }
 0x86c   : > { %v5442_v46 = vpop.f32.mrf.mxu3  ;;  %v5448_v56 = vadd.f32 %v5429_v5, %v5340_v22 }
 0x86d   : > { %v5403_v16 = vpop.f32.mrf.mxu0  ;;  %v5416_v3 = vpop.f32.mrf.mxu1  ;;  %v5449_v12 = vadd.f32 %v5442_v46, %v5341_v23 }
 0x86e   : > { %v5446_v62 = vadd.f32 %v5403_v16, %v5338_v33  ;;  %v5447_v48 = vadd.f32 %v5416_v3, %v5339_v53 }
 0x873   : > { %v5431_v26 = vpop.f32.mrf.mxu2 }
 0x874   : > { %v5444_v11 = vpop.f32.mrf.mxu3 }
 0x875   : > { %v5405_v31 = vpop.f32.mrf.mxu0  ;;  %v5418_v8 = vpop.f32.mrf.mxu1 }
 0x87b   : > { %v5537_v25 = vpop.f32.mrf.mxu2 }
 0x87c   : > { %v5550_v4 = vpop.f32.mrf.mxu3  ;;  %v5556_v50 = vadd.f32 %v5537_v25, %v5448_v56 }
 0x87d   : > { %v5511_v47 = vpop.f32.mrf.mxu0  ;;  %v5524_v61 = vpop.f32.mrf.mxu1  ;;  %v5557_v18 = vadd.f32 %v5550_v4, %v5449_v12 }
 0x87e   : > { %v5554_v13 = vadd.f32 %v5511_v47, %v5446_v62  ;;  %v5555_v0 = vadd.f32 %v5524_v61, %v5447_v48 }
 0x883   : > { %v5539_v37 = vpop.f32.mrf.mxu2 }
 0x884   : > { %v5552_v10 = vpop.f32.mrf.mxu3 }
 0x885   : > { %v5513_v36 = vpop.f32.mrf.mxu0  ;;  %v5526_v32 = vpop.f32.mrf.mxu1 }
 0x88b   : > { %v5645_v51 = vpop.f32.mrf.mxu2 }
 0x88c   : > { %v5658_v20 = vpop.f32.mrf.mxu3  ;;  %v5664_v60 = vadd.f32 %v5645_v51, %v5556_v50 }
 0x88d   : > { %v5619_v52 = vpop.f32.mrf.mxu0  ;;  %v5632_v49 = vpop.f32.mrf.mxu1  ;;  %v5665_v21 = vadd.f32 %v5658_v20, %v5557_v18 }
 0x88e   : > { %v5662_v6 = vadd.f32 %v5619_v52, %v5554_v13  ;;  %v5663_v54 = vadd.f32 %v5632_v49, %v5555_v0 }
 0x893   : > { %v5647_v9 = vpop.f32.mrf.mxu2 }
 0x894   : > { %v5660_v15 = vpop.f32.mrf.mxu3 }
 0x895   : > { %v5621_v27 = vpop.f32.mrf.mxu0  ;;  %v5634_v39 = vpop.f32.mrf.mxu1 }
 0x89b   : > { %v5753_v44 = vpop.f32.mrf.mxu2 }
 0x89c   : > { %v5766_v45 = vpop.f32.mrf.mxu3  ;;  %v5772_v40 = vadd.f32 %v5753_v44, %v5664_v60  ;;  %v9977_v44 = vld [vmem:[%s10616_s2 + $0x14] sm:$0xf] }
 0x89d   : > { %v5727_v55 = vpop.f32.mrf.mxu0  ;;  %v5740_v34 = vpop.f32.mrf.mxu1  ;;  %v5773_v42 = vadd.f32 %v5766_v45, %v5665_v21  ;;  %v5920_v45 = vld [vmem:[#allocation3 + $0x8] sm:$0x3]  ;;  %v5924_v12 = vunpack.c.l.b16 %v9977_v44 }
 0x89e   : > { %v5770_v7 = vadd.f32 %v5727_v55, %v5662_v6  ;;  %v5771_v22 = vadd.f32 %v5740_v34, %v5663_v54 }
 0x8a3   : > { %v5755_v1 = vpop.f32.mrf.mxu2 }
 0x8a4   : > { %v5768_v43 = vpop.f32.mrf.mxu3 }
 0x8a5   : > { %v5729_v29 = vpop.f32.mrf.mxu0  ;;  %v5742_v57 = vpop.f32.mrf.mxu1 }
 0x8a6   : > { %v5925_v29 = vpack.c.b16 %v5924_v12, %v5924_v12  ;;  %v6122_v57 = vld [vmem:[#allocation3 + $0x8] sm:$0x3] }
 0x8ab   : > { %v5861_v30 = vpop.f32.mrf.mxu2 }
 0x8ac   : > { %v5880_v59 = vadd.f32 %v5861_v30, %v5772_v40  ;;  %v5874_v23 = vpop.f32.mrf.mxu3  ;;  %v6338_v30 = vld [vmem:[#allocation3 + $0x8] sm:$0x3] }
 0x8ad   : > { %v5881_v63 = vadd.f32 %v5874_v23, %v5773_v42  ;;  %v5835_v19 = vpop.f32.mrf.mxu0  ;;  %v5848_v33 = vpop.f32.mrf.mxu1  ;;  %v8204_v42 = vld [vmem:[%s10616_s2 + $0x14] sm:$0xf] }
 0x8ae   : > { %v5891_v53 = vadd.f32 %v5887_v17, %v5880_v59  ;;  %v5878_v28 = vadd.f32 %v5835_v19, %v5770_v7  ;;  %v5879_v14 = vadd.f32 %v5848_v33, %v5771_v22  ;;  %v6124_v22 = vunpack.c.l.b16 %v8204_v42 }
 0x8af   : > { %v5892_v24 = vadd.f32 %v5887_v17, %v5881_v63 }
 0x8b0   : > { %v5895_v5 = vmax.f32 %v5891_v53, 0.0  ;;  %v5889_v46 = vadd.f32 %v5887_v17, %v5878_v28  ;;  %v5890_v16 = vadd.f32 %v5887_v17, %v5879_v14  ;;  %v6125_v19 = vpack.c.b16 %v6124_v22, %v6124_v22 }
 0x8b1   : > { %v5896_v3 = vmax.f32 %v5892_v24, 0.0 }
 0x8b2   : > { %v5899_v26 = vmul.f32 %v5895_v5, %v8739_v58  ;;  %v5893_v11 = vmax.f32 %v5889_v46, 0.0  ;;  %v5894_v31 = vmax.f32 %v5890_v16, 0.0  ;;  %v8209_v46 = vld [vmem:[%s10616_s2 + $0x14] sm:$0xf] }
 0x8b3   : > { %v5900_v8 = vmul.f32 %v5896_v3, %v8741_v2  ;;  %v5863_v25 = vpop.f32.mrf.mxu2  ;;  %v6232_v16 = vunpack.c.l.b16 %v8209_v46  ;;  %v6554_v3 = vld [vmem:[#allocation3 + $0x8] sm:$0x3] }
 0x8b4   : > { %v5897_v4 = vmul.f32 %v5893_v11, %v8733_v41  ;;  %v5898_v47 = vmul.f32 %v5894_v31, %v8731_v38  ;;  %v5876_v61 = vpop.f32.mrf.mxu3 }
 0x8b5   : > { %v5902_v37 = vpack.c.bf16 %v5900_v8, %v5899_v26  ;;  %v5837_v10 = vpop.f32.mrf.mxu0  ;;  %v5850_v36 = vpop.f32.mrf.mxu1  ;;  %v6233_v25 = vpack.c.b16 %v6232_v16, %v6232_v16  ;;  %v8234_v16 = vld [vmem:[%s10616_s2 + $0x14] sm:$0xf] }
 0x8b6   : > { %v5901_v32 = vpack.c.bf16 %v5898_v47, %v5897_v4  ;;  %v8214_v10 = vld [vmem:[%s10616_s2 + $0x14] sm:$0xf] }
 0x8b7   : > { %v5906_v51 = vrot.slane %v5902_v37, 4  ;;  %v5907_v20 = vrot.slane %v5902_v37, 6 }
 0x8b8   : > { %v5905_v52 = vrot.slane %v5901_v32, 2 }
 0x8b9   : > { %v5913_v49 = vsel %vm2068_vm12, %v5906_v51, %v5907_v20  ;;  %v6340_v51 = vunpack.c.l.b16 %v8214_v10  ;;  %v6930_v20 = vld [vmem:[#allocation3 + $0xa] sm:$0x3] }
 0x8ba   : > { %v5910_v9 = vsel %vm304_vm1, %v5901_v32, %v5905_v52 }
 0x8bb   : > { %v9968_v15 = vsel %vm1270_vm10, %v5910_v9, %v5913_v49  ;;  %v6341_v9 = vpack.c.b16 %v6340_v51, %v6340_v51 }
 0x8bc   : > { %5916 = vst [vmem:[#allocation4 + $0x2] sm:$0xff] %v9968_v15 }
 0x8c3   : > { %v9971_v27 = vld [vmem:[#allocation4] sm:$0xff]  ;;  %v5922_v39 = vld [vmem:[#allocation4 + $0x8] sm:$0x3] }
 0x8c4   : > { %5929 = vst [vmem:[#allocation1] ss:$4 sm:$0xff] %v9971_v27  ;;  %v6230_v21 = vld [vmem:[#allocation4 + $0x8] sm:$0x3] }
 0x8c5   : > { %5932 = vst [vmem:[#allocation1 + $0x20] ss:$4 sm:$0xff] %v5922_v39  ;;  %v6446_v28 = vld [vmem:[#allocation4 + $0x8] sm:$0x3] }
 0x8c6   : > { %v6662_v37 = vld [vmem:[#allocation4 + $0x8] sm:$0x3] }
 0x8cb   : > { %v5933_v55 = vld.sshfl [vmem:[#allocation1] sm:$0xff pattern:$0x73625140]  ;;  %v5935_v34 = vld.sshfl [vmem:[#allocation1 + $0x8] sm:$0xff pattern:$0x73625140] }
 0x8cc   : > { %v5937_v1 = vld.sshfl [vmem:[#allocation1 + $0x10] sm:$0xff pattern:$0x73625140]  ;;  %v5939_v56 = vld.sshfl [vmem:[#allocation1 + $0x18] sm:$0xff pattern:$0x73625140] }
 0x8cd   : > { %6025 = vst [vmem:[#allocation1] ss:$4 sm:$0xff] %v8967_v35  ;;  %v5941_v43 = vld.sshfl [vmem:[#allocation1 + $0x20] sm:$0xff pattern:$0x73625140]  ;;  %5949 = vrot.lane.b32.xlu2 %v5939_v56, %s8409_s7  ;;  %5947 = vrot.lane.b32.xlu1 %v5937_v1, %s8409_s7 }
 0x8ce   : > { %5951 = vrot.lane.b32.xlu0 %v5941_v43, %s8409_s7  ;;  %6028 = vst [vmem:[#allocation1 + $0x20] ss:$4 sm:$0xff] %v5920_v45 }
 0x8d4   : > { %v6029_v62 = vld.sshfl [vmem:[#allocation1] sm:$0xff pattern:$0x73625140]  ;;  %v6031_v48 = vld.sshfl [vmem:[#allocation1 + $0x8] sm:$0xff pattern:$0x73625140] }
 0x8d5   : > { %v6033_v50 = vld.sshfl [vmem:[#allocation1 + $0x10] sm:$0xff pattern:$0x73625140]  ;;  %v6035_v18 = vld.sshfl [vmem:[#allocation1 + $0x18] sm:$0xff pattern:$0x73625140]  ;;  %5926 = vrot.lane.b32.xlu1 %v5925_v29, %s8408_s6  ;;  %5943 = vrot.lane.b32.xlu2 %v5933_v55, %s8409_s7 }
 0x8d6   : > { %6129 = vst [vmem:[#allocation1] ss:$4 sm:$0xff] %v8967_v35  ;;  %5945 = vrot.lane.b32.xlu0 %v5935_v34, %s8409_s7  ;;  %v6037_v13 = vld.sshfl [vmem:[#allocation1 + $0x20] sm:$0xff pattern:$0x73625140]  ;;  %s10646_s6 = smov 96  }
 0x8d7   : > { %6132 = vst [vmem:[#allocation1 + $0x20] ss:$4 sm:$0xff] %v6122_v57  ;;  %v10030_v55 = vld [vmem:[#allocation3 + $0x2] sm:$0xff]  ;;  %v8219_v34 = vld [vmem:[%s10616_s2 + $0x14] sm:$0xf] }
 0x8d8   : > { %v6448_v29 = vunpack.c.l.b16 %v8219_v34 }
 0x8da   : > { %v6449_v57 = vpack.c.b16 %v6448_v29, %v6448_v29 }
 0x8dd   : > { %v6133_v0 = vld.sshfl [vmem:[#allocation1] sm:$0xff pattern:$0x73625140]  ;;  %v6135_v60 = vld.sshfl [vmem:[#allocation1 + $0x8] sm:$0xff pattern:$0x73625140]  ;;  %6045 = vrot.lane.b32.xlu2 %v6035_v18, %s8409_s7  ;;  %6043 = vrot.lane.b32.xlu1 %v6033_v50, %s8409_s7 }
 0x8de   : > { %v6137_v6 = vld.sshfl [vmem:[#allocation1 + $0x10] sm:$0xff pattern:$0x73625140]  ;;  %v6139_v54 = vld.sshfl [vmem:[#allocation1 + $0x18] sm:$0xff pattern:$0x73625140]  ;;  %6047 = vrot.lane.b32.xlu0 %v6037_v13, %s8409_s7 }
 0x8df   : > { %6237 = vst [vmem:[#allocation1] ss:$4 sm:$0xff] %v9971_v27  ;;  %v6141_v40 = vld.sshfl [vmem:[#allocation1 + $0x20] sm:$0xff pattern:$0x73625140] }
 0x8e0   : > { %6240 = vst [vmem:[#allocation1 + $0x20] ss:$4 sm:$0xff] %v6230_v21  ;;  %v8224_v13 = vld [vmem:[%s10616_s2 + $0x14] sm:$0xf] }
 0x8e1   : > { %v6556_v21 = vunpack.c.l.b16 %v8224_v13  ;;  %v8244_v13 = vld [vmem:[%s10616_s2 + $0x14] sm:$0xf] }
 0x8e3   : > { %v6557_v42 = vpack.c.b16 %v6556_v21, %v6556_v21 }
 0x8e5   : > { %6041 = vrot.lane.b32.xlu2 %v6031_v48, %s8409_s7  ;;  %6039 = vrot.lane.b32.xlu1 %v6029_v62, %s8409_s7  ;;  %s10653_s7 = sshll.u32 %s10667_s15, 2 }
 0x8e6   : > { %v6241_v17 = vld.sshfl [vmem:[#allocation1] sm:$0xff pattern:$0x73625140]  ;;  %v6243_v7 = vld.sshfl [vmem:[#allocation1 + $0x8] sm:$0xff pattern:$0x73625140]  ;;  %6147 = vrot.lane.b32.xlu0 %v6137_v6, %s10640_s9 }
 0x8e7   : > { %v6245_v59 = vld.sshfl [vmem:[#allocation1 + $0x10] sm:$0xff pattern:$0x73625140]  ;;  %v6247_v23 = vld.sshfl [vmem:[#allocation1 + $0x18] sm:$0xff pattern:$0x73625140] }
 0x8e8   : > { %6345 = vst [vmem:[#allocation1] ss:$4 sm:$0xff] %v8967_v35  ;;  %v6249_v63 = vld.sshfl [vmem:[#allocation1 + $0x20] sm:$0xff pattern:$0x73625140] }
 0x8e9   : > { %6348 = vst [vmem:[#allocation1 + $0x20] ss:$4 sm:$0xff] %v6338_v30 }
 0x8ed   : > { %6151 = vrot.lane.b32.xlu2 %v6141_v40, %s10640_s9  ;;  %6149 = vrot.lane.b32.xlu1 %v6139_v54, %s10640_s9 }
 0x8ee   : > { %6126 = vrot.lane.b32.xlu0 %v6125_v19, %s8411_s11 }
 0x8ef   : > { %v6349_v33 = vld.sshfl [vmem:[#allocation1] sm:$0xff pattern:$0x73625140]  ;;  %v6351_v53 = vld.sshfl [vmem:[#allocation1 + $0x8] sm:$0xff pattern:$0x73625140] }
 0x8f0   : > { %v6353_v14 = vld.sshfl [vmem:[#allocation1 + $0x10] sm:$0xff pattern:$0x73625140]  ;;  %v6355_v24 = vld.sshfl [vmem:[#allocation1 + $0x18] sm:$0xff pattern:$0x73625140] }
 0x8f1   : > { %6453 = vst [vmem:[#allocation1] ss:$4 sm:$0xff] %v9971_v27  ;;  %v6357_v5 = vld.sshfl [vmem:[#allocation1 + $0x20] sm:$0xff pattern:$0x73625140] }
 0x8f2   : > { %6456 = vst [vmem:[#allocation1 + $0x20] ss:$4 sm:$0xff] %v6446_v28 }
 0x8f5   : > { %6145 = vrot.lane.b32.xlu2 %v6135_v60, %s10640_s9  ;;  %6143 = vrot.lane.b32.xlu1 %v6133_v0, %s10640_s9 }
 0x8f6   : > { %6255 = vrot.lane.b32.xlu0 %v6245_v59, %s10640_s9 }
 0x8f8   : > { %v6457_v26 = vld.sshfl [vmem:[#allocation1] sm:$0xff pattern:$0x73625140]  ;;  %v6459_v11 = vld.sshfl [vmem:[#allocation1 + $0x8] sm:$0xff pattern:$0x73625140] }
 0x8f9   : > { %v6461_v31 = vld.sshfl [vmem:[#allocation1 + $0x10] sm:$0xff pattern:$0x73625140]  ;;  %v6463_v8 = vld.sshfl [vmem:[#allocation1 + $0x18] sm:$0xff pattern:$0x73625140] }
 0x8fa   : > { %6561 = vst [vmem:[#allocation1] ss:$4 sm:$0xff] %v8967_v35  ;;  %v6465_v4 = vld.sshfl [vmem:[#allocation1 + $0x20] sm:$0xff pattern:$0x73625140] }
 0x8fb   : > { %6564 = vst [vmem:[#allocation1 + $0x20] ss:$4 sm:$0xff] %v6554_v3  ;;  %v6771_v3 = vunpack.c.l.b16 %v8234_v16 }
 0x8fd   : > { %6259 = vrot.lane.b32.xlu2 %v6249_v63, %s10640_s9  ;;  %6257 = vrot.lane.b32.xlu1 %v6247_v23, %s10640_s9  ;;  %v7038_v23 = vld [vmem:[#allocation4 + $0xa] sm:$0x3]  ;;  %v8229_v63 = vld [vmem:[%s10616_s2 + $0x14] sm:$0xf]  ;;  %v6772_v10 = vpack.c.b16 %v6771_v3, %v6771_v3 }
 0x8fe   : > { %6234 = vrot.lane.b32.xlu0 %v6233_v25, %s8413_s24 }
 0x901   : > { %v10013_v47 = vld.sshfl [vmem:[#allocation1] sm:$0xff pattern:$0x73625140]  ;;  %v10015_v61 = vld.sshfl [vmem:[#allocation1 + $0x8] sm:$0xff pattern:$0x73625140] }
 0x902   : > { %v6569_v36 = vld.sshfl [vmem:[#allocation1 + $0x10] sm:$0xff pattern:$0x73625140]  ;;  %v6571_v35 = vld.sshfl [vmem:[#allocation1 + $0x18] sm:$0xff pattern:$0x73625140] }
 0x903   : > { %6669 = vst [vmem:[#allocation1] ss:$4 sm:$0xff] %v9971_v27  ;;  %v6573_v32 = vld.sshfl [vmem:[#allocation1 + $0x20] sm:$0xff pattern:$0x73625140] }
 0x904   : > { %6672 = vst [vmem:[#allocation1 + $0x20] ss:$4 sm:$0xff] %v6662_v37 }
 0x905   : > { %6253 = vrot.lane.b32.xlu2 %v6243_v7, %s10640_s9  ;;  %6251 = vrot.lane.b32.xlu1 %v6241_v17, %s10640_s9  ;;  %s10647_s9 = smov 92  }
 0x906   : > { %6363 = vrot.lane.b32.xlu0 %v6353_v14, %s8410_s8 }
 0x90a   : > { %v10024_v52 = vld.sshfl [vmem:[#allocation1] sm:$0xff pattern:$0x73625140]  ;;  %v10026_v49 = vld.sshfl [vmem:[#allocation1 + $0x8] sm:$0xff pattern:$0x73625140] }
 0x90b   : > { %v6677_v39 = vld.sshfl [vmem:[#allocation1 + $0x10] sm:$0xff pattern:$0x73625140]  ;;  %v10028_v45 = vld.sshfl [vmem:[#allocation1 + $0x18] sm:$0xff pattern:$0x73625140] }
 0x90c   : > { %6776 = vst [vmem:[#allocation1] ss:$4 sm:$0xff] %v10030_v55  ;;  %v6681_v27 = vld.sshfl [vmem:[#allocation1 + $0x20] sm:$0xff pattern:$0x73625140] }
 0x90d   : > { %6367 = vrot.lane.b32.xlu2 %v6357_v5, %s8410_s8  ;;  %6365 = vrot.lane.b32.xlu1 %v6355_v24, %s8410_s8  ;;  %6940 = vst [vmem:[#allocation1 + $0x20] ss:$4 sm:$0xff] %v6930_v20 }
 0x90e   : > { %6342 = vrot.lane.b32.xlu0 %v6341_v9, %s8414_s25  ;;  %s10648_s25 = smov 127  }
 0x913   : > { %v10039_v1 = vld.sshfl [vmem:[#allocation1] sm:$0xff pattern:$0x73625140]  ;;  %v10041_v56 = vld.sshfl [vmem:[#allocation1 + $0x8] sm:$0xff pattern:$0x73625140] }
 0x914   : > { %v10043_v43 = vld.sshfl [vmem:[#allocation1 + $0x10] sm:$0xff pattern:$0x73625140]  ;;  %v10045_v12 = vld.sshfl [vmem:[#allocation1 + $0x18] sm:$0xff pattern:$0x73625140] }
 0x915   : > { %6856 = vst [vmem:[#allocation1] ss:$4 sm:$0xff] %v9968_v15  ;;  %6361 = vrot.lane.b32.xlu2 %v6351_v53, %s8410_s8  ;;  %6359 = vrot.lane.b32.xlu1 %v6349_v33, %s8410_s8  ;;  %v10093_v19 = vld.sshfl [vmem:[#allocation1 + $0x20] sm:$0xff pattern:$0x73625140]  ;;  %v6664_v33 = vunpack.c.l.b16 %v8229_v63 }
 0x916   : > { %6471 = vrot.lane.b32.xlu0 %v6461_v31, %s8410_s8  ;;  %7048 = vst [vmem:[#allocation1 + $0x20] ss:$4 sm:$0xff] %v7038_v23  ;;  %v7146_v31 = vld [vmem:[#allocation3 + $0xa] sm:$0x3] }
 0x917   : > { %v6665_v46 = vpack.c.b16 %v6664_v33, %v6664_v33 }
 0x91c   : > { %v10051_v62 = vld.sshfl [vmem:[#allocation1] sm:$0xff pattern:$0x73625140]  ;;  %v10053_v48 = vld.sshfl [vmem:[#allocation1 + $0x8] sm:$0xff pattern:$0x73625140] }
 0x91d   : > { %v10055_v50 = vld.sshfl [vmem:[#allocation1 + $0x10] sm:$0xff pattern:$0x73625140]  ;;  %v10057_v18 = vld.sshfl [vmem:[#allocation1 + $0x18] sm:$0xff pattern:$0x73625140]  ;;  %6475 = vrot.lane.b32.xlu2 %v6465_v4, %s8410_s8  ;;  %6473 = vrot.lane.b32.xlu1 %v6463_v8, %s8410_s8 }
 0x91e   : > { %6937 = vst [vmem:[#allocation1] ss:$4 sm:$0xff] %v10030_v55  ;;  %6450 = vrot.lane.b32.xlu0 %v6449_v57, %s8416_s30 }
 0x925   : > { %6469 = vrot.lane.b32.xlu2 %v6459_v11, %s8410_s8  ;;  %6467 = vrot.lane.b32.xlu1 %v6457_v26, %s8410_s8  ;;  %v10068_v0 = vld.sshfl [vmem:[#allocation1 + $0x18] sm:$0xff pattern:$0x73625140]  ;;  %v10070_v60 = vld.sshfl [vmem:[#allocation1 + $0x10] sm:$0xff pattern:$0x73625140] }
 0x926   : > { %6579 = vrot.lane.b32.xlu0 %v6569_v36, %s8412_s14  ;;  %v10073_v6 = vld.sshfl [vmem:[#allocation1] sm:$0xff pattern:$0x73625140]  ;;  %v10075_v54 = vld.sshfl [vmem:[#allocation1 + $0x8] sm:$0xff pattern:$0x73625140] }
 0x927   : > { %v5950_v40 = vpop.permute.xlu2 %5949  ;;  %7045 = vst [vmem:[#allocation1] ss:$4 sm:$0xff] %v9968_v15  ;;  %v8239_v36 = vld [vmem:[%s10616_s2 + $0x14] sm:$0xf] }
 0x928   : > { %v6851_v9 = vunpack.c.l.b16 %v8239_v36 }
 0x92a   : > { %v6852_v29 = vpack.c.b16 %v6851_v9, %v6851_v9 }
 0x92d   : > { %6583 = vrot.lane.b32.xlu2 %v6573_v32, %s8412_s14  ;;  %6581 = vrot.lane.b32.xlu1 %v6571_v35, %s8412_s14  ;;  %v10129_v35 = vld.sshfl [vmem:[#allocation1 + $0x20] sm:$0xff pattern:$0x73625140] }
 0x92e   : > { %6558 = vrot.lane.b32.xlu0 %v6557_v42, %s8418_s13  ;;  %v10081_v30 = vld.sshfl [vmem:[#allocation1 + $0x18] sm:$0xff pattern:$0x73625140]  ;;  %v10083_v7 = vld.sshfl [vmem:[#allocation1 + $0x10] sm:$0xff pattern:$0x73625140]  ;;  %v6932_v42 = vunpack.c.l.b16 %v8244_v13 }
 0x92f   : > { %v5944_v17 = vpop.permute.xlu2 %5943  ;;  %v10085_v22 = vld.sshfl [vmem:[#allocation1] sm:$0xff pattern:$0x73625140]  ;;  %v10087_v59 = vld.sshfl [vmem:[#allocation1 + $0x8] sm:$0xff pattern:$0x73625140] }
 0x930   : > { %7153 = vst [vmem:[#allocation1] ss:$4 sm:$0xff] %v10030_v55  ;;  %s10650_s13 = smov 84  }
 0x931   : > { %7156 = vst [vmem:[#allocation1 + $0x20] ss:$4 sm:$0xff] %v7146_v31 }
 0x935   : > { %6577 = vrot.lane.b32.xlu2 %v10015_v61, %s8412_s14  ;;  %6575 = vrot.lane.b32.xlu1 %v10013_v47, %s8412_s14 }
 0x936   : > { %6687 = vrot.lane.b32.xlu0 %v6677_v39, %s8412_s14 }
 0x937   : > { %v10100_v53 = vpop.permute.xlu2 %6045  ;;  %v10102_v28 = vld.sshfl [vmem:[#allocation1 + $0x18] sm:$0xff pattern:$0x73625140]  ;;  %v10104_v14 = vld.sshfl [vmem:[#allocation1 + $0x10] sm:$0xff pattern:$0x73625140] }
 0x938   : > { %v10106_v24 = vld.sshfl [vmem:[#allocation1] sm:$0xff pattern:$0x73625140]  ;;  %v10108_v5 = vld.sshfl [vmem:[#allocation1 + $0x8] sm:$0xff pattern:$0x73625140] }
 0x939   : > { %7261 = vst [vmem:[#allocation1] ss:$4 sm:$0xff] %v9968_v15 }
 0x93d   : > { %6691 = vrot.lane.b32.xlu2 %v6681_v27, %s8412_s14  ;;  %6689 = vrot.lane.b32.xlu1 %v10028_v45, %s8412_s14 }
 0x93e   : > { %6666 = vrot.lane.b32.xlu0 %v6665_v46, %s8419_s26  ;;  %v7254_v46 = vld [vmem:[#allocation4 + $0xa] sm:$0x3] }
 0x93f   : > { %v5948_v26 = vpop.permute.xlu1 %5947  ;;  %v10118_v11 = vpop.permute.xlu2 %6041 }
 0x940   : > { %v5952_v8 = vpop.permute.xlu0 %5951  ;;  %v5955_v25 = vsel %vm392_vm3, %v5948_v26, %v5950_v40  ;;  %v10123_v61 = vld.sshfl [vmem:[#allocation1 + $0x18] sm:$0xff pattern:$0x73625140]  ;;  %v10131_v32 = vld.sshfl [vmem:[#allocation1 + $0x10] sm:$0xff pattern:$0x73625140] }
 0x941   : > { %v5956_v4 = vsel %vm392_vm3, %v5950_v40, %v5952_v8  ;;  %v5967_v47 = vsel %vm304_vm1, %v5955_v25, 0  ;;  %v10133_v51 = vld.sshfl [vmem:[#allocation1] sm:$0xff pattern:$0x73625140]  ;;  %v6933_v25 = vpack.c.b16 %v6932_v42, %v6932_v42 }
 0x942   : > { %v5970_v37 = vsel %vm304_vm1, %v5956_v4, 0  ;;  %6005 = vmatpush.bf16.msra.mxu2 %v5967_v47  ;;  %v10135_v20 = vld.sshfl [vmem:[#allocation1 + $0x8] sm:$0xff pattern:$0x73625140] }
 0x943   : > { %6018 = vmatpush.bf16.msra.mxu3 %v5970_v37  ;;  %7369 = vst [vmem:[#allocation1] ss:$4 sm:$0xff] %v10030_v55  ;;  %v10181_v4 = vld.sshfl [vmem:[#allocation1 + $0x20] sm:$0xff pattern:$0x73625140] }
 0x944   : > { %7264 = vst [vmem:[#allocation1 + $0x20] ss:$4 sm:$0xff] %v7254_v46 }
 0x945   : > { %6685 = vrot.lane.b32.xlu2 %v10026_v49, %s8412_s14  ;;  %6683 = vrot.lane.b32.xlu1 %v10024_v52, %s8412_s14 }
 0x946   : > { %6773 = vrot.lane.b32.xlu0 %v6772_v10, %s10646_s6  ;;  %s10651_s6 = smov 76  }
 0x947   : > { %v5927_v39 = vpop.permute.xlu1 %5926  ;;  %v10143_v45 = vpop.permute.xlu2 %6151 }
 0x948   : > { %v5946_v27 = vpop.permute.xlu0 %5945  ;;  %8198 = vmatmul.msk.bf16.vlgmr.msra.gmra.mxu2 %vm300_vm2, %v5927_v39  ;;  %8199 = vmatmul.msk.bf16.vlgmr.msra.gmra.mxu3 %vm300_vm2, %v5927_v39 }
 0x949   : > { %v5953_v34 = vsel %vm392_vm3, %v5944_v17, %v5946_v27  ;;  %v5954_v49 = vsel %vm392_vm3, %v5946_v27, %v5948_v26 }
 0x94a   : > { %v5961_v52 = vsel %vm304_vm1, %v5953_v34, 0  ;;  %v5964_v57 = vsel %vm304_vm1, %v5954_v49, 0  ;;  %v10154_v21 = vld.sshfl [vmem:[#allocation1 + $0x18] sm:$0xff pattern:$0x73625140] }
 0x94b   : > { %5979 = vmatpush.bf16.msra.mxu0 %v5961_v52  ;;  %5992 = vmatpush.bf16.msra.mxu1 %v5964_v57  ;;  %v10156_v40 = vld.sshfl [vmem:[#allocation1 + $0x10] sm:$0xff pattern:$0x73625140]  ;;  %v10161_v17 = vld.sshfl [vmem:[#allocation1] sm:$0xff pattern:$0x73625140] }
 0x94c   : > { %v10163_v23 = vld.sshfl [vmem:[#allocation1 + $0x8] sm:$0xff pattern:$0x73625140] }
 0x94d   : > { %6853 = vrot.lane.b32.xlu1 %v6852_v29, %s10647_s9  ;;  %6955 = vrot.lane.b32.xlu2 %v10070_v60, %s10648_s25  ;;  %7477 = vst [vmem:[#allocation1] ss:$4 sm:$0xff] %v9968_v15  ;;  %v7362_v49 = vld [vmem:[#allocation3 + $0xa] sm:$0x3]  ;;  %s10652_s9 = smov 68  }
 0x94e   : > { %8196 = vmatmul.msk.bf16.vlgmr.msra.gmra.mxu0 %vm300_vm2, %v5927_v39  ;;  %8197 = vmatmul.msk.bf16.vlgmr.msra.gmra.mxu1 %vm300_vm2, %v5927_v39 }
 0x94f   : > { %6957 = vrot.lane.b32.xlu0 %v10068_v0, %s10648_s25  ;;  %v6044_v63 = vpop.permute.xlu1 %6043  ;;  %v10170_v33 = vpop.permute.xlu2 %6145 }
 0x950   : > { %v6048_v16 = vpop.permute.xlu0 %6047  ;;  %v6050_v60 = vsel %vm392_vm3, %v10118_v11, %v6044_v63  ;;  %v6051_v3 = vsel %vm392_vm3, %v6044_v63, %v10100_v53 }
 0x951   : > { %v6052_v26 = vsel %vm392_vm3, %v10100_v53, %v6048_v16  ;;  %v6060_v31 = vsel %vm304_vm1, %v6050_v60, 0  ;;  %v6063_v8 = vsel %vm304_vm1, %v6051_v3, 0  ;;  %v10236_v60 = vld.sshfl [vmem:[#allocation1 + $0x20] sm:$0xff pattern:$0x73625140] }
 0x952   : > { %v6066_v0 = vsel %vm304_vm1, %v6052_v26, 0  ;;  %6088 = vmatpush.bf16.msrb.mxu1 %v6060_v31  ;;  %6101 = vmatpush.bf16.msrb.mxu2 %v6063_v8  ;;  %7372 = vst [vmem:[#allocation1 + $0x20] ss:$4 sm:$0xff] %v7362_v49 }
 0x953   : > { %6114 = vmatpush.bf16.msrb.mxu3 %v6066_v0 }
 0x954   : > { %v10186_v47 = vld.sshfl [vmem:[#allocation1 + $0x18] sm:$0xff pattern:$0x73625140]  ;;  %v10188_v53 = vld.sshfl [vmem:[#allocation1 + $0x10] sm:$0xff pattern:$0x73625140] }
 0x955   : > { %6959 = vrot.lane.b32.xlu1 %v10093_v19, %s10648_s25  ;;  %6934 = vrot.lane.b32.xlu2 %v6933_v25, %s10649_s28  ;;  %v10190_v37 = vld.sshfl [vmem:[#allocation1] sm:$0xff pattern:$0x73625140]  ;;  %v10196_v9 = vld.sshfl [vmem:[#allocation1 + $0x8] sm:$0xff pattern:$0x73625140] }
 0x956   : > { %7585 = vst [vmem:[#allocation1] ss:$4 sm:$0xff] %v10030_v55 }
 0x957   : > { %6951 = vrot.lane.b32.xlu0 %v10073_v6, %s10648_s25  ;;  %v6040_v10 = vpop.permute.xlu1 %6039  ;;  %v10194_v36 = vpop.permute.xlu2 %6259 }
 0x958   : > { %v6049_v39 = vsel %vm392_vm3, %v6040_v10, %v10118_v11  ;;  %v6148_v19 = vpop.permute.xlu0 %6147  ;;  %8202 = vmatmul.msk.bf16.vlgmr.msrb.gmra.mxu2 %vm300_vm2, %v9977_v44  ;;  %8203 = vmatmul.msk.bf16.vlgmr.msrb.gmra.mxu3 %vm300_vm2, %v9977_v44  ;;  %v8249_v11 = vld [vmem:[%s10616_s2 + $0x14] sm:$0xf]  ;;  %v7470_v10 = vld [vmem:[#allocation4 + $0xa] sm:$0x3] }
 0x959   : > { %v6057_v27 = vsel %vm304_vm1, %v6049_v39, 0  ;;  %v6154_v6 = vsel %vm295_vm0, %v10170_v33, %v6148_v19  ;;  %v7040_v55 = vunpack.c.l.b16 %v8249_v11 }
 0x95a   : > { %v6164_v34 = vsel %vm304_vm1, %v6154_v6, 0  ;;  %6075 = vmatpush.bf16.msrb.mxu0 %v6057_v27 }
 0x95b   : > { %6192 = vmatpush.bf16.msra.mxu1 %v6164_v34  ;;  %v7041_v16 = vpack.c.b16 %v7040_v55, %v7040_v55  ;;  %v10266_v34 = vld.sshfl [vmem:[#allocation1 + $0x20] sm:$0xff pattern:$0x73625140] }
 0x95c   : > { %7480 = vst [vmem:[#allocation1 + $0x20] ss:$4 sm:$0xff] %v7470_v10 }
 0x95d   : > { %6953 = vrot.lane.b32.xlu1 %v10075_v54, %s10648_s25  ;;  %7063 = vrot.lane.b32.xlu2 %v10083_v7, %s10648_s25  ;;  %v10222_v57 = vld.sshfl [vmem:[#allocation1 + $0x18] sm:$0xff pattern:$0x73625140]  ;;  %v10224_v13 = vld.sshfl [vmem:[#allocation1 + $0x10] sm:$0xff pattern:$0x73625140] }
 0x95e   : > { %8200 = vmatmul.msk.bf16.vlgmr.msrb.gmra.mxu0 %vm300_vm2, %v9977_v44  ;;  %8201 = vmatmul.msk.bf16.vlgmr.msrb.gmra.mxu1 %vm300_vm2, %v9977_v44  ;;  %v10229_v63 = vld.sshfl [vmem:[#allocation1] sm:$0xff pattern:$0x73625140]  ;;  %v10231_v46 = vld.sshfl [vmem:[#allocation1 + $0x8] sm:$0xff pattern:$0x73625140] }
 0x95f   : > { %7065 = vrot.lane.b32.xlu0 %v10081_v30, %s10648_s25  ;;  %v6150_v29 = vpop.permute.xlu1 %6149  ;;  %v6254_v52 = vpop.permute.xlu2 %6253  ;;  %7693 = vst [vmem:[#allocation1] ss:$4 sm:$0xff] %v9968_v15 }
 0x960   : > { %v6155_v54 = vsel %vm295_vm0, %v6148_v19, %v6150_v29  ;;  %v6156_v7 = vsel %vm295_vm0, %v6150_v29, %v10143_v45  ;;  %v6127_v42 = vpop.permute.xlu0 %6126 }
 0x961   : > { %v6167_v44 = vsel %vm304_vm1, %v6155_v54, 0  ;;  %v6170_v30 = vsel %vm304_vm1, %v6156_v7, 0 }
 0x962   : > { %6205 = vmatpush.bf16.msra.mxu2 %v6167_v44  ;;  %6218 = vmatpush.bf16.msra.mxu3 %v6170_v30 }
 0x965   : > { %7067 = vrot.lane.b32.xlu1 %v10129_v35, %s10648_s25  ;;  %7042 = vrot.lane.b32.xlu2 %v7041_v16, %s10650_s13 }
 0x967   : > { %7059 = vrot.lane.b32.xlu0 %v10085_v22, %s10648_s25  ;;  %v6144_v45 = vpop.permute.xlu1 %6143  ;;  %v6368_v3 = vpop.permute.xlu2 %6367  ;;  %v8254_v22 = vld [vmem:[%s10616_s2 + $0x14] sm:$0xf] }
 0x968   : > { %v6153_v26 = vsel %vm295_vm0, %v6144_v45, %v10170_v33  ;;  %v6256_v31 = vpop.permute.xlu0 %6255  ;;  %8207 = vmatmul.msk.bf16.vlgmr.msra.gmra.mxu2 %vm300_vm2, %v6127_v42  ;;  %8208 = vmatmul.msk.bf16.vlgmr.msra.gmra.mxu3 %vm300_vm2, %v6127_v42  ;;  %v7148_v33 = vunpack.c.l.b16 %v8254_v22 }
 0x969   : > { %v6161_v15 = vsel %vm304_vm1, %v6153_v26, 0  ;;  %v6262_v8 = vsel %vm295_vm0, %v6254_v52, %v6256_v31  ;;  %v10294_v26 = vld.sshfl [vmem:[#allocation1 + $0x20] sm:$0xff pattern:$0x73625140] }
 0x96a   : > { %v6272_v35 = vsel %vm304_vm1, %v6262_v8, 0  ;;  %6179 = vmatpush.bf16.msra.mxu0 %v6161_v15  ;;  %v7149_v6 = vpack.c.b16 %v7148_v33, %v7148_v33 }
 0x96b   : > { %6300 = vmatpush.bf16.msrb.mxu1 %v6272_v35 }
 0x96d   : > { %7061 = vrot.lane.b32.xlu1 %v10087_v59, %s10648_s25  ;;  %7171 = vrot.lane.b32.xlu2 %v10104_v14, %s10641_s12 }
 0x96e   : > { %8205 = vmatmul.msk.bf16.vlgmr.msra.gmra.mxu0 %vm300_vm2, %v6127_v42  ;;  %8206 = vmatmul.msk.bf16.vlgmr.msra.gmra.mxu1 %vm300_vm2, %v6127_v42  ;;  %v7578_v42 = vld [vmem:[#allocation3 + $0xa] sm:$0x3] }
 0x96f   : > { %7173 = vrot.lane.b32.xlu0 %v10102_v28, %s10641_s12  ;;  %v6258_v25 = vpop.permute.xlu1 %6257  ;;  %v6362_v0 = vpop.permute.xlu2 %6361  ;;  %7588 = vst [vmem:[#allocation1 + $0x20] ss:$4 sm:$0xff] %v7578_v42 }
 0x970   : > { %v6263_v39 = vsel %vm295_vm0, %v6256_v31, %v6258_v25  ;;  %v6264_v19 = vsel %vm295_vm0, %v6258_v25, %v10194_v36  ;;  %v6235_v59 = vpop.permute.xlu0 %6234 }
 0x971   : > { %v6275_v27 = vsel %vm304_vm1, %v6263_v39, 0  ;;  %v6278_v14 = vsel %vm304_vm1, %v6264_v19, 0  ;;  %v7686_v19 = vld [vmem:[#allocation4 + $0xa] sm:$0x3] }
 0x972   : > { %6313 = vmatpush.bf16.msrb.mxu2 %v6275_v27  ;;  %6326 = vmatpush.bf16.msrb.mxu3 %v6278_v14 }
 0x975   : > { %7175 = vrot.lane.b32.xlu1 %v10181_v4, %s10641_s12  ;;  %7150 = vrot.lane.b32.xlu2 %v7149_v6, %s10642_s5 }
 0x976   : > { %v10322_v27 = vld.sshfl [vmem:[#allocation1 + $0x20] sm:$0xff pattern:$0x73625140] }
 0x977   : > { %7167 = vrot.lane.b32.xlu0 %v10106_v24, %s10641_s12  ;;  %v6252_v28 = vpop.permute.xlu1 %6251  ;;  %v6476_v36 = vpop.permute.xlu2 %6475  ;;  %v8259_v24 = vld [vmem:[%s10616_s2 + $0x14] sm:$0xf]  ;;  %7696 = vst [vmem:[#allocation1 + $0x20] ss:$4 sm:$0xff] %v7686_v19 }
 0x978   : > { %v6261_v11 = vsel %vm295_vm0, %v6252_v28, %v6254_v52  ;;  %v6364_v55 = vpop.permute.xlu0 %6363  ;;  %8212 = vmatmul.msk.bf16.vlgmr.msrb.gmra.mxu2 %vm300_vm2, %v6235_v59  ;;  %8213 = vmatmul.msk.bf16.vlgmr.msrb.gmra.mxu3 %vm300_vm2, %v6235_v59  ;;  %v7256_v52 = vunpack.c.l.b16 %v8259_v24 }
 0x979   : > { %v6269_v49 = vsel %vm304_vm1, %v6261_v11, 0  ;;  %v6370_v29 = vsel %vm497_vm4, %v6362_v0, %v6364_v55 }
 0x97a   : > { %v6380_v4 = vsel %vm304_vm1, %v6370_v29, 0  ;;  %6287 = vmatpush.bf16.msrb.mxu0 %v6269_v49  ;;  %v7257_v45 = vpack.c.b16 %v7256_v52, %v7256_v52 }
 0x97b   : > { %6408 = vmatpush.bf16.msra.mxu1 %v6380_v4 }
 0x97d   : > { %7169 = vrot.lane.b32.xlu1 %v10108_v5, %s10641_s12  ;;  %7279 = vrot.lane.b32.xlu2 %v10131_v32, %s10641_s12 }
 0x97e   : > { %8210 = vmatmul.msk.bf16.vlgmr.msrb.gmra.mxu0 %vm300_vm2, %v6235_v59  ;;  %8211 = vmatmul.msk.bf16.vlgmr.msrb.gmra.mxu1 %vm300_vm2, %v6235_v59 }
 0x97f   : > { %7281 = vrot.lane.b32.xlu0 %v10123_v61, %s10641_s12  ;;  %v6366_v54 = vpop.permute.xlu1 %6365  ;;  %v6470_v7 = vpop.permute.xlu2 %6469 }
 0x980   : > { %v6371_v44 = vsel %vm497_vm4, %v6364_v55, %v6366_v54  ;;  %v6372_v30 = vsel %vm497_vm4, %v6366_v54, %v6368_v3  ;;  %v6343_v16 = vpop.permute.xlu0 %6342 }
 0x981   : > { %v6383_v5 = vsel %vm304_vm1, %v6371_v44, 0  ;;  %v6386_v32 = vsel %vm304_vm1, %v6372_v30, 0 }
 0x982   : > { %6421 = vmatpush.bf16.msra.mxu2 %v6383_v5  ;;  %6434 = vmatpush.bf16.msra.mxu3 %v6386_v32 }
 0x985   : > { %7283 = vrot.lane.b32.xlu1 %v10236_v60, %s10641_s12  ;;  %7258 = vrot.lane.b32.xlu2 %v7257_v45, %s10651_s6  ;;  %v6786_v45 = vsel %vm304_vm1, %v10041_v56, 0  ;;  %v6788_v56 = vsel %vm304_vm1, %v10043_v43, 0  ;;  %v6868_v43 = vsel %vm304_vm1, %v10055_v50, 0 }
 0x987   : > { %7275 = vrot.lane.b32.xlu0 %v10133_v51, %s10641_s12  ;;  %v6360_v61 = vpop.permute.xlu1 %6359  ;;  %v6584_v3 = vpop.permute.xlu2 %6583  ;;  %v8264_v51 = vld [vmem:[%s10616_s2 + $0x14] sm:$0xf] }
 0x988   : > { %v6369_v31 = vsel %vm497_vm4, %v6360_v61, %v6362_v0  ;;  %v6472_v15 = vpop.permute.xlu0 %6471  ;;  %8217 = vmatmul.msk.bf16.vlgmr.msra.gmra.mxu2 %vm300_vm2, %v6343_v16  ;;  %8218 = vmatmul.msk.bf16.vlgmr.msra.gmra.mxu3 %vm300_vm2, %v6343_v16  ;;  %v7364_v22 = vunpack.c.l.b16 %v8264_v51 }
 0x989   : > { %v6377_v8 = vsel %vm304_vm1, %v6369_v31, 0  ;;  %v6478_v35 = vsel %vm497_vm4, %v6470_v7, %v6472_v15 }
 0x98a   : > { %v6488_v60 = vsel %vm304_vm1, %v6478_v35, 0  ;;  %6395 = vmatpush.bf16.msra.mxu0 %v6377_v8  ;;  %v7365_v59 = vpack.c.b16 %v7364_v22, %v7364_v22 }
 0x98b   : > { %6516 = vmatpush.bf16.msrb.mxu1 %v6488_v60 }
 0x98d   : > { %7277 = vrot.lane.b32.xlu1 %v10135_v20, %s10641_s12  ;;  %7387 = vrot.lane.b32.xlu2 %v10156_v40, %s8416_s30 }
 0x98e   : > { %8215 = vmatmul.msk.bf16.vlgmr.msra.gmra.mxu0 %vm300_vm2, %v6343_v16  ;;  %8216 = vmatmul.msk.bf16.vlgmr.msra.gmra.mxu1 %vm300_vm2, %v6343_v16 }
 0x98f   : > { %7389 = vrot.lane.b32.xlu0 %v10154_v21, %s8416_s30  ;;  %v6474_v33 = vpop.permute.xlu1 %6473  ;;  %v6578_v25 = vpop.permute.xlu2 %6577 }
 0x990   : > { %v6479_v0 = vsel %vm497_vm4, %v6472_v15, %v6474_v33  ;;  %v6480_v10 = vsel %vm497_vm4, %v6474_v33, %v6476_v36  ;;  %v6451_v39 = vpop.permute.xlu0 %6450 }
 0x991   : > { %v6491_v20 = vsel %vm304_vm1, %v6479_v0, 0  ;;  %v6494_v40 = vsel %vm304_vm1, %v6480_v10, 0  ;;  %v7701_v0 = vld.sshfl [vmem:[#allocation1 + $0x10] sm:$0xff pattern:$0x73625140]  ;;  %v6864_v10 = vsel %vm304_vm1, %v10051_v62, 0 }
 0x992   : > { %6529 = vmatpush.bf16.msrb.mxu2 %v6491_v20  ;;  %6542 = vmatpush.bf16.msrb.mxu3 %v6494_v40  ;;  %v7705_v40 = vld.sshfl [vmem:[#allocation1 + $0x20] sm:$0xff pattern:$0x73625140] }
 0x995   : > { %7391 = vrot.lane.b32.xlu1 %v10266_v34, %s8416_s30  ;;  %7366 = vrot.lane.b32.xlu2 %v7365_v59, %s10643_s22 }
 0x997   : > { %7383 = vrot.lane.b32.xlu0 %v10161_v17, %s8416_s30  ;;  %v6468_v21 = vpop.permute.xlu1 %6467  ;;  %v6692_v14 = vpop.permute.xlu2 %6691  ;;  %v8269_v17 = vld [vmem:[%s10616_s2 + $0x14] sm:$0xf] }
 0x998   : > { %v6477_v6 = vsel %vm497_vm4, %v6468_v21, %v6470_v7  ;;  %v6580_v28 = vpop.permute.xlu0 %6579  ;;  %8222 = vmatmul.msk.bf16.vlgmr.msrb.gmra.mxu2 %vm300_vm2, %v6451_v39  ;;  %8223 = vmatmul.msk.bf16.vlgmr.msrb.gmra.mxu3 %vm300_vm2, %v6451_v39  ;;  %v7472_v55 = vunpack.c.l.b16 %v8269_v17 }
 0x999   : > { %v6485_v36 = vsel %vm304_vm1, %v6477_v6, 0  ;;  %v6586_v11 = vsel %vm606_vm5, %v6578_v25, %v6580_v28 }
 0x99a   : > { %v6596_v34 = vsel %vm304_vm1, %v6586_v11, 0  ;;  %6503 = vmatpush.bf16.msrb.mxu0 %v6485_v36  ;;  %v8284_v36 = vld [vmem:[%s10617_s3 + $0x28] sm:$0xff] }
 0x99b   : > { %6624 = vmatpush.bf16.msra.mxu1 %v6596_v34 }
 0x99d   : > { %7385 = vrot.lane.b32.xlu1 %v10163_v23, %s8416_s30  ;;  %7495 = vrot.lane.b32.xlu2 %v10188_v53, %s8416_s30  ;;  %v7473_v53 = vpack.c.b16 %v7472_v55, %v7472_v55 }
 0x99e   : > { %8220 = vmatmul.msk.bf16.vlgmr.msrb.gmra.mxu0 %vm300_vm2, %v6451_v39  ;;  %8221 = vmatmul.msk.bf16.vlgmr.msrb.gmra.mxu1 %vm300_vm2, %v6451_v39 }
 0x99f   : > { %7497 = vrot.lane.b32.xlu0 %v10186_v47, %s8416_s30  ;;  %v6582_v49 = vpop.permute.xlu1 %6581  ;;  %v6686_v29 = vpop.permute.xlu2 %6685 }
 0x9a0   : > { %v6587_v4 = vsel %vm606_vm5, %v6580_v28, %v6582_v49  ;;  %v6588_v24 = vsel %vm606_vm5, %v6582_v49, %v6584_v3  ;;  %v6559_v52 = vpop.permute.xlu0 %6558  ;;  %v7699_v49 = vld.sshfl [vmem:[#allocation1 + $0x8] sm:$0xff pattern:$0x73625140] }
 0x9a1   : > { %v6599_v23 = vsel %vm304_vm1, %v6587_v4, 0  ;;  %v6602_v54 = vsel %vm304_vm1, %v6588_v24, 0 }
 0x9a2   : > { %6637 = vmatpush.bf16.msra.mxu2 %v6599_v23  ;;  %6650 = vmatpush.bf16.msra.mxu3 %v6602_v54 }
 0x9a5   : > { %7499 = vrot.lane.b32.xlu1 %v10294_v26, %s8416_s30  ;;  %7474 = vrot.lane.b32.xlu2 %v7473_v53, %s10652_s9 }
 0x9a7   : > { %7491 = vrot.lane.b32.xlu0 %v10190_v37, %s8416_s30  ;;  %v6576_v47 = vpop.permute.xlu1 %6575  ;;  %v10355_v7 = vpop.permute.xlu2 %6955  ;;  %v8274_v37 = vld [vmem:[%s10616_s2 + $0x14] sm:$0xf] }
 0x9a8   : > { %v6585_v42 = vsel %vm606_vm5, %v6576_v47, %v6578_v25  ;;  %v6688_v44 = vpop.permute.xlu0 %6687  ;;  %8227 = vmatmul.msk.bf16.vlgmr.msra.gmra.mxu2 %vm300_vm2, %v6559_v52  ;;  %8228 = vmatmul.msk.bf16.vlgmr.msra.gmra.mxu3 %vm300_vm2, %v6559_v52  ;;  %v7580_v32 = vunpack.c.l.b16 %v8274_v37  ;;  %v8279_v25 = vld [vmem:[%s10616_s2 + $0x14] sm:$0xf] }
 0x9a9   : > { %v6593_v30 = vsel %vm304_vm1, %v6585_v42, 0  ;;  %v6694_v16 = vsel %vm606_vm5, %v6686_v29, %v6688_v44  ;;  %v7688_v50 = vunpack.c.l.b16 %v8279_v25 }
 0x9aa   : > { %v6704_v5 = vsel %vm304_vm1, %v6694_v16, 0  ;;  %6611 = vmatpush.bf16.msra.mxu0 %v6593_v30  ;;  %v7581_v8 = vpack.c.b16 %v7580_v32, %v7580_v32 }
 0x9ab   : > { %6732 = vmatpush.bf16.msrb.mxu1 %v6704_v5  ;;  %v7689_v20 = vpack.c.b16 %v7688_v50, %v7688_v50 }
 0x9ad   : > { %7493 = vrot.lane.b32.xlu1 %v10196_v9, %s8416_s30  ;;  %7603 = vrot.lane.b32.xlu2 %v10224_v13, %s10644_s10 }
 0x9ae   : > { %8225 = vmatmul.msk.bf16.vlgmr.msra.gmra.mxu0 %vm300_vm2, %v6559_v52  ;;  %8226 = vmatmul.msk.bf16.vlgmr.msra.gmra.mxu1 %vm300_vm2, %v6559_v52 }
 0x9af   : > { %6812 = vmatpush.bf16.msra.mxu1 %v6786_v45  ;;  %7605 = vrot.lane.b32.xlu0 %v10222_v57, %s10644_s10  ;;  %v6690_v26 = vpop.permute.xlu1 %6689  ;;  %v10376_v61 = vpop.permute.xlu2 %6934  ;;  %v6790_v57 = vsel %vm304_vm1, %v10045_v12, 0  ;;  %v6870_v12 = vsel %vm304_vm1, %v10057_v18, 0  ;;  %v6866_v18 = vsel %vm304_vm1, %v10053_v48, 0  ;;  %v7697_v48 = vld.sshfl [vmem:[#allocation1] sm:$0xff pattern:$0x73625140] }
 0x9b0   : > { %v6695_v9 = vsel %vm606_vm5, %v6688_v44, %v6690_v26  ;;  %v6696_v3 = vsel %vm606_vm5, %v6690_v26, %v6692_v14  ;;  %v6667_v13 = vpop.permute.xlu0 %6666 }
 0x9b1   : > { %v6707_v31 = vsel %vm304_vm1, %v6695_v9, 0  ;;  %v6710_v15 = vsel %vm304_vm1, %v6696_v3, 0 }
 0x9b2   : > { %6745 = vmatpush.bf16.msrb.mxu2 %v6707_v31  ;;  %6758 = vmatpush.bf16.msrb.mxu3 %v6710_v15 }
 0x9b5   : > { %7607 = vrot.lane.b32.xlu1 %v10322_v27, %s10644_s10  ;;  %7582 = vrot.lane.b32.xlu2 %v7581_v8, %s10645_s29 }
 0x9b6   : > { %6825 = vmatpush.bf16.msra.mxu2 %v6788_v56  ;;  %6838 = vmatpush.bf16.msra.mxu3 %v6790_v57 }
 0x9b7   : > { %7599 = vrot.lane.b32.xlu0 %v10229_v63, %s10644_s10  ;;  %v6684_v35 = vpop.permute.xlu1 %6683  ;;  %v10391_v60 = vpop.permute.xlu2 %7063  ;;  %v6784_v63 = vsel %vm304_vm1, %v10039_v1, 0  ;;  %v7703_v1 = vld.sshfl [vmem:[#allocation1 + $0x18] sm:$0xff pattern:$0x73625140] }
 0x9b8   : > { %v6774_v51 = vpop.permute.xlu0 %6773  ;;  %v6693_v22 = vsel %vm606_vm5, %v6684_v35, %v6686_v29  ;;  %8232 = vmatmul.msk.bf16.vlgmr.msrb.gmra.mxu2 %vm300_vm2, %v6667_v13  ;;  %8233 = vmatmul.msk.bf16.vlgmr.msrb.gmra.mxu3 %vm300_vm2, %v6667_v13 }
 0x9b9   : > { %v6701_v33 = vsel %vm304_vm1, %v6693_v22, 0 }
 0x9ba   : > { %6905 = vmatpush.bf16.msrb.mxu2 %v6868_v43  ;;  %6918 = vmatpush.bf16.msrb.mxu3 %v6870_v12 }
 0x9bb   : > { %6719 = vmatpush.bf16.msrb.mxu0 %v6701_v33 }
 0x9bd   : > { %7601 = vrot.lane.b32.xlu1 %v10231_v46, %s10644_s10  ;;  %7711 = vrot.lane.b32.xlu2 %v7701_v0, %s10644_s10 }
 0x9be   : > { %8230 = vmatmul.msk.bf16.vlgmr.msrb.gmra.mxu0 %vm300_vm2, %v6667_v13  ;;  %8231 = vmatmul.msk.bf16.vlgmr.msrb.gmra.mxu1 %vm300_vm2, %v6667_v13 }
 0x9bf   : > { %6799 = vmatpush.bf16.msra.mxu0 %v6784_v63  ;;  %6892 = vmatpush.bf16.msrb.mxu1 %v6866_v18  ;;  %v10416_v39 = vpop.permute.xlu1 %6853  ;;  %v10418_v46 = vpop.permute.xlu2 %7042 }
 0x9c0   : > { %7713 = vrot.lane.b32.xlu0 %v7703_v1, %s10644_s10 }
 0x9c1   : > { %v6958_v19 = vpop.permute.xlu0 %6957 }
 0x9c2   : > { %v6963_v59 = vsel %vm795_vm6, %v10355_v7, %v6958_v19 }
 0x9c3   : > { %6879 = vmatpush.bf16.msrb.mxu0 %v6864_v10  ;;  %v6975_v62 = vsel %vm304_vm1, %v6963_v59, 0 }
 0x9c5   : > { %7715 = vrot.lane.b32.xlu1 %v7705_v40, %s10644_s10  ;;  %7690 = vrot.lane.b32.xlu2 %v7689_v20, %s8438_s27 }
 0x9c7   : > { %v6960_v27 = vpop.permute.xlu1 %6959  ;;  %v10427_v14 = vpop.permute.xlu2 %7171 }
 0x9c8   : > { %7707 = vrot.lane.b32.xlu0 %v7697_v48, %s10644_s10  ;;  %v6964_v21 = vsel %vm795_vm6, %v6958_v19, %v6960_v27  ;;  %8237 = vmatmul.msk.bf16.vlgmr.msra.gmra.mxu2 %vm300_vm2, %v6774_v51 }
 0x9c9   : > { %8238 = vmatmul.msk.bf16.vlgmr.msra.gmra.mxu3 %vm300_vm2, %v6774_v51  ;;  %v6978_v6 = vsel %vm304_vm1, %v6964_v21, 0  ;;  %v6952_v28 = vpop.permute.xlu0 %6951  ;;  %7013 = vmatpush.bf16.msra.mxu2 %v6975_v62 }
 0x9ca   : > { %7026 = vmatpush.bf16.msra.mxu3 %v6978_v6 }
 0x9cb   : > { %v5981_v11 = vpop.f32.mrf.mxu0  ;;  %v5994_v34 = vpop.f32.mrf.mxu1 }
 0x9cc   : > { %v6007_v17 = vpop.f32.mrf.mxu2  ;;  %v6020_v55 = vpop.f32.mrf.mxu3 }
 0x9cd   : > { %7796 = vperm.xlu2 %8363, %v8284_v36   ;;  %7709 = vrot.lane.b32.xlu1 %v7699_v49, %s10644_s10  ;;  %s8289_s10 = smul.u32 12, %s10665_s16 }
 0x9ce   : > { %8236 = vmatmul.msk.bf16.vlgmr.msra.gmra.mxu1 %vm300_vm2, %v6774_v51  ;;  %8235 = vmatmul.msk.bf16.vlgmr.msra.gmra.mxu0 %vm300_vm2, %v6774_v51 }
 0x9cf   : > { %v6954_v29 = vpop.permute.xlu1 %6953  ;;  %v10443_v53 = vpop.permute.xlu2 %7150  ;;  %s248_s13 = sadd.s32 %s8289_s10, %s10653_s7 }
 0x9d0   : > { %v6961_v4 = vsel %vm795_vm6, %v6952_v28, %v6954_v29  ;;  %v6962_v24 = vsel %vm795_vm6, %v6954_v29, %v10355_v7  ;;  %s7940_s16 = sshll.u32 %s248_s13, 3 }
 0x9d1   : > { %v6969_v52 = vsel %vm304_vm1, %v6961_v4, 0  ;;  %v6972_v23 = vsel %vm304_vm1, %v6962_v24, 0  ;;  %v7066_v54 = vpop.permute.xlu0 %7065  ;;  %s250_s11 = scalar_lea.vmem %s10618_s4, %s7940_s16 }
 0x9d2   : > { %6987 = vmatpush.bf16.msra.mxu0 %v6969_v52  ;;  %7000 = vmatpush.bf16.msra.mxu1 %v6972_v23  ;;  %v7071_v16 = vsel %vm795_vm6, %v10391_v60, %v7066_v54 }
 0x9d3   : > { %v5983_v47 = vpop.f32.mrf.mxu0  ;;  %v5996_v42 = vpop.f32.mrf.mxu1  ;;  %v7083_v37 = vsel %vm304_vm1, %v7071_v16, 0 }
 0x9d4   : > { %v6009_v44 = vpop.f32.mrf.mxu2  ;;  %v6022_v30 = vpop.f32.mrf.mxu3 }
 0x9d7   : > { %v7068_v5 = vpop.permute.xlu1 %7067  ;;  %v10454_v57 = vpop.permute.xlu2 %7279 }
 0x9d8   : > { %v7072_v7 = vsel %vm795_vm6, %v7066_v54, %v7068_v5  ;;  %8242 = vmatmul.msk.bf16.vlgmr.msrb.gmra.mxu2 %vm300_vm2, %v10416_v39 }
 0x9d9   : > { %8243 = vmatmul.msk.bf16.vlgmr.msrb.gmra.mxu3 %vm300_vm2, %v10416_v39  ;;  %v7086_v32 = vsel %vm304_vm1, %v7072_v7, 0  ;;  %v7060_v45 = vpop.permute.xlu0 %7059  ;;  %7121 = vmatpush.bf16.msrb.mxu2 %v7083_v37 }
 0x9da   : > { %7134 = vmatpush.bf16.msrb.mxu3 %v7086_v32 }
 0x9db   : > { %v6077_v26 = vpop.f32.mrf.mxu0  ;;  %v6090_v9 = vpop.f32.mrf.mxu1 }
 0x9dc   : > { %v6078_v3 = vadd.f32 %v6077_v26, %v5981_v11  ;;  %v6091_v13 = vadd.f32 %v6090_v9, %v5994_v34  ;;  %v6103_v31 = vpop.f32.mrf.mxu2  ;;  %v6116_v15 = vpop.f32.mrf.mxu3 }
 0x9dd   : > { %v6104_v8 = vadd.f32 %v6103_v31, %v6007_v17  ;;  %v6117_v56 = vadd.f32 %v6116_v15, %v6020_v55 }
 0x9de   : > { %8240 = vmatmul.msk.bf16.vlgmr.msrb.gmra.mxu0 %vm300_vm2, %v10416_v39  ;;  %8241 = vmatmul.msk.bf16.vlgmr.msrb.gmra.mxu1 %vm300_vm2, %v10416_v39 }
 0x9df   : > { %v7062_v35 = vpop.permute.xlu1 %7061  ;;  %v10468_v39 = vpop.permute.xlu2 %7258 }
 0x9e0   : > { %v7069_v51 = vsel %vm795_vm6, %v7060_v45, %v7062_v35  ;;  %v7070_v22 = vsel %vm795_vm6, %v7062_v35, %v10391_v60 }
 0x9e1   : > { %v7077_v43 = vsel %vm304_vm1, %v7069_v51, 0  ;;  %v7080_v12 = vsel %vm304_vm1, %v7070_v22, 0  ;;  %v7174_v33 = vpop.permute.xlu0 %7173 }
 0x9e2   : > { %7095 = vmatpush.bf16.msrb.mxu0 %v7077_v43  ;;  %7108 = vmatpush.bf16.msrb.mxu1 %v7080_v12  ;;  %v7179_v18 = vsel %vm904_vm7, %v10427_v14, %v7174_v33 }
 0x9e3   : > { %v6079_v63 = vpop.f32.mrf.mxu0  ;;  %v6092_v25 = vpop.f32.mrf.mxu1  ;;  %v7191_v10 = vsel %vm304_vm1, %v7179_v18, 0 }
 0x9e4   : > { %v6105_v0 = vpop.f32.mrf.mxu2  ;;  %v6118_v50 = vpop.f32.mrf.mxu3 }
 0x9e7   : > { %v7176_v1 = vpop.permute.xlu1 %7175  ;;  %v10485_v29 = vpop.permute.xlu2 %7387 }
 0x9e8   : > { %v7180_v60 = vsel %vm904_vm7, %v7174_v33, %v7176_v1  ;;  %8247 = vmatmul.msk.bf16.vlgmr.msra.gmra.mxu2 %vm300_vm2, %v10376_v61 }
 0x9e9   : > { %8248 = vmatmul.msk.bf16.vlgmr.msra.gmra.mxu3 %vm300_vm2, %v10376_v61  ;;  %v7194_v19 = vsel %vm304_vm1, %v7180_v60, 0  ;;  %v7168_v20 = vpop.permute.xlu0 %7167  ;;  %7229 = vmatpush.bf16.msra.mxu2 %v7191_v10 }
 0x9ea   : > { %7242 = vmatpush.bf16.msra.mxu3 %v7194_v19 }
 0x9eb   : > { %v6181_v40 = vpop.f32.mrf.mxu0  ;;  %v6194_v59 = vpop.f32.mrf.mxu1 }
 0x9ec   : > { %v6224_v48 = vadd.f32 %v6181_v40, %v6078_v3  ;;  %v6225_v27 = vadd.f32 %v6194_v59, %v6091_v13  ;;  %v6207_v62 = vpop.f32.mrf.mxu2  ;;  %v6220_v21 = vpop.f32.mrf.mxu3 }
 0x9ed   : > { %v6226_v6 = vadd.f32 %v6207_v62, %v6104_v8  ;;  %v6227_v28 = vadd.f32 %v6220_v21, %v6117_v56 }
 0x9ee   : > { %8245 = vmatmul.msk.bf16.vlgmr.msra.gmra.mxu0 %vm300_vm2, %v10376_v61  ;;  %8246 = vmatmul.msk.bf16.vlgmr.msra.gmra.mxu1 %vm300_vm2, %v10376_v61 }
 0x9ef   : > { %v7170_v36 = vpop.permute.xlu1 %7169  ;;  %v10496_v9 = vpop.permute.xlu2 %7366 }
 0x9f0   : > { %v7177_v11 = vsel %vm904_vm7, %v7168_v20, %v7170_v36  ;;  %v7178_v34 = vsel %vm904_vm7, %v7170_v36, %v10427_v14 }
 0x9f1   : > { %v7185_v17 = vsel %vm304_vm1, %v7177_v11, 0  ;;  %v7188_v55 = vsel %vm304_vm1, %v7178_v34, 0  ;;  %v7282_v49 = vpop.permute.xlu0 %7281 }
 0x9f2   : > { %7203 = vmatpush.bf16.msra.mxu0 %v7185_v17  ;;  %7216 = vmatpush.bf16.msra.mxu1 %v7188_v55  ;;  %v7287_v61 = vsel %vm904_vm7, %v10454_v57, %v7282_v49 }
 0x9f3   : > { %v6183_v4 = vpop.f32.mrf.mxu0  ;;  %v6196_v24 = vpop.f32.mrf.mxu1  ;;  %v7299_v47 = vsel %vm304_vm1, %v7287_v61, 0 }
 0x9f4   : > { %v6209_v52 = vpop.f32.mrf.mxu2  ;;  %v6222_v23 = vpop.f32.mrf.mxu3 }
 0x9f7   : > { %v7284_v54 = vpop.permute.xlu1 %7283  ;;  %v7496_v33 = vpop.permute.xlu2 %7495 }
 0x9f8   : > { %v7288_v14 = vsel %vm904_vm7, %v7282_v49, %v7284_v54  ;;  %8252 = vmatmul.msk.bf16.vlgmr.msrb.gmra.mxu2 %vm300_vm2, %v10418_v46 }
 0x9f9   : > { %8253 = vmatmul.msk.bf16.vlgmr.msrb.gmra.mxu3 %vm300_vm2, %v10418_v46  ;;  %v7302_v42 = vsel %vm304_vm1, %v7288_v14, 0  ;;  %v7276_v44 = vpop.permute.xlu0 %7275  ;;  %7337 = vmatpush.bf16.msrb.mxu2 %v7299_v47 }
 0x9fa   : > { %7350 = vmatpush.bf16.msrb.mxu3 %v7302_v42 }
 0x9fb   : > { %v6289_v30 = vpop.f32.mrf.mxu0  ;;  %v6302_v16 = vpop.f32.mrf.mxu1 }
 0x9fc   : > { %v6332_v5 = vadd.f32 %v6289_v30, %v6224_v48  ;;  %v6333_v37 = vadd.f32 %v6302_v16, %v6225_v27  ;;  %v6315_v7 = vpop.f32.mrf.mxu2  ;;  %v6328_v32 = vpop.f32.mrf.mxu3 }
 0x9fd   : > { %v6334_v45 = vadd.f32 %v6315_v7, %v6226_v6  ;;  %v6335_v26 = vadd.f32 %v6328_v32, %v6227_v28 }
 0x9fe   : > { %8250 = vmatmul.msk.bf16.vlgmr.msrb.gmra.mxu0 %vm300_vm2, %v10418_v46  ;;  %8251 = vmatmul.msk.bf16.vlgmr.msrb.gmra.mxu1 %vm300_vm2, %v10418_v46 }
 0x9ff   : > { %v7278_v3 = vpop.permute.xlu1 %7277  ;;  %v10525_v28 = vpop.permute.xlu2 %7474 }
 0xa00   : > { %v7285_v13 = vsel %vm904_vm7, %v7276_v44, %v7278_v3  ;;  %v7286_v31 = vsel %vm904_vm7, %v7278_v3, %v10454_v57 }
 0xa01   : > { %v7293_v15 = vsel %vm304_vm1, %v7285_v13, 0  ;;  %v7296_v8 = vsel %vm304_vm1, %v7286_v31, 0  ;;  %v7390_v56 = vpop.permute.xlu0 %7389 }
 0xa02   : > { %7311 = vmatpush.bf16.msrb.mxu0 %v7293_v15  ;;  %7324 = vmatpush.bf16.msrb.mxu1 %v7296_v8  ;;  %v7395_v46 = vsel %vm1013_vm8, %v10485_v29, %v7390_v56 }
 0xa03   : > { %v6291_v35 = vpop.f32.mrf.mxu0  ;;  %v6304_v51 = vpop.f32.mrf.mxu1  ;;  %v7407_v63 = vsel %vm304_vm1, %v7395_v46, 0 }
 0xa04   : > { %v6317_v22 = vpop.f32.mrf.mxu2  ;;  %v6330_v43 = vpop.f32.mrf.mxu3 }
 0xa07   : > { %v7392_v12 = vpop.permute.xlu1 %7391  ;;  %v7604_v30 = vpop.permute.xlu2 %7603 }
 0xa08   : > { %v7396_v57 = vsel %vm1013_vm8, %v7390_v56, %v7392_v12  ;;  %8257 = vmatmul.msk.bf16.vlgmr.msra.gmra.mxu2 %vm300_vm2, %v10443_v53 }
 0xa09   : > { %8258 = vmatmul.msk.bf16.vlgmr.msra.gmra.mxu3 %vm300_vm2, %v10443_v53  ;;  %v7410_v25 = vsel %vm304_vm1, %v7396_v57, 0  ;;  %v7384_v0 = vpop.permute.xlu0 %7383  ;;  %7445 = vmatpush.bf16.msra.mxu2 %v7407_v63 }
 0xa0a   : > { %7458 = vmatpush.bf16.msra.mxu3 %v7410_v25 }
 0xa0b   : > { %v6397_v50 = vpop.f32.mrf.mxu0  ;;  %v6410_v18 = vpop.f32.mrf.mxu1 }
 0xa0c   : > { %v6440_v1 = vadd.f32 %v6397_v50, %v6332_v5  ;;  %v6441_v10 = vadd.f32 %v6410_v18, %v6333_v37  ;;  %v6423_v60 = vpop.f32.mrf.mxu2  ;;  %v6436_v19 = vpop.f32.mrf.mxu3 }
 0xa0d   : > { %v6442_v20 = vadd.f32 %v6423_v60, %v6334_v45  ;;  %v6443_v40 = vadd.f32 %v6436_v19, %v6335_v26 }
 0xa0e   : > { %8255 = vmatmul.msk.bf16.vlgmr.msra.gmra.mxu0 %vm300_vm2, %v10443_v53  ;;  %8256 = vmatmul.msk.bf16.vlgmr.msra.gmra.mxu1 %vm300_vm2, %v10443_v53 }
 0xa0f   : > { %v7386_v59 = vpop.permute.xlu1 %7385 }
 0xa10   : > { %v7393_v48 = vsel %vm1013_vm8, %v7384_v0, %v7386_v59  ;;  %v7394_v27 = vsel %vm1013_vm8, %v7386_v59, %v10485_v29 }
 0xa11   : > { %v7401_v62 = vsel %vm304_vm1, %v7393_v48, 0  ;;  %v7404_v21 = vsel %vm304_vm1, %v7394_v27, 0  ;;  %v7498_v6 = vpop.permute.xlu0 %7497 }
 0xa12   : > { %7419 = vmatpush.bf16.msra.mxu0 %v7401_v62  ;;  %7432 = vmatpush.bf16.msra.mxu1 %v7404_v21  ;;  %v7503_v53 = vsel %vm1013_vm8, %v7496_v33, %v7498_v6 }
 0xa13   : > { %v6399_v36 = vpop.f32.mrf.mxu0  ;;  %v6412_v11 = vpop.f32.mrf.mxu1  ;;  %v7515_v49 = vsel %vm304_vm1, %v7503_v53, 0 }
 0xa14   : > { %v6425_v34 = vpop.f32.mrf.mxu2  ;;  %v6438_v17 = vpop.f32.mrf.mxu3 }
 0xa17   : > { %v7500_v55 = vpop.permute.xlu1 %7499 }
 0xa18   : > { %v7504_v29 = vsel %vm1013_vm8, %v7498_v6, %v7500_v55  ;;  %8262 = vmatmul.msk.bf16.vlgmr.msrb.gmra.mxu2 %vm300_vm2, %v10468_v39 }
 0xa19   : > { %8263 = vmatmul.msk.bf16.vlgmr.msrb.gmra.mxu3 %vm300_vm2, %v10468_v39  ;;  %v7518_v4 = vsel %vm304_vm1, %v7504_v29, 0  ;;  %v7492_v24 = vpop.permute.xlu0 %7491  ;;  %7553 = vmatpush.bf16.msrb.mxu2 %v7515_v49 }
 0xa1a   : > { %7566 = vmatpush.bf16.msrb.mxu3 %v7518_v4 }
 0xa1b   : > { %v6505_v52 = vpop.f32.mrf.mxu0  ;;  %v6518_v23 = vpop.f32.mrf.mxu1 }
 0xa1c   : > { %v6548_v61 = vadd.f32 %v6505_v52, %v6440_v1  ;;  %v6549_v54 = vadd.f32 %v6518_v23, %v6441_v10  ;;  %v6531_v47 = vpop.f32.mrf.mxu2  ;;  %v6544_v14 = vpop.f32.mrf.mxu3 }
 0xa1d   : > { %v6550_v42 = vadd.f32 %v6531_v47, %v6442_v20  ;;  %v6551_v44 = vadd.f32 %v6544_v14, %v6443_v40 }
 0xa1e   : > { %8260 = vmatmul.msk.bf16.vlgmr.msrb.gmra.mxu0 %vm300_vm2, %v10468_v39  ;;  %8261 = vmatmul.msk.bf16.vlgmr.msrb.gmra.mxu1 %vm300_vm2, %v10468_v39  ;;  %v10544_v39 = vpop.permute.xlu2 %7582 }
 0xa1f   : > { %v7494_v16 = vpop.permute.xlu1 %7493 }
 0xa20   : > { %v7501_v5 = vsel %vm1013_vm8, %v7492_v24, %v7494_v16  ;;  %v7502_v37 = vsel %vm1013_vm8, %v7494_v16, %v7496_v33 }
 0xa21   : > { %v7509_v7 = vsel %vm304_vm1, %v7501_v5, 0  ;;  %v7512_v32 = vsel %vm304_vm1, %v7502_v37, 0  ;;  %v7606_v45 = vpop.permute.xlu0 %7605 }
 0xa22   : > { %7527 = vmatpush.bf16.msrb.mxu0 %v7509_v7  ;;  %7540 = vmatpush.bf16.msrb.mxu1 %v7512_v32  ;;  %v7611_v15 = vsel %vm1122_vm9, %v7604_v30, %v7606_v45 }
 0xa23   : > { %v6507_v26 = vpop.f32.mrf.mxu0  ;;  %v6520_v3 = vpop.f32.mrf.mxu1  ;;  %v7623_v56 = vsel %vm304_vm1, %v7611_v15, 0 }
 0xa24   : > { %v6533_v13 = vpop.f32.mrf.mxu2  ;;  %v6546_v31 = vpop.f32.mrf.mxu3 }
 0xa26   : > { %v7712_v19 = vpop.permute.xlu2 %7711 }
 0xa27   : > { %v7608_v8 = vpop.permute.xlu1 %7607 }
 0xa28   : > { %v7612_v35 = vsel %vm1122_vm9, %v7606_v45, %v7608_v8  ;;  %8267 = vmatmul.msk.bf16.vlgmr.msra.gmra.mxu2 %vm300_vm2, %v10496_v9 }
 0xa29   : > { %8268 = vmatmul.msk.bf16.vlgmr.msra.gmra.mxu3 %vm300_vm2, %v10496_v9  ;;  %v7626_v51 = vsel %vm304_vm1, %v7612_v35, 0  ;;  %v7600_v22 = vpop.permute.xlu0 %7599  ;;  %7661 = vmatpush.bf16.msra.mxu2 %v7623_v56 }
 0xa2a   : > { %7674 = vmatpush.bf16.msra.mxu3 %v7626_v51 }
 0xa2b   : > { %v6613_v43 = vpop.f32.mrf.mxu0  ;;  %v6626_v46 = vpop.f32.mrf.mxu1 }
 0xa2c   : > { %v6656_v12 = vadd.f32 %v6613_v43, %v6548_v61  ;;  %v6657_v33 = vadd.f32 %v6626_v46, %v6549_v54  ;;  %v6639_v63 = vpop.f32.mrf.mxu2  ;;  %v6652_v57 = vpop.f32.mrf.mxu3 }
 0xa2d   : > { %v6658_v25 = vadd.f32 %v6639_v63, %v6550_v42  ;;  %v6659_v0 = vadd.f32 %v6652_v57, %v6551_v44 }
 0xa2e   : > { %8265 = vmatmul.msk.bf16.vlgmr.msra.gmra.mxu0 %vm300_vm2, %v10496_v9  ;;  %8266 = vmatmul.msk.bf16.vlgmr.msra.gmra.mxu1 %vm300_vm2, %v10496_v9  ;;  %v7691_v8 = vpop.permute.xlu2 %7690 }
 0xa2f   : > { %v7602_v50 = vpop.permute.xlu1 %7601 }
 0xa30   : > { %v7609_v18 = vsel %vm1122_vm9, %v7600_v22, %v7602_v50  ;;  %v7610_v1 = vsel %vm1122_vm9, %v7602_v50, %v7604_v30 }
 0xa31   : > { %v7617_v10 = vsel %vm304_vm1, %v7609_v18, 0  ;;  %v7620_v60 = vsel %vm304_vm1, %v7610_v1, 0 }
 0xa32   : > { %v7714_v20 = vpop.permute.xlu0 %7713  ;;  %7635 = vmatpush.bf16.msra.mxu0 %v7617_v10  ;;  %7648 = vmatpush.bf16.msra.mxu1 %v7620_v60 }
 0xa33   : > { %v6615_v40 = vpop.f32.mrf.mxu0  ;;  %v6628_v59 = vpop.f32.mrf.mxu1  ;;  %v7719_v62 = vsel %vm1122_vm9, %v7712_v19, %v7714_v20 }
 0xa34   : > { %v6641_v48 = vpop.f32.mrf.mxu2  ;;  %v6654_v27 = vpop.f32.mrf.mxu3  ;;  %v7731_v21 = vsel %vm304_vm1, %v7719_v62, 0 }
 0xa37   : > { %v7716_v9 = vpop.permute.xlu1 %7715 }
 0xa38   : > { %v7720_v6 = vsel %vm1122_vm9, %v7714_v20, %v7716_v9  ;;  %8272 = vmatmul.msk.bf16.vlgmr.msrb.gmra.mxu2 %vm300_vm2, %v10525_v28 }
 0xa39   : > { %8273 = vmatmul.msk.bf16.vlgmr.msrb.gmra.mxu3 %vm300_vm2, %v10525_v28  ;;  %v7734_v36 = vsel %vm304_vm1, %v7720_v6, 0  ;;  %7769 = vmatpush.bf16.msrb.mxu2 %v7731_v21 }
 0xa3a   : > { %7782 = vmatpush.bf16.msrb.mxu3 %v7734_v36  ;;  %v7708_v24 = vpop.permute.xlu0 %7707 }
 0xa3b   : > { %v6721_v11 = vpop.f32.mrf.mxu0  ;;  %v6734_v34 = vpop.f32.mrf.mxu1 }
 0xa3c   : > { %v6764_v17 = vadd.f32 %v6721_v11, %v6656_v12  ;;  %v6765_v53 = vadd.f32 %v6734_v34, %v6657_v33  ;;  %v6747_v55 = vpop.f32.mrf.mxu2  ;;  %v6760_v49 = vpop.f32.mrf.mxu3 }
 0xa3d   : > { %v6766_v29 = vadd.f32 %v6747_v55, %v6658_v25  ;;  %v6767_v4 = vadd.f32 %v6760_v49, %v6659_v0 }
 0xa3e   : > { %8270 = vmatmul.msk.bf16.vlgmr.msrb.gmra.mxu0 %vm300_vm2, %v10525_v28  ;;  %8271 = vmatmul.msk.bf16.vlgmr.msrb.gmra.mxu1 %vm300_vm2, %v10525_v28 }
 0xa3f   : > { %v7710_v52 = vpop.permute.xlu1 %7709 }
 0xa40   : > { %v7717_v23 = vsel %vm1122_vm9, %v7708_v24, %v7710_v52  ;;  %v7718_v61 = vsel %vm1122_vm9, %v7710_v52, %v7712_v19 }
 0xa41   : > { %v7725_v54 = vsel %vm304_vm1, %v7717_v23, 0  ;;  %v7728_v47 = vsel %vm304_vm1, %v7718_v61, 0 }
 0xa42   : > { %7743 = vmatpush.bf16.msrb.mxu0 %v7725_v54  ;;  %7756 = vmatpush.bf16.msrb.mxu1 %v7728_v47 }
 0xa43   : > { %v6723_v14 = vpop.f32.mrf.mxu0  ;;  %v6736_v42 = vpop.f32.mrf.mxu1 }
 0xa44   : > { %v6749_v44 = vpop.f32.mrf.mxu2  ;;  %v6762_v30 = vpop.f32.mrf.mxu3 }
 0xa48   : > { %8277 = vmatmul.msk.bf16.vlgmr.msra.gmra.mxu2 %vm300_vm2, %v10544_v39 }
 0xa49   : > { %8278 = vmatmul.msk.bf16.vlgmr.msra.gmra.mxu3 %vm300_vm2, %v10544_v39 }
 0xa4b   : > { %v6801_v28 = vpop.f32.mrf.mxu0  ;;  %v6814_v16 = vpop.f32.mrf.mxu1 }
 0xa4c   : > { %v6844_v5 = vadd.f32 %v6801_v28, %v6764_v17  ;;  %v6845_v37 = vadd.f32 %v6814_v16, %v6765_v53  ;;  %v6827_v7 = vpop.f32.mrf.mxu2  ;;  %v6840_v32 = vpop.f32.mrf.mxu3 }
 0xa4d   : > { %v6846_v45 = vadd.f32 %v6827_v7, %v6766_v29  ;;  %v6847_v26 = vadd.f32 %v6840_v32, %v6767_v4 }
 0xa4e   : > { %8275 = vmatmul.msk.bf16.vlgmr.msra.gmra.mxu0 %vm300_vm2, %v10544_v39  ;;  %8276 = vmatmul.msk.bf16.vlgmr.msra.gmra.mxu1 %vm300_vm2, %v10544_v39 }
 0xa53   : > { %v6803_v3 = vpop.f32.mrf.mxu0  ;;  %v6816_v13 = vpop.f32.mrf.mxu1 }
 0xa54   : > { %v6829_v31 = vpop.f32.mrf.mxu2  ;;  %v6842_v15 = vpop.f32.mrf.mxu3 }
 0xa58   : > { %8282 = vmatmul.msk.bf16.vlgmr.msrb.gmra.mxu2 %vm300_vm2, %v7691_v8 }
 0xa59   : > { %8283 = vmatmul.msk.bf16.vlgmr.msrb.gmra.mxu3 %vm300_vm2, %v7691_v8 }
 0xa5b   : > { %v6881_v56 = vpop.f32.mrf.mxu0  ;;  %v6894_v35 = vpop.f32.mrf.mxu1 }
 0xa5c   : > { %v6924_v51 = vadd.f32 %v6881_v56, %v6844_v5  ;;  %v6925_v22 = vadd.f32 %v6894_v35, %v6845_v37  ;;  %v6907_v43 = vpop.f32.mrf.mxu2  ;;  %v6920_v46 = vpop.f32.mrf.mxu3 }
 0xa5d   : > { %v6926_v12 = vadd.f32 %v6907_v43, %v6846_v45  ;;  %v6927_v33 = vadd.f32 %v6920_v46, %v6847_v26 }
 0xa5e   : > { %8280 = vmatmul.msk.bf16.vlgmr.msrb.gmra.mxu0 %vm300_vm2, %v7691_v8  ;;  %8281 = vmatmul.msk.bf16.vlgmr.msrb.gmra.mxu1 %vm300_vm2, %v7691_v8 }
 0xa63   : > { %v6883_v39 = vpop.f32.mrf.mxu0  ;;  %v6896_v63 = vpop.f32.mrf.mxu1 }
 0xa64   : > { %v6909_v57 = vpop.f32.mrf.mxu2  ;;  %v6922_v25 = vpop.f32.mrf.mxu3 }
 0xa6b   : > { %v6989_v0 = vpop.f32.mrf.mxu0  ;;  %v7002_v50 = vpop.f32.mrf.mxu1 }
 0xa6c   : > { %v7032_v18 = vadd.f32 %v6989_v0, %v6924_v51  ;;  %v7033_v1 = vadd.f32 %v7002_v50, %v6925_v22  ;;  %v7015_v10 = vpop.f32.mrf.mxu2  ;;  %v7028_v60 = vpop.f32.mrf.mxu3 }
 0xa6d   : > { %v7034_v19 = vadd.f32 %v7015_v10, %v6926_v12  ;;  %v7035_v20 = vadd.f32 %v7028_v60, %v6927_v33 }
 0xa73   : > { %v6991_v40 = vpop.f32.mrf.mxu0  ;;  %v7004_v59 = vpop.f32.mrf.mxu1 }
 0xa74   : > { %v7017_v48 = vpop.f32.mrf.mxu2  ;;  %v7030_v27 = vpop.f32.mrf.mxu3 }
 0xa7b   : > { %v7097_v62 = vpop.f32.mrf.mxu0  ;;  %v7110_v9 = vpop.f32.mrf.mxu1 }
 0xa7c   : > { %v7140_v21 = vadd.f32 %v7097_v62, %v7032_v18  ;;  %v7141_v6 = vadd.f32 %v7110_v9, %v7033_v1  ;;  %v7123_v36 = vpop.f32.mrf.mxu2  ;;  %v7136_v11 = vpop.f32.mrf.mxu3 }
 0xa7d   : > { %v7142_v34 = vadd.f32 %v7123_v36, %v7034_v19  ;;  %v7143_v17 = vadd.f32 %v7136_v11, %v7035_v20 }
 0xa83   : > { %v7099_v53 = vpop.f32.mrf.mxu0  ;;  %v7112_v55 = vpop.f32.mrf.mxu1 }
 0xa84   : > { %v7125_v49 = vpop.f32.mrf.mxu2  ;;  %v7138_v29 = vpop.f32.mrf.mxu3 }
 0xa8b   : > { %v7205_v4 = vpop.f32.mrf.mxu0  ;;  %v7218_v24 = vpop.f32.mrf.mxu1 }
 0xa8c   : > { %v7248_v52 = vadd.f32 %v7205_v4, %v7140_v21  ;;  %v7249_v23 = vadd.f32 %v7218_v24, %v7141_v6  ;;  %v7231_v61 = vpop.f32.mrf.mxu2  ;;  %v7244_v54 = vpop.f32.mrf.mxu3 }
 0xa8d   : > { %v7250_v47 = vadd.f32 %v7231_v61, %v7142_v34  ;;  %v7251_v14 = vadd.f32 %v7244_v54, %v7143_v17 }
 0xa93   : > { %v7207_v42 = vpop.f32.mrf.mxu0  ;;  %v7220_v44 = vpop.f32.mrf.mxu1 }
 0xa94   : > { %v7233_v30 = vpop.f32.mrf.mxu2  ;;  %v7246_v28 = vpop.f32.mrf.mxu3 }
 0xa95   : > { %v7811_v28 = vld [vmem:[#allocation2 + $0x4] sm:$0xff] }
 0xa9b   : > { %v7313_v16 = vpop.f32.mrf.mxu0  ;;  %v7326_v5 = vpop.f32.mrf.mxu1 }
 0xa9c   : > { %v7339_v37 = vpop.f32.mrf.mxu2  ;;  %v7352_v7 = vpop.f32.mrf.mxu3  ;;  %v7356_v19 = vadd.f32 %v7313_v16, %v7248_v52  ;;  %v7357_v20 = vadd.f32 %v7326_v5, %v7249_v23 }
 0xa9d   : > { %v7358_v48 = vadd.f32 %v7339_v37, %v7250_v47  ;;  %v7359_v27 = vadd.f32 %v7352_v7, %v7251_v14  ;;  %v7797_v47 = vpop.permute.xlu2 %7796 }
 0xaa3   : > { %v7315_v32 = vpop.f32.mrf.mxu0  ;;  %v7328_v45 = vpop.f32.mrf.mxu1 }
 0xaa4   : > { %v7341_v26 = vpop.f32.mrf.mxu2  ;;  %v7354_v3 = vpop.f32.mrf.mxu3  ;;  %v7812_v32 = vld [vmem:[#allocation2 + $0xc] sm:$0xff] }
 0xaab   : > { %v7421_v13 = vpop.f32.mrf.mxu0  ;;  %v7434_v31 = vpop.f32.mrf.mxu1 }
 0xaac   : > { %v7447_v15 = vpop.f32.mrf.mxu2  ;;  %v7460_v8 = vpop.f32.mrf.mxu3  ;;  %v7464_v62 = vadd.f32 %v7421_v13, %v7356_v19  ;;  %v7465_v9 = vadd.f32 %v7434_v31, %v7357_v20  ;;  %v7813_v13 = vunpack.c.l.bf16 %v7811_v28 }
 0xaad   : > { %v7466_v21 = vadd.f32 %v7447_v15, %v7358_v48  ;;  %v7467_v6 = vadd.f32 %v7460_v8, %v7359_v27  ;;  %v7814_v15 = vunpack.c.h.bf16 %v7811_v28 }
 0xab3   : > { %v7423_v56 = vpop.f32.mrf.mxu0  ;;  %v7436_v35 = vpop.f32.mrf.mxu1 }
 0xab4   : > { %v7449_v51 = vpop.f32.mrf.mxu2  ;;  %v7462_v22 = vpop.f32.mrf.mxu3  ;;  %v7815_v56 = vunpack.c.l.bf16 %v7812_v32 }
 0xab5   : > { %v7816_v51 = vunpack.c.h.bf16 %v7812_v32 }
 0xabb   : > { %v7529_v43 = vpop.f32.mrf.mxu0  ;;  %v7542_v46 = vpop.f32.mrf.mxu1 }
 0xabc   : > { %v7555_v12 = vpop.f32.mrf.mxu2  ;;  %v7568_v33 = vpop.f32.mrf.mxu3  ;;  %v7572_v36 = vadd.f32 %v7529_v43, %v7464_v62  ;;  %v7573_v11 = vadd.f32 %v7542_v46, %v7465_v9 }
 0xabd   : > { %v7574_v34 = vadd.f32 %v7555_v12, %v7466_v21  ;;  %v7575_v17 = vadd.f32 %v7568_v33, %v7467_v6 }
 0xac3   : > { %v7531_v39 = vpop.f32.mrf.mxu0  ;;  %v7544_v63 = vpop.f32.mrf.mxu1 }
 0xac4   : > { %v7557_v57 = vpop.f32.mrf.mxu2  ;;  %v7570_v25 = vpop.f32.mrf.mxu3 }
 0xacb   : > { %v7637_v0 = vpop.f32.mrf.mxu0  ;;  %v7650_v50 = vpop.f32.mrf.mxu1 }
 0xacc   : > { %v7663_v18 = vpop.f32.mrf.mxu2  ;;  %v7676_v1 = vpop.f32.mrf.mxu3  ;;  %v7680_v53 = vadd.f32 %v7637_v0, %v7572_v36  ;;  %v7681_v55 = vadd.f32 %v7650_v50, %v7573_v11 }
 0xacd   : > { %v7682_v49 = vadd.f32 %v7663_v18, %v7574_v34  ;;  %v7683_v29 = vadd.f32 %v7676_v1, %v7575_v17 }
 0xad3   : > { %v7639_v10 = vpop.f32.mrf.mxu0  ;;  %v7652_v60 = vpop.f32.mrf.mxu1 }
 0xad4   : > { %v7665_v40 = vpop.f32.mrf.mxu2  ;;  %v7678_v59 = vpop.f32.mrf.mxu3 }
 0xadb   : > { %v7745_v4 = vpop.f32.mrf.mxu0  ;;  %v7758_v24 = vpop.f32.mrf.mxu1 }
 0xadc   : > { %v7788_v52 = vadd.f32 %v7745_v4, %v7680_v53  ;;  %v7789_v23 = vadd.f32 %v7758_v24, %v7681_v55  ;;  %v7771_v61 = vpop.f32.mrf.mxu2  ;;  %v7784_v54 = vpop.f32.mrf.mxu3 }
 0xadd   : > { %v7790_v14 = vadd.f32 %v7771_v61, %v7682_v49  ;;  %v7791_v42 = vadd.f32 %v7784_v54, %v7683_v29 }
 0xade   : > { %v7799_v44 = vadd.f32 %v7797_v47, %v7788_v52  ;;  %v7800_v30 = vadd.f32 %v7797_v47, %v7789_v23 }
 0xadf   : > { %v7801_v16 = vadd.f32 %v7797_v47, %v7790_v14  ;;  %v7802_v5 = vadd.f32 %v7797_v47, %v7791_v42 }
 0xae0   : > { %v7803_v37 = vmax.f32 %v7799_v44, 0.0  ;;  %v7804_v7 = vmax.f32 %v7800_v30, 0.0 }
 0xae1   : > { %v7805_v45 = vmax.f32 %v7801_v16, 0.0  ;;  %v7806_v26 = vmax.f32 %v7802_v5, 0.0 }
 0xae2   : > { %v7807_v3 = vmul.f32 %v7803_v37, %v8733_v41  ;;  %v7808_v31 = vmul.f32 %v7804_v7, %v8731_v38 }
 0xae3   : > { %v7809_v8 = vmul.f32 %v7805_v45, %v8739_v58  ;;  %v7810_v35 = vmul.f32 %v7806_v26, %v8741_v2  ;;  %v7747_v22 = vpop.f32.mrf.mxu0  ;;  %v7760_v43 = vpop.f32.mrf.mxu1 }
 0xae4   : > { %v7817_v46 = vadd.f32 %v7813_v13, %v7807_v3  ;;  %v7818_v12 = vadd.f32 %v7814_v15, %v7808_v31  ;;  %v7773_v33 = vpop.f32.mrf.mxu2  ;;  %v7786_v41 = vpop.f32.mrf.mxu3 }
 0xae5   : > { %v7819_v39 = vadd.f32 %v7815_v56, %v7809_v8  ;;  %v7820_v63 = vadd.f32 %v7816_v51, %v7810_v35 }
 0xae6   : > { %7821 = vst [vmem:[%s250_s11] sm:$0xff] %v7817_v46 }
 0xae7   : > { %7822 = vst [vmem:[%s250_s11 + $0x8] sm:$0xff] %v7818_v12 }
 0xae8   : > { %7823 = vst [vmem:[%s250_s11 + $0x10] sm:$0xff] %v7819_v39 }
 0xae9   : > { %7824 = vst [vmem:[%s250_s11 + $0x18] sm:$0xff] %v7820_v63 }
 0xaea PF: > { %s14_s19 = sadd.s32 1, %s8405_s19   ;;  %s10654_s15 = smov %s8397_s17 }
 0xaeb   : > { %p11_p7 = scmp.ge.s32.totalorder %s14_s19, 8   ;;  %s10655_s16 = smov %s8401_s18 }
 0xaec   : > { %s10656_s17 = smov %s10659_s20  ;;  %s10657_s18 = smov %s10663_s21 }
 0xaed   :  { %13 = sbr.rel (!%p11_p7) target bundleno = 3 (0x3), region = 136 }

</bundles_post_ra>
